<compile_context>
chip_gen: v7x
topology: tpu7x:2x2x1
jax: 0.10.0
libtpu: 0.0.40
codegen_flags: <defaults>
</compile_context>

<pallas_src>
import functools

import jax
import jax.numpy as jnp
import numpy as np
from jax.experimental import pallas as pl
from jax.experimental.pallas import tpu as pltpu


def _leaky(v):
    # nn.LeakyReLU default negative_slope = 0.01
    return jnp.where(v >= 0, v, 0.01 * v)


def _tap_offsets():
    # Conv3d kernel_size=3, padding=1 -> tap offsets in {-1, 0, +1}^3.
    return [(kd - 1, kh - 1, kw - 1)
            for kd in range(3) for kh in range(3) for kw in range(3)]


def _fused_forward_kernel(meas1_ref, measre_ref, mask_ref, invms_ref, tapm_ref,
                          w1_ref, b1_ref, w2_ref, b2_ref, w3_ref, b3_ref,
                          w4_ref, b4_ref, out_ref, xf1_ref, *, B, P, shifts):
    DP = B * P

    # ---------------- fused mask re-projection chain (layout [*, P]) --------
    m = mask_ref[...]                                    # [B, P]
    mp1 = 1.0 + m
    x = measre_ref[0]                                    # [1, P]
    # data_ = meas_re + maskt * meas_re ; SwinIR is an identity stand-in.
    # TODO(synk): SwinIR / SwinIR_2 definitions are not provided; identity used.
    x_final_1 = x * mp1                                  # [B, P]
    s = jnp.sum(m * x_final_1, axis=0, keepdims=True)    # [1, P]
    # out2 = sum_b (meas1 - mask_b * x_final_1_b) = B*meas1 - sum_b mask_b*x
    out2 = B * meas1_ref[0] - s                          # [1, P]
    out2_re = out2 * invms_ref[...]                      # hoisted reciprocal
    # out2_re_ = out2_re + maskt*out2_re ; SwinIR_2 identity ; + x_final_1
    x_final = out2_re * mp1 + x_final_1                  # [B, P]
    xf1_ref[0] = x_final_1                               # lane-dense store

    # Flatten (B, P) -> (1, B*P): aligned lane concat (offsets multiple of P).
    xflat = jnp.concatenate([x_final[i:i + 1, :] for i in range(B)], axis=1)

    tapm = tapm_ref[...]                                 # [27, DP] 0/1 masks

    def shifted(hval, t):
        """Padded-input value at tap t: lane shift w/ zero fill + boundary mask."""
        s_ = shifts[t]
        cin = hval.shape[0]
        if s_ > 0:
            sh = jnp.concatenate(
                [hval[:, s_:], jnp.zeros((cin, s_), jnp.float32)], axis=1)
        elif s_ < 0:
            sh = jnp.concatenate(
                [jnp.zeros((cin, -s_), jnp.float32), hval[:, :DP + s_]], axis=1)
        else:
            sh = hval
        return sh * tapm[t:t + 1, :]

    # ---------------- Conv3d(1 -> 8): VPU broadcast FMA over 27 taps --------
    w1 = w1_ref[...]                                     # [8, 27]
    acc1 = jnp.zeros((w1.shape[0], DP), jnp.float32)
    for t in range(27):
        acc1 = acc1 + w1[:, t:t + 1] * shifted(xflat, t)
    h = _leaky(acc1 + b1_ref[...])                       # [8, DP]

    # -------- Conv3d(Cin -> Cout) as one im2col matmul (K = 27*Cin) ---------
    def conv_mm(hval, w_ref, b_ref):
        pat = jnp.concatenate([shifted(hval, t) for t in range(27)], axis=0)
        return jnp.dot(w_ref[...], pat,
                       preferred_element_type=jnp.float32) + b_ref[...]

    h = _leaky(conv_mm(h, w2_ref, b2_ref))               # [16, DP]
    h = _leaky(conv_mm(h, w3_ref, b3_ref))               # [8, DP]
    out_ref[0] = conv_mm(h, w4_ref, b4_ref)              # [1, DP] lane-dense


def model_1129_forward(meas1, meas_re, mask, mask_s, conv2_params):
    # meas1: [N,H,W], meas_re: [N,1,H,W], mask: [B,H,W], mask_s: [H,W]
    N, H, W = meas1.shape
    B = mask.shape[0]
    P = H * W
    DP = B * P

    # Lane-dense views of all kernel operands.
    meas1_f = meas1.reshape(N, 1, P).astype(jnp.float32)
    measre_f = meas_re.reshape(N, 1, P).astype(jnp.float32)
    mask_f = mask.reshape(B, P).astype(jnp.float32)
    inv_ms = (1.0 / mask_s).reshape(1, P).astype(jnp.float32)

    # Hoisted per-tap lane-shift amounts + 0/1 boundary masks (constants).
    dpi = np.arange(DP)
    d_i, h_i, w_i = dpi // P, (dpi % P) // W, dpi % W
    shifts, rows = [], []
    for (dd, dh, dw) in _tap_offsets():
        shifts.append(dd * P + dh * W + dw)
        ok = ((d_i + dd >= 0) & (d_i + dd < B) &
              (h_i + dh >= 0) & (h_i + dh < H) &
              (w_i + dw >= 0) & (w_i + dw < W))
        rows.append(ok.astype(np.float32))
    tap_masks = jnp.asarray(np.stack(rows))              # [27, DP]

    # Weights -> [Cout, 27*Cin] (tap-major, then Cin); biases -> [Cout, 1].
    def to_mm(w):                                        # w: [3,3,3,Cin,Cout]
        _, _, _, cin, cout = w.shape
        return jnp.transpose(w.reshape(27, cin, cout),
                             (2, 0, 1)).reshape(cout, 27 * cin)

    (w1, b1), (w2, b2), (w3, b3), (w4, b4) = conv2_params
    w1m, w2m, w3m, w4m = to_mm(w1), to_mm(w2), to_mm(w3), to_mm(w4)
    b1c, b2c, b3c, b4c = (b.reshape(-1, 1) for b in (b1, b2, b3, b4))

    def full_spec(arr):
        nd = arr.ndim
        return pl.BlockSpec(tuple(arr.shape), lambda n, _nd=nd: (0,) * _nd)

    kern = functools.partial(_fused_forward_kernel, B=B, P=P,
                             shifts=tuple(shifts))
    out_flat, xf1_flat = pl.pallas_call(
        kern,
        out_shape=(jax.ShapeDtypeStruct((N, 1, DP), jnp.float32),
                   jax.ShapeDtypeStruct((N, B, P), jnp.float32)),
        grid=(N,),
        in_specs=[
            pl.BlockSpec((1, 1, P), lambda n: (n, 0, 0)),   # meas1
            pl.BlockSpec((1, 1, P), lambda n: (n, 0, 0)),   # meas_re
            full_spec(mask_f),                              # mask
            full_spec(inv_ms),                              # 1/mask_s
            full_spec(tap_masks),                           # tap boundary masks
            full_spec(w1m), full_spec(b1c),                 # Conv3d 1->8
            full_spec(w2m), full_spec(b2c),                 # Conv3d 8->16
            full_spec(w3m), full_spec(b3c),                 # Conv3d 16->8
            full_spec(w4m), full_spec(b4c),                 # Conv3d 8->1
        ],
        out_specs=(pl.BlockSpec((1, 1, DP), lambda n: (n, 0, 0)),
                   pl.BlockSpec((1, B, P), lambda n: (n, 0, 0))),
        compiler_params=pltpu.CompilerParams(
            dimension_semantics=("parallel",)),
    )(meas1_f, measre_f, mask_f, inv_ms, tap_masks,
      w1m, b1c, w2m, b2c, w3m, b3c, w4m, b4c)

    # Free layout plumbing back to the PyTorch NCDHW / NCHW shapes.
    out_final = out_flat.reshape(N, 1, B, H, W)
    x_final_1 = xf1_flat.reshape(N, B, H, W)
    return out_final, x_final_1


def init_conv2_params(key):
    # self.conv2 = Conv3d(1->8) LReLU Conv3d(8->16) LReLU Conv3d(16->8) LReLU Conv3d(8->1)
    dims = [(1, 8), (8, 16), (16, 8), (8, 1)]
    keys = jax.random.split(key, 2 * len(dims))
    params = []
    for i, (cin, cout) in enumerate(dims):
        bound = 1.0 / ((cin * 27) ** 0.5)
        w = jax.random.uniform(keys[2 * i], (3, 3, 3, cin, cout),
                               minval=-bound, maxval=bound, dtype=jnp.float32)
        b = jax.random.uniform(keys[2 * i + 1], (cout,),
                               minval=-bound, maxval=bound, dtype=jnp.float32)
        params.append((w, b))
    return params


if __name__ == "__main__":
    key = jax.random.PRNGKey(0)
    k_mask, k_meas, k_conv = jax.random.split(key, 3)

    N, B, H, W = 2, 4, 16, 16        # batch, frames (args.B), args.size

    # self.mask / mask_s are not defined in the provided snippet -> synthesize
    # a deterministic binary sensing mask (typical video-SCI setup).
    mask = (jax.random.uniform(k_mask, (B, H, W)) > 0.5).astype(jnp.float32)
    mask_s = jnp.sum(mask, axis=0)
    mask_s = jnp.where(mask_s == 0, 1.0, mask_s)     # zero-division guard

    meas1 = jax.random.uniform(k_meas, (N, H, W), dtype=jnp.float32)
    meas_re = (meas1 / mask_s)[:, None, :, :]        # [N, 1, H, W]

    conv2_params = init_conv2_params(k_conv)

    fwd = jax.jit(model_1129_forward)
    out_final, x_final_1 = fwd(meas1, meas_re, mask, mask_s, conv2_params)
    jax.block_until_ready((out_final, x_final_1))

    assert out_final.shape == (N, 1, B, H, W), out_final.shape
    assert x_final_1.shape == (N, B, H, W), x_final_1.shape
    print("KERNEL_OK")
</pallas_src>

<mosaic_0001>
module attributes {stable_mosaic.version = 11 : i64} {
  func.func @_fused_forward_kernel(%arg0: i32, %arg1: memref<1x1x256xf32, #tpu.memory_space<vmem>>, %arg2: memref<1x1x256xf32, #tpu.memory_space<vmem>>, %arg3: memref<4x256xf32, #tpu.memory_space<vmem>>, %arg4: memref<1x256xf32, #tpu.memory_space<vmem>>, %arg5: memref<27x1024xf32, #tpu.memory_space<vmem>>, %arg6: memref<8x27xf32, #tpu.memory_space<vmem>>, %arg7: memref<8x1xf32, #tpu.memory_space<vmem>>, %arg8: memref<16x216xf32, #tpu.memory_space<vmem>>, %arg9: memref<16x1xf32, #tpu.memory_space<vmem>>, %arg10: memref<8x432xf32, #tpu.memory_space<vmem>>, %arg11: memref<8x1xf32, #tpu.memory_space<vmem>>, %arg12: memref<1x216xf32, #tpu.memory_space<vmem>>, %arg13: memref<1x1xf32, #tpu.memory_space<vmem>>, %arg14: memref<1x1x1024xf32, #tpu.memory_space<vmem>>, %arg15: memref<1x4x256xf32, #tpu.memory_space<vmem>>) attributes {dimension_semantics = [#tpu.dimension_semantics<parallel>], iteration_bounds = array<i64: 2>, scalar_prefetch = 0 : i64, scratch_operands = 0 : i64, tpu.core_type = #tpu.core_type<tc>, window_params = [{transform_indices = @transform_0, window_bounds = array<i64: 1, 1, 256>}, {transform_indices = @transform_1, window_bounds = array<i64: 1, 1, 256>}, {pipeline_mode = #tpu.pipeline_mode<synchronous>, transform_indices = @transform_2, window_bounds = array<i64: 4, 256>}, {pipeline_mode = #tpu.pipeline_mode<synchronous>, transform_indices = @transform_3, window_bounds = array<i64: 1, 256>}, {pipeline_mode = #tpu.pipeline_mode<synchronous>, transform_indices = @transform_4, window_bounds = array<i64: 27, 1024>}, {pipeline_mode = #tpu.pipeline_mode<synchronous>, transform_indices = @transform_5, window_bounds = array<i64: 8, 27>}, {pipeline_mode = #tpu.pipeline_mode<synchronous>, transform_indices = @transform_6, window_bounds = array<i64: 8, 1>}, {pipeline_mode = #tpu.pipeline_mode<synchronous>, transform_indices = @transform_7, window_bounds = array<i64: 16, 216>}, {pipeline_mode = #tpu.pipeline_mode<synchronous>, transform_indices = @transform_8, window_bounds = array<i64: 16, 1>}, {pipeline_mode = #tpu.pipeline_mode<synchronous>, transform_indices = @transform_9, window_bounds = array<i64: 8, 432>}, {pipeline_mode = #tpu.pipeline_mode<synchronous>, transform_indices = @transform_10, window_bounds = array<i64: 8, 1>}, {pipeline_mode = #tpu.pipeline_mode<synchronous>, transform_indices = @transform_11, window_bounds = array<i64: 1, 216>}, {pipeline_mode = #tpu.pipeline_mode<synchronous>, transform_indices = @transform_12, window_bounds = array<i64: 1, 1>}, {transform_indices = @transform_13, window_bounds = array<i64: 1, 1, 1024>}, {transform_indices = @transform_14, window_bounds = array<i64: 1, 4, 256>}]} {
    %c0 = arith.constant 0 : index
    %c0_0 = arith.constant 0 : index
    %0 = vector.load %arg3[%c0, %c0_0] : memref<4x256xf32, #tpu.memory_space<vmem>>, vector<4x256xf32>
    %cst = arith.constant 1.000000e+00 : f32
    %1 = vector.broadcast %cst : f32 to vector<4x256xf32>
    %2 = arith.addf %1, %0 : vector<4x256xf32>
    %c0_1 = arith.constant 0 : index
    %c0_2 = arith.constant 0 : index
    %c0_3 = arith.constant 0 : index
    %3 = vector.load %arg2[%c0_1, %c0_2, %c0_3] : memref<1x1x256xf32, #tpu.memory_space<vmem>>, vector<1x1x256xf32>
    %4 = vector.shape_cast %3 : vector<1x1x256xf32> to vector<1x256xf32>
    %5 = vector.broadcast %4 : vector<1x256xf32> to vector<4x256xf32>
    %6 = arith.mulf %5, %2 : vector<4x256xf32>
    %7 = arith.mulf %0, %6 : vector<4x256xf32>
    %cst_4 = arith.constant dense<0.000000e+00> : vector<256xf32>
    %8 = vector.multi_reduction <add>, %7, %cst_4 [0] : vector<4x256xf32> to vector<256xf32>
    %9 = vector.shape_cast %8 : vector<256xf32> to vector<1x256xf32>
    %c0_5 = arith.constant 0 : index
    %c0_6 = arith.constant 0 : index
    %c0_7 = arith.constant 0 : index
    %10 = vector.load %arg1[%c0_5, %c0_6, %c0_7] : memref<1x1x256xf32, #tpu.memory_space<vmem>>, vector<1x1x256xf32>
    %11 = vector.shape_cast %10 : vector<1x1x256xf32> to vector<1x256xf32>
    %cst_8 = arith.constant 4.000000e+00 : f32
    %12 = vector.broadcast %cst_8 : f32 to vector<1x256xf32>
    %13 = arith.mulf %12, %11 : vector<1x256xf32>
    %14 = arith.subf %13, %9 : vector<1x256xf32>
    %c0_9 = arith.constant 0 : index
    %c0_10 = arith.constant 0 : index
    %15 = vector.load %arg4[%c0_9, %c0_10] : memref<1x256xf32, #tpu.memory_space<vmem>>, vector<1x256xf32>
    %16 = arith.mulf %14, %15 : vector<1x256xf32>
    %17 = vector.broadcast %16 : vector<1x256xf32> to vector<4x256xf32>
    %18 = arith.mulf %17, %2 : vector<4x256xf32>
    %19 = arith.addf %18, %6 : vector<4x256xf32>
    %c0_11 = arith.constant 0 : index
    %c0_12 = arith.constant 0 : index
    %c0_13 = arith.constant 0 : index
    %20 = vector.load %arg15[%c0_11, %c0_12, %c0_13] : memref<1x4x256xf32, #tpu.memory_space<vmem>>, vector<1x4x256xf32>
    %21 = vector.shape_cast %20 : vector<1x4x256xf32> to vector<4x256xf32>
    %22 = vector.shape_cast %6 : vector<4x256xf32> to vector<1x4x256xf32>
    tpu.vector_store %arg15[%c0_11, %c0_12, %c0_13], %22 {strides = array<i32>} : memref<1x4x256xf32, #tpu.memory_space<vmem>>, vector<1x4x256xf32>,
    %23 = vector.extract_strided_slice %19 {offsets = [0, 0], sizes = [1, 256], strides = [1, 1]} : vector<4x256xf32> to vector<1x256xf32>
    %24 = vector.extract_strided_slice %19 {offsets = [1, 0], sizes = [1, 256], strides = [1, 1]} : vector<4x256xf32> to vector<1x256xf32>
    %25 = vector.extract_strided_slice %19 {offsets = [2, 0], sizes = [1, 256], strides = [1, 1]} : vector<4x256xf32> to vector<1x256xf32>
    %26 = vector.extract_strided_slice %19 {offsets = [3, 0], sizes = [1, 256], strides = [1, 1]} : vector<4x256xf32> to vector<1x256xf32>
    %27 = tpu.concatenate %23, %24, %25, %26 in 1 : vector<1x256xf32>, vector<1x256xf32>, vector<1x256xf32>, vector<1x256xf32> -> vector<1x1024xf32>
    %c0_14 = arith.constant 0 : index
    %c0_15 = arith.constant 0 : index
    %28 = vector.load %arg5[%c0_14, %c0_15] : memref<27x1024xf32, #tpu.memory_space<vmem>>, vector<27x1024xf32>
    %c0_16 = arith.constant 0 : index
    %c0_17 = arith.constant 0 : index
    %29 = vector.load %arg6[%c0_16, %c0_17] : memref<8x27xf32, #tpu.memory_space<vmem>>, vector<8x27xf32>
    %cst_18 = arith.constant 0.000000e+00 : f32
    %30 = vector.broadcast %cst_18 : f32 to vector<8x1024xf32>
    %31 = vector.extract_strided_slice %29 {offsets = [0, 0], sizes = [8, 1], strides = [1, 1]} : vector<8x27xf32> to vector<8x1xf32>
    %cst_19 = arith.constant 0.000000e+00 : f32
    %32 = vector.broadcast %cst_19 : f32 to vector<1x273xf32>
    %33 = vector.extract_strided_slice %27 {offsets = [0, 0], sizes = [1, 751], strides = [1, 1]} : vector<1x1024xf32> to vector<1x751xf32>
    %34 = tpu.concatenate %32, %33 in 1 : vector<1x273xf32>, vector<1x751xf32> -> vector<1x1024xf32>
    %35 = vector.extract_strided_slice %28 {offsets = [0, 0], sizes = [1, 1024], strides = [1, 1]} : vector<27x1024xf32> to vector<1x1024xf32>
    %36 = arith.mulf %34, %35 : vector<1x1024xf32>
    %37 = vector.broadcast %31 : vector<8x1xf32> to vector<8x1024xf32>
    %38 = vector.broadcast %36 : vector<1x1024xf32> to vector<8x1024xf32>
    %39 = arith.mulf %37, %38 : vector<8x1024xf32>
    %40 = arith.addf %30, %39 : vector<8x1024xf32>
    %41 = vector.extract_strided_slice %29 {offsets = [0, 1], sizes = [8, 1], strides = [1, 1]} : vector<8x27xf32> to vector<8x1xf32>
    %cst_20 = arith.constant 0.000000e+00 : f32
    %42 = vector.broadcast %cst_20 : f32 to vector<1x272xf32>
    %43 = vector.extract_strided_slice %27 {offsets = [0, 0], sizes = [1, 752], strides = [1, 1]} : vector<1x1024xf32> to vector<1x752xf32>
    %44 = tpu.concatenate %42, %43 in 1 : vector<1x272xf32>, vector<1x752xf32> -> vector<1x1024xf32>
    %45 = vector.extract_strided_slice %28 {offsets = [1, 0], sizes = [1, 1024], strides = [1, 1]} : vector<27x1024xf32> to vector<1x1024xf32>
    %46 = arith.mulf %44, %45 : vector<1x1024xf32>
    %47 = vector.broadcast %41 : vector<8x1xf32> to vector<8x1024xf32>
    %48 = vector.broadcast %46 : vector<1x1024xf32> to vector<8x1024xf32>
    %49 = arith.mulf %47, %48 : vector<8x1024xf32>
    %50 = arith.addf %40, %49 : vector<8x1024xf32>
    %51 = vector.extract_strided_slice %29 {offsets = [0, 2], sizes = [8, 1], strides = [1, 1]} : vector<8x27xf32> to vector<8x1xf32>
    %cst_21 = arith.constant 0.000000e+00 : f32
    %52 = vector.broadcast %cst_21 : f32 to vector<1x271xf32>
    %53 = vector.extract_strided_slice %27 {offsets = [0, 0], sizes = [1, 753], strides = [1, 1]} : vector<1x1024xf32> to vector<1x753xf32>
    %54 = tpu.concatenate %52, %53 in 1 : vector<1x271xf32>, vector<1x753xf32> -> vector<1x1024xf32>
    %55 = vector.extract_strided_slice %28 {offsets = [2, 0], sizes = [1, 1024], strides = [1, 1]} : vector<27x1024xf32> to vector<1x1024xf32>
    %56 = arith.mulf %54, %55 : vector<1x1024xf32>
    %57 = vector.broadcast %51 : vector<8x1xf32> to vector<8x1024xf32>
    %58 = vector.broadcast %56 : vector<1x1024xf32> to vector<8x1024xf32>
    %59 = arith.mulf %57, %58 : vector<8x1024xf32>
    %60 = arith.addf %50, %59 : vector<8x1024xf32>
    %61 = vector.extract_strided_slice %29 {offsets = [0, 3], sizes = [8, 1], strides = [1, 1]} : vector<8x27xf32> to vector<8x1xf32>
    %cst_22 = arith.constant 0.000000e+00 : f32
    %62 = vector.broadcast %cst_22 : f32 to vector<1x257xf32>
    %63 = vector.extract_strided_slice %27 {offsets = [0, 0], sizes = [1, 767], strides = [1, 1]} : vector<1x1024xf32> to vector<1x767xf32>
    %64 = tpu.concatenate %62, %63 in 1 : vector<1x257xf32>, vector<1x767xf32> -> vector<1x1024xf32>
    %65 = vector.extract_strided_slice %28 {offsets = [3, 0], sizes = [1, 1024], strides = [1, 1]} : vector<27x1024xf32> to vector<1x1024xf32>
    %66 = arith.mulf %64, %65 : vector<1x1024xf32>
    %67 = vector.broadcast %61 : vector<8x1xf32> to vector<8x1024xf32>
    %68 = vector.broadcast %66 : vector<1x1024xf32> to vector<8x1024xf32>
    %69 = arith.mulf %67, %68 : vector<8x1024xf32>
    %70 = arith.addf %60, %69 : vector<8x1024xf32>
    %71 = vector.extract_strided_slice %29 {offsets = [0, 4], sizes = [8, 1], strides = [1, 1]} : vector<8x27xf32> to vector<8x1xf32>
    %cst_23 = arith.constant 0.000000e+00 : f32
    %72 = vector.broadcast %cst_23 : f32 to vector<1x256xf32>
    %73 = vector.extract_strided_slice %27 {offsets = [0, 0], sizes = [1, 768], strides = [1, 1]} : vector<1x1024xf32> to vector<1x768xf32>
    %74 = tpu.concatenate %72, %73 in 1 : vector<1x256xf32>, vector<1x768xf32> -> vector<1x1024xf32>
    %75 = vector.extract_strided_slice %28 {offsets = [4, 0], sizes = [1, 1024], strides = [1, 1]} : vector<27x1024xf32> to vector<1x1024xf32>
    %76 = arith.mulf %74, %75 : vector<1x1024xf32>
    %77 = vector.broadcast %71 : vector<8x1xf32> to vector<8x1024xf32>
    %78 = vector.broadcast %76 : vector<1x1024xf32> to vector<8x1024xf32>
    %79 = arith.mulf %77, %78 : vector<8x1024xf32>
    %80 = arith.addf %70, %79 : vector<8x1024xf32>
    %81 = vector.extract_strided_slice %29 {offsets = [0, 5], sizes = [8, 1], strides = [1, 1]} : vector<8x27xf32> to vector<8x1xf32>
    %cst_24 = arith.constant 0.000000e+00 : f32
    %82 = vector.broadcast %cst_24 : f32 to vector<1x255xf32>
    %83 = vector.extract_strided_slice %27 {offsets = [0, 0], sizes = [1, 769], strides = [1, 1]} : vector<1x1024xf32> to vector<1x769xf32>
    %84 = tpu.concatenate %82, %83 in 1 : vector<1x255xf32>, vector<1x769xf32> -> vector<1x1024xf32>
    %85 = vector.extract_strided_slice %28 {offsets = [5, 0], sizes = [1, 1024], strides = [1, 1]} : vector<27x1024xf32> to vector<1x1024xf32>
    %86 = arith.mulf %84, %85 : vector<1x1024xf32>
    %87 = vector.broadcast %81 : vector<8x1xf32> to vector<8x1024xf32>
    %88 = vector.broadcast %86 : vector<1x1024xf32> to vector<8x1024xf32>
    %89 = arith.mulf %87, %88 : vector<8x1024xf32>
    %90 = arith.addf %80, %89 : vector<8x1024xf32>
    %91 = vector.extract_strided_slice %29 {offsets = [0, 6], sizes = [8, 1], strides = [1, 1]} : vector<8x27xf32> to vector<8x1xf32>
    %cst_25 = arith.constant 0.000000e+00 : f32
    %92 = vector.broadcast %cst_25 : f32 to vector<1x241xf32>
    %93 = vector.extract_strided_slice %27 {offsets = [0, 0], sizes = [1, 783], strides = [1, 1]} : vector<1x1024xf32> to vector<1x783xf32>
    %94 = tpu.concatenate %92, %93 in 1 : vector<1x241xf32>, vector<1x783xf32> -> vector<1x1024xf32>
    %95 = vector.extract_strided_slice %28 {offsets = [6, 0], sizes = [1, 1024], strides = [1, 1]} : vector<27x1024xf32> to vector<1x1024xf32>
    %96 = arith.mulf %94, %95 : vector<1x1024xf32>
    %97 = vector.broadcast %91 : vector<8x1xf32> to vector<8x1024xf32>
    %98 = vector.broadcast %96 : vector<1x1024xf32> to vector<8x1024xf32>
    %99 = arith.mulf %97, %98 : vector<8x1024xf32>
    %100 = arith.addf %90, %99 : vector<8x1024xf32>
    %101 = vector.extract_strided_slice %29 {offsets = [0, 7], sizes = [8, 1], strides = [1, 1]} : vector<8x27xf32> to vector<8x1xf32>
    %cst_26 = arith.constant 0.000000e+00 : f32
    %102 = vector.broadcast %cst_26 : f32 to vector<1x240xf32>
    %103 = vector.extract_strided_slice %27 {offsets = [0, 0], sizes = [1, 784], strides = [1, 1]} : vector<1x1024xf32> to vector<1x784xf32>
    %104 = tpu.concatenate %102, %103 in 1 : vector<1x240xf32>, vector<1x784xf32> -> vector<1x1024xf32>
    %105 = vector.extract_strided_slice %28 {offsets = [7, 0], sizes = [1, 1024], strides = [1, 1]} : vector<27x1024xf32> to vector<1x1024xf32>
    %106 = arith.mulf %104, %105 : vector<1x1024xf32>
    %107 = vector.broadcast %101 : vector<8x1xf32> to vector<8x1024xf32>
    %108 = vector.broadcast %106 : vector<1x1024xf32> to vector<8x1024xf32>
    %109 = arith.mulf %107, %108 : vector<8x1024xf32>
    %110 = arith.addf %100, %109 : vector<8x1024xf32>
    %111 = vector.extract_strided_slice %29 {offsets = [0, 8], sizes = [8, 1], strides = [1, 1]} : vector<8x27xf32> to vector<8x1xf32>
    %cst_27 = arith.constant 0.000000e+00 : f32
    %112 = vector.broadcast %cst_27 : f32 to vector<1x239xf32>
    %113 = vector.extract_strided_slice %27 {offsets = [0, 0], sizes = [1, 785], strides = [1, 1]} : vector<1x1024xf32> to vector<1x785xf32>
    %114 = tpu.concatenate %112, %113 in 1 : vector<1x239xf32>, vector<1x785xf32> -> vector<1x1024xf32>
    %115 = vector.extract_strided_slice %28 {offsets = [8, 0], sizes = [1, 1024], strides = [1, 1]} : vector<27x1024xf32> to vector<1x1024xf32>
    %116 = arith.mulf %114, %115 : vector<1x1024xf32>
    %117 = vector.broadcast %111 : vector<8x1xf32> to vector<8x1024xf32>
    %118 = vector.broadcast %116 : vector<1x1024xf32> to vector<8x1024xf32>
    %119 = arith.mulf %117, %118 : vector<8x1024xf32>
    %120 = arith.addf %110, %119 : vector<8x1024xf32>
    %121 = vector.extract_strided_slice %29 {offsets = [0, 9], sizes = [8, 1], strides = [1, 1]} : vector<8x27xf32> to vector<8x1xf32>
    %cst_28 = arith.constant 0.000000e+00 : f32
    %122 = vector.broadcast %cst_28 : f32 to vector<1x17xf32>
    %123 = vector.extract_strided_slice %27 {offsets = [0, 0], sizes = [1, 1007], strides = [1, 1]} : vector<1x1024xf32> to vector<1x1007xf32>
    %124 = tpu.concatenate %122, %123 in 1 : vector<1x17xf32>, vector<1x1007xf32> -> vector<1x1024xf32>
    %125 = vector.extract_strided_slice %28 {offsets = [9, 0], sizes = [1, 1024], strides = [1, 1]} : vector<27x1024xf32> to vector<1x1024xf32>
    %126 = arith.mulf %124, %125 : vector<1x1024xf32>
    %127 = vector.broadcast %121 : vector<8x1xf32> to vector<8x1024xf32>
    %128 = vector.broadcast %126 : vector<1x1024xf32> to vector<8x1024xf32>
    %129 = arith.mulf %127, %128 : vector<8x1024xf32>
    %130 = arith.addf %120, %129 : vector<8x1024xf32>
    %131 = vector.extract_strided_slice %29 {offsets = [0, 10], sizes = [8, 1], strides = [1, 1]} : vector<8x27xf32> to vector<8x1xf32>
    %cst_29 = arith.constant 0.000000e+00 : f32
    %132 = vector.broadcast %cst_29 : f32 to vector<1x16xf32>
    %133 = vector.extract_strided_slice %27 {offsets = [0, 0], sizes = [1, 1008], strides = [1, 1]} : vector<1x1024xf32> to vector<1x1008xf32>
    %134 = tpu.concatenate %132, %133 in 1 : vector<1x16xf32>, vector<1x1008xf32> -> vector<1x1024xf32>
    %135 = vector.extract_strided_slice %28 {offsets = [10, 0], sizes = [1, 1024], strides = [1, 1]} : vector<27x1024xf32> to vector<1x1024xf32>
    %136 = arith.mulf %134, %135 : vector<1x1024xf32>
    %137 = vector.broadcast %131 : vector<8x1xf32> to vector<8x1024xf32>
    %138 = vector.broadcast %136 : vector<1x1024xf32> to vector<8x1024xf32>
    %139 = arith.mulf %137, %138 : vector<8x1024xf32>
    %140 = arith.addf %130, %139 : vector<8x1024xf32>
    %141 = vector.extract_strided_slice %29 {offsets = [0, 11], sizes = [8, 1], strides = [1, 1]} : vector<8x27xf32> to vector<8x1xf32>
    %cst_30 = arith.constant 0.000000e+00 : f32
    %142 = vector.broadcast %cst_30 : f32 to vector<1x15xf32>
    %143 = vector.extract_strided_slice %27 {offsets = [0, 0], sizes = [1, 1009], strides = [1, 1]} : vector<1x1024xf32> to vector<1x1009xf32>
    %144 = tpu.concatenate %142, %143 in 1 : vector<1x15xf32>, vector<1x1009xf32> -> vector<1x1024xf32>
    %145 = vector.extract_strided_slice %28 {offsets = [11, 0], sizes = [1, 1024], strides = [1, 1]} : vector<27x1024xf32> to vector<1x1024xf32>
    %146 = arith.mulf %144, %145 : vector<1x1024xf32>
    %147 = vector.broadcast %141 : vector<8x1xf32> to vector<8x1024xf32>
    %148 = vector.broadcast %146 : vector<1x1024xf32> to vector<8x1024xf32>
    %149 = arith.mulf %147, %148 : vector<8x1024xf32>
    %150 = arith.addf %140, %149 : vector<8x1024xf32>
    %151 = vector.extract_strided_slice %29 {offsets = [0, 12], sizes = [8, 1], strides = [1, 1]} : vector<8x27xf32> to vector<8x1xf32>
    %cst_31 = arith.constant 0.000000e+00 : f32
    %152 = vector.broadcast %cst_31 : f32 to vector<1x1xf32>
    %153 = vector.extract_strided_slice %27 {offsets = [0, 0], sizes = [1, 1023], strides = [1, 1]} : vector<1x1024xf32> to vector<1x1023xf32>
    %154 = tpu.concatenate %152, %153 in 1 : vector<1x1xf32>, vector<1x1023xf32> -> vector<1x1024xf32>
    %155 = vector.extract_strided_slice %28 {offsets = [12, 0], sizes = [1, 1024], strides = [1, 1]} : vector<27x1024xf32> to vector<1x1024xf32>
    %156 = arith.mulf %154, %155 : vector<1x1024xf32>
    %157 = vector.broadcast %151 : vector<8x1xf32> to vector<8x1024xf32>
    %158 = vector.broadcast %156 : vector<1x1024xf32> to vector<8x1024xf32>
    %159 = arith.mulf %157, %158 : vector<8x1024xf32>
    %160 = arith.addf %150, %159 : vector<8x1024xf32>
    %161 = vector.extract_strided_slice %29 {offsets = [0, 13], sizes = [8, 1], strides = [1, 1]} : vector<8x27xf32> to vector<8x1xf32>
    %162 = vector.extract_strided_slice %28 {offsets = [13, 0], sizes = [1, 1024], strides = [1, 1]} : vector<27x1024xf32> to vector<1x1024xf32>
    %163 = arith.mulf %27, %162 : vector<1x1024xf32>
    %164 = vector.broadcast %161 : vector<8x1xf32> to vector<8x1024xf32>
    %165 = vector.broadcast %163 : vector<1x1024xf32> to vector<8x1024xf32>
    %166 = arith.mulf %164, %165 : vector<8x1024xf32>
    %167 = arith.addf %160, %166 : vector<8x1024xf32>
    %168 = vector.extract_strided_slice %29 {offsets = [0, 14], sizes = [8, 1], strides = [1, 1]} : vector<8x27xf32> to vector<8x1xf32>
    %169 = vector.extract_strided_slice %27 {offsets = [0, 1], sizes = [1, 1023], strides = [1, 1]} : vector<1x1024xf32> to vector<1x1023xf32>
    %cst_32 = arith.constant 0.000000e+00 : f32
    %170 = vector.broadcast %cst_32 : f32 to vector<1x1xf32>
    %171 = tpu.concatenate %169, %170 in 1 : vector<1x1023xf32>, vector<1x1xf32> -> vector<1x1024xf32>
    %172 = vector.extract_strided_slice %28 {offsets = [14, 0], sizes = [1, 1024], strides = [1, 1]} : vector<27x1024xf32> to vector<1x1024xf32>
    %173 = arith.mulf %171, %172 : vector<1x1024xf32>
    %174 = vector.broadcast %168 : vector<8x1xf32> to vector<8x1024xf32>
    %175 = vector.broadcast %173 : vector<1x1024xf32> to vector<8x1024xf32>
    %176 = arith.mulf %174, %175 : vector<8x1024xf32>
    %177 = arith.addf %167, %176 : vector<8x1024xf32>
    %178 = vector.extract_strided_slice %29 {offsets = [0, 15], sizes = [8, 1], strides = [1, 1]} : vector<8x27xf32> to vector<8x1xf32>
    %179 = vector.extract_strided_slice %27 {offsets = [0, 15], sizes = [1, 1009], strides = [1, 1]} : vector<1x1024xf32> to vector<1x1009xf32>
    %cst_33 = arith.constant 0.000000e+00 : f32
    %180 = vector.broadcast %cst_33 : f32 to vector<1x15xf32>
    %181 = tpu.concatenate %179, %180 in 1 : vector<1x1009xf32>, vector<1x15xf32> -> vector<1x1024xf32>
    %182 = vector.extract_strided_slice %28 {offsets = [15, 0], sizes = [1, 1024], strides = [1, 1]} : vector<27x1024xf32> to vector<1x1024xf32>
    %183 = arith.mulf %181, %182 : vector<1x1024xf32>
    %184 = vector.broadcast %178 : vector<8x1xf32> to vector<8x1024xf32>
    %185 = vector.broadcast %183 : vector<1x1024xf32> to vector<8x1024xf32>
    %186 = arith.mulf %184, %185 : vector<8x1024xf32>
    %187 = arith.addf %177, %186 : vector<8x1024xf32>
    %188 = vector.extract_strided_slice %29 {offsets = [0, 16], sizes = [8, 1], strides = [1, 1]} : vector<8x27xf32> to vector<8x1xf32>
    %189 = vector.extract_strided_slice %27 {offsets = [0, 16], sizes = [1, 1008], strides = [1, 1]} : vector<1x1024xf32> to vector<1x1008xf32>
    %cst_34 = arith.constant 0.000000e+00 : f32
    %190 = vector.broadcast %cst_34 : f32 to vector<1x16xf32>
    %191 = tpu.concatenate %189, %190 in 1 : vector<1x1008xf32>, vector<1x16xf32> -> vector<1x1024xf32>
    %192 = vector.extract_strided_slice %28 {offsets = [16, 0], sizes = [1, 1024], strides = [1, 1]} : vector<27x1024xf32> to vector<1x1024xf32>
    %193 = arith.mulf %191, %192 : vector<1x1024xf32>
    %194 = vector.broadcast %188 : vector<8x1xf32> to vector<8x1024xf32>
    %195 = vector.broadcast %193 : vector<1x1024xf32> to vector<8x1024xf32>
    %196 = arith.mulf %194, %195 : vector<8x1024xf32>
    %197 = arith.addf %187, %196 : vector<8x1024xf32>
    %198 = vector.extract_strided_slice %29 {offsets = [0, 17], sizes = [8, 1], strides = [1, 1]} : vector<8x27xf32> to vector<8x1xf32>
    %199 = vector.extract_strided_slice %27 {offsets = [0, 17], sizes = [1, 1007], strides = [1, 1]} : vector<1x1024xf32> to vector<1x1007xf32>
    %cst_35 = arith.constant 0.000000e+00 : f32
    %200 = vector.broadcast %cst_35 : f32 to vector<1x17xf32>
    %201 = tpu.concatenate %199, %200 in 1 : vector<1x1007xf32>, vector<1x17xf32> -> vector<1x1024xf32>
    %202 = vector.extract_strided_slice %28 {offsets = [17, 0], sizes = [1, 1024], strides = [1, 1]} : vector<27x1024xf32> to vector<1x1024xf32>
    %203 = arith.mulf %201, %202 : vector<1x1024xf32>
    %204 = vector.broadcast %198 : vector<8x1xf32> to vector<8x1024xf32>
    %205 = vector.broadcast %203 : vector<1x1024xf32> to vector<8x1024xf32>
    %206 = arith.mulf %204, %205 : vector<8x1024xf32>
    %207 = arith.addf %197, %206 : vector<8x1024xf32>
    %208 = vector.extract_strided_slice %29 {offsets = [0, 18], sizes = [8, 1], strides = [1, 1]} : vector<8x27xf32> to vector<8x1xf32>
    %209 = vector.extract_strided_slice %27 {offsets = [0, 239], sizes = [1, 785], strides = [1, 1]} : vector<1x1024xf32> to vector<1x785xf32>
    %cst_36 = arith.constant 0.000000e+00 : f32
    %210 = vector.broadcast %cst_36 : f32 to vector<1x239xf32>
    %211 = tpu.concatenate %209, %210 in 1 : vector<1x785xf32>, vector<1x239xf32> -> vector<1x1024xf32>
    %212 = vector.extract_strided_slice %28 {offsets = [18, 0], sizes = [1, 1024], strides = [1, 1]} : vector<27x1024xf32> to vector<1x1024xf32>
    %213 = arith.mulf %211, %212 : vector<1x1024xf32>
    %214 = vector.broadcast %208 : vector<8x1xf32> to vector<8x1024xf32>
    %215 = vector.broadcast %213 : vector<1x1024xf32> to vector<8x1024xf32>
    %216 = arith.mulf %214, %215 : vector<8x1024xf32>
    %217 = arith.addf %207, %216 : vector<8x1024xf32>
    %218 = vector.extract_strided_slice %29 {offsets = [0, 19], sizes = [8, 1], strides = [1, 1]} : vector<8x27xf32> to vector<8x1xf32>
    %219 = vector.extract_strided_slice %27 {offsets = [0, 240], sizes = [1, 784], strides = [1, 1]} : vector<1x1024xf32> to vector<1x784xf32>
    %cst_37 = arith.constant 0.000000e+00 : f32
    %220 = vector.broadcast %cst_37 : f32 to vector<1x240xf32>
    %221 = tpu.concatenate %219, %220 in 1 : vector<1x784xf32>, vector<1x240xf32> -> vector<1x1024xf32>
    %222 = vector.extract_strided_slice %28 {offsets = [19, 0], sizes = [1, 1024], strides = [1, 1]} : vector<27x1024xf32> to vector<1x1024xf32>
    %223 = arith.mulf %221, %222 : vector<1x1024xf32>
    %224 = vector.broadcast %218 : vector<8x1xf32> to vector<8x1024xf32>
    %225 = vector.broadcast %223 : vector<1x1024xf32> to vector<8x1024xf32>
    %226 = arith.mulf %224, %225 : vector<8x1024xf32>
    %227 = arith.addf %217, %226 : vector<8x1024xf32>
    %228 = vector.extract_strided_slice %29 {offsets = [0, 20], sizes = [8, 1], strides = [1, 1]} : vector<8x27xf32> to vector<8x1xf32>
    %229 = vector.extract_strided_slice %27 {offsets = [0, 241], sizes = [1, 783], strides = [1, 1]} : vector<1x1024xf32> to vector<1x783xf32>
    %cst_38 = arith.constant 0.000000e+00 : f32
    %230 = vector.broadcast %cst_38 : f32 to vector<1x241xf32>
    %231 = tpu.concatenate %229, %230 in 1 : vector<1x783xf32>, vector<1x241xf32> -> vector<1x1024xf32>
    %232 = vector.extract_strided_slice %28 {offsets = [20, 0], sizes = [1, 1024], strides = [1, 1]} : vector<27x1024xf32> to vector<1x1024xf32>
    %233 = arith.mulf %231, %232 : vector<1x1024xf32>
    %234 = vector.broadcast %228 : vector<8x1xf32> to vector<8x1024xf32>
    %235 = vector.broadcast %233 : vector<1x1024xf32> to vector<8x1024xf32>
    %236 = arith.mulf %234, %235 : vector<8x1024xf32>
    %237 = arith.addf %227, %236 : vector<8x1024xf32>
    %238 = vector.extract_strided_slice %29 {offsets = [0, 21], sizes = [8, 1], strides = [1, 1]} : vector<8x27xf32> to vector<8x1xf32>
    %239 = vector.extract_strided_slice %27 {offsets = [0, 255], sizes = [1, 769], strides = [1, 1]} : vector<1x1024xf32> to vector<1x769xf32>
    %cst_39 = arith.constant 0.000000e+00 : f32
    %240 = vector.broadcast %cst_39 : f32 to vector<1x255xf32>
    %241 = tpu.concatenate %239, %240 in 1 : vector<1x769xf32>, vector<1x255xf32> -> vector<1x1024xf32>
    %242 = vector.extract_strided_slice %28 {offsets = [21, 0], sizes = [1, 1024], strides = [1, 1]} : vector<27x1024xf32> to vector<1x1024xf32>
    %243 = arith.mulf %241, %242 : vector<1x1024xf32>
    %244 = vector.broadcast %238 : vector<8x1xf32> to vector<8x1024xf32>
    %245 = vector.broadcast %243 : vector<1x1024xf32> to vector<8x1024xf32>
    %246 = arith.mulf %244, %245 : vector<8x1024xf32>
    %247 = arith.addf %237, %246 : vector<8x1024xf32>
    %248 = vector.extract_strided_slice %29 {offsets = [0, 22], sizes = [8, 1], strides = [1, 1]} : vector<8x27xf32> to vector<8x1xf32>
    %249 = vector.extract_strided_slice %27 {offsets = [0, 256], sizes = [1, 768], strides = [1, 1]} : vector<1x1024xf32> to vector<1x768xf32>
    %cst_40 = arith.constant 0.000000e+00 : f32
    %250 = vector.broadcast %cst_40 : f32 to vector<1x256xf32>
    %251 = tpu.concatenate %249, %250 in 1 : vector<1x768xf32>, vector<1x256xf32> -> vector<1x1024xf32>
    %252 = vector.extract_strided_slice %28 {offsets = [22, 0], sizes = [1, 1024], strides = [1, 1]} : vector<27x1024xf32> to vector<1x1024xf32>
    %253 = arith.mulf %251, %252 : vector<1x1024xf32>
    %254 = vector.broadcast %248 : vector<8x1xf32> to vector<8x1024xf32>
    %255 = vector.broadcast %253 : vector<1x1024xf32> to vector<8x1024xf32>
    %256 = arith.mulf %254, %255 : vector<8x1024xf32>
    %257 = arith.addf %247, %256 : vector<8x1024xf32>
    %258 = vector.extract_strided_slice %29 {offsets = [0, 23], sizes = [8, 1], strides = [1, 1]} : vector<8x27xf32> to vector<8x1xf32>
    %259 = vector.extract_strided_slice %27 {offsets = [0, 257], sizes = [1, 767], strides = [1, 1]} : vector<1x1024xf32> to vector<1x767xf32>
    %cst_41 = arith.constant 0.000000e+00 : f32
    %260 = vector.broadcast %cst_41 : f32 to vector<1x257xf32>
    %261 = tpu.concatenate %259, %260 in 1 : vector<1x767xf32>, vector<1x257xf32> -> vector<1x1024xf32>
    %262 = vector.extract_strided_slice %28 {offsets = [23, 0], sizes = [1, 1024], strides = [1, 1]} : vector<27x1024xf32> to vector<1x1024xf32>
    %263 = arith.mulf %261, %262 : vector<1x1024xf32>
    %264 = vector.broadcast %258 : vector<8x1xf32> to vector<8x1024xf32>
    %265 = vector.broadcast %263 : vector<1x1024xf32> to vector<8x1024xf32>
    %266 = arith.mulf %264, %265 : vector<8x1024xf32>
    %267 = arith.addf %257, %266 : vector<8x1024xf32>
    %268 = vector.extract_strided_slice %29 {offsets = [0, 24], sizes = [8, 1], strides = [1, 1]} : vector<8x27xf32> to vector<8x1xf32>
    %269 = vector.extract_strided_slice %27 {offsets = [0, 271], sizes = [1, 753], strides = [1, 1]} : vector<1x1024xf32> to vector<1x753xf32>
    %cst_42 = arith.constant 0.000000e+00 : f32
    %270 = vector.broadcast %cst_42 : f32 to vector<1x271xf32>
    %271 = tpu.concatenate %269, %270 in 1 : vector<1x753xf32>, vector<1x271xf32> -> vector<1x1024xf32>
    %272 = vector.extract_strided_slice %28 {offsets = [24, 0], sizes = [1, 1024], strides = [1, 1]} : vector<27x1024xf32> to vector<1x1024xf32>
    %273 = arith.mulf %271, %272 : vector<1x1024xf32>
    %274 = vector.broadcast %268 : vector<8x1xf32> to vector<8x1024xf32>
    %275 = vector.broadcast %273 : vector<1x1024xf32> to vector<8x1024xf32>
    %276 = arith.mulf %274, %275 : vector<8x1024xf32>
    %277 = arith.addf %267, %276 : vector<8x1024xf32>
    %278 = vector.extract_strided_slice %29 {offsets = [0, 25], sizes = [8, 1], strides = [1, 1]} : vector<8x27xf32> to vector<8x1xf32>
    %279 = vector.extract_strided_slice %27 {offsets = [0, 272], sizes = [1, 752], strides = [1, 1]} : vector<1x1024xf32> to vector<1x752xf32>
    %cst_43 = arith.constant 0.000000e+00 : f32
    %280 = vector.broadcast %cst_43 : f32 to vector<1x272xf32>
    %281 = tpu.concatenate %279, %280 in 1 : vector<1x752xf32>, vector<1x272xf32> -> vector<1x1024xf32>
    %282 = vector.extract_strided_slice %28 {offsets = [25, 0], sizes = [1, 1024], strides = [1, 1]} : vector<27x1024xf32> to vector<1x1024xf32>
    %283 = arith.mulf %281, %282 : vector<1x1024xf32>
    %284 = vector.broadcast %278 : vector<8x1xf32> to vector<8x1024xf32>
    %285 = vector.broadcast %283 : vector<1x1024xf32> to vector<8x1024xf32>
    %286 = arith.mulf %284, %285 : vector<8x1024xf32>
    %287 = arith.addf %277, %286 : vector<8x1024xf32>
    %288 = vector.extract_strided_slice %29 {offsets = [0, 26], sizes = [8, 1], strides = [1, 1]} : vector<8x27xf32> to vector<8x1xf32>
    %289 = vector.extract_strided_slice %27 {offsets = [0, 273], sizes = [1, 751], strides = [1, 1]} : vector<1x1024xf32> to vector<1x751xf32>
    %cst_44 = arith.constant 0.000000e+00 : f32
    %290 = vector.broadcast %cst_44 : f32 to vector<1x273xf32>
    %291 = tpu.concatenate %289, %290 in 1 : vector<1x751xf32>, vector<1x273xf32> -> vector<1x1024xf32>
    %292 = vector.extract_strided_slice %28 {offsets = [26, 0], sizes = [1, 1024], strides = [1, 1]} : vector<27x1024xf32> to vector<1x1024xf32>
    %293 = arith.mulf %291, %292 : vector<1x1024xf32>
    %294 = vector.broadcast %288 : vector<8x1xf32> to vector<8x1024xf32>
    %295 = vector.broadcast %293 : vector<1x1024xf32> to vector<8x1024xf32>
    %296 = arith.mulf %294, %295 : vector<8x1024xf32>
    %297 = arith.addf %287, %296 : vector<8x1024xf32>
    %c0_45 = arith.constant 0 : index
    %c0_46 = arith.constant 0 : index
    %298 = vector.load %arg7[%c0_45, %c0_46] : memref<8x1xf32, #tpu.memory_space<vmem>>, vector<8x1xf32>
    %299 = vector.broadcast %298 : vector<8x1xf32> to vector<8x1024xf32>
    %300 = arith.addf %297, %299 : vector<8x1024xf32>
    %cst_47 = arith.constant 0.000000e+00 : f32
    %301 = vector.broadcast %cst_47 : f32 to vector<8x1024xf32>
    %302 = arith.cmpf oge, %300, %301 : vector<8x1024xf32>
    %cst_48 = arith.constant 0.00999999977 : f32
    %303 = vector.broadcast %cst_48 : f32 to vector<8x1024xf32>
    %304 = arith.mulf %303, %300 : vector<8x1024xf32>
    %305 = arith.select %302, %300, %304 : vector<8x1024xi1>, vector<8x1024xf32>
    %cst_49 = arith.constant 0.000000e+00 : f32
    %306 = vector.broadcast %cst_49 : f32 to vector<8x273xf32>
    %307 = vector.extract_strided_slice %305 {offsets = [0, 0], sizes = [8, 751], strides = [1, 1]} : vector<8x1024xf32> to vector<8x751xf32>
    %308 = tpu.concatenate %306, %307 in 1 : vector<8x273xf32>, vector<8x751xf32> -> vector<8x1024xf32>
    %309 = vector.extract_strided_slice %28 {offsets = [0, 0], sizes = [1, 1024], strides = [1, 1]} : vector<27x1024xf32> to vector<1x1024xf32>
    %310 = vector.broadcast %309 : vector<1x1024xf32> to vector<8x1024xf32>
    %311 = arith.mulf %308, %310 : vector<8x1024xf32>
    %cst_50 = arith.constant 0.000000e+00 : f32
    %312 = vector.broadcast %cst_50 : f32 to vector<8x272xf32>
    %313 = vector.extract_strided_slice %305 {offsets = [0, 0], sizes = [8, 752], strides = [1, 1]} : vector<8x1024xf32> to vector<8x752xf32>
    %314 = tpu.concatenate %312, %313 in 1 : vector<8x272xf32>, vector<8x752xf32> -> vector<8x1024xf32>
    %315 = vector.extract_strided_slice %28 {offsets = [1, 0], sizes = [1, 1024], strides = [1, 1]} : vector<27x1024xf32> to vector<1x1024xf32>
    %316 = vector.broadcast %315 : vector<1x1024xf32> to vector<8x1024xf32>
    %317 = arith.mulf %314, %316 : vector<8x1024xf32>
    %cst_51 = arith.constant 0.000000e+00 : f32
    %318 = vector.broadcast %cst_51 : f32 to vector<8x271xf32>
    %319 = vector.extract_strided_slice %305 {offsets = [0, 0], sizes = [8, 753], strides = [1, 1]} : vector<8x1024xf32> to vector<8x753xf32>
    %320 = tpu.concatenate %318, %319 in 1 : vector<8x271xf32>, vector<8x753xf32> -> vector<8x1024xf32>
    %321 = vector.extract_strided_slice %28 {offsets = [2, 0], sizes = [1, 1024], strides = [1, 1]} : vector<27x1024xf32> to vector<1x1024xf32>
    %322 = vector.broadcast %321 : vector<1x1024xf32> to vector<8x1024xf32>
    %323 = arith.mulf %320, %322 : vector<8x1024xf32>
    %cst_52 = arith.constant 0.000000e+00 : f32
    %324 = vector.broadcast %cst_52 : f32 to vector<8x257xf32>
    %325 = vector.extract_strided_slice %305 {offsets = [0, 0], sizes = [8, 767], strides = [1, 1]} : vector<8x1024xf32> to vector<8x767xf32>
    %326 = tpu.concatenate %324, %325 in 1 : vector<8x257xf32>, vector<8x767xf32> -> vector<8x1024xf32>
    %327 = vector.extract_strided_slice %28 {offsets = [3, 0], sizes = [1, 1024], strides = [1, 1]} : vector<27x1024xf32> to vector<1x1024xf32>
    %328 = vector.broadcast %327 : vector<1x1024xf32> to vector<8x1024xf32>
    %329 = arith.mulf %326, %328 : vector<8x1024xf32>
    %cst_53 = arith.constant 0.000000e+00 : f32
    %330 = vector.broadcast %cst_53 : f32 to vector<8x256xf32>
    %331 = vector.extract_strided_slice %305 {offsets = [0, 0], sizes = [8, 768], strides = [1, 1]} : vector<8x1024xf32> to vector<8x768xf32>
    %332 = tpu.concatenate %330, %331 in 1 : vector<8x256xf32>, vector<8x768xf32> -> vector<8x1024xf32>
    %333 = vector.extract_strided_slice %28 {offsets = [4, 0], sizes = [1, 1024], strides = [1, 1]} : vector<27x1024xf32> to vector<1x1024xf32>
    %334 = vector.broadcast %333 : vector<1x1024xf32> to vector<8x1024xf32>
    %335 = arith.mulf %332, %334 : vector<8x1024xf32>
    %cst_54 = arith.constant 0.000000e+00 : f32
    %336 = vector.broadcast %cst_54 : f32 to vector<8x255xf32>
    %337 = vector.extract_strided_slice %305 {offsets = [0, 0], sizes = [8, 769], strides = [1, 1]} : vector<8x1024xf32> to vector<8x769xf32>
    %338 = tpu.concatenate %336, %337 in 1 : vector<8x255xf32>, vector<8x769xf32> -> vector<8x1024xf32>
    %339 = vector.extract_strided_slice %28 {offsets = [5, 0], sizes = [1, 1024], strides = [1, 1]} : vector<27x1024xf32> to vector<1x1024xf32>
    %340 = vector.broadcast %339 : vector<1x1024xf32> to vector<8x1024xf32>
    %341 = arith.mulf %338, %340 : vector<8x1024xf32>
    %cst_55 = arith.constant 0.000000e+00 : f32
    %342 = vector.broadcast %cst_55 : f32 to vector<8x241xf32>
    %343 = vector.extract_strided_slice %305 {offsets = [0, 0], sizes = [8, 783], strides = [1, 1]} : vector<8x1024xf32> to vector<8x783xf32>
    %344 = tpu.concatenate %342, %343 in 1 : vector<8x241xf32>, vector<8x783xf32> -> vector<8x1024xf32>
    %345 = vector.extract_strided_slice %28 {offsets = [6, 0], sizes = [1, 1024], strides = [1, 1]} : vector<27x1024xf32> to vector<1x1024xf32>
    %346 = vector.broadcast %345 : vector<1x1024xf32> to vector<8x1024xf32>
    %347 = arith.mulf %344, %346 : vector<8x1024xf32>
    %cst_56 = arith.constant 0.000000e+00 : f32
    %348 = vector.broadcast %cst_56 : f32 to vector<8x240xf32>
    %349 = vector.extract_strided_slice %305 {offsets = [0, 0], sizes = [8, 784], strides = [1, 1]} : vector<8x1024xf32> to vector<8x784xf32>
    %350 = tpu.concatenate %348, %349 in 1 : vector<8x240xf32>, vector<8x784xf32> -> vector<8x1024xf32>
    %351 = vector.extract_strided_slice %28 {offsets = [7, 0], sizes = [1, 1024], strides = [1, 1]} : vector<27x1024xf32> to vector<1x1024xf32>
    %352 = vector.broadcast %351 : vector<1x1024xf32> to vector<8x1024xf32>
    %353 = arith.mulf %350, %352 : vector<8x1024xf32>
    %cst_57 = arith.constant 0.000000e+00 : f32
    %354 = vector.broadcast %cst_57 : f32 to vector<8x239xf32>
    %355 = vector.extract_strided_slice %305 {offsets = [0, 0], sizes = [8, 785], strides = [1, 1]} : vector<8x1024xf32> to vector<8x785xf32>
    %356 = tpu.concatenate %354, %355 in 1 : vector<8x239xf32>, vector<8x785xf32> -> vector<8x1024xf32>
    %357 = vector.extract_strided_slice %28 {offsets = [8, 0], sizes = [1, 1024], strides = [1, 1]} : vector<27x1024xf32> to vector<1x1024xf32>
    %358 = vector.broadcast %357 : vector<1x1024xf32> to vector<8x1024xf32>
    %359 = arith.mulf %356, %358 : vector<8x1024xf32>
    %cst_58 = arith.constant 0.000000e+00 : f32
    %360 = vector.broadcast %cst_58 : f32 to vector<8x17xf32>
    %361 = vector.extract_strided_slice %305 {offsets = [0, 0], sizes = [8, 1007], strides = [1, 1]} : vector<8x1024xf32> to vector<8x1007xf32>
    %362 = tpu.concatenate %360, %361 in 1 : vector<8x17xf32>, vector<8x1007xf32> -> vector<8x1024xf32>
    %363 = vector.extract_strided_slice %28 {offsets = [9, 0], sizes = [1, 1024], strides = [1, 1]} : vector<27x1024xf32> to vector<1x1024xf32>
    %364 = vector.broadcast %363 : vector<1x1024xf32> to vector<8x1024xf32>
    %365 = arith.mulf %362, %364 : vector<8x1024xf32>
    %cst_59 = arith.constant 0.000000e+00 : f32
    %366 = vector.broadcast %cst_59 : f32 to vector<8x16xf32>
    %367 = vector.extract_strided_slice %305 {offsets = [0, 0], sizes = [8, 1008], strides = [1, 1]} : vector<8x1024xf32> to vector<8x1008xf32>
    %368 = tpu.concatenate %366, %367 in 1 : vector<8x16xf32>, vector<8x1008xf32> -> vector<8x1024xf32>
    %369 = vector.extract_strided_slice %28 {offsets = [10, 0], sizes = [1, 1024], strides = [1, 1]} : vector<27x1024xf32> to vector<1x1024xf32>
    %370 = vector.broadcast %369 : vector<1x1024xf32> to vector<8x1024xf32>
    %371 = arith.mulf %368, %370 : vector<8x1024xf32>
    %cst_60 = arith.constant 0.000000e+00 : f32
    %372 = vector.broadcast %cst_60 : f32 to vector<8x15xf32>
    %373 = vector.extract_strided_slice %305 {offsets = [0, 0], sizes = [8, 1009], strides = [1, 1]} : vector<8x1024xf32> to vector<8x1009xf32>
    %374 = tpu.concatenate %372, %373 in 1 : vector<8x15xf32>, vector<8x1009xf32> -> vector<8x1024xf32>
    %375 = vector.extract_strided_slice %28 {offsets = [11, 0], sizes = [1, 1024], strides = [1, 1]} : vector<27x1024xf32> to vector<1x1024xf32>
    %376 = vector.broadcast %375 : vector<1x1024xf32> to vector<8x1024xf32>
    %377 = arith.mulf %374, %376 : vector<8x1024xf32>
    %cst_61 = arith.constant 0.000000e+00 : f32
    %378 = vector.broadcast %cst_61 : f32 to vector<8x1xf32>
    %379 = vector.extract_strided_slice %305 {offsets = [0, 0], sizes = [8, 1023], strides = [1, 1]} : vector<8x1024xf32> to vector<8x1023xf32>
    %380 = tpu.concatenate %378, %379 in 1 : vector<8x1xf32>, vector<8x1023xf32> -> vector<8x1024xf32>
    %381 = vector.extract_strided_slice %28 {offsets = [12, 0], sizes = [1, 1024], strides = [1, 1]} : vector<27x1024xf32> to vector<1x1024xf32>
    %382 = vector.broadcast %381 : vector<1x1024xf32> to vector<8x1024xf32>
    %383 = arith.mulf %380, %382 : vector<8x1024xf32>
    %384 = vector.extract_strided_slice %28 {offsets = [13, 0], sizes = [1, 1024], strides = [1, 1]} : vector<27x1024xf32> to vector<1x1024xf32>
    %385 = vector.broadcast %384 : vector<1x1024xf32> to vector<8x1024xf32>
    %386 = arith.mulf %305, %385 : vector<8x1024xf32>
    %387 = vector.extract_strided_slice %305 {offsets = [0, 1], sizes = [8, 1023], strides = [1, 1]} : vector<8x1024xf32> to vector<8x1023xf32>
    %cst_62 = arith.constant 0.000000e+00 : f32
    %388 = vector.broadcast %cst_62 : f32 to vector<8x1xf32>
    %389 = tpu.concatenate %387, %388 in 1 : vector<8x1023xf32>, vector<8x1xf32> -> vector<8x1024xf32>
    %390 = vector.extract_strided_slice %28 {offsets = [14, 0], sizes = [1, 1024], strides = [1, 1]} : vector<27x1024xf32> to vector<1x1024xf32>
    %391 = vector.broadcast %390 : vector<1x1024xf32> to vector<8x1024xf32>
    %392 = arith.mulf %389, %391 : vector<8x1024xf32>
    %393 = vector.extract_strided_slice %305 {offsets = [0, 15], sizes = [8, 1009], strides = [1, 1]} : vector<8x1024xf32> to vector<8x1009xf32>
    %cst_63 = arith.constant 0.000000e+00 : f32
    %394 = vector.broadcast %cst_63 : f32 to vector<8x15xf32>
    %395 = tpu.concatenate %393, %394 in 1 : vector<8x1009xf32>, vector<8x15xf32> -> vector<8x1024xf32>
    %396 = vector.extract_strided_slice %28 {offsets = [15, 0], sizes = [1, 1024], strides = [1, 1]} : vector<27x1024xf32> to vector<1x1024xf32>
    %397 = vector.broadcast %396 : vector<1x1024xf32> to vector<8x1024xf32>
    %398 = arith.mulf %395, %397 : vector<8x1024xf32>
    %399 = vector.extract_strided_slice %305 {offsets = [0, 16], sizes = [8, 1008], strides = [1, 1]} : vector<8x1024xf32> to vector<8x1008xf32>
    %cst_64 = arith.constant 0.000000e+00 : f32
    %400 = vector.broadcast %cst_64 : f32 to vector<8x16xf32>
    %401 = tpu.concatenate %399, %400 in 1 : vector<8x1008xf32>, vector<8x16xf32> -> vector<8x1024xf32>
    %402 = vector.extract_strided_slice %28 {offsets = [16, 0], sizes = [1, 1024], strides = [1, 1]} : vector<27x1024xf32> to vector<1x1024xf32>
    %403 = vector.broadcast %402 : vector<1x1024xf32> to vector<8x1024xf32>
    %404 = arith.mulf %401, %403 : vector<8x1024xf32>
    %405 = vector.extract_strided_slice %305 {offsets = [0, 17], sizes = [8, 1007], strides = [1, 1]} : vector<8x1024xf32> to vector<8x1007xf32>
    %cst_65 = arith.constant 0.000000e+00 : f32
    %406 = vector.broadcast %cst_65 : f32 to vector<8x17xf32>
    %407 = tpu.concatenate %405, %406 in 1 : vector<8x1007xf32>, vector<8x17xf32> -> vector<8x1024xf32>
    %408 = vector.extract_strided_slice %28 {offsets = [17, 0], sizes = [1, 1024], strides = [1, 1]} : vector<27x1024xf32> to vector<1x1024xf32>
    %409 = vector.broadcast %408 : vector<1x1024xf32> to vector<8x1024xf32>
    %410 = arith.mulf %407, %409 : vector<8x1024xf32>
    %411 = vector.extract_strided_slice %305 {offsets = [0, 239], sizes = [8, 785], strides = [1, 1]} : vector<8x1024xf32> to vector<8x785xf32>
    %cst_66 = arith.constant 0.000000e+00 : f32
    %412 = vector.broadcast %cst_66 : f32 to vector<8x239xf32>
    %413 = tpu.concatenate %411, %412 in 1 : vector<8x785xf32>, vector<8x239xf32> -> vector<8x1024xf32>
    %414 = vector.extract_strided_slice %28 {offsets = [18, 0], sizes = [1, 1024], strides = [1, 1]} : vector<27x1024xf32> to vector<1x1024xf32>
    %415 = vector.broadcast %414 : vector<1x1024xf32> to vector<8x1024xf32>
    %416 = arith.mulf %413, %415 : vector<8x1024xf32>
    %417 = vector.extract_strided_slice %305 {offsets = [0, 240], sizes = [8, 784], strides = [1, 1]} : vector<8x1024xf32> to vector<8x784xf32>
    %cst_67 = arith.constant 0.000000e+00 : f32
    %418 = vector.broadcast %cst_67 : f32 to vector<8x240xf32>
    %419 = tpu.concatenate %417, %418 in 1 : vector<8x784xf32>, vector<8x240xf32> -> vector<8x1024xf32>
    %420 = vector.extract_strided_slice %28 {offsets = [19, 0], sizes = [1, 1024], strides = [1, 1]} : vector<27x1024xf32> to vector<1x1024xf32>
    %421 = vector.broadcast %420 : vector<1x1024xf32> to vector<8x1024xf32>
    %422 = arith.mulf %419, %421 : vector<8x1024xf32>
    %423 = vector.extract_strided_slice %305 {offsets = [0, 241], sizes = [8, 783], strides = [1, 1]} : vector<8x1024xf32> to vector<8x783xf32>
    %cst_68 = arith.constant 0.000000e+00 : f32
    %424 = vector.broadcast %cst_68 : f32 to vector<8x241xf32>
    %425 = tpu.concatenate %423, %424 in 1 : vector<8x783xf32>, vector<8x241xf32> -> vector<8x1024xf32>
    %426 = vector.extract_strided_slice %28 {offsets = [20, 0], sizes = [1, 1024], strides = [1, 1]} : vector<27x1024xf32> to vector<1x1024xf32>
    %427 = vector.broadcast %426 : vector<1x1024xf32> to vector<8x1024xf32>
    %428 = arith.mulf %425, %427 : vector<8x1024xf32>
    %429 = vector.extract_strided_slice %305 {offsets = [0, 255], sizes = [8, 769], strides = [1, 1]} : vector<8x1024xf32> to vector<8x769xf32>
    %cst_69 = arith.constant 0.000000e+00 : f32
    %430 = vector.broadcast %cst_69 : f32 to vector<8x255xf32>
    %431 = tpu.concatenate %429, %430 in 1 : vector<8x769xf32>, vector<8x255xf32> -> vector<8x1024xf32>
    %432 = vector.extract_strided_slice %28 {offsets = [21, 0], sizes = [1, 1024], strides = [1, 1]} : vector<27x1024xf32> to vector<1x1024xf32>
    %433 = vector.broadcast %432 : vector<1x1024xf32> to vector<8x1024xf32>
    %434 = arith.mulf %431, %433 : vector<8x1024xf32>
    %435 = vector.extract_strided_slice %305 {offsets = [0, 256], sizes = [8, 768], strides = [1, 1]} : vector<8x1024xf32> to vector<8x768xf32>
    %cst_70 = arith.constant 0.000000e+00 : f32
    %436 = vector.broadcast %cst_70 : f32 to vector<8x256xf32>
    %437 = tpu.concatenate %435, %436 in 1 : vector<8x768xf32>, vector<8x256xf32> -> vector<8x1024xf32>
    %438 = vector.extract_strided_slice %28 {offsets = [22, 0], sizes = [1, 1024], strides = [1, 1]} : vector<27x1024xf32> to vector<1x1024xf32>
    %439 = vector.broadcast %438 : vector<1x1024xf32> to vector<8x1024xf32>
    %440 = arith.mulf %437, %439 : vector<8x1024xf32>
    %441 = vector.extract_strided_slice %305 {offsets = [0, 257], sizes = [8, 767], strides = [1, 1]} : vector<8x1024xf32> to vector<8x767xf32>
    %cst_71 = arith.constant 0.000000e+00 : f32
    %442 = vector.broadcast %cst_71 : f32 to vector<8x257xf32>
    %443 = tpu.concatenate %441, %442 in 1 : vector<8x767xf32>, vector<8x257xf32> -> vector<8x1024xf32>
    %444 = vector.extract_strided_slice %28 {offsets = [23, 0], sizes = [1, 1024], strides = [1, 1]} : vector<27x1024xf32> to vector<1x1024xf32>
    %445 = vector.broadcast %444 : vector<1x1024xf32> to vector<8x1024xf32>
    %446 = arith.mulf %443, %445 : vector<8x1024xf32>
    %447 = vector.extract_strided_slice %305 {offsets = [0, 271], sizes = [8, 753], strides = [1, 1]} : vector<8x1024xf32> to vector<8x753xf32>
    %cst_72 = arith.constant 0.000000e+00 : f32
    %448 = vector.broadcast %cst_72 : f32 to vector<8x271xf32>
    %449 = tpu.concatenate %447, %448 in 1 : vector<8x753xf32>, vector<8x271xf32> -> vector<8x1024xf32>
    %450 = vector.extract_strided_slice %28 {offsets = [24, 0], sizes = [1, 1024], strides = [1, 1]} : vector<27x1024xf32> to vector<1x1024xf32>
    %451 = vector.broadcast %450 : vector<1x1024xf32> to vector<8x1024xf32>
    %452 = arith.mulf %449, %451 : vector<8x1024xf32>
    %453 = vector.extract_strided_slice %305 {offsets = [0, 272], sizes = [8, 752], strides = [1, 1]} : vector<8x1024xf32> to vector<8x752xf32>
    %cst_73 = arith.constant 0.000000e+00 : f32
    %454 = vector.broadcast %cst_73 : f32 to vector<8x272xf32>
    %455 = tpu.concatenate %453, %454 in 1 : vector<8x752xf32>, vector<8x272xf32> -> vector<8x1024xf32>
    %456 = vector.extract_strided_slice %28 {offsets = [25, 0], sizes = [1, 1024], strides = [1, 1]} : vector<27x1024xf32> to vector<1x1024xf32>
    %457 = vector.broadcast %456 : vector<1x1024xf32> to vector<8x1024xf32>
    %458 = arith.mulf %455, %457 : vector<8x1024xf32>
    %459 = vector.extract_strided_slice %305 {offsets = [0, 273], sizes = [8, 751], strides = [1, 1]} : vector<8x1024xf32> to vector<8x751xf32>
    %cst_74 = arith.constant 0.000000e+00 : f32
    %460 = vector.broadcast %cst_74 : f32 to vector<8x273xf32>
    %461 = tpu.concatenate %459, %460 in 1 : vector<8x751xf32>, vector<8x273xf32> -> vector<8x1024xf32>
    %462 = vector.extract_strided_slice %28 {offsets = [26, 0], sizes = [1, 1024], strides = [1, 1]} : vector<27x1024xf32> to vector<1x1024xf32>
    %463 = vector.broadcast %462 : vector<1x1024xf32> to vector<8x1024xf32>
    %464 = arith.mulf %461, %463 : vector<8x1024xf32>
    %465 = tpu.concatenate %311, %317, %323, %329, %335, %341, %347, %353, %359, %365, %371, %377, %383, %386, %392, %398 in 0 : vector<8x1024xf32>, vector<8x1024xf32>, vector<8x1024xf32>, vector<8x1024xf32>, vector<8x1024xf32>, vector<8x1024xf32>, vector<8x1024xf32>, vector<8x1024xf32>, vector<8x1024xf32>, vector<8x1024xf32>, vector<8x1024xf32>, vector<8x1024xf32>, vector<8x1024xf32>, vector<8x1024xf32>, vector<8x1024xf32>, vector<8x1024xf32> -> vector<128x1024xf32>
    %466 = tpu.concatenate %404, %410, %416, %422, %428, %434, %440, %446, %452, %458, %464 in 0 : vector<8x1024xf32>, vector<8x1024xf32>, vector<8x1024xf32>, vector<8x1024xf32>, vector<8x1024xf32>, vector<8x1024xf32>, vector<8x1024xf32>, vector<8x1024xf32>, vector<8x1024xf32>, vector<8x1024xf32>, vector<8x1024xf32> -> vector<88x1024xf32>
    %467 = tpu.concatenate %465, %466 in 0 : vector<128x1024xf32>, vector<88x1024xf32> -> vector<216x1024xf32>
    %c0_75 = arith.constant 0 : index
    %c0_76 = arith.constant 0 : index
    %468 = vector.load %arg8[%c0_75, %c0_76] : memref<16x216xf32, #tpu.memory_space<vmem>>, vector<16x216xf32>
    %cst_77 = arith.constant dense<0.000000e+00> : vector<16x1024xf32>
    %469 = tpu.matmul %468, %467, %cst_77 {dimension_numbers = #tpu.dot_dimension_numbers<[1], [0], [0], [1], [0, 0, 1, 1], [], []>} : vector<16x216xf32>, vector<216x1024xf32>, vector<16x1024xf32> -> vector<16x1024xf32>
    %c0_78 = arith.constant 0 : index
    %c0_79 = arith.constant 0 : index
    %470 = vector.load %arg9[%c0_78, %c0_79] : memref<16x1xf32, #tpu.memory_space<vmem>>, vector<16x1xf32>
    %471 = vector.broadcast %470 : vector<16x1xf32> to vector<16x1024xf32>
    %472 = arith.addf %469, %471 : vector<16x1024xf32>
    %cst_80 = arith.constant 0.000000e+00 : f32
    %473 = vector.broadcast %cst_80 : f32 to vector<16x1024xf32>
    %474 = arith.cmpf oge, %472, %473 : vector<16x1024xf32>
    %cst_81 = arith.constant 0.00999999977 : f32
    %475 = vector.broadcast %cst_81 : f32 to vector<16x1024xf32>
    %476 = arith.mulf %475, %472 : vector<16x1024xf32>
    %477 = arith.select %474, %472, %476 : vector<16x1024xi1>, vector<16x1024xf32>
    %cst_82 = arith.constant 0.000000e+00 : f32
    %478 = vector.broadcast %cst_82 : f32 to vector<16x273xf32>
    %479 = vector.extract_strided_slice %477 {offsets = [0, 0], sizes = [16, 751], strides = [1, 1]} : vector<16x1024xf32> to vector<16x751xf32>
    %480 = tpu.concatenate %478, %479 in 1 : vector<16x273xf32>, vector<16x751xf32> -> vector<16x1024xf32>
    %481 = vector.extract_strided_slice %28 {offsets = [0, 0], sizes = [1, 1024], strides = [1, 1]} : vector<27x1024xf32> to vector<1x1024xf32>
    %482 = vector.broadcast %481 : vector<1x1024xf32> to vector<16x1024xf32>
    %483 = arith.mulf %480, %482 : vector<16x1024xf32>
    %cst_83 = arith.constant 0.000000e+00 : f32
    %484 = vector.broadcast %cst_83 : f32 to vector<16x272xf32>
    %485 = vector.extract_strided_slice %477 {offsets = [0, 0], sizes = [16, 752], strides = [1, 1]} : vector<16x1024xf32> to vector<16x752xf32>
    %486 = tpu.concatenate %484, %485 in 1 : vector<16x272xf32>, vector<16x752xf32> -> vector<16x1024xf32>
    %487 = vector.extract_strided_slice %28 {offsets = [1, 0], sizes = [1, 1024], strides = [1, 1]} : vector<27x1024xf32> to vector<1x1024xf32>
    %488 = vector.broadcast %487 : vector<1x1024xf32> to vector<16x1024xf32>
    %489 = arith.mulf %486, %488 : vector<16x1024xf32>
    %cst_84 = arith.constant 0.000000e+00 : f32
    %490 = vector.broadcast %cst_84 : f32 to vector<16x271xf32>
    %491 = vector.extract_strided_slice %477 {offsets = [0, 0], sizes = [16, 753], strides = [1, 1]} : vector<16x1024xf32> to vector<16x753xf32>
    %492 = tpu.concatenate %490, %491 in 1 : vector<16x271xf32>, vector<16x753xf32> -> vector<16x1024xf32>
    %493 = vector.extract_strided_slice %28 {offsets = [2, 0], sizes = [1, 1024], strides = [1, 1]} : vector<27x1024xf32> to vector<1x1024xf32>
    %494 = vector.broadcast %493 : vector<1x1024xf32> to vector<16x1024xf32>
    %495 = arith.mulf %492, %494 : vector<16x1024xf32>
    %cst_85 = arith.constant 0.000000e+00 : f32
    %496 = vector.broadcast %cst_85 : f32 to vector<16x257xf32>
    %497 = vector.extract_strided_slice %477 {offsets = [0, 0], sizes = [16, 767], strides = [1, 1]} : vector<16x1024xf32> to vector<16x767xf32>
    %498 = tpu.concatenate %496, %497 in 1 : vector<16x257xf32>, vector<16x767xf32> -> vector<16x1024xf32>
    %499 = vector.extract_strided_slice %28 {offsets = [3, 0], sizes = [1, 1024], strides = [1, 1]} : vector<27x1024xf32> to vector<1x1024xf32>
    %500 = vector.broadcast %499 : vector<1x1024xf32> to vector<16x1024xf32>
    %501 = arith.mulf %498, %500 : vector<16x1024xf32>
    %cst_86 = arith.constant 0.000000e+00 : f32
    %502 = vector.broadcast %cst_86 : f32 to vector<16x256xf32>
    %503 = vector.extract_strided_slice %477 {offsets = [0, 0], sizes = [16, 768], strides = [1, 1]} : vector<16x1024xf32> to vector<16x768xf32>
    %504 = tpu.concatenate %502, %503 in 1 : vector<16x256xf32>, vector<16x768xf32> -> vector<16x1024xf32>
    %505 = vector.extract_strided_slice %28 {offsets = [4, 0], sizes = [1, 1024], strides = [1, 1]} : vector<27x1024xf32> to vector<1x1024xf32>
    %506 = vector.broadcast %505 : vector<1x1024xf32> to vector<16x1024xf32>
    %507 = arith.mulf %504, %506 : vector<16x1024xf32>
    %cst_87 = arith.constant 0.000000e+00 : f32
    %508 = vector.broadcast %cst_87 : f32 to vector<16x255xf32>
    %509 = vector.extract_strided_slice %477 {offsets = [0, 0], sizes = [16, 769], strides = [1, 1]} : vector<16x1024xf32> to vector<16x769xf32>
    %510 = tpu.concatenate %508, %509 in 1 : vector<16x255xf32>, vector<16x769xf32> -> vector<16x1024xf32>
    %511 = vector.extract_strided_slice %28 {offsets = [5, 0], sizes = [1, 1024], strides = [1, 1]} : vector<27x1024xf32> to vector<1x1024xf32>
    %512 = vector.broadcast %511 : vector<1x1024xf32> to vector<16x1024xf32>
    %513 = arith.mulf %510, %512 : vector<16x1024xf32>
    %cst_88 = arith.constant 0.000000e+00 : f32
    %514 = vector.broadcast %cst_88 : f32 to vector<16x241xf32>
    %515 = vector.extract_strided_slice %477 {offsets = [0, 0], sizes = [16, 783], strides = [1, 1]} : vector<16x1024xf32> to vector<16x783xf32>
    %516 = tpu.concatenate %514, %515 in 1 : vector<16x241xf32>, vector<16x783xf32> -> vector<16x1024xf32>
    %517 = vector.extract_strided_slice %28 {offsets = [6, 0], sizes = [1, 1024], strides = [1, 1]} : vector<27x1024xf32> to vector<1x1024xf32>
    %518 = vector.broadcast %517 : vector<1x1024xf32> to vector<16x1024xf32>
    %519 = arith.mulf %516, %518 : vector<16x1024xf32>
    %cst_89 = arith.constant 0.000000e+00 : f32
    %520 = vector.broadcast %cst_89 : f32 to vector<16x240xf32>
    %521 = vector.extract_strided_slice %477 {offsets = [0, 0], sizes = [16, 784], strides = [1, 1]} : vector<16x1024xf32> to vector<16x784xf32>
    %522 = tpu.concatenate %520, %521 in 1 : vector<16x240xf32>, vector<16x784xf32> -> vector<16x1024xf32>
    %523 = vector.extract_strided_slice %28 {offsets = [7, 0], sizes = [1, 1024], strides = [1, 1]} : vector<27x1024xf32> to vector<1x1024xf32>
    %524 = vector.broadcast %523 : vector<1x1024xf32> to vector<16x1024xf32>
    %525 = arith.mulf %522, %524 : vector<16x1024xf32>
    %cst_90 = arith.constant 0.000000e+00 : f32
    %526 = vector.broadcast %cst_90 : f32 to vector<16x239xf32>
    %527 = vector.extract_strided_slice %477 {offsets = [0, 0], sizes = [16, 785], strides = [1, 1]} : vector<16x1024xf32> to vector<16x785xf32>
    %528 = tpu.concatenate %526, %527 in 1 : vector<16x239xf32>, vector<16x785xf32> -> vector<16x1024xf32>
    %529 = vector.extract_strided_slice %28 {offsets = [8, 0], sizes = [1, 1024], strides = [1, 1]} : vector<27x1024xf32> to vector<1x1024xf32>
    %530 = vector.broadcast %529 : vector<1x1024xf32> to vector<16x1024xf32>
    %531 = arith.mulf %528, %530 : vector<16x1024xf32>
    %cst_91 = arith.constant 0.000000e+00 : f32
    %532 = vector.broadcast %cst_91 : f32 to vector<16x17xf32>
    %533 = vector.extract_strided_slice %477 {offsets = [0, 0], sizes = [16, 1007], strides = [1, 1]} : vector<16x1024xf32> to vector<16x1007xf32>
    %534 = tpu.concatenate %532, %533 in 1 : vector<16x17xf32>, vector<16x1007xf32> -> vector<16x1024xf32>
    %535 = vector.extract_strided_slice %28 {offsets = [9, 0], sizes = [1, 1024], strides = [1, 1]} : vector<27x1024xf32> to vector<1x1024xf32>
    %536 = vector.broadcast %535 : vector<1x1024xf32> to vector<16x1024xf32>
    %537 = arith.mulf %534, %536 : vector<16x1024xf32>
    %cst_92 = arith.constant 0.000000e+00 : f32
    %538 = vector.broadcast %cst_92 : f32 to vector<16x16xf32>
    %539 = vector.extract_strided_slice %477 {offsets = [0, 0], sizes = [16, 1008], strides = [1, 1]} : vector<16x1024xf32> to vector<16x1008xf32>
    %540 = tpu.concatenate %538, %539 in 1 : vector<16x16xf32>, vector<16x1008xf32> -> vector<16x1024xf32>
    %541 = vector.extract_strided_slice %28 {offsets = [10, 0], sizes = [1, 1024], strides = [1, 1]} : vector<27x1024xf32> to vector<1x1024xf32>
    %542 = vector.broadcast %541 : vector<1x1024xf32> to vector<16x1024xf32>
    %543 = arith.mulf %540, %542 : vector<16x1024xf32>
    %cst_93 = arith.constant 0.000000e+00 : f32
    %544 = vector.broadcast %cst_93 : f32 to vector<16x15xf32>
    %545 = vector.extract_strided_slice %477 {offsets = [0, 0], sizes = [16, 1009], strides = [1, 1]} : vector<16x1024xf32> to vector<16x1009xf32>
    %546 = tpu.concatenate %544, %545 in 1 : vector<16x15xf32>, vector<16x1009xf32> -> vector<16x1024xf32>
    %547 = vector.extract_strided_slice %28 {offsets = [11, 0], sizes = [1, 1024], strides = [1, 1]} : vector<27x1024xf32> to vector<1x1024xf32>
    %548 = vector.broadcast %547 : vector<1x1024xf32> to vector<16x1024xf32>
    %549 = arith.mulf %546, %548 : vector<16x1024xf32>
    %cst_94 = arith.constant 0.000000e+00 : f32
    %550 = vector.broadcast %cst_94 : f32 to vector<16x1xf32>
    %551 = vector.extract_strided_slice %477 {offsets = [0, 0], sizes = [16, 1023], strides = [1, 1]} : vector<16x1024xf32> to vector<16x1023xf32>
    %552 = tpu.concatenate %550, %551 in 1 : vector<16x1xf32>, vector<16x1023xf32> -> vector<16x1024xf32>
    %553 = vector.extract_strided_slice %28 {offsets = [12, 0], sizes = [1, 1024], strides = [1, 1]} : vector<27x1024xf32> to vector<1x1024xf32>
    %554 = vector.broadcast %553 : vector<1x1024xf32> to vector<16x1024xf32>
    %555 = arith.mulf %552, %554 : vector<16x1024xf32>
    %556 = vector.extract_strided_slice %28 {offsets = [13, 0], sizes = [1, 1024], strides = [1, 1]} : vector<27x1024xf32> to vector<1x1024xf32>
    %557 = vector.broadcast %556 : vector<1x1024xf32> to vector<16x1024xf32>
    %558 = arith.mulf %477, %557 : vector<16x1024xf32>
    %559 = vector.extract_strided_slice %477 {offsets = [0, 1], sizes = [16, 1023], strides = [1, 1]} : vector<16x1024xf32> to vector<16x1023xf32>
    %cst_95 = arith.constant 0.000000e+00 : f32
    %560 = vector.broadcast %cst_95 : f32 to vector<16x1xf32>
    %561 = tpu.concatenate %559, %560 in 1 : vector<16x1023xf32>, vector<16x1xf32> -> vector<16x1024xf32>
    %562 = vector.extract_strided_slice %28 {offsets = [14, 0], sizes = [1, 1024], strides = [1, 1]} : vector<27x1024xf32> to vector<1x1024xf32>
    %563 = vector.broadcast %562 : vector<1x1024xf32> to vector<16x1024xf32>
    %564 = arith.mulf %561, %563 : vector<16x1024xf32>
    %565 = vector.extract_strided_slice %477 {offsets = [0, 15], sizes = [16, 1009], strides = [1, 1]} : vector<16x1024xf32> to vector<16x1009xf32>
    %cst_96 = arith.constant 0.000000e+00 : f32
    %566 = vector.broadcast %cst_96 : f32 to vector<16x15xf32>
    %567 = tpu.concatenate %565, %566 in 1 : vector<16x1009xf32>, vector<16x15xf32> -> vector<16x1024xf32>
    %568 = vector.extract_strided_slice %28 {offsets = [15, 0], sizes = [1, 1024], strides = [1, 1]} : vector<27x1024xf32> to vector<1x1024xf32>
    %569 = vector.broadcast %568 : vector<1x1024xf32> to vector<16x1024xf32>
    %570 = arith.mulf %567, %569 : vector<16x1024xf32>
    %571 = vector.extract_strided_slice %477 {offsets = [0, 16], sizes = [16, 1008], strides = [1, 1]} : vector<16x1024xf32> to vector<16x1008xf32>
    %cst_97 = arith.constant 0.000000e+00 : f32
    %572 = vector.broadcast %cst_97 : f32 to vector<16x16xf32>
    %573 = tpu.concatenate %571, %572 in 1 : vector<16x1008xf32>, vector<16x16xf32> -> vector<16x1024xf32>
    %574 = vector.extract_strided_slice %28 {offsets = [16, 0], sizes = [1, 1024], strides = [1, 1]} : vector<27x1024xf32> to vector<1x1024xf32>
    %575 = vector.broadcast %574 : vector<1x1024xf32> to vector<16x1024xf32>
    %576 = arith.mulf %573, %575 : vector<16x1024xf32>
    %577 = vector.extract_strided_slice %477 {offsets = [0, 17], sizes = [16, 1007], strides = [1, 1]} : vector<16x1024xf32> to vector<16x1007xf32>
    %cst_98 = arith.constant 0.000000e+00 : f32
    %578 = vector.broadcast %cst_98 : f32 to vector<16x17xf32>
    %579 = tpu.concatenate %577, %578 in 1 : vector<16x1007xf32>, vector<16x17xf32> -> vector<16x1024xf32>
    %580 = vector.extract_strided_slice %28 {offsets = [17, 0], sizes = [1, 1024], strides = [1, 1]} : vector<27x1024xf32> to vector<1x1024xf32>
    %581 = vector.broadcast %580 : vector<1x1024xf32> to vector<16x1024xf32>
    %582 = arith.mulf %579, %581 : vector<16x1024xf32>
    %583 = vector.extract_strided_slice %477 {offsets = [0, 239], sizes = [16, 785], strides = [1, 1]} : vector<16x1024xf32> to vector<16x785xf32>
    %cst_99 = arith.constant 0.000000e+00 : f32
    %584 = vector.broadcast %cst_99 : f32 to vector<16x239xf32>
    %585 = tpu.concatenate %583, %584 in 1 : vector<16x785xf32>, vector<16x239xf32> -> vector<16x1024xf32>
    %586 = vector.extract_strided_slice %28 {offsets = [18, 0], sizes = [1, 1024], strides = [1, 1]} : vector<27x1024xf32> to vector<1x1024xf32>
    %587 = vector.broadcast %586 : vector<1x1024xf32> to vector<16x1024xf32>
    %588 = arith.mulf %585, %587 : vector<16x1024xf32>
    %589 = vector.extract_strided_slice %477 {offsets = [0, 240], sizes = [16, 784], strides = [1, 1]} : vector<16x1024xf32> to vector<16x784xf32>
    %cst_100 = arith.constant 0.000000e+00 : f32
    %590 = vector.broadcast %cst_100 : f32 to vector<16x240xf32>
    %591 = tpu.concatenate %589, %590 in 1 : vector<16x784xf32>, vector<16x240xf32> -> vector<16x1024xf32>
    %592 = vector.extract_strided_slice %28 {offsets = [19, 0], sizes = [1, 1024], strides = [1, 1]} : vector<27x1024xf32> to vector<1x1024xf32>
    %593 = vector.broadcast %592 : vector<1x1024xf32> to vector<16x1024xf32>
    %594 = arith.mulf %591, %593 : vector<16x1024xf32>
    %595 = vector.extract_strided_slice %477 {offsets = [0, 241], sizes = [16, 783], strides = [1, 1]} : vector<16x1024xf32> to vector<16x783xf32>
    %cst_101 = arith.constant 0.000000e+00 : f32
    %596 = vector.broadcast %cst_101 : f32 to vector<16x241xf32>
    %597 = tpu.concatenate %595, %596 in 1 : vector<16x783xf32>, vector<16x241xf32> -> vector<16x1024xf32>
    %598 = vector.extract_strided_slice %28 {offsets = [20, 0], sizes = [1, 1024], strides = [1, 1]} : vector<27x1024xf32> to vector<1x1024xf32>
    %599 = vector.broadcast %598 : vector<1x1024xf32> to vector<16x1024xf32>
    %600 = arith.mulf %597, %599 : vector<16x1024xf32>
    %601 = vector.extract_strided_slice %477 {offsets = [0, 255], sizes = [16, 769], strides = [1, 1]} : vector<16x1024xf32> to vector<16x769xf32>
    %cst_102 = arith.constant 0.000000e+00 : f32
    %602 = vector.broadcast %cst_102 : f32 to vector<16x255xf32>
    %603 = tpu.concatenate %601, %602 in 1 : vector<16x769xf32>, vector<16x255xf32> -> vector<16x1024xf32>
    %604 = vector.extract_strided_slice %28 {offsets = [21, 0], sizes = [1, 1024], strides = [1, 1]} : vector<27x1024xf32> to vector<1x1024xf32>
    %605 = vector.broadcast %604 : vector<1x1024xf32> to vector<16x1024xf32>
    %606 = arith.mulf %603, %605 : vector<16x1024xf32>
    %607 = vector.extract_strided_slice %477 {offsets = [0, 256], sizes = [16, 768], strides = [1, 1]} : vector<16x1024xf32> to vector<16x768xf32>
    %cst_103 = arith.constant 0.000000e+00 : f32
    %608 = vector.broadcast %cst_103 : f32 to vector<16x256xf32>
    %609 = tpu.concatenate %607, %608 in 1 : vector<16x768xf32>, vector<16x256xf32> -> vector<16x1024xf32>
    %610 = vector.extract_strided_slice %28 {offsets = [22, 0], sizes = [1, 1024], strides = [1, 1]} : vector<27x1024xf32> to vector<1x1024xf32>
    %611 = vector.broadcast %610 : vector<1x1024xf32> to vector<16x1024xf32>
    %612 = arith.mulf %609, %611 : vector<16x1024xf32>
    %613 = vector.extract_strided_slice %477 {offsets = [0, 257], sizes = [16, 767], strides = [1, 1]} : vector<16x1024xf32> to vector<16x767xf32>
    %cst_104 = arith.constant 0.000000e+00 : f32
    %614 = vector.broadcast %cst_104 : f32 to vector<16x257xf32>
    %615 = tpu.concatenate %613, %614 in 1 : vector<16x767xf32>, vector<16x257xf32> -> vector<16x1024xf32>
    %616 = vector.extract_strided_slice %28 {offsets = [23, 0], sizes = [1, 1024], strides = [1, 1]} : vector<27x1024xf32> to vector<1x1024xf32>
    %617 = vector.broadcast %616 : vector<1x1024xf32> to vector<16x1024xf32>
    %618 = arith.mulf %615, %617 : vector<16x1024xf32>
    %619 = vector.extract_strided_slice %477 {offsets = [0, 271], sizes = [16, 753], strides = [1, 1]} : vector<16x1024xf32> to vector<16x753xf32>
    %cst_105 = arith.constant 0.000000e+00 : f32
    %620 = vector.broadcast %cst_105 : f32 to vector<16x271xf32>
    %621 = tpu.concatenate %619, %620 in 1 : vector<16x753xf32>, vector<16x271xf32> -> vector<16x1024xf32>
    %622 = vector.extract_strided_slice %28 {offsets = [24, 0], sizes = [1, 1024], strides = [1, 1]} : vector<27x1024xf32> to vector<1x1024xf32>
    %623 = vector.broadcast %622 : vector<1x1024xf32> to vector<16x1024xf32>
    %624 = arith.mulf %621, %623 : vector<16x1024xf32>
    %625 = vector.extract_strided_slice %477 {offsets = [0, 272], sizes = [16, 752], strides = [1, 1]} : vector<16x1024xf32> to vector<16x752xf32>
    %cst_106 = arith.constant 0.000000e+00 : f32
    %626 = vector.broadcast %cst_106 : f32 to vector<16x272xf32>
    %627 = tpu.concatenate %625, %626 in 1 : vector<16x752xf32>, vector<16x272xf32> -> vector<16x1024xf32>
    %628 = vector.extract_strided_slice %28 {offsets = [25, 0], sizes = [1, 1024], strides = [1, 1]} : vector<27x1024xf32> to vector<1x1024xf32>
    %629 = vector.broadcast %628 : vector<1x1024xf32> to vector<16x1024xf32>
    %630 = arith.mulf %627, %629 : vector<16x1024xf32>
    %631 = vector.extract_strided_slice %477 {offsets = [0, 273], sizes = [16, 751], strides = [1, 1]} : vector<16x1024xf32> to vector<16x751xf32>
    %cst_107 = arith.constant 0.000000e+00 : f32
    %632 = vector.broadcast %cst_107 : f32 to vector<16x273xf32>
    %633 = tpu.concatenate %631, %632 in 1 : vector<16x751xf32>, vector<16x273xf32> -> vector<16x1024xf32>
    %634 = vector.extract_strided_slice %28 {offsets = [26, 0], sizes = [1, 1024], strides = [1, 1]} : vector<27x1024xf32> to vector<1x1024xf32>
    %635 = vector.broadcast %634 : vector<1x1024xf32> to vector<16x1024xf32>
    %636 = arith.mulf %633, %635 : vector<16x1024xf32>
    %637 = tpu.concatenate %483, %489, %495, %501, %507, %513, %519, %525, %531, %537, %543, %549, %555, %558, %564, %570 in 0 : vector<16x1024xf32>, vector<16x1024xf32>, vector<16x1024xf32>, vector<16x1024xf32>, vector<16x1024xf32>, vector<16x1024xf32>, vector<16x1024xf32>, vector<16x1024xf32>, vector<16x1024xf32>, vector<16x1024xf32>, vector<16x1024xf32>, vector<16x1024xf32>, vector<16x1024xf32>, vector<16x1024xf32>, vector<16x1024xf32>, vector<16x1024xf32> -> vector<256x1024xf32>
    %638 = tpu.concatenate %576, %582, %588, %594, %600, %606, %612, %618, %624, %630, %636 in 0 : vector<16x1024xf32>, vector<16x1024xf32>, vector<16x1024xf32>, vector<16x1024xf32>, vector<16x1024xf32>, vector<16x1024xf32>, vector<16x1024xf32>, vector<16x1024xf32>, vector<16x1024xf32>, vector<16x1024xf32>, vector<16x1024xf32> -> vector<176x1024xf32>
    %639 = tpu.concatenate %637, %638 in 0 : vector<256x1024xf32>, vector<176x1024xf32> -> vector<432x1024xf32>
    %c0_108 = arith.constant 0 : index
    %c0_109 = arith.constant 0 : index
    %640 = vector.load %arg10[%c0_108, %c0_109] : memref<8x432xf32, #tpu.memory_space<vmem>>, vector<8x432xf32>
    %cst_110 = arith.constant dense<0.000000e+00> : vector<8x1024xf32>
    %641 = tpu.matmul %640, %639, %cst_110 {dimension_numbers = #tpu.dot_dimension_numbers<[1], [0], [0], [1], [0, 0, 1, 1], [], []>} : vector<8x432xf32>, vector<432x1024xf32>, vector<8x1024xf32> -> vector<8x1024xf32>
    %c0_111 = arith.constant 0 : index
    %c0_112 = arith.constant 0 : index
    %642 = vector.load %arg11[%c0_111, %c0_112] : memref<8x1xf32, #tpu.memory_space<vmem>>, vector<8x1xf32>
    %643 = vector.broadcast %642 : vector<8x1xf32> to vector<8x1024xf32>
    %644 = arith.addf %641, %643 : vector<8x1024xf32>
    %cst_113 = arith.constant 0.000000e+00 : f32
    %645 = vector.broadcast %cst_113 : f32 to vector<8x1024xf32>
    %646 = arith.cmpf oge, %644, %645 : vector<8x1024xf32>
    %cst_114 = arith.constant 0.00999999977 : f32
    %647 = vector.broadcast %cst_114 : f32 to vector<8x1024xf32>
    %648 = arith.mulf %647, %644 : vector<8x1024xf32>
    %649 = arith.select %646, %644, %648 : vector<8x1024xi1>, vector<8x1024xf32>
    %cst_115 = arith.constant 0.000000e+00 : f32
    %650 = vector.broadcast %cst_115 : f32 to vector<8x273xf32>
    %651 = vector.extract_strided_slice %649 {offsets = [0, 0], sizes = [8, 751], strides = [1, 1]} : vector<8x1024xf32> to vector<8x751xf32>
    %652 = tpu.concatenate %650, %651 in 1 : vector<8x273xf32>, vector<8x751xf32> -> vector<8x1024xf32>
    %653 = vector.extract_strided_slice %28 {offsets = [0, 0], sizes = [1, 1024], strides = [1, 1]} : vector<27x1024xf32> to vector<1x1024xf32>
    %654 = vector.broadcast %653 : vector<1x1024xf32> to vector<8x1024xf32>
    %655 = arith.mulf %652, %654 : vector<8x1024xf32>
    %cst_116 = arith.constant 0.000000e+00 : f32
    %656 = vector.broadcast %cst_116 : f32 to vector<8x272xf32>
    %657 = vector.extract_strided_slice %649 {offsets = [0, 0], sizes = [8, 752], strides = [1, 1]} : vector<8x1024xf32> to vector<8x752xf32>
    %658 = tpu.concatenate %656, %657 in 1 : vector<8x272xf32>, vector<8x752xf32> -> vector<8x1024xf32>
    %659 = vector.extract_strided_slice %28 {offsets = [1, 0], sizes = [1, 1024], strides = [1, 1]} : vector<27x1024xf32> to vector<1x1024xf32>
    %660 = vector.broadcast %659 : vector<1x1024xf32> to vector<8x1024xf32>
    %661 = arith.mulf %658, %660 : vector<8x1024xf32>
    %cst_117 = arith.constant 0.000000e+00 : f32
    %662 = vector.broadcast %cst_117 : f32 to vector<8x271xf32>
    %663 = vector.extract_strided_slice %649 {offsets = [0, 0], sizes = [8, 753], strides = [1, 1]} : vector<8x1024xf32> to vector<8x753xf32>
    %664 = tpu.concatenate %662, %663 in 1 : vector<8x271xf32>, vector<8x753xf32> -> vector<8x1024xf32>
    %665 = vector.extract_strided_slice %28 {offsets = [2, 0], sizes = [1, 1024], strides = [1, 1]} : vector<27x1024xf32> to vector<1x1024xf32>
    %666 = vector.broadcast %665 : vector<1x1024xf32> to vector<8x1024xf32>
    %667 = arith.mulf %664, %666 : vector<8x1024xf32>
    %cst_118 = arith.constant 0.000000e+00 : f32
    %668 = vector.broadcast %cst_118 : f32 to vector<8x257xf32>
    %669 = vector.extract_strided_slice %649 {offsets = [0, 0], sizes = [8, 767], strides = [1, 1]} : vector<8x1024xf32> to vector<8x767xf32>
    %670 = tpu.concatenate %668, %669 in 1 : vector<8x257xf32>, vector<8x767xf32> -> vector<8x1024xf32>
    %671 = vector.extract_strided_slice %28 {offsets = [3, 0], sizes = [1, 1024], strides = [1, 1]} : vector<27x1024xf32> to vector<1x1024xf32>
    %672 = vector.broadcast %671 : vector<1x1024xf32> to vector<8x1024xf32>
    %673 = arith.mulf %670, %672 : vector<8x1024xf32>
    %cst_119 = arith.constant 0.000000e+00 : f32
    %674 = vector.broadcast %cst_119 : f32 to vector<8x256xf32>
    %675 = vector.extract_strided_slice %649 {offsets = [0, 0], sizes = [8, 768], strides = [1, 1]} : vector<8x1024xf32> to vector<8x768xf32>
    %676 = tpu.concatenate %674, %675 in 1 : vector<8x256xf32>, vector<8x768xf32> -> vector<8x1024xf32>
    %677 = vector.extract_strided_slice %28 {offsets = [4, 0], sizes = [1, 1024], strides = [1, 1]} : vector<27x1024xf32> to vector<1x1024xf32>
    %678 = vector.broadcast %677 : vector<1x1024xf32> to vector<8x1024xf32>
    %679 = arith.mulf %676, %678 : vector<8x1024xf32>
    %cst_120 = arith.constant 0.000000e+00 : f32
    %680 = vector.broadcast %cst_120 : f32 to vector<8x255xf32>
    %681 = vector.extract_strided_slice %649 {offsets = [0, 0], sizes = [8, 769], strides = [1, 1]} : vector<8x1024xf32> to vector<8x769xf32>
    %682 = tpu.concatenate %680, %681 in 1 : vector<8x255xf32>, vector<8x769xf32> -> vector<8x1024xf32>
    %683 = vector.extract_strided_slice %28 {offsets = [5, 0], sizes = [1, 1024], strides = [1, 1]} : vector<27x1024xf32> to vector<1x1024xf32>
    %684 = vector.broadcast %683 : vector<1x1024xf32> to vector<8x1024xf32>
    %685 = arith.mulf %682, %684 : vector<8x1024xf32>
    %cst_121 = arith.constant 0.000000e+00 : f32
    %686 = vector.broadcast %cst_121 : f32 to vector<8x241xf32>
    %687 = vector.extract_strided_slice %649 {offsets = [0, 0], sizes = [8, 783], strides = [1, 1]} : vector<8x1024xf32> to vector<8x783xf32>
    %688 = tpu.concatenate %686, %687 in 1 : vector<8x241xf32>, vector<8x783xf32> -> vector<8x1024xf32>
    %689 = vector.extract_strided_slice %28 {offsets = [6, 0], sizes = [1, 1024], strides = [1, 1]} : vector<27x1024xf32> to vector<1x1024xf32>
    %690 = vector.broadcast %689 : vector<1x1024xf32> to vector<8x1024xf32>
    %691 = arith.mulf %688, %690 : vector<8x1024xf32>
    %cst_122 = arith.constant 0.000000e+00 : f32
    %692 = vector.broadcast %cst_122 : f32 to vector<8x240xf32>
    %693 = vector.extract_strided_slice %649 {offsets = [0, 0], sizes = [8, 784], strides = [1, 1]} : vector<8x1024xf32> to vector<8x784xf32>
    %694 = tpu.concatenate %692, %693 in 1 : vector<8x240xf32>, vector<8x784xf32> -> vector<8x1024xf32>
    %695 = vector.extract_strided_slice %28 {offsets = [7, 0], sizes = [1, 1024], strides = [1, 1]} : vector<27x1024xf32> to vector<1x1024xf32>
    %696 = vector.broadcast %695 : vector<1x1024xf32> to vector<8x1024xf32>
    %697 = arith.mulf %694, %696 : vector<8x1024xf32>
    %cst_123 = arith.constant 0.000000e+00 : f32
    %698 = vector.broadcast %cst_123 : f32 to vector<8x239xf32>
    %699 = vector.extract_strided_slice %649 {offsets = [0, 0], sizes = [8, 785], strides = [1, 1]} : vector<8x1024xf32> to vector<8x785xf32>
    %700 = tpu.concatenate %698, %699 in 1 : vector<8x239xf32>, vector<8x785xf32> -> vector<8x1024xf32>
    %701 = vector.extract_strided_slice %28 {offsets = [8, 0], sizes = [1, 1024], strides = [1, 1]} : vector<27x1024xf32> to vector<1x1024xf32>
    %702 = vector.broadcast %701 : vector<1x1024xf32> to vector<8x1024xf32>
    %703 = arith.mulf %700, %702 : vector<8x1024xf32>
    %cst_124 = arith.constant 0.000000e+00 : f32
    %704 = vector.broadcast %cst_124 : f32 to vector<8x17xf32>
    %705 = vector.extract_strided_slice %649 {offsets = [0, 0], sizes = [8, 1007], strides = [1, 1]} : vector<8x1024xf32> to vector<8x1007xf32>
    %706 = tpu.concatenate %704, %705 in 1 : vector<8x17xf32>, vector<8x1007xf32> -> vector<8x1024xf32>
    %707 = vector.extract_strided_slice %28 {offsets = [9, 0], sizes = [1, 1024], strides = [1, 1]} : vector<27x1024xf32> to vector<1x1024xf32>
    %708 = vector.broadcast %707 : vector<1x1024xf32> to vector<8x1024xf32>
    %709 = arith.mulf %706, %708 : vector<8x1024xf32>
    %cst_125 = arith.constant 0.000000e+00 : f32
    %710 = vector.broadcast %cst_125 : f32 to vector<8x16xf32>
    %711 = vector.extract_strided_slice %649 {offsets = [0, 0], sizes = [8, 1008], strides = [1, 1]} : vector<8x1024xf32> to vector<8x1008xf32>
    %712 = tpu.concatenate %710, %711 in 1 : vector<8x16xf32>, vector<8x1008xf32> -> vector<8x1024xf32>
    %713 = vector.extract_strided_slice %28 {offsets = [10, 0], sizes = [1, 1024], strides = [1, 1]} : vector<27x1024xf32> to vector<1x1024xf32>
    %714 = vector.broadcast %713 : vector<1x1024xf32> to vector<8x1024xf32>
    %715 = arith.mulf %712, %714 : vector<8x1024xf32>
    %cst_126 = arith.constant 0.000000e+00 : f32
    %716 = vector.broadcast %cst_126 : f32 to vector<8x15xf32>
    %717 = vector.extract_strided_slice %649 {offsets = [0, 0], sizes = [8, 1009], strides = [1, 1]} : vector<8x1024xf32> to vector<8x1009xf32>
    %718 = tpu.concatenate %716, %717 in 1 : vector<8x15xf32>, vector<8x1009xf32> -> vector<8x1024xf32>
    %719 = vector.extract_strided_slice %28 {offsets = [11, 0], sizes = [1, 1024], strides = [1, 1]} : vector<27x1024xf32> to vector<1x1024xf32>
    %720 = vector.broadcast %719 : vector<1x1024xf32> to vector<8x1024xf32>
    %721 = arith.mulf %718, %720 : vector<8x1024xf32>
    %cst_127 = arith.constant 0.000000e+00 : f32
    %722 = vector.broadcast %cst_127 : f32 to vector<8x1xf32>
    %723 = vector.extract_strided_slice %649 {offsets = [0, 0], sizes = [8, 1023], strides = [1, 1]} : vector<8x1024xf32> to vector<8x1023xf32>
    %724 = tpu.concatenate %722, %723 in 1 : vector<8x1xf32>, vector<8x1023xf32> -> vector<8x1024xf32>
    %725 = vector.extract_strided_slice %28 {offsets = [12, 0], sizes = [1, 1024], strides = [1, 1]} : vector<27x1024xf32> to vector<1x1024xf32>
    %726 = vector.broadcast %725 : vector<1x1024xf32> to vector<8x1024xf32>
    %727 = arith.mulf %724, %726 : vector<8x1024xf32>
    %728 = vector.extract_strided_slice %28 {offsets = [13, 0], sizes = [1, 1024], strides = [1, 1]} : vector<27x1024xf32> to vector<1x1024xf32>
    %729 = vector.broadcast %728 : vector<1x1024xf32> to vector<8x1024xf32>
    %730 = arith.mulf %649, %729 : vector<8x1024xf32>
    %731 = vector.extract_strided_slice %649 {offsets = [0, 1], sizes = [8, 1023], strides = [1, 1]} : vector<8x1024xf32> to vector<8x1023xf32>
    %cst_128 = arith.constant 0.000000e+00 : f32
    %732 = vector.broadcast %cst_128 : f32 to vector<8x1xf32>
    %733 = tpu.concatenate %731, %732 in 1 : vector<8x1023xf32>, vector<8x1xf32> -> vector<8x1024xf32>
    %734 = vector.extract_strided_slice %28 {offsets = [14, 0], sizes = [1, 1024], strides = [1, 1]} : vector<27x1024xf32> to vector<1x1024xf32>
    %735 = vector.broadcast %734 : vector<1x1024xf32> to vector<8x1024xf32>
    %736 = arith.mulf %733, %735 : vector<8x1024xf32>
    %737 = vector.extract_strided_slice %649 {offsets = [0, 15], sizes = [8, 1009], strides = [1, 1]} : vector<8x1024xf32> to vector<8x1009xf32>
    %cst_129 = arith.constant 0.000000e+00 : f32
    %738 = vector.broadcast %cst_129 : f32 to vector<8x15xf32>
    %739 = tpu.concatenate %737, %738 in 1 : vector<8x1009xf32>, vector<8x15xf32> -> vector<8x1024xf32>
    %740 = vector.extract_strided_slice %28 {offsets = [15, 0], sizes = [1, 1024], strides = [1, 1]} : vector<27x1024xf32> to vector<1x1024xf32>
    %741 = vector.broadcast %740 : vector<1x1024xf32> to vector<8x1024xf32>
    %742 = arith.mulf %739, %741 : vector<8x1024xf32>
    %743 = vector.extract_strided_slice %649 {offsets = [0, 16], sizes = [8, 1008], strides = [1, 1]} : vector<8x1024xf32> to vector<8x1008xf32>
    %cst_130 = arith.constant 0.000000e+00 : f32
    %744 = vector.broadcast %cst_130 : f32 to vector<8x16xf32>
    %745 = tpu.concatenate %743, %744 in 1 : vector<8x1008xf32>, vector<8x16xf32> -> vector<8x1024xf32>
    %746 = vector.extract_strided_slice %28 {offsets = [16, 0], sizes = [1, 1024], strides = [1, 1]} : vector<27x1024xf32> to vector<1x1024xf32>
    %747 = vector.broadcast %746 : vector<1x1024xf32> to vector<8x1024xf32>
    %748 = arith.mulf %745, %747 : vector<8x1024xf32>
    %749 = vector.extract_strided_slice %649 {offsets = [0, 17], sizes = [8, 1007], strides = [1, 1]} : vector<8x1024xf32> to vector<8x1007xf32>
    %cst_131 = arith.constant 0.000000e+00 : f32
    %750 = vector.broadcast %cst_131 : f32 to vector<8x17xf32>
    %751 = tpu.concatenate %749, %750 in 1 : vector<8x1007xf32>, vector<8x17xf32> -> vector<8x1024xf32>
    %752 = vector.extract_strided_slice %28 {offsets = [17, 0], sizes = [1, 1024], strides = [1, 1]} : vector<27x1024xf32> to vector<1x1024xf32>
    %753 = vector.broadcast %752 : vector<1x1024xf32> to vector<8x1024xf32>
    %754 = arith.mulf %751, %753 : vector<8x1024xf32>
    %755 = vector.extract_strided_slice %649 {offsets = [0, 239], sizes = [8, 785], strides = [1, 1]} : vector<8x1024xf32> to vector<8x785xf32>
    %cst_132 = arith.constant 0.000000e+00 : f32
    %756 = vector.broadcast %cst_132 : f32 to vector<8x239xf32>
    %757 = tpu.concatenate %755, %756 in 1 : vector<8x785xf32>, vector<8x239xf32> -> vector<8x1024xf32>
    %758 = vector.extract_strided_slice %28 {offsets = [18, 0], sizes = [1, 1024], strides = [1, 1]} : vector<27x1024xf32> to vector<1x1024xf32>
    %759 = vector.broadcast %758 : vector<1x1024xf32> to vector<8x1024xf32>
    %760 = arith.mulf %757, %759 : vector<8x1024xf32>
    %761 = vector.extract_strided_slice %649 {offsets = [0, 240], sizes = [8, 784], strides = [1, 1]} : vector<8x1024xf32> to vector<8x784xf32>
    %cst_133 = arith.constant 0.000000e+00 : f32
    %762 = vector.broadcast %cst_133 : f32 to vector<8x240xf32>
    %763 = tpu.concatenate %761, %762 in 1 : vector<8x784xf32>, vector<8x240xf32> -> vector<8x1024xf32>
    %764 = vector.extract_strided_slice %28 {offsets = [19, 0], sizes = [1, 1024], strides = [1, 1]} : vector<27x1024xf32> to vector<1x1024xf32>
    %765 = vector.broadcast %764 : vector<1x1024xf32> to vector<8x1024xf32>
    %766 = arith.mulf %763, %765 : vector<8x1024xf32>
    %767 = vector.extract_strided_slice %649 {offsets = [0, 241], sizes = [8, 783], strides = [1, 1]} : vector<8x1024xf32> to vector<8x783xf32>
    %cst_134 = arith.constant 0.000000e+00 : f32
    %768 = vector.broadcast %cst_134 : f32 to vector<8x241xf32>
    %769 = tpu.concatenate %767, %768 in 1 : vector<8x783xf32>, vector<8x241xf32> -> vector<8x1024xf32>
    %770 = vector.extract_strided_slice %28 {offsets = [20, 0], sizes = [1, 1024], strides = [1, 1]} : vector<27x1024xf32> to vector<1x1024xf32>
    %771 = vector.broadcast %770 : vector<1x1024xf32> to vector<8x1024xf32>
    %772 = arith.mulf %769, %771 : vector<8x1024xf32>
    %773 = vector.extract_strided_slice %649 {offsets = [0, 255], sizes = [8, 769], strides = [1, 1]} : vector<8x1024xf32> to vector<8x769xf32>
    %cst_135 = arith.constant 0.000000e+00 : f32
    %774 = vector.broadcast %cst_135 : f32 to vector<8x255xf32>
    %775 = tpu.concatenate %773, %774 in 1 : vector<8x769xf32>, vector<8x255xf32> -> vector<8x1024xf32>
    %776 = vector.extract_strided_slice %28 {offsets = [21, 0], sizes = [1, 1024], strides = [1, 1]} : vector<27x1024xf32> to vector<1x1024xf32>
    %777 = vector.broadcast %776 : vector<1x1024xf32> to vector<8x1024xf32>
    %778 = arith.mulf %775, %777 : vector<8x1024xf32>
    %779 = vector.extract_strided_slice %649 {offsets = [0, 256], sizes = [8, 768], strides = [1, 1]} : vector<8x1024xf32> to vector<8x768xf32>
    %cst_136 = arith.constant 0.000000e+00 : f32
    %780 = vector.broadcast %cst_136 : f32 to vector<8x256xf32>
    %781 = tpu.concatenate %779, %780 in 1 : vector<8x768xf32>, vector<8x256xf32> -> vector<8x1024xf32>
    %782 = vector.extract_strided_slice %28 {offsets = [22, 0], sizes = [1, 1024], strides = [1, 1]} : vector<27x1024xf32> to vector<1x1024xf32>
    %783 = vector.broadcast %782 : vector<1x1024xf32> to vector<8x1024xf32>
    %784 = arith.mulf %781, %783 : vector<8x1024xf32>
    %785 = vector.extract_strided_slice %649 {offsets = [0, 257], sizes = [8, 767], strides = [1, 1]} : vector<8x1024xf32> to vector<8x767xf32>
    %cst_137 = arith.constant 0.000000e+00 : f32
    %786 = vector.broadcast %cst_137 : f32 to vector<8x257xf32>
    %787 = tpu.concatenate %785, %786 in 1 : vector<8x767xf32>, vector<8x257xf32> -> vector<8x1024xf32>
    %788 = vector.extract_strided_slice %28 {offsets = [23, 0], sizes = [1, 1024], strides = [1, 1]} : vector<27x1024xf32> to vector<1x1024xf32>
    %789 = vector.broadcast %788 : vector<1x1024xf32> to vector<8x1024xf32>
    %790 = arith.mulf %787, %789 : vector<8x1024xf32>
    %791 = vector.extract_strided_slice %649 {offsets = [0, 271], sizes = [8, 753], strides = [1, 1]} : vector<8x1024xf32> to vector<8x753xf32>
    %cst_138 = arith.constant 0.000000e+00 : f32
    %792 = vector.broadcast %cst_138 : f32 to vector<8x271xf32>
    %793 = tpu.concatenate %791, %792 in 1 : vector<8x753xf32>, vector<8x271xf32> -> vector<8x1024xf32>
    %794 = vector.extract_strided_slice %28 {offsets = [24, 0], sizes = [1, 1024], strides = [1, 1]} : vector<27x1024xf32> to vector<1x1024xf32>
    %795 = vector.broadcast %794 : vector<1x1024xf32> to vector<8x1024xf32>
    %796 = arith.mulf %793, %795 : vector<8x1024xf32>
    %797 = vector.extract_strided_slice %649 {offsets = [0, 272], sizes = [8, 752], strides = [1, 1]} : vector<8x1024xf32> to vector<8x752xf32>
    %cst_139 = arith.constant 0.000000e+00 : f32
    %798 = vector.broadcast %cst_139 : f32 to vector<8x272xf32>
    %799 = tpu.concatenate %797, %798 in 1 : vector<8x752xf32>, vector<8x272xf32> -> vector<8x1024xf32>
    %800 = vector.extract_strided_slice %28 {offsets = [25, 0], sizes = [1, 1024], strides = [1, 1]} : vector<27x1024xf32> to vector<1x1024xf32>
    %801 = vector.broadcast %800 : vector<1x1024xf32> to vector<8x1024xf32>
    %802 = arith.mulf %799, %801 : vector<8x1024xf32>
    %803 = vector.extract_strided_slice %649 {offsets = [0, 273], sizes = [8, 751], strides = [1, 1]} : vector<8x1024xf32> to vector<8x751xf32>
    %cst_140 = arith.constant 0.000000e+00 : f32
    %804 = vector.broadcast %cst_140 : f32 to vector<8x273xf32>
    %805 = tpu.concatenate %803, %804 in 1 : vector<8x751xf32>, vector<8x273xf32> -> vector<8x1024xf32>
    %806 = vector.extract_strided_slice %28 {offsets = [26, 0], sizes = [1, 1024], strides = [1, 1]} : vector<27x1024xf32> to vector<1x1024xf32>
    %807 = vector.broadcast %806 : vector<1x1024xf32> to vector<8x1024xf32>
    %808 = arith.mulf %805, %807 : vector<8x1024xf32>
    %809 = tpu.concatenate %655, %661, %667, %673, %679, %685, %691, %697, %703, %709, %715, %721, %727, %730, %736, %742 in 0 : vector<8x1024xf32>, vector<8x1024xf32>, vector<8x1024xf32>, vector<8x1024xf32>, vector<8x1024xf32>, vector<8x1024xf32>, vector<8x1024xf32>, vector<8x1024xf32>, vector<8x1024xf32>, vector<8x1024xf32>, vector<8x1024xf32>, vector<8x1024xf32>, vector<8x1024xf32>, vector<8x1024xf32>, vector<8x1024xf32>, vector<8x1024xf32> -> vector<128x1024xf32>
    %810 = tpu.concatenate %748, %754, %760, %766, %772, %778, %784, %790, %796, %802, %808 in 0 : vector<8x1024xf32>, vector<8x1024xf32>, vector<8x1024xf32>, vector<8x1024xf32>, vector<8x1024xf32>, vector<8x1024xf32>, vector<8x1024xf32>, vector<8x1024xf32>, vector<8x1024xf32>, vector<8x1024xf32>, vector<8x1024xf32> -> vector<88x1024xf32>
    %811 = tpu.concatenate %809, %810 in 0 : vector<128x1024xf32>, vector<88x1024xf32> -> vector<216x1024xf32>
    %c0_141 = arith.constant 0 : index
    %c0_142 = arith.constant 0 : index
    %812 = vector.load %arg12[%c0_141, %c0_142] : memref<1x216xf32, #tpu.memory_space<vmem>>, vector<1x216xf32>
    %cst_143 = arith.constant dense<0.000000e+00> : vector<1x1024xf32>
    %813 = tpu.matmul %812, %811, %cst_143 {dimension_numbers = #tpu.dot_dimension_numbers<[1], [0], [0], [1], [0, 0, 1, 1], [], []>} : vector<1x216xf32>, vector<216x1024xf32>, vector<1x1024xf32> -> vector<1x1024xf32>
    %c0_144 = arith.constant 0 : index
    %c0_145 = arith.constant 0 : index
    %814 = vector.load %arg13[%c0_144, %c0_145] : memref<1x1xf32, #tpu.memory_space<vmem>>, vector<1x1xf32>
    %815 = vector.broadcast %814 : vector<1x1xf32> to vector<1x1024xf32>
    %816 = arith.addf %813, %815 : vector<1x1024xf32>
    %c0_146 = arith.constant 0 : index
    %c0_147 = arith.constant 0 : index
    %c0_148 = arith.constant 0 : index
    %817 = vector.load %arg14[%c0_146, %c0_147, %c0_148] : memref<1x1x1024xf32, #tpu.memory_space<vmem>>, vector<1x1x1024xf32>
    %818 = vector.shape_cast %817 : vector<1x1x1024xf32> to vector<1x1024xf32>
    %819 = vector.shape_cast %816 : vector<1x1024xf32> to vector<1x1x1024xf32>
    tpu.vector_store %arg14[%c0_146, %c0_147, %c0_148], %819 {strides = array<i32>} : memref<1x1x1024xf32, #tpu.memory_space<vmem>>, vector<1x1x1024xf32>,
    return
  }
  func.func @transform_0(%arg0: i32) -> (i32, i32, i32) {
    %c0_i32 = arith.constant 0 : i32
    %c0_i32_0 = arith.constant 0 : i32
    %c0_i32_1 = arith.constant 0 : i32
    return %arg0, %c0_i32, %c0_i32_0 : i32, i32, i32
  }
  func.func @transform_1(%arg0: i32) -> (i32, i32, i32) {
    %c0_i32 = arith.constant 0 : i32
    %c0_i32_0 = arith.constant 0 : i32
    %c0_i32_1 = arith.constant 0 : i32
    return %arg0, %c0_i32, %c0_i32_0 : i32, i32, i32
  }
  func.func @transform_2(%arg0: i32) -> (i32, i32) {
    %c0_i32 = arith.constant 0 : i32
    %c0_i32_0 = arith.constant 0 : i32
    %c0_i32_1 = arith.constant 0 : i32
    return %c0_i32, %c0_i32_0 : i32, i32
  }
  func.func @transform_3(%arg0: i32) -> (i32, i32) {
    %c0_i32 = arith.constant 0 : i32
    %c0_i32_0 = arith.constant 0 : i32
    %c0_i32_1 = arith.constant 0 : i32
    return %c0_i32, %c0_i32_0 : i32, i32
  }
  func.func @transform_4(%arg0: i32) -> (i32, i32) {
    %c0_i32 = arith.constant 0 : i32
    %c0_i32_0 = arith.constant 0 : i32
    %c0_i32_1 = arith.constant 0 : i32
    return %c0_i32, %c0_i32_0 : i32, i32
  }
  func.func @transform_5(%arg0: i32) -> (i32, i32) {
    %c0_i32 = arith.constant 0 : i32
    %c0_i32_0 = arith.constant 0 : i32
    %c0_i32_1 = arith.constant 0 : i32
    return %c0_i32, %c0_i32_0 : i32, i32
  }
  func.func @transform_6(%arg0: i32) -> (i32, i32) {
    %c0_i32 = arith.constant 0 : i32
    %c0_i32_0 = arith.constant 0 : i32
    %c0_i32_1 = arith.constant 0 : i32
    return %c0_i32, %c0_i32_0 : i32, i32
  }
  func.func @transform_7(%arg0: i32) -> (i32, i32) {
    %c0_i32 = arith.constant 0 : i32
    %c0_i32_0 = arith.constant 0 : i32
    %c0_i32_1 = arith.constant 0 : i32
    return %c0_i32, %c0_i32_0 : i32, i32
  }
  func.func @transform_8(%arg0: i32) -> (i32, i32) {
    %c0_i32 = arith.constant 0 : i32
    %c0_i32_0 = arith.constant 0 : i32
    %c0_i32_1 = arith.constant 0 : i32
    return %c0_i32, %c0_i32_0 : i32, i32
  }
  func.func @transform_9(%arg0: i32) -> (i32, i32) {
    %c0_i32 = arith.constant 0 : i32
    %c0_i32_0 = arith.constant 0 : i32
    %c0_i32_1 = arith.constant 0 : i32
    return %c0_i32, %c0_i32_0 : i32, i32
  }
  func.func @transform_10(%arg0: i32) -> (i32, i32) {
    %c0_i32 = arith.constant 0 : i32
    %c0_i32_0 = arith.constant 0 : i32
    %c0_i32_1 = arith.constant 0 : i32
    return %c0_i32, %c0_i32_0 : i32, i32
  }
  func.func @transform_11(%arg0: i32) -> (i32, i32) {
    %c0_i32 = arith.constant 0 : i32
    %c0_i32_0 = arith.constant 0 : i32
    %c0_i32_1 = arith.constant 0 : i32
    return %c0_i32, %c0_i32_0 : i32, i32
  }
  func.func @transform_12(%arg0: i32) -> (i32, i32) {
    %c0_i32 = arith.constant 0 : i32
    %c0_i32_0 = arith.constant 0 : i32
    %c0_i32_1 = arith.constant 0 : i32
    return %c0_i32, %c0_i32_0 : i32, i32
  }
  func.func @transform_13(%arg0: i32) -> (i32, i32, i32) {
    %c0_i32 = arith.constant 0 : i32
    %c0_i32_0 = arith.constant 0 : i32
    %c0_i32_1 = arith.constant 0 : i32
    return %arg0, %c0_i32, %c0_i32_0 : i32, i32, i32
  }
  func.func @transform_14(%arg0: i32) -> (i32, i32, i32) {
    %c0_i32 = arith.constant 0 : i32
    %c0_i32_0 = arith.constant 0 : i32
    %c0_i32_1 = arith.constant 0 : i32
    return %arg0, %c0_i32, %c0_i32_0 : i32, i32, i32
  }
}

</mosaic_0001>

<bundles_post_ra>
// kernel: model_1129_forward.1
= control target key start
LH: loop header
LB: loop body
LE: loop exit
PB: predicated region body
PF: predicated region fallthrough
CT: control target
= control target key end

     0   :  { %s8314_s15 = smov 0   ;;  %s15152_s0 = inlined_call_operand.vmem [shape: f32[2,1,256], index: 0, kind: input, shape index: {}]   ;;  %s15153_s1 = inlined_call_operand.vmem [shape: f32[2,1,256], index: 1, kind: input, shape index: {}]   ;;  %s15154_s2 = inlined_call_operand.vmem [shape: f32[4,256], index: 2, kind: input, shape index: {}]   ;;  %s15155_s3 = inlined_call_operand.vmem [shape: f32[1,256], index: 3, kind: input, shape index: {}]   ;;  %s15156_s4 = inlined_call_operand.vmem [shape: f32[27,1024], index: 4, kind: input, shape index: {}]   ;;  %s15157_s5 = inlined_call_operand.vmem [shape: f32[8,27], index: 5, kind: input, shape index: {}]   ;;  %s15158_s6 = inlined_call_operand.vmem [shape: f32[8,1], index: 6, kind: input, shape index: {}]   ;;  %s15159_s7 = inlined_call_operand.vmem [shape: f32[16,216], index: 7, kind: input, shape index: {}]   ;;  %s15160_s8 = inlined_call_operand.vmem [shape: f32[16,1], index: 8, kind: input, shape index: {}]   ;;  %s15161_s9 = inlined_call_operand.vmem [shape: f32[8,432], index: 9, kind: input, shape index: {}]   ;;  %s15162_s10 = inlined_call_operand.vmem [shape: f32[8,1], index: 10, kind: input, shape index: {}]   ;;  %s15163_s11 = inlined_call_operand.vmem [shape: f32[1,216], index: 11, kind: input, shape index: {}]   ;;  %s15164_s12 = inlined_call_operand.<no memory space> [shape: f32[1,1], index: 12, kind: input, shape index: {}]   ;;  %s15165_s13 = inlined_call_operand.vmem [shape: f32[2,1,1024], index: 13, kind: output, shape index: {0}]   ;;  %s15166_s14 = inlined_call_operand.vmem [shape: f32[2,4,256], index: 14, kind: output, shape index: {1}]  }
   0x1   :  { %v20_v0 = vstv %s15164_s12 }
   0x2   :  { %21 = vst [vmem:[#allocation2] sm:$0x1] %v20_v0 }
   0x3 LB: > { %s7175_s16 = sadd.s32 4294967295, %s8198_s15   ;;  %p7179_p0 = scmp.ge.s32.totalorder %s8198_s15, 1  ;;  %s8198_s15 = sphi %s8314_s15, %s27_s15  }
   0x4   : > { %p425_p1 = scmp.lt.s32.totalorder %s8198_s15, 3 }
   0x6   : > { %p426_p2 = pnand %p7179_p0, %p425_p1 }
   0x8   : > { %429 = sbr.rel (%p426_p2) target bundleno = 1872 (0x750), region = 72 }
   0xf   : > { %v8325_v1 = vld [vmem:[%s15157_s5] sm:$0xff]  ;;  %p478_p3 = scmp.lt.s32.totalorder %s7175_s16, 1  ;;  %v8200_v2 = vmov 2   ;;  %v8201_v3 = vmov 0   ;;  %v499_v6 = vlaneseq  ;;  %v8202_v8 = vmov 3   ;;  %s8215_s29 = smov 127  }
  0x10   : > { %8114 = vset.pattern.permute.xlu1 %v8200_v2  ;;  %8112 = vset.pattern.permute.xlu0 %v8201_v3  ;;  %v495_v4 = vld [vmem:[%s15154_s2] sm:$0xff]  ;;  %v8203_v9 = vmov 1   ;;  %v8204_v16 = vmov 4   ;;  %v8205_v17 = vmov 5   ;;  %vm522_vm0 = vcmask 1043456   ;;  %s8216_s30 = smov 17  }
  0x11   : > { %868 = vperm.xlu1 %8114, %v8325_v1   ;;  %658 = vperm.xlu0 %8112, %v8325_v1   ;;  %s17257_s16 = smov (!%p478_p3, %s7175_s16), 1  ;;  %v8335_v5 = vadd.f32 1.0, %v495_v4  ;;  %v8343_v7 = vshrl.u32 %v499_v6, 7  ;;  %v8206_v22 = vmov 6   ;;  %v8207_v23 = vmov 8   ;;  %s8217_s17 = smov 16  }
  0x12   : > { %s7180_s20 = sshll.u32 %s17257_s16, 1  ;;  %v8208_v30 = vmov 7   ;;  %v8209_v31 = vmov 11   ;;  %v8210_v34 = vmov 1966171168   ;;  %v8211_v38 = vmov 9  }
  0x13   : > { %s485_s23 = scalar_lea.vmem %s15153_s1, %s7180_s20  ;;  %15920 = vst [vmem:[#allocation3_spill] sm:$0xff] %v8343_v7  ;;  %v8348_v11 = vsub.s32 0, %v8343_v7  ;;  %v8351_v12 = vsub.s32 1, %v8343_v7  ;;  %v8355_v13 = vcombine.high %v8335_v5, %v8335_v5  ;;  %v543_v35 = vunpack.c.l.s4 %v8210_v34  ;;  %s481_s26 = scalar_lea.vmem %s15152_s0, %s7180_s20  ;;  %v558_v54 = vld [vmem:[%s15155_s3] sm:$0x3] }
  0x14   : > { %v497_v10 = vld [vmem:[%s485_s23] sm:$0x3]  ;;  %v8212_v42 = vmov 12   ;;  %v8213_v47 = vmov 10   ;;  %v8214_v53 = vmov 14   ;;  %s8218_s18 = smov 113  }
  0x15   : > { %8115 = vset.pattern.permute.xlu1 %v8202_v8  ;;  %8113 = vset.pattern.permute.xlu0 %v8203_v9  ;;  %15921 = vst [vmem:[#allocation4_spill] sm:$0xff] %v8348_v11  ;;  %15922 = vst [vmem:[#allocation5_spill] sm:$0xff] %v8351_v12  ;;  %v502_v14 = vrot.slane %v497_v10, %v8348_v11  ;;  %v506_v15 = vrot.slane %v497_v10, %v8351_v12  ;;  %v544_v41 = vunpack.c.0.s8 %v543_v35  ;;  %v537_v48 = vld [vmem:[%s481_s26] sm:$0x3]  ;;  %s8219_s12 = smov 15   ;;  %v8220_v62 = vmov 13  }
  0x16   : > { %969 = vperm.xlu1 %8115, %v8325_v1   ;;  %767 = vperm.xlu0 %8113, %v8325_v1   ;;  %v538_v50 = vmul.f32 4.0, %v537_v48  ;;  %s8221_s19 = smov 112   ;;  %s8222_s20 = smov 1   ;;  %v8223_v0 = vmov 15   ;;  %v8225_v2 = vmov 16   ;;  %v8227_v6 = vmov 18  }
  0x17   : > { %v512_v18 = vmul.f32 %v502_v14, %v8335_v5  ;;  %v8361_v19 = vmul.f32 %v8355_v13, %v506_v15  ;;  %v8380_v46 = vsub.s32 %v544_v41, %v8343_v7  ;;  %s8224_s21 = smov 111   ;;  %v8228_v8 = vmov 19  }
  0x18   : > { %v8229_v9 = vmov 20   ;;  %v8230_v10 = vmov 21   ;;  %v8232_v15 = vmov 24   ;;  %vm635_vm1 = vcmask 138240  }
  0x19   : > { %v8366_v20 = vcombine.low %v512_v18, %v8361_v19  ;;  %15924 = vst [vmem:[#allocation7_spill] sm:$0xff] %v8380_v46  ;;  %vm1110_vm2 = vcmask 1039360   ;;  %vm721_vm3 = vcmask 130048   ;;  %vm1215_vm4 = vcmask 924672  }
  0x1a   : > { %8116 = vset.pattern.permute.xlu1 %v8204_v16  ;;  %8117 = vset.pattern.permute.xlu0 %v8205_v17  ;;  %v8233_v16 = vmov 23   ;;  %v8234_v17 = vmov 25   ;;  %vm830_vm5 = vcmask 121856   ;;  %vm1320_vm6 = vcmask 916480  }
  0x1b   : > { %1045 = vperm.xlu1 %8116, %v8325_v1   ;;  %1150 = vperm.xlu0 %8117, %v8325_v1   ;;  %15923 = vst [vmem:[#allocation6_spill] sm:$0xff] %v8366_v20  ;;  %v518_v21 = vmul.f32 %v8366_v20, %v495_v4  ;;  %v8226_v4 = vmov 17   ;;  %vm931_vm7 = vcmask 7168   ;;  %vm1425_vm8 = vcmask 908288  }
  0x1c   : > { %vm4338_vm14 = vcmask 719872  }
  0x1d   : > { %v520_v24 = vcombine.high %v518_v21, %v518_v21  ;;  %v523_v25 = vsel %vm522_vm0, %v518_v21, 0.0 }
  0x1e   : > { %v524_v26 = vrot.slane %v523_v25, 4 }
  0x1f   : > { %8118 = vset.pattern.permute.xlu1 %v8206_v22  ;;  %8120 = vset.pattern.permute.xlu0 %v8207_v23  ;;  %v530_v27 = vsel %vm522_vm0, %v520_v24, 0.0  ;;  %v590_v22 = vld [vmem:[%s15156_s4] sm:$0xff]  ;;  %v8481_v23 = vld [vmem:[%s15156_s4 + $0x8] sm:$0xff] }
  0x20   : > { %1255 = vperm.xlu1 %8118, %v8325_v1   ;;  %1449 = vperm.xlu0 %8120, %v8325_v1   ;;  %v525_v28 = vadd.f32 %v524_v26, %v523_v25  ;;  %v531_v29 = vrot.slane %v530_v27, 4  ;;  %v843_v24 = vrot.slane %v590_v22, 2  ;;  %v742_v26 = vrot.slane %v590_v22, 1 }
  0x21   : > { %v1020_v34 = vrot.slane %v590_v22, 4  ;;  %v8502_v35 = vmul.f32 0.0, %v8481_v23 }
  0x22   : > { %v526_v32 = vrot.slane %v525_v28, 2  ;;  %v532_v33 = vadd.f32 %v531_v29, %v530_v27  ;;  %v743_v27 = vrot.slane %v8481_v23, 1  ;;  %v8491_v29 = vmul.f32 0.0, %v590_v22 }
  0x24   : > { %8119 = vset.pattern.permute.xlu1 %v8208_v30  ;;  %8123 = vset.pattern.permute.xlu0 %v8209_v31  ;;  %v527_v36 = vadd.f32 %v526_v32, %v525_v28  ;;  %v533_v37 = vrot.slane %v532_v33, 2  ;;  %v844_v28 = vrot.slane %v8481_v23, 2  ;;  %v945_v30 = vrot.slane %v8481_v23, 3 }
  0x25   : > { %1360 = vperm.xlu1 %8119, %v8325_v1   ;;  %1709 = vperm.xlu0 %8123, %v8325_v1   ;;  %v8494_v31 = vmul.f32 0.0, %v843_v24  ;;  %v1021_v32 = vrot.slane %v8481_v23, 4  ;;  %v8509_v41 = vmul.f32 0.0, %v743_v27  ;;  %v8685_v27 = vld [vmem:[%s15156_s4 + $0xb8] sm:$0xff] }
  0x26   : > { %v528_v39 = vrot.slane %v527_v36, 1  ;;  %v534_v40 = vadd.f32 %v533_v37, %v532_v33  ;;  %v944_v33 = vrot.slane %v590_v22, 3  ;;  %v1230_v37 = vrot.slane %v590_v22, 6  ;;  %15935 = vst [vmem:[#allocation18_spill] sm:$0xff] %v8685_v27 }
  0x27   : > { %v8523_v48 = vmul.f32 0.0, %v945_v30 }
  0x28   : > { %v529_v43 = vadd.f32 %v528_v39, %v527_v36  ;;  %v535_v44 = vrot.slane %v534_v40, 1  ;;  %v1125_v36 = vrot.slane %v590_v22, 5  ;;  %v8504_v39 = vmul.f32 0.0, %v742_v26 }
  0x29   : > { %8121 = vset.pattern.permute.xlu1 %v8211_v38  ;;  %8124 = vset.pattern.permute.xlu0 %v8212_v42  ;;  %v1335_v38 = vrot.slane %v590_v22, 7  ;;  %v8511_v42 = vmul.f32 0.0, %v844_v28 }
  0x2a   : > { %1541 = vperm.xlu1 %8121, %v8325_v1   ;;  %v536_v45 = vadd.f32 %v535_v44, %v534_v40  ;;  %v8517_v44 = vsub.s32 3, %v8343_v7 }
  0x2c   : > { %v541_v49 = vcombine.low %v529_v43, %v536_v45  ;;  %v8514_v43 = vsub.s32 2, %v8343_v7  ;;  %15926 = vst [vmem:[#allocation9_spill] sm:$0xff] %v8517_v44  ;;  %v664_v45 = vrot.slane %v8491_v29, %v8348_v11 }
  0x2e   : > { %8122 = vset.pattern.permute.xlu1 %v8213_v47  ;;  %v548_v51 = vrot.slane %v541_v49, %v8380_v46  ;;  %15925 = vst [vmem:[#allocation8_spill] sm:$0xff] %v8514_v43  ;;  %v8528_v49 = vld [vmem:[%s15156_s4 + $0x40] sm:$0xff] }
  0x2f   : > { %1625 = vperm.xlu1 %8122, %v8325_v1  }
  0x30   : > { %v555_v52 = vrot.slane %v548_v51, %v8380_v46  ;;  %v8535_v51 = vmul.f32 0.0, %v1021_v32 }
  0x32   : > { %v557_v55 = vsub.f32 %v538_v50, %v555_v52  ;;  %v874_v50 = vrot.slane %v8494_v31, %v8348_v11  ;;  %v8540_v52 = vld [vmem:[%s15156_s4 + $0x10] sm:$0xff]  ;;  %v8739_v31 = vld [vmem:[%s15156_s4 + $0x58] sm:$0xff] }
  0x33   : > { %8126 = vset.pattern.permute.xlu1 %v8214_v53  ;;  %v8542_v53 = vmul.f32 0.0, %v944_v33 }
  0x34   : > { %v559_v56 = vmul.f32 %v558_v54, %v557_v55  ;;  %v8544_v54 = vmul.f32 0.0, %v1020_v34  ;;  %v8549_v55 = vld [vmem:[%s15156_s4 + $0x18] sm:$0xff]  ;;  %v1844_v34 = vrot.slane %v8528_v49, 5 }
  0x36   : > { %v564_v57 = vrot.slane %v559_v56, %v8348_v11  ;;  %v568_v60 = vrot.slane %v559_v56, %v8351_v12 }
  0x38   : > { %v571_v58 = vmul.f32 %v564_v57, %v8335_v5  ;;  %v572_v61 = vmul.f32 %v568_v60, %v8355_v13  ;;  %v8231_v13 = vmov 22   ;;  %v8562_v60 = vmul.f32 0.0, %v1230_v37 }
  0x3a   : > { %v8390_v59 = vadd.f32 %v571_v58, %v512_v18  ;;  %v8409_v63 = vadd.f32 %v572_v61, %v8361_v19  ;;  %v8235_v18 = vmov 26   ;;  %v8560_v58 = vmul.f32 0.0, %v1125_v36 }
  0x3b   : > { %v8564_v61 = vmul.f32 0.0, %v1335_v38 }
  0x3c   : > { %1096 = vrot.lane.b32.xlu0 %v8390_v59, %s8215_s29  ;;  %623 = vrot.lane.b32.xlu1 %v8390_v59, %s8216_s30  ;;  %v8424_v5 = vrot.slane %v8390_v59, 1  ;;  %v8445_v14 = vrot.slane %v8409_v63, 1  ;;  %v8462_v19 = vrot.slane %v8390_v59, 2  ;;  %v8507_v40 = vrot.slane %v8409_v63, 2 }
  0x3d   : > { %v8656_v38 = vmul.f32 %v1844_v34, %v8390_v59  ;;  %v8677_v34 = vld [vmem:[%s15156_s4 + $0x48] sm:$0xff] }
  0x3f   : > { %15933 = vst [vmem:[#allocation16_spill] sm:$0xff] %v8656_v38 }
  0x40   : > { %709 = vrot.lane.b32.xlu0 %v8390_v59, %s8217_s17  ;;  %1201 = vrot.lane.b32.xlu1 %v8390_v59, %s8218_s18 }
  0x44   : > { %1793 = vperm.xlu0 %8124, %v8325_v1   ;;  %818 = vrot.lane.b32.xlu1 %v8390_v59, %s8219_s12 }
  0x48   : > { %8125 = vset.pattern.permute.xlu0 %v8220_v62  ;;  %1306 = vrot.lane.b32.xlu1 %v8390_v59, %s8221_s19  ;;  %v8569_v62 = vld [vmem:[%s15156_s4 + $0x28] sm:$0xff] }
  0x49   : > { %1869 = vperm.xlu0 %8125, %v8325_v1   ;;  %v1025_v26 = vrot.slane %v8569_v62, 4 }
  0x4c   : > { %919 = vrot.lane.b32.xlu1 %v8390_v59, %s8222_s20 }
  0x4d   : > { %711 = vrot.lane.b32.xlu0 %v8409_v63, %s8217_s17 }
  0x4e   : > { %8127 = vset.pattern.permute.xlu0 %v8223_v0  ;;  %v773_v0 = vrot.slane %v8504_v39, %v8348_v11 }
  0x50   : > { %1411 = vrot.lane.b32.xlu1 %v8390_v59, %s8224_s21 }
  0x51   : > { %2033 = vperm.xlu0 %8127, %v8325_v1  }
  0x54   : > { %625 = vrot.lane.b32.xlu1 %v8409_v63, %s8216_s30 }
  0x55   : > { %8128 = vset.pattern.permute.xlu0 %v8225_v2 }
  0x56   : > { %2099 = vperm.xlu0 %8128, %v8325_v1  }
  0x58   : > { %1951 = vperm.xlu1 %8126, %v8325_v1  }
  0x5a   : > { %8129 = vset.pattern.permute.xlu0 %v8226_v4  ;;  %v15947_v4 = vrot.slane %v8511_v42, %v8348_v11 }
  0x5b   : > { %2189 = vperm.xlu0 %8129, %v8325_v1  }
  0x5c   : > { %1098 = vrot.lane.b32.xlu1 %v8409_v63, %s8215_s29 }
  0x5d   : > { %8130 = vset.pattern.permute.xlu1 %v8227_v6  ;;  %v8578_v6 = vmul.f32 0.0, %v8528_v49 }
  0x5f   : > { %627 = vrot.lane.b32.xlu0 %v8424_v5, %s8216_s30 }
  0x60   : > { %820 = vrot.lane.b32.xlu1 %v8409_v63, %s8219_s12  ;;  %8131 = vset.pattern.permute.xlu0 %v8228_v8  ;;  %v8583_v8 = vld [vmem:[%s15156_s4 + $0x30] sm:$0xff] }
  0x61   : > { %15928 = vst [vmem:[#allocation11_spill] sm:$0xff] %v8583_v8  ;;  %v1026_v30 = vrot.slane %v8583_v8, 4 }
  0x63   : > { %2345 = vperm.xlu0 %8131, %v8325_v1   ;;  %v8649_v28 = vmul.f32 %v1026_v30, %v8462_v19  ;;  %v2405_v30 = vrot.slane %v8685_v27, 4 }
  0x64   : > { %1203 = vrot.lane.b32.xlu1 %v8409_v63, %s8218_s18 }
  0x65   : > { %v8731_v7 = vmul.f32 0.0, %v2405_v30 }
  0x67   : > { %8132 = vset.pattern.permute.xlu0 %v8229_v9  ;;  %15940 = vst [vmem:[#allocation23_spill] sm:$0xff] %v8731_v7 }
  0x68   : > { %921 = vrot.lane.b32.xlu1 %v8409_v63, %s8222_s20  ;;  %2423 = vperm.xlu0 %8132, %v8325_v1  }
  0x6c   : > { %1308 = vrot.lane.b32.xlu1 %v8409_v63, %s8221_s19  ;;  %8133 = vset.pattern.permute.xlu0 %v8230_v10  ;;  %v1022_v10 = vrot.slane %v8540_v52, 4 }
  0x6d   : > { %2501 = vperm.xlu0 %8133, %v8325_v1  }
  0x6e   : > { %v8625_v39 = vmul.f32 %v1022_v10, %v8390_v59  ;;  %v8641_v10 = vmul.f32 %v1025_v26, %v8445_v14 }
  0x70   : > { %1413 = vrot.lane.b32.xlu1 %v8409_v63, %s8224_s21 }
  0x71   : > { %8134 = vset.pattern.permute.xlu0 %v8231_v13  ;;  %v1023_v13 = vrot.slane %v8549_v55, 4 }
  0x72   : > { %2577 = vperm.xlu0 %8134, %v8325_v1  }
  0x74   : > { %2267 = vperm.xlu1 %8130, %v8325_v1  }
  0x76   : > { %715 = vrot.lane.b32.xlu0 %v8445_v14, %s8217_s17 }
  0x77   : > { %8136 = vset.pattern.permute.xlu0 %v8232_v15 }
  0x78   : > { %1100 = vrot.lane.b32.xlu1 %v8424_v5, %s8215_s29 }
  0x79   : > { %8135 = vset.pattern.permute.xlu1 %v8233_v16  ;;  %v8593_v16 = vld [vmem:[%s15156_s4 + $0x38] sm:$0xff] }
  0x7a   : > { %2713 = vperm.xlu0 %8136, %v8325_v1   ;;  %15929 = vst [vmem:[#allocation12_spill] sm:$0xff] %v8593_v16  ;;  %v1027_v36 = vrot.slane %v8593_v16, 4  ;;  %v15988_v16 = vrot.slane %v8528_v49, 3 }
  0x7c   : > { %713 = vrot.lane.b32.xlu1 %v8424_v5, %s8217_s17  ;;  %v8659_v26 = vmul.f32 %v1027_v36, %v8507_v40  ;;  %v8680_v36 = vrot.slane %v8409_v63, 3 }
  0x7e   : > { %8137 = vset.pattern.permute.xlu0 %v8234_v17  ;;  %15934 = vst [vmem:[#allocation17_spill] sm:$0xff] %v8680_v36 }
  0x7f   : > { %2797 = vperm.xlu0 %8137, %v8325_v1  }
  0x80   : > { %1205 = vrot.lane.b32.xlu1 %v8424_v5, %s8218_s18 }
  0x83   : > { %8138 = vset.pattern.permute.xlu0 %v8235_v18  ;;  %v1845_v18 = vrot.slane %v8677_v34, 5 }
  0x84   : > { %822 = vrot.lane.b32.xlu1 %v8424_v5, %s8219_s12  ;;  %2873 = vperm.xlu0 %8138, %v8325_v1  }
  0x85   : > { %v8734_v46 = vmul.f32 %v1845_v18, %v8409_v63 }
  0x87   : > { %15941 = vst [vmem:[#allocation24_spill] sm:$0xff] %v8734_v46 }
  0x88   : > { %1310 = vrot.lane.b32.xlu1 %v8424_v5, %s8221_s19  ;;  %1104 = vrot.lane.b32.xlu0 %v8462_v19, %s8215_s29 }
  0x89   : > { %8140 = vset.pattern.permute.xlu0 %v8201_v3 }
  0x8c   : > { %923 = vrot.lane.b32.xlu1 %v8424_v5, %s8222_s20  ;;  %717 = vrot.lane.b32.xlu0 %v8462_v19, %s8217_s17 }
  0x90   : > { %v8473_v21 = vpop.permute.xlu1 %868  ;;  %1415 = vrot.lane.b32.xlu1 %v8424_v5, %s8224_s21  ;;  %826 = vrot.lane.b32.xlu0 %v8462_v19, %s8219_s12  ;;  %v8556_v56 = vpop.permute.xlu0 %658 }
  0x91   : > { %15927 = vst [vmem:[#allocation10_spill] sm:$0xff] %v8556_v56  ;;  %v693_v9 = vmul.f32 %v664_v45, %v8556_v56  ;;  %v2327_v45 = vrot.slane %v8685_v27, 3 }
  0x93   : > { %v8729_v20 = vmul.f32 0.0, %v2327_v45  ;;  %v1847_v45 = vrot.slane %v8739_v31, 5 }
  0x94   : > { %629 = vrot.lane.b32.xlu1 %v8445_v14, %s8216_s30  ;;  %927 = vrot.lane.b32.xlu0 %v8462_v19, %s8222_s20 }
  0x95   : > { %v8487_v25 = vpop.permute.xlu1 %969  ;;  %v8621_v37 = vpop.permute.xlu0 %767  ;;  %15939 = vst [vmem:[#allocation22_spill] sm:$0xff] %v8729_v20 }
  0x96   : > { %15931 = vst [vmem:[#allocation14_spill] sm:$0xff] %v8621_v37  ;;  %v802_v32 = vmul.f32 %v773_v0, %v8621_v37  ;;  %v8692_v0 = vld [vmem:[%s15156_s4 + $0x50] sm:$0xff] }
  0x97   : > { %15936 = vst [vmem:[#allocation19_spill] sm:$0xff] %v8692_v0 }
  0x98   : > { %2653 = vperm.xlu1 %8135, %v8325_v1   ;;  %633 = vrot.lane.b32.xlu0 %v8507_v40, %s8216_s30  ;;  %v8554_v1 = vld [vmem:[%s15156_s4 + $0x20] sm:$0xff]  ;;  %v810_v2 = vadd.f32 %v802_v32, %v693_v9  ;;  %v15942_v9 = vrot.slane %v8542_v53, %v8348_v11  ;;  %v1846_v53 = vrot.slane %v8692_v0, 5 }
  0x99   : > { %v1024_v15 = vrot.slane %v8554_v1, 4 }
  0x9a   : > { %v8521_v47 = vpop.permute.xlu1 %1045  ;;  %v8726_v57 = vpop.permute.xlu0 %1150  ;;  %v1004_v32 = vmul.f32 %v15942_v9, %v8487_v25 }
  0x9b   : > { %v8631_v29 = vmul.f32 %v1024_v15, %v8424_v5  ;;  %v903_v15 = vmul.f32 %v874_v50, %v8473_v21  ;;  %15938 = vst [vmem:[#allocation21_spill] sm:$0xff] %v8726_v57 }
  0x9c   : > { %1102 = vrot.lane.b32.xlu1 %v8445_v14, %s8215_s29  ;;  %719 = vrot.lane.b32.xlu0 %v8507_v40, %s8217_s17 }
  0x9d   : > { %8139 = vset.pattern.permute.xlu1 %v8201_v3  ;;  %v8628_v3 = vmul.f32 %v1023_v13, %v8409_v63  ;;  %v8644_v13 = vrot.slane %v8390_v59, 3  ;;  %v8697_v59 = vld [vmem:[%s15156_s4 + $0x80] sm:$0xff]  ;;  %v911_v50 = vadd.f32 %v903_v15, %v810_v2  ;;  %v15944_v63 = vrot.slane %v8502_v35, %v8348_v11 }
  0x9e   : > { %15937 = vst [vmem:[#allocation20_spill] sm:$0xff] %v8697_v59  ;;  %v15945_v2 = vrot.slane %v8509_v41, %v8348_v11  ;;  %v15946_v35 = vrot.slane %v8544_v54, %v8348_v11  ;;  %v8795_v54 = vmul.f32 %v1846_v53, %v8424_v5  ;;  %v2552_v44 = vrot.slane %v8697_v59, 6 }
  0x9f   : > { %v8597_v17 = vpop.permute.xlu1 %1255  ;;  %v694_v18 = vmul.f32 %v15944_v63, %v8556_v56  ;;  %v2483_v63 = vrot.slane %v8685_v27, 5  ;;  %v8767_v41 = vpop.permute.xlu0 %1449  ;;  %v1012_v9 = vadd.f32 %v1004_v32, %v911_v50  ;;  %v8792_v50 = vld [vmem:[%s15156_s4 + $0x88] sm:$0xff]  ;;  %v15954_v53 = vrot.slane %v8523_v48, %v8348_v11 }
  0xa0   : > { %15930 = vst [vmem:[#allocation13_spill] sm:$0xff] %v8597_v17  ;;  %824 = vrot.lane.b32.xlu1 %v8445_v14, %s8219_s12  ;;  %828 = vrot.lane.b32.xlu0 %v8507_v40, %s8219_s12  ;;  %v803_v15 = vmul.f32 %v15945_v2, %v8621_v37  ;;  %v1080_v43 = vmul.f32 %v15946_v35, %v8521_v47  ;;  %15948 = vst [vmem:[#allocation26_spill] sm:$0xff] %v8792_v50  ;;  %v8860_v48 = vld [vmem:[%s15156_s4 + $0x68] sm:$0xff]  ;;  %v15984_v59 = vrot.slane %v8540_v52, 1 }
  0xa1   : > { %v904_v2 = vmul.f32 %v15947_v4, %v8473_v21  ;;  %15949 = vst [vmem:[#allocation27_spill] sm:$0xff] %v8795_v54  ;;  %v8801_v42 = vmul.f32 0.0, %v2483_v63  ;;  %v15952_v63 = vrot.slane %v8560_v58, %v8348_v11  ;;  %v1005_v35 = vmul.f32 %v15954_v53, %v8487_v25  ;;  %v8842_v53 = vld [vmem:[%s15156_s4 + $0x60] sm:$0xff]  ;;  %15958 = vst [vmem:[#allocation34_spill] sm:$0xff] %v8860_v48 }
  0xa2   : > { %v1088_v38 = vadd.f32 %v1080_v43, %v1012_v9  ;;  %15956 = vst [vmem:[#allocation32_spill] sm:$0xff] %v8842_v53  ;;  %v8852_v9 = vld [vmem:[%s15156_s4 + $0x90] sm:$0xff]  ;;  %v15960_v32 = vrot.slane %v8562_v60, %v8348_v11  ;;  %v15965_v46 = vrot.slane %v8628_v3, %v8348_v11 }
  0xa3   : > { %15950 = vst [vmem:[#allocation28_spill] sm:$0xff] %v8801_v42  ;;  %v1185_v12 = vmul.f32 %v15952_v63, %v8726_v57  ;;  %v8865_v43 = vld [vmem:[%s15156_s4 + $0x70] sm:$0xff]  ;;  %v15961_v42 = vrot.slane %v8535_v51, %v8348_v11 }
  0xa4   : > { %v8653_v33 = vpop.permute.xlu1 %1360  ;;  %1207 = vrot.lane.b32.xlu1 %v8445_v14, %s8218_s18  ;;  %929 = vrot.lane.b32.xlu0 %v8507_v40, %s8222_s20  ;;  %15959 = vst [vmem:[#allocation35_spill] sm:$0xff] %v8865_v43  ;;  %v1290_v63 = vmul.f32 %v15960_v32, %v8597_v17  ;;  %v1850_v51 = vrot.slane %v8865_v43, 5  ;;  %v15963_v32 = vrot.slane %v8625_v39, %v8348_v11 }
  0xa5   : > { %15932 = vst [vmem:[#allocation15_spill] sm:$0xff] %v8653_v33  ;;  %v1193_v4 = vadd.f32 %v1185_v12, %v1088_v38  ;;  %v1081_v20 = vmul.f32 %v15961_v42, %v8521_v47  ;;  %v1848_v12 = vrot.slane %v8842_v53, 5  ;;  %v1849_v38 = vrot.slane %v8860_v48, 5 }
  0xa6   : > { %v8907_v39 = vmul.f32 %v15965_v46, %v8521_v47  ;;  %v15971_v46 = vrot.slane %v8649_v28, %v8348_v11  ;;  %v15974_v28 = vrot.slane %v8659_v26, %v8348_v11 }
  0xa8   : > { %925 = vrot.lane.b32.xlu1 %v8445_v14, %s8222_s20  ;;  %1500 = vrot.lane.b32.xlu0 %v8644_v13, %s8216_s30  ;;  %15966 = vst [vmem:[#allocation37_spill] sm:$0xff] %v8907_v39  ;;  %v8927_v3 = vmul.f32 %v15971_v46, %v8521_v47 }
  0xa9   : > { %v8708_v24 = vpop.permute.xlu1 %1541 }
  0xaa   : > { %15972 = vst [vmem:[#allocation40_spill] sm:$0xff] %v8927_v3 }
  0xac   : > { %1312 = vrot.lane.b32.xlu1 %v8445_v14, %s8221_s19  ;;  %1592 = vrot.lane.b32.xlu0 %v8644_v13, %s8217_s17 }
  0xae   : > { %v8747_v30 = vpop.permute.xlu1 %1625 }
  0xaf   : > { %15943 = vst [vmem:[#allocation25_spill] sm:$0xff] %v8747_v30  ;;  %v811_v30 = vadd.f32 %v803_v15, %v694_v18  ;;  %v8806_v18 = vmul.f32 %v1847_v45, %v8445_v14  ;;  %v8818_v45 = vpop.permute.xlu0 %1709 }
  0xb0   : > { %1417 = vrot.lane.b32.xlu1 %v8445_v14, %s8224_s21  ;;  %1676 = vrot.lane.b32.xlu0 %v8644_v13, %s8219_s12  ;;  %15953 = vst [vmem:[#allocation30_spill] sm:$0xff] %v8818_v45 }
  0xb1   : > { %15951 = vst [vmem:[#allocation29_spill] sm:$0xff] %v8806_v18  ;;  %v912_v7 = vadd.f32 %v904_v2, %v811_v30  ;;  %v2924_v30 = vld [vmem:[%s15158_s6] sm:$0xff]  ;;  %v8855_v2 = vmul.f32 %v2552_v44, %v8424_v5  ;;  %v15964_v44 = vrot.slane %v8564_v61, %v8348_v11  ;;  %v15969_v61 = vrot.slane %v8641_v10, %v8348_v11 }
  0xb2   : > { %v8786_v22 = vpop.permute.xlu1 %623  ;;  %v8947_v10 = vmul.f32 %v15974_v28, %v8521_v47 }
  0xb3   : > { %15957 = vst [vmem:[#allocation33_spill] sm:$0xff] %v8855_v2  ;;  %v1013_v58 = vadd.f32 %v1005_v35, %v912_v7  ;;  %v8887_v42 = vpop.permute.xlu0 %1096  ;;  %v8893_v35 = vmul.f32 %v15963_v32, %v8521_v47  ;;  %v1298_v7 = vadd.f32 %v1290_v63, %v1193_v4  ;;  %v1395_v5 = vmul.f32 %v15964_v44, %v8653_v33 }
  0xb4   : > { %631 = vrot.lane.b32.xlu1 %v8462_v19, %s8216_s30  ;;  %1760 = vrot.lane.b32.xlu0 %v8644_v13, %s8222_s20  ;;  %v15967_v32 = vrot.slane %v8631_v29, %v8348_v11  ;;  %v8921_v4 = vmul.f32 %v15969_v61, %v8521_v47  ;;  %v8930_v29 = vmul.f32 %v1848_v12, %v8462_v19  ;;  %v2249_v12 = vrot.slane %v8685_v27, 2 }
  0xb5   : > { %15975 = vst [vmem:[#allocation42_spill] sm:$0xff] %v8947_v10  ;;  %v8953_v44 = vmul.f32 %v1850_v51, %v8644_v13  ;;  %v1403_v26 = vadd.f32 %v1395_v5, %v1298_v7  ;;  %v1124_v46 = vsel %vm1110_vm2, 0.0, %v8887_v42  ;;  %v2553_v61 = vrot.slane %v8792_v50, 6 }
  0xb6   : > { %v8824_v15 = vpop.permute.xlu1 %1201  ;;  %v8913_v54 = vmul.f32 %v15967_v32, %v8521_v47  ;;  %15970 = vst [vmem:[#allocation39_spill] sm:$0xff] %v8921_v4  ;;  %v15976_v47 = vrot.slane %v8578_v6, %v8348_v11  ;;  %v647_v32 = vsel %vm635_vm1, 0.0, %v8786_v22  ;;  %v8980_v6 = vld [vmem:[%s15156_s4 + $0x78] sm:$0xff]  ;;  %v8988_v60 = vmul.f32 0.0, %v2249_v12 }
  0xb7   : > { %15955 = vst [vmem:[#allocation31_spill] sm:$0xff] %v8824_v15  ;;  %v8968_v27 = vpop.permute.xlu0 %709  ;;  %15977 = vst [vmem:[#allocation43_spill] sm:$0xff] %v8980_v6  ;;  %v15979_v7 = vrot.slane %v8528_v49, 1  ;;  %v650_v51 = vmul.f32 %v647_v32, %v8540_v52  ;;  %v15987_v2 = vrot.slane %v8540_v52, 2 }
  0xb8   : > { %2927 = vperm.xlu1 %8139, %v2924_v30   ;;  %1920 = vrot.lane.b32.xlu0 %v8680_v36, %s8215_s29  ;;  %15968 = vst [vmem:[#allocation38_spill] sm:$0xff] %v8913_v54  ;;  %v8915_v30 = vadd.f32 %v1081_v20, %v1013_v58  ;;  %v8941_v20 = vld [vmem:[%s15156_s4 + $0x98] sm:$0xff]  ;;  %v8950_v58 = vmul.f32 %v1849_v38, %v8507_v40  ;;  %15978 = vst [vmem:[#allocation44_spill] sm:$0xff] %v8988_v60  ;;  %v733_v5 = vsel %vm721_vm3, 0.0, %v8968_v27 }
  0xb9   : > { %v1484_v38 = vmul.f32 %v15976_v47, %v8767_v41  ;;  %v1532_v3 = vmul.f32 %v15979_v7, %v647_v32  ;;  %v1229_v47 = vsel %vm1215_vm4, 0.0, %v8824_v15  ;;  %v15985_v32 = vrot.slane %v8528_v49, 2 }
  0xba   : > { %v8877_v18 = vpop.permute.xlu1 %818  ;;  %v672_v15 = vrot.slane %v650_v51, %v8348_v11  ;;  %v15990_v51 = vrot.slane %v8540_v52, 3 }
  0xbb   : > { %15962 = vst [vmem:[#allocation36_spill] sm:$0xff] %v8877_v18  ;;  %v1492_v10 = vadd.f32 %v1484_v38, %v1403_v26  ;;  %v1851_v26 = vrot.slane %v8980_v6, 5  ;;  %v15982_v38 = vrot.slane %v8481_v23, 5  ;;  %v1547_v39 = vrot.slane %v1532_v3, %v8348_v11 }
  0xbc   : > { %1209 = vrot.lane.b32.xlu1 %v8462_v19, %s8218_s18  ;;  %1502 = vrot.lane.b32.xlu0 %v8680_v36, %s8216_s30  ;;  %v760_v6 = vmul.f32 %v15984_v59, %v733_v5  ;;  %v842_v28 = vsel %vm830_vm5, 0.0, %v8877_v18  ;;  %v1616_v12 = vmul.f32 %v15985_v32, %v733_v5  ;;  %v695_v18 = vmul.f32 %v672_v15, %v8556_v56 }
  0xbd   : > { %v1142_v7 = vmul.f32 %v15982_v38, %v1124_v46  ;;  %v9022_v38 = vmul.f32 %v2553_v61, %v8445_v14  ;;  %v9036_v14 = vmul.f32 %v1851_v26, %v8680_v36  ;;  %v15986_v46 = vrot.slane %v8481_v23, 6 }
  0xbe   : > { %v8932_v63 = vpop.permute.xlu1 %1306  ;;  %v781_v5 = vrot.slane %v760_v6, %v8348_v11  ;;  %v15991_v6 = vld [vmem:[#allocation25_spill] sm:$0xff] }
  0xbf   : > { %15973 = vst [vmem:[#allocation41_spill] sm:$0xff] %v8932_v63  ;;  %15983 = vst [vmem:[#allocation47_spill] sm:$0xff] %v9022_v38  ;;  %v1160_v3 = vrot.slane %v1142_v7, %v8348_v11  ;;  %v1334_v59 = vsel %vm1320_vm6, 0.0, %v8932_v63  ;;  %v1247_v26 = vmul.f32 %v15986_v46, %v1229_v47  ;;  %v861_v7 = vmul.f32 %v15987_v2, %v842_v28 }
  0xc0   : > { %1314 = vrot.lane.b32.xlu1 %v8462_v19, %s8221_s19  ;;  %1594 = vrot.lane.b32.xlu0 %v8680_v36, %s8217_s17  ;;  %v1700_v63 = vmul.f32 %v15988_v16, %v842_v28  ;;  %v1631_v47 = vrot.slane %v1616_v12, %v8348_v11  ;;  %v15989_v46 = vrot.slane %v8481_v23, 7  ;;  %v804_v32 = vmul.f32 %v781_v5, %v8621_v37 }
  0xc1   : > { %v1186_v28 = vmul.f32 %v1160_v3, %v8726_v57  ;;  %v1265_v12 = vrot.slane %v1247_v26, %v8348_v11  ;;  %v15992_v26 = vrot.slane %v8528_v49, 4 }
  0xc2   : > { %v8997_v4 = vpop.permute.xlu1 %919  ;;  %v1352_v2 = vmul.f32 %v15989_v46, %v1334_v59  ;;  %v882_v59 = vrot.slane %v861_v7, %v8348_v11  ;;  %v1715_v46 = vrot.slane %v1700_v63, %v8348_v11  ;;  %v1660_v8 = vmul.f32 %v1631_v47, %v15991_v6 }
  0xc3   : > { %15980 = vst [vmem:[#allocation45_spill] sm:$0xff] %v8997_v4  ;;  %v9003_v54 = vpop.permute.xlu0 %1793  ;;  %v943_v0 = vsel %vm931_vm7, 0.0, %v8997_v4  ;;  %v1194_v3 = vadd.f32 %v1186_v28, %v8915_v30  ;;  %v1291_v47 = vmul.f32 %v1265_v12, %v8597_v17  ;;  %v9109_v28 = vld [vmem:[%s15156_s4 + $0xa0] sm:$0xff] }
  0xc4   : > { %15981 = vst [vmem:[#allocation46_spill] sm:$0xff] %v9003_v54  ;;  %1419 = vrot.lane.b32.xlu1 %v8462_v19, %s8224_s21  ;;  %1678 = vrot.lane.b32.xlu0 %v8680_v36, %s8219_s12  ;;  %v1576_v36 = vmul.f32 %v1547_v39, %v8708_v24  ;;  %v962_v39 = vmul.f32 %v15990_v51, %v943_v0  ;;  %15994 = vst [vmem:[#allocation49_spill] sm:$0xff] %v9109_v28  ;;  %v9115_v12 = vld [vmem:[%s15156_s4 + $0xc0] sm:$0x7] }
  0xc5   : > { %v1370_v23 = vrot.slane %v1352_v2, %v8348_v11  ;;  %v1784_v7 = vmul.f32 %v15992_v26, %v943_v0  ;;  %v905_v0 = vmul.f32 %v882_v59, %v8473_v21  ;;  %v1744_v2 = vmul.f32 %v1715_v46, %v8818_v45  ;;  %15995 = vst [vmem:[#allocation50_spill] sm:$0xff] %v9115_v12 }
  0xc6   : > { %v9041_v61 = vpop.permute.xlu1 %1411  ;;  %v1584_v51 = vadd.f32 %v1576_v36, %v1492_v10  ;;  %v983_v36 = vrot.slane %v962_v39, %v8348_v11  ;;  %v812_v39 = vadd.f32 %v804_v32, %v695_v18  ;;  %v15996_v32 = vrot.slane %v8677_v34, 1 }
  0xc7   : > { %v1439_v63 = vsel %vm1425_vm8, 0.0, %v9041_v61  ;;  %v1799_v10 = vrot.slane %v1784_v7, %v8348_v11  ;;  %v2554_v59 = vrot.slane %v8852_v9, 6  ;;  %v1299_v46 = vadd.f32 %v1291_v47, %v1194_v3 }
  0xc8   : > { %v9043_v60 = vpop.permute.xlu0 %1869  ;;  %1106 = vrot.lane.b32.xlu1 %v8507_v40, %s8215_s29  ;;  %v1441_v26 = vmul.f32 %v1439_v63, %v8677_v34  ;;  %v1668_v5 = vadd.f32 %v1660_v8, %v1584_v51  ;;  %v1006_v18 = vmul.f32 %v983_v36, %v8487_v25  ;;  %v913_v8 = vadd.f32 %v905_v0, %v812_v39 }
  0xc9   : > { %v1828_v3 = vmul.f32 %v1799_v10, %v9003_v54  ;;  %v9148_v39 = vmul.f32 %v2554_v59, %v8462_v19  ;;  %v16000_v10 = vrot.slane %v8677_v34, 2  ;;  %v9165_v59 = vld [vmem:[%s15156_s4 + $0xb0] sm:$0xff] }
  0xca   : > { %v9083_v16 = vpop.permute.xlu1 %625  ;;  %v1752_v51 = vadd.f32 %v1744_v2, %v1668_v5  ;;  %v1459_v38 = vrot.slane %v1441_v26, %v8348_v11  ;;  %v1014_v0 = vadd.f32 %v1006_v18, %v913_v8  ;;  %v15999_v26 = vrot.slane %v8549_v55, 1  ;;  %16001 = vst [vmem:[#allocation53_spill] sm:$0xff] %v9165_v59 }
  0xcb   : > { %v636_v30 = vsel %vm635_vm1, %v8786_v22, %v9083_v16  ;;  %v1396_v22 = vmul.f32 %v1370_v23, %v8653_v33  ;;  %v2556_v5 = vrot.slane %v9109_v28, 6  ;;  %v16004_v33 = vld [vmem:[#allocation24_spill] sm:$0xff] }
  0xcc   : > { %v9071_v4 = vpop.permute.xlu0 %711  ;;  %1211 = vrot.lane.b32.xlu1 %v8507_v40, %s8218_s18  ;;  %v1533_v63 = vmul.f32 %v15996_v32, %v636_v30  ;;  %v651_v8 = vmul.f32 %v636_v30, %v8549_v55  ;;  %v2555_v30 = vrot.slane %v8941_v20, 6  ;;  %v9177_v19 = vadd.f32 %v8893_v35, %v1014_v0  ;;  %v9195_v35 = vld [vmem:[%s15156_s4 + $0xa8] sm:$0xff] }
  0xcd   : > { %v722_v36 = vsel %vm721_vm3, %v8968_v27, %v9071_v4  ;;  %v1404_v50 = vadd.f32 %v1396_v22, %v1299_v46  ;;  %v16005_v32 = vrot.slane %v16004_v33, %v8348_v11  ;;  %v2634_v0 = vrot.slane %v9165_v59, 7  ;;  %v16011_v33 = vld [vmem:[#allocation29_spill] sm:$0xff] }
  0xce   : > { %v1551_v2 = vrot.slane %v1533_v63, %v8348_v11  ;;  %v761_v46 = vmul.f32 %v15999_v26, %v722_v36  ;;  %v1617_v22 = vmul.f32 %v16000_v10, %v722_v36  ;;  %v1485_v63 = vmul.f32 %v1459_v38, %v8767_v41  ;;  %v16002_v10 = vld [vmem:[#allocation16_spill] sm:$0xff] }
  0xcf   : > { %v1836_v36 = vadd.f32 %v1828_v3, %v1752_v51  ;;  %v16003_v38 = vrot.slane %v16002_v10, %v8348_v11  ;;  %16006 = vst [vmem:[#allocation16_spill] sm:$0xff] %v9195_v35  ;;  %v676_v7 = vrot.slane %v651_v8, %v8348_v11  ;;  %v9224_v8 = vmul.f32 %v2555_v30, %v8507_v40 }
  0xd0   : > { %v9094_v15 = vpop.permute.xlu0 %2033  ;;  %1316 = vrot.lane.b32.xlu1 %v8507_v40, %s8221_s19  ;;  %v1577_v27 = vmul.f32 %v1551_v2, %v8708_v24  ;;  %v785_v10 = vrot.slane %v761_v46, %v8348_v11  ;;  %v9190_v2 = vmul.f32 %v16005_v32, %v9043_v60  ;;  %v1493_v51 = vadd.f32 %v1485_v63, %v1404_v50  ;;  %v16008_v46 = vld [vmem:[#allocation27_spill] sm:$0xff] }
  0xd1   : > { %15993 = vst [vmem:[#allocation48_spill] sm:$0xff] %v9094_v15  ;;  %v1904_v18 = vmul.f32 %v16003_v38, %v9043_v60  ;;  %v1635_v38 = vrot.slane %v1617_v22, %v8348_v11  ;;  %v16009_v22 = vrot.slane %v16008_v46, %v8348_v11  ;;  %v16012_v32 = vrot.slane %v16011_v33, %v8348_v11 }
  0xd2   : > { %v16015_v50 = vrot.slane %v8930_v29, %v8348_v11  ;;  %v9227_v46 = vmul.f32 %v2556_v5, %v8644_v13  ;;  %v16019_v29 = vrot.slane %v8953_v44, %v8348_v11  ;;  %v805_v5 = vmul.f32 %v785_v10, %v8621_v37 }
  0xd3   : > { %v9205_v12 = vmul.f32 %v16009_v22, %v9043_v60  ;;  %v9211_v43 = vmul.f32 %v16012_v32, %v9043_v60  ;;  %v9213_v48 = vadd.f32 %v1904_v18, %v1836_v36  ;;  %v1585_v22 = vadd.f32 %v1577_v27, %v1493_v51 }
  0xd4   : > { %1421 = vrot.lane.b32.xlu1 %v8507_v40, %s8224_s21  ;;  %v9221_v63 = vmul.f32 %v16015_v50, %v9043_v60  ;;  %v16017_v18 = vrot.slane %v8950_v58, %v8348_v11  ;;  %v9241_v33 = vmul.f32 %v16019_v29, %v9043_v60  ;;  %v2557_v40 = vrot.slane %v9195_v35, 6 }
  0xd5   : > { %v9129_v23 = vpop.permute.xlu0 %2099  ;;  %16010 = vst [vmem:[#allocation27_spill] sm:$0xff] %v9205_v12  ;;  %16013 = vst [vmem:[#allocation29_spill] sm:$0xff] %v9211_v43  ;;  %v1661_v27 = vmul.f32 %v1635_v38, %v15991_v6  ;;  %v9249_v51 = vmul.f32 0.0, %v2634_v0  ;;  %v696_v58 = vmul.f32 %v676_v7, %v8556_v56  ;;  %v2558_v29 = vrot.slane %v9165_v59, 6  ;;  %v16029_v38 = vld [vmem:[#allocation17_spill] sm:$0xff] }
  0xd6   : > { %15997 = vst [vmem:[#allocation51_spill] sm:$0xff] %v9129_v23  ;;  %16016 = vst [vmem:[#allocation55_spill] sm:$0xff] %v9221_v63  ;;  %v9235_v36 = vmul.f32 %v16017_v18, %v9043_v60  ;;  %v16025_v7 = vrot.slane %v9036_v14, %v8348_v11  ;;  %v16027_v18 = vrot.slane %v8540_v52, 5  ;;  %v16040_v12 = vrot.slane %v8677_v34, 4 }
  0xd7   : > { %v9138_v15 = vpop.permute.xlu1 %1951  ;;  %16020 = vst [vmem:[#allocation57_spill] sm:$0xff] %v9241_v33  ;;  %16021 = vst [vmem:[#allocation58_spill] sm:$0xff] %v9249_v51  ;;  %v9281_v43 = vadd.f32 %v805_v5, %v696_v58  ;;  %v9283_v14 = vadd.f32 %v1661_v27, %v1585_v22  ;;  %v9292_v10 = vmul.f32 0.0, %v2558_v29  ;;  %v16032_v22 = vrot.slane %v8549_v55, 2 }
  0xd8   : > { %15998 = vst [vmem:[#allocation52_spill] sm:$0xff] %v9138_v15  ;;  %1108 = vrot.lane.b32.xlu1 %v8644_v13, %s8215_s29  ;;  %16018 = vst [vmem:[#allocation56_spill] sm:$0xff] %v9235_v36  ;;  %v9268_v0 = vmul.f32 %v16025_v7, %v9043_v60  ;;  %v16028_v36 = vld [vmem:[#allocation36_spill] sm:$0xff]  ;;  %v16030_v60 = vrot.slane %v8528_v49, 6  ;;  %v16033_v27 = vrot.slane %v8677_v34, 3 }
  0xd9   : > { %16031 = vst [vmem:[#allocation36_spill] sm:$0xff] %v9292_v10 }
  0xda   : > { %v9158_v47 = vpop.permute.xlu0 %2189  ;;  %16026 = vst [vmem:[#allocation61_spill] sm:$0xff] %v9268_v0 }
  0xdb   : > { %v9167_v26 = vpop.permute.xlu1 %1098 }
  0xdc   : > { %1213 = vrot.lane.b32.xlu1 %v8644_v13, %s8218_s18  ;;  %v1111_v30 = vsel %vm1110_vm2, %v8887_v42, %v9167_v26  ;;  %v9279_v42 = vmul.f32 %v2557_v40, %v16029_v38 }
  0xdd   : > { %v1143_v44 = vmul.f32 %v16027_v18, %v1111_v30  ;;  %v1942_v7 = vmul.f32 %v16030_v60, %v1111_v30  ;;  %v9308_v18 = vld [vmem:[%s15156_s4 + $0xc8] sm:$0x7] }
  0xde   : > { %v9199_v3 = vpop.permute.xlu0 %627  ;;  %16036 = vst [vmem:[#allocation63_spill] sm:$0xff] %v9308_v18 }
  0xdf   : > { %16007 = vst [vmem:[#allocation24_spill] sm:$0xff] %v9199_v3  ;;  %v9215_v28 = vpop.permute.xlu1 %820  ;;  %v637_v40 = vsel %vm635_vm1, %v9083_v16, %v9199_v3  ;;  %v16037_v16 = vld [vmem:[#allocation45_spill] sm:$0xff]  ;;  %v1957_v0 = vrot.slane %v1942_v7, %v8348_v11 }
  0xe0   : > { %16014 = vst [vmem:[#allocation54_spill] sm:$0xff] %v9215_v28  ;;  %1318 = vrot.lane.b32.xlu1 %v8644_v13, %s8221_s19  ;;  %v831_v63 = vsel %vm830_vm5, %v16028_v36, %v9215_v28  ;;  %v16038_v36 = vld [vmem:[#allocation31_spill] sm:$0xff]  ;;  %v652_v3 = vmul.f32 %v637_v40, %v8554_v1  ;;  %v16048_v7 = vld [vmem:[#allocation41_spill] sm:$0xff] }
  0xe1   : > { %v862_v5 = vmul.f32 %v16032_v22, %v831_v63  ;;  %v1701_v30 = vmul.f32 %v16033_v27, %v831_v63  ;;  %v16043_v27 = vld [vmem:[#allocation20_spill] sm:$0xff] }
  0xe2   : > { %v9252_v32 = vpop.permute.xlu0 %2345  ;;  %v16044_v6 = vrot.slane %v16043_v27, 2 }
  0xe3   : > { %16022 = vst [vmem:[#allocation59_spill] sm:$0xff] %v9252_v32  ;;  %v9257_v33 = vpop.permute.xlu1 %1203  ;;  %v16047_v32 = vrot.slane %v8528_v49, 7 }
  0xe4   : > { %16024 = vst [vmem:[#allocation60_spill] sm:$0xff] %v9257_v33  ;;  %1423 = vrot.lane.b32.xlu1 %v8644_v13, %s8224_s21  ;;  %v1164_v13 = vrot.slane %v1143_v44, %v8348_v11  ;;  %v1216_v29 = vsel %vm1215_vm4, %v16038_v36, %v9257_v33  ;;  %v16039_v44 = vrot.slane %v8549_v55, 3  ;;  %v9336_v37 = vmul.f32 %v16044_v6, %v637_v40 }
  0xe5   : > { %v886_v36 = vrot.slane %v862_v5, %v8348_v11  ;;  %v2024_v33 = vmul.f32 %v16047_v32, %v1216_v29  ;;  %v680_v32 = vrot.slane %v652_v3, %v8348_v11 }
  0xe6   : > { %v1187_v5 = vmul.f32 %v1164_v13, %v8726_v57 }
  0xe7   : > { %v9301_v58 = vpop.permute.xlu1 %921  ;;  %v9303_v60 = vpop.permute.xlu0 %2423  ;;  %v906_v13 = vmul.f32 %v886_v36, %v8473_v21 }
  0xe8   : > { %16034 = vst [vmem:[#allocation17_spill] sm:$0xff] %v9301_v58  ;;  %16035 = vst [vmem:[#allocation62_spill] sm:$0xff] %v9303_v60  ;;  %v932_v22 = vsel %vm931_vm7, %v16037_v16, %v9301_v58  ;;  %2002 = vrot.lane.b32.xlu1 %v16029_v38, %s8218_s18  ;;  %v16041_v60 = vld [vmem:[#allocation19_spill] sm:$0xff] }
  0xe9   : > { %v963_v51 = vmul.f32 %v16039_v44, %v932_v22  ;;  %v1785_v16 = vmul.f32 %v16040_v12, %v932_v22  ;;  %v16042_v58 = vrot.slane %v16041_v60, 1  ;;  %v1719_v44 = vrot.slane %v1701_v30, %v8348_v11 }
  0xea   : > { %v16046_v22 = vrot.slane %v8540_v52, 6  ;;  %v1986_v30 = vmul.f32 %v1957_v0, %v9138_v15 }
  0xeb   : > { %v1534_v63 = vmul.f32 %v16042_v58, %v637_v40  ;;  %v9340_v28 = vpop.permute.xlu1 %1308  ;;  %v1803_v49 = vrot.slane %v1785_v16, %v8348_v11  ;;  %v2273_v40 = vrot.slane %v9336_v37, %v8348_v11  ;;  %v1745_v0 = vmul.f32 %v1719_v44, %v8818_v45 }
  0xec   : > { %16045 = vst [vmem:[#allocation45_spill] sm:$0xff] %v9340_v28  ;;  %v1248_v58 = vmul.f32 %v16046_v22, %v1216_v29  ;;  %v1321_v10 = vsel %vm1320_vm6, %v16048_v7, %v9340_v28  ;;  %v9350_v6 = vpop.permute.xlu0 %2501  ;;  %2084 = vrot.lane.b32.xlu1 %v16029_v38, %s8221_s19  ;;  %v987_v22 = vrot.slane %v963_v51, %v8348_v11  ;;  %v16050_v7 = vrot.slane %v8540_v52, 7 }
  0xed   : > { %16049 = vst [vmem:[#allocation31_spill] sm:$0xff] %v9350_v6  ;;  %v1555_v29 = vrot.slane %v1534_v63, %v8348_v11  ;;  %v2090_v51 = vmul.f32 %v1321_v10, %v16043_v27  ;;  %v2039_v63 = vrot.slane %v2024_v33, %v8348_v11  ;;  %v1195_v16 = vadd.f32 %v1187_v5, %v9177_v19 }
  0xee   : > { %v1353_v12 = vmul.f32 %v16050_v7, %v1321_v10  ;;  %v1269_v3 = vrot.slane %v1248_v58, %v8348_v11  ;;  %v1994_v36 = vadd.f32 %v1986_v30, %v9213_v48  ;;  %v1007_v10 = vmul.f32 %v987_v22, %v8487_v25  ;;  %v16057_v22 = vld [vmem:[#allocation15_spill] sm:$0xff] }
  0xef   : > { %v9369_v28 = vpop.permute.xlu1 %1413  ;;  %v1829_v44 = vmul.f32 %v1803_v49, %v9003_v54  ;;  %v9386_v33 = vmul.f32 %v680_v32, %v8556_v56  ;;  %v914_v19 = vadd.f32 %v906_v13, %v9281_v43  ;;  %v1753_v48 = vadd.f32 %v1745_v0, %v9283_v14  ;;  %v16053_v32 = vld [vmem:[#allocation48_spill] sm:$0xff]  ;;  %v16059_v43 = vld [vmem:[#allocation37_spill] sm:$0xff] }
  0xf0   : > { %v1426_v52 = vsel %vm1425_vm8, %v9041_v61, %v9369_v28  ;;  %2150 = vrot.lane.b32.xlu1 %v16029_v38, %s8224_s21  ;;  %v9389_v61 = vmul.f32 %v1555_v29, %v8708_v24  ;;  %v1374_v7 = vrot.slane %v1353_v12, %v8348_v11  ;;  %v2105_v5 = vrot.slane %v2090_v51, %v8348_v11  ;;  %v9409_v14 = vld [vmem:[%s15156_s4 + $0xf0] sm:$0x7] }
  0xf1   : > { %v9383_v58 = vpop.permute.xlu0 %2577  ;;  %v1442_v37 = vmul.f32 %v1426_v52, %v16041_v60  ;;  %v1292_v49 = vmul.f32 %v1269_v3, %v8597_v17  ;;  %v2068_v6 = vmul.f32 %v2039_v63, %v16053_v32  ;;  %v16054_v29 = vrot.slane %v16043_v27, 1  ;;  %16055 = vst [vmem:[#allocation41_spill] sm:$0xff] %v9409_v14  ;;  %v16056_v3 = vld [vmem:[#allocation11_spill] sm:$0xff] }
  0xf2   : > { %16051 = vst [vmem:[#allocation19_spill] sm:$0xff] %v9383_v58  ;;  %v1015_v12 = vadd.f32 %v1007_v10, %v914_v19  ;;  %v1837_v13 = vadd.f32 %v1829_v44, %v1753_v48  ;;  %v2134_v56 = vmul.f32 %v2105_v5, %v9129_v23  ;;  %v9423_v10 = vmul.f32 0.0, %v9409_v14 }
  0xf3   : > { %v9396_v30 = vpop.permute.xlu1 %2267  ;;  %v2180_v18 = vmul.f32 %v16054_v29, %v1426_v52  ;;  %v1397_v52 = vmul.f32 %v1374_v7, %v16057_v22  ;;  %v1463_v29 = vrot.slane %v1442_v37, %v8348_v11  ;;  %v1300_v48 = vadd.f32 %v1292_v49, %v1195_v16 }
  0xf4   : > { %16052 = vst [vmem:[#allocation20_spill] sm:$0xff] %v9396_v30  ;;  %1762 = vrot.lane.b32.xlu1 %v16029_v38, %s8222_s20  ;;  %16058 = vst [vmem:[#allocation64_spill] sm:$0xff] %v9423_v10  ;;  %v2076_v63 = vadd.f32 %v2068_v6, %v1994_v36  ;;  %v9432_v38 = vadd.f32 %v16059_v43, %v1015_v12  ;;  %v9435_v5 = vadd.f32 %v9190_v2, %v1837_v13 }
  0xf5   : > { %v9411_v0 = vpop.permute.xlu0 %715  ;;  %v2195_v7 = vrot.slane %v2180_v18, %v8348_v11  ;;  %v1405_v16 = vadd.f32 %v1397_v52, %v1300_v48  ;;  %v1486_v6 = vmul.f32 %v1463_v29, %v8767_v41  ;;  %v16061_v18 = vrot.slane %v8549_v55, 5  ;;  %v16065_v52 = vld [vmem:[#allocation47_spill] sm:$0xff] }
  0xf6   : > { %v2142_v2 = vadd.f32 %v2134_v56, %v2076_v63  ;;  %v16064_v12 = vrot.slane %v8677_v34, 6  ;;  %v2302_v44 = vmul.f32 %v2273_v40, %v9396_v30  ;;  %v16066_v29 = vrot.slane %v16065_v52, %v8348_v11  ;;  %v9473_v40 = vld [vmem:[%s15156_s4 + $0xd0] sm:$0x7] }
  0xf7   : > { %v9420_v50 = vpop.permute.xlu1 %1100  ;;  %v16068_v63 = vrot.slane %v9148_v39, %v8348_v11  ;;  %16070 = vst [vmem:[#allocation65_spill] sm:$0xff] %v9473_v40  ;;  %v16073_v39 = vrot.slane %v16041_v60, 2  ;;  %v16074_v10 = vrot.slane %v16043_v27, 3 }
  0xf8   : > { %v1112_v37 = vsel %vm1110_vm2, %v9167_v26, %v9420_v50  ;;  %v16062_v26 = vld [vmem:[#allocation33_spill] sm:$0xff]  ;;  %v9457_v48 = vmul.f32 %v16066_v29, %v9383_v58  ;;  %v1494_v29 = vadd.f32 %v1486_v6, %v1405_v16 }
  0xf9   : > { %v9437_v51 = vpop.permute.xlu0 %2713  ;;  %v1144_v36 = vmul.f32 %v16061_v18, %v1112_v37  ;;  %v16063_v49 = vrot.slane %v16062_v26, %v8348_v11  ;;  %v1943_v13 = vmul.f32 %v16064_v12, %v1112_v37  ;;  %v2224_v18 = vmul.f32 %v2195_v7, %v9158_v47 }
  0xfa   : > { %16060 = vst [vmem:[#allocation37_spill] sm:$0xff] %v9437_v51  ;;  %16067 = vst [vmem:[#allocation33_spill] sm:$0xff] %v9457_v48  ;;  %v9468_v37 = vmul.f32 %v16068_v63, %v9383_v58 }
  0xfb   : > { %v9448_v43 = vmul.f32 %v16063_v49, %v9383_v58  ;;  %v714_v14 = vpop.permute.xlu1 %713  ;;  %v16071_v49 = vrot.slane %v8554_v1, 1  ;;  %v1168_v19 = vrot.slane %v1144_v36, %v8348_v11  ;;  %v1961_v51 = vrot.slane %v1943_v13, %v8348_v11 }
  0xfc   : > { %v723_v26 = vsel %vm721_vm3, %v9071_v4, %v714_v14  ;;  %v724_v56 = vsel %vm721_vm3, %v714_v14, %v9411_v0  ;;  %16069 = vst [vmem:[#allocation47_spill] sm:$0xff] %v9468_v37  ;;  %v16077_v4 = vrot.slane %v8739_v31, 2  ;;  %v2232_v6 = vadd.f32 %v2224_v18, %v2142_v2  ;;  %v16085_v18 = vld [vmem:[#allocation26_spill] sm:$0xff] }
  0xfd   : > { %v762_v7 = vmul.f32 %v16071_v49, %v723_v26  ;;  %v1618_v63 = vmul.f32 %v16073_v39, %v723_v26  ;;  %v2336_v37 = vmul.f32 %v16074_v10, %v723_v26  ;;  %v16076_v49 = vrot.slane %v8569_v62, 1 }
  0xfe   : > { %v9485_v48 = vpop.permute.xlu0 %2797  ;;  %v1619_v59 = vmul.f32 %v16077_v4, %v724_v56  ;;  %v16079_v36 = vrot.slane %v9224_v8, %v8348_v11  ;;  %v16081_v13 = vrot.slane %v9227_v46, %v8348_v11  ;;  %v16083_v4 = vrot.slane %v9279_v42, %v8348_v11  ;;  %v16087_v8 = vld [vmem:[#allocation60_spill] sm:$0xff] }
  0xff   : > { %16075 = vst [vmem:[#allocation66_spill] sm:$0xff] %v9485_v48  ;;  %v763_v12 = vmul.f32 %v16076_v49, %v724_v56  ;;  %v9492_v14 = vpop.permute.xlu1 %1205  ;;  %v789_v2 = vrot.slane %v762_v7, %v8348_v11  ;;  %v16086_v49 = vrot.slane %v16085_v18, 3  ;;  %v1188_v42 = vmul.f32 %v1168_v19, %v8726_v57 }
 0x100   : > { %16078 = vst [vmem:[#allocation67_spill] sm:$0xff] %v9492_v14  ;;  %v9499_v10 = vmul.f32 %v16079_v36, %v9383_v58  ;;  %v9505_v26 = vmul.f32 %v16081_v13, %v9383_v58  ;;  %v9511_v39 = vmul.f32 %v16083_v4, %v9383_v58  ;;  %v1217_v36 = vsel %vm1215_vm4, %v16087_v8, %v9492_v14  ;;  %v16102_v14 = vld [vmem:[#allocation34_spill] sm:$0xff] }
 0x101   : > { %v2337_v16 = vmul.f32 %v16086_v49, %v724_v56  ;;  %v1639_v4 = vrot.slane %v1618_v63, %v8348_v11  ;;  %v2351_v7 = vrot.slane %v2336_v37, %v8348_v11  ;;  %v1987_v56 = vmul.f32 %v1961_v51, %v9138_v15  ;;  %v16095_v63 = vld [vmem:[#allocation54_spill] sm:$0xff] }
 0x102   : > { %16080 = vst [vmem:[#allocation68_spill] sm:$0xff] %v9499_v10  ;;  %16082 = vst [vmem:[#allocation69_spill] sm:$0xff] %v9505_v26  ;;  %v16088_v10 = vld [vmem:[#allocation36_spill] sm:$0xff]  ;;  %v1586_v26 = vadd.f32 %v9389_v61, %v1494_v29  ;;  %v793_v49 = vrot.slane %v763_v12, %v8348_v11  ;;  %v1643_v8 = vrot.slane %v1619_v59, %v8348_v11  ;;  %v16094_v19 = vrot.slane %v8677_v34, 7  ;;  %v9546_v51 = vld [vmem:[%s15156_s4 + $0x38] sm:$0xff] }
 0x103   : > { %16084 = vst [vmem:[#allocation70_spill] sm:$0xff] %v9511_v39  ;;  %v16089_v46 = vrot.slane %v16088_v10, %v8348_v11  ;;  %v16091_v39 = vrot.slane %v8549_v55, 6  ;;  %v9534_v10 = vpop.permute.xlu1 %822  ;;  %v2310_v61 = vadd.f32 %v2302_v44, %v2232_v6  ;;  %16096 = vst [vmem:[#allocation54_spill] sm:$0xff] %v9546_v51  ;;  %v16097_v12 = vld [vmem:[#allocation14_spill] sm:$0xff]  ;;  %v16098_v44 = vrot.slane %v8554_v1, 2 }
 0x104   : > { %16092 = vst [vmem:[#allocation60_spill] sm:$0xff] %v9534_v10  ;;  %v2025_v29 = vmul.f32 %v16094_v19, %v1217_v36  ;;  %v832_v37 = vsel %vm830_vm5, %v16095_v63, %v9534_v10  ;;  %v16099_v34 = vrot.slane %v16041_v60, 3  ;;  %v16100_v19 = vld [vmem:[#allocation25_spill] sm:$0xff]  ;;  %v16101_v63 = vld [vmem:[#allocation59_spill] sm:$0xff]  ;;  %v1196_v59 = vadd.f32 %v1188_v42, %v9432_v38 }
 0x105   : > { %v9523_v13 = vmul.f32 %v16089_v46, %v9383_v58  ;;  %v1249_v40 = vmul.f32 %v16091_v39, %v1217_v36  ;;  %v9536_v46 = vpop.permute.xlu0 %2873  ;;  %v806_v39 = vmul.f32 %v789_v2, %v16097_v12  ;;  %v2355_v58 = vrot.slane %v2337_v16, %v8348_v11  ;;  %v16108_v38 = vld [vmem:[#allocation45_spill] sm:$0xff] }
 0x106   : > { %16093 = vst [vmem:[#allocation36_spill] sm:$0xff] %v9536_v46  ;;  %v863_v6 = vmul.f32 %v16098_v44, %v832_v37  ;;  %v1702_v36 = vmul.f32 %v16099_v34, %v832_v37  ;;  %v2380_v46 = vmul.f32 %v2351_v7, %v16101_v63  ;;  %v1995_v2 = vadd.f32 %v1987_v56, %v9435_v5 }
 0x107   : > { %16090 = vst [vmem:[#allocation26_spill] sm:$0xff] %v9523_v13  ;;  %v1662_v13 = vmul.f32 %v1639_v4, %v16100_v19  ;;  %v1273_v48 = vrot.slane %v1249_v40, %v8348_v11  ;;  %v9562_v16 = vmul.f32 %v793_v49, %v16097_v12  ;;  %v9565_v44 = vmul.f32 %v1643_v8, %v16100_v19  ;;  %v9567_v10 = vpop.permute.xlu1 %1310  ;;  %v16109_v8 = vld [vmem:[#allocation35_spill] sm:$0xff] }
 0x108   : > { %16105 = vst [vmem:[#allocation59_spill] sm:$0xff] %v9567_v10  ;;  %v2043_v4 = vrot.slane %v2025_v29, %v8348_v11  ;;  %v890_v40 = vrot.slane %v863_v6, %v8348_v11  ;;  %v16107_v7 = vrot.slane %v16043_v27, 4  ;;  %v1322_v5 = vsel %vm1320_vm6, %v16108_v38, %v9567_v10 }
 0x109   : > { %16103 = vst [vmem:[#allocation14_spill] sm:$0xff] %v9562_v16  ;;  %16104 = vst [vmem:[#allocation25_spill] sm:$0xff] %v9565_v44  ;;  %v9569_v34 = vpop.permute.xlu0 %1104  ;;  %v814_v42 = vadd.f32 %v806_v39, %v9386_v33  ;;  %v9580_v56 = vmul.f32 %v2355_v58, %v16101_v63  ;;  %v1723_v49 = vrot.slane %v1702_v36, %v8348_v11 }
 0x10a   : > { %16106 = vst [vmem:[#allocation71_spill] sm:$0xff] %v9569_v34  ;;  %v2414_v15 = vmul.f32 %v16107_v7, %v832_v37  ;;  %v1670_v44 = vadd.f32 %v1662_v13, %v1586_v26  ;;  %v9584_v29 = vadd.f32 %v2380_v46, %v2310_v61  ;;  %v1293_v6 = vmul.f32 %v1273_v48, %v8597_v17  ;;  %v16112_v46 = vld [vmem:[#allocation17_spill] sm:$0xff] }
 0x10b   : > { %v16110_v7 = vrot.slane %v8549_v55, 7  ;;  %v2091_v38 = vmul.f32 %v1322_v5, %v16085_v18  ;;  %v9591_v33 = vpop.permute.xlu1 %923  ;;  %v2069_v26 = vmul.f32 %v2043_v4, %v16053_v32  ;;  %v907_v13 = vmul.f32 %v890_v40, %v8473_v21 }
 0x10c   : > { %16111 = vst [vmem:[#allocation45_spill] sm:$0xff] %v9591_v33  ;;  %v2429_v48 = vrot.slane %v2414_v15, %v8348_v11  ;;  %v933_v55 = vsel %vm931_vm7, %v16112_v46, %v9591_v33  ;;  %v1746_v61 = vmul.f32 %v1723_v49, %v8818_v45  ;;  %v16114_v37 = vrot.slane %v16041_v60, 4 }
 0x10d   : > { %v1354_v16 = vmul.f32 %v16110_v7, %v1322_v5  ;;  %v9593_v58 = vpop.permute.xlu0 %717  ;;  %v16113_v5 = vrot.slane %v8554_v1, 3  ;;  %v1301_v36 = vadd.f32 %v1293_v6, %v1196_v59  ;;  %v16115_v40 = vrot.slane %v16043_v27, 5  ;;  %v16118_v6 = vld [vmem:[#allocation62_spill] sm:$0xff] }
 0x10e   : > { %v1786_v39 = vmul.f32 %v16114_v37, %v933_v55  ;;  %v725_v4 = vsel %vm721_vm3, %v9411_v0, %v9593_v58  ;;  %v2109_v10 = vrot.slane %v2091_v38, %v8348_v11  ;;  %v9626_v0 = vld [vmem:[%s15156_s4 + $0xd8] sm:$0x7]  ;;  %v2077_v59 = vadd.f32 %v2069_v26, %v1995_v2 }
 0x10f   : > { %v964_v7 = vmul.f32 %v16113_v5, %v933_v55  ;;  %v2492_v15 = vmul.f32 %v16115_v40, %v933_v55  ;;  %v1378_v49 = vrot.slane %v1354_v16, %v8348_v11  ;;  %v9619_v52 = vpop.permute.xlu1 %1415  ;;  %16117 = vst [vmem:[#allocation72_spill] sm:$0xff] %v9626_v0  ;;  %v2458_v55 = vmul.f32 %v2429_v48, %v16118_v6 }
 0x110   : > { %v1807_v37 = vrot.slane %v1786_v39, %v8348_v11  ;;  %16116 = vst [vmem:[#allocation17_spill] sm:$0xff] %v9619_v52  ;;  %v16119_v16 = vrot.slane %v16056_v3, 1  ;;  %v1754_v46 = vadd.f32 %v1746_v61, %v1670_v44  ;;  %v16120_v39 = vrot.slane %v8842_v53, 2 }
 0x111   : > { %v991_v5 = vrot.slane %v964_v7, %v8348_v11  ;;  %v9621_v32 = vpop.permute.xlu0 %826  ;;  %v915_v7 = vadd.f32 %v907_v13, %v814_v42  ;;  %v2507_v33 = vrot.slane %v2492_v15, %v8348_v11  ;;  %v16121_v2 = vrot.slane %v8852_v9, 3 }
 0x112   : > { %v764_v40 = vmul.f32 %v16119_v16, %v725_v4  ;;  %v1620_v57 = vmul.f32 %v16120_v39, %v725_v4  ;;  %v1427_v48 = vsel %vm1425_vm8, %v9369_v28, %v9619_v52  ;;  %v1398_v16 = vmul.f32 %v1378_v49, %v16057_v22 }
 0x113   : > { %v1008_v17 = vmul.f32 %v991_v5, %v8487_v25  ;;  %v2338_v26 = vmul.f32 %v16121_v2, %v725_v4  ;;  %v2135_v44 = vmul.f32 %v2109_v10, %v9129_v23  ;;  %v1830_v42 = vmul.f32 %v1807_v37, %v9003_v54  ;;  %v9645_v13 = vpop.permute.xlu1 %629  ;;  %v8142_v4 = vld [vmem:[%s15156_s4 + $0x58] sm:$0xff]  ;;  %v16124_v10 = vld [vmem:[#allocation24_spill] sm:$0xff]  ;;  %v16127_v23 = vld [vmem:[#allocation31_spill] sm:$0xff] }
 0x114   : > { %16122 = vst [vmem:[#allocation73_spill] sm:$0xff] %v9645_v13  ;;  %v797_v15 = vrot.slane %v764_v40, %v8348_v11  ;;  %v1443_v39 = vmul.f32 %v8142_v4, %v1427_v48  ;;  %v16123_v28 = vrot.slane %v16085_v18, 1  ;;  %v638_v37 = vsel %vm635_vm1, %v16124_v10, %v9645_v13  ;;  %v8143_v5 = vld [vmem:[%s15156_s4 + $0x28] sm:$0xff] }
 0x115   : > { %v9647_v61 = vpop.permute.xlu0 %927  ;;  %v1647_v2 = vrot.slane %v1620_v57, %v8348_v11  ;;  %v653_v51 = vmul.f32 %v8143_v5, %v638_v37  ;;  %v16125_v40 = vrot.slane %v8739_v31, 1  ;;  %v16126_v0 = vrot.slane %v16085_v18, 2 }
 0x116   : > { %v2181_v49 = vmul.f32 %v16123_v28, %v1427_v48  ;;  %v1016_v35 = vadd.f32 %v1008_v17, %v915_v7  ;;  %v2536_v48 = vmul.f32 %v2507_v33, %v16127_v23  ;;  %v2359_v28 = vrot.slane %v2338_v26, %v8348_v11 }
 0x117   : > { %v1535_v38 = vmul.f32 %v16125_v40, %v638_v37  ;;  %v2259_v4 = vmul.f32 %v16126_v0, %v638_v37  ;;  %v1467_v10 = vrot.slane %v1443_v39, %v8348_v11  ;;  %v1838_v13 = vadd.f32 %v1830_v42, %v1754_v46  ;;  %v9673_v52 = vpop.permute.xlu1 %2653 }
 0x118   : > { %v2199_v57 = vrot.slane %v2181_v49, %v8348_v11  ;;  %v684_v22 = vrot.slane %v653_v51, %v8348_v11  ;;  %16128 = vst [vmem:[#allocation24_spill] sm:$0xff] %v9673_v52  ;;  %v2466_v0 = vadd.f32 %v2458_v55, %v9584_v29  ;;  %v1406_v17 = vadd.f32 %v1398_v16, %v1301_v36  ;;  %v16133_v49 = vld [vmem:[#allocation10_spill] sm:$0xff]  ;;  %v16150_v36 = vld [vmem:[#allocation21_spill] sm:$0xff] }
 0x119   : > { %v1559_v5 = vrot.slane %v1535_v38, %v8348_v11  ;;  %v9675_v40 = vpop.permute.xlu0 %633  ;;  %v1487_v33 = vmul.f32 %v1467_v10, %v8767_v41  ;;  %v2277_v7 = vrot.slane %v2259_v4, %v8348_v11  ;;  %v2143_v26 = vadd.f32 %v2135_v44, %v2077_v59  ;;  %v16135_v4 = vld [vmem:[#allocation27_spill] sm:$0xff] }
 0x11a   : > { %v9681_v46 = vmul.f32 %v797_v15, %v16097_v12  ;;  %v9684_v42 = vmul.f32 %v1647_v2, %v16100_v19  ;;  %v2544_v38 = vadd.f32 %v2536_v48, %v2466_v0  ;;  %v9688_v39 = vmul.f32 %v2359_v28, %v16101_v63  ;;  %v16134_v15 = vld [vmem:[#allocation38_spill] sm:$0xff] }
 0x11b   : > { %v1579_v29 = vmul.f32 %v1559_v5, %v8708_v24  ;;  %v2225_v16 = vmul.f32 %v2199_v57, %v9158_v47  ;;  %v698_v59 = vmul.f32 %v684_v22, %v16133_v49  ;;  %v1103_v44 = vpop.permute.xlu1 %1102  ;;  %v1092_v37 = vadd.f32 %v16134_v15, %v1016_v35  ;;  %v16153_v49 = vld [vmem:[#allocation60_spill] sm:$0xff] }
 0x11c   : > { %16129 = vst [vmem:[#allocation74_spill] sm:$0xff] %v9681_v46  ;;  %16130 = vst [vmem:[#allocation75_spill] sm:$0xff] %v9684_v42  ;;  %v1914_v2 = vadd.f32 %v16135_v4, %v1838_v13  ;;  %v1495_v51 = vadd.f32 %v1487_v33, %v1406_v17  ;;  %v2303_v48 = vmul.f32 %v2277_v7, %v9396_v30  ;;  %v16136_v57 = vrot.slane %v8554_v1, 5 }
 0x11d   : > { %16131 = vst [vmem:[#allocation76_spill] sm:$0xff] %v9688_v39  ;;  %v9696_v10 = vpop.permute.xlu0 %719  ;;  %v1113_v28 = vsel %vm1110_vm2, %v9420_v50, %v1103_v44  ;;  %v1114_v5 = vsel %vm1110_vm2, %v1103_v44, %v9569_v34  ;;  %v16137_v22 = vrot.slane %v8569_v62, 5  ;;  %v16138_v35 = vrot.slane %v16041_v60, 6 }
 0x11e   : > { %v1145_v0 = vmul.f32 %v16136_v57, %v1113_v28  ;;  %v16139_v15 = vrot.slane %v8739_v31, 6  ;;  %v1587_v33 = vadd.f32 %v1579_v29, %v1495_v51  ;;  %v16140_v7 = vrot.slane %v16043_v27, 7  ;;  %v9721_v57 = vld [vmem:[%s15156_s4 + $0xe0] sm:$0x7] }
 0x11f   : > { %v1146_v55 = vmul.f32 %v16137_v22, %v1114_v5  ;;  %v1944_v13 = vmul.f32 %v16138_v35, %v1113_v28  ;;  %v16141_v50 = vrot.slane %v16085_v18, 7  ;;  %v726_v44 = vsel %vm721_vm3, %v9593_v58, %v9696_v10  ;;  %16142 = vst [vmem:[#allocation38_spill] sm:$0xff] %v9721_v57  ;;  %v825_v27 = vpop.permute.xlu1 %824  ;;  %v16149_v57 = vld [vmem:[#allocation25_spill] sm:$0xff] }
 0x120   : > { %v1945_v17 = vmul.f32 %v16139_v15, %v1114_v5  ;;  %v2644_v4 = vmul.f32 %v16140_v7, %v1113_v28  ;;  %v1172_v22 = vrot.slane %v1145_v0, %v8348_v11  ;;  %v2620_v51 = vadd.f32 %v9448_v43, %v2544_v38  ;;  %v9733_v7 = vld [vmem:[%s15156_s4 + $0xe8] sm:$0x7]  ;;  %v16144_v0 = vld [vmem:[#allocation14_spill] sm:$0xff] }
 0x121   : > { %v2645_v39 = vmul.f32 %v16141_v50, %v1114_v5  ;;  %v1176_v35 = vrot.slane %v1146_v55, %v8348_v11  ;;  %v2233_v28 = vadd.f32 %v2225_v16, %v2143_v26  ;;  %v1965_v5 = vrot.slane %v1944_v13, %v8348_v11  ;;  %16143 = vst [vmem:[#allocation27_spill] sm:$0xff] %v9733_v7  ;;  %v16145_v55 = vld [vmem:[#allocation12_spill] sm:$0xff]  ;;  %v9754_v16 = vpop.permute.xlu0 %828 }
 0x122   : > { %v1969_v15 = vrot.slane %v1945_v17, %v8348_v11  ;;  %v2659_v58 = vrot.slane %v2644_v4, %v8348_v11  ;;  %v9736_v50 = vadd.f32 %v16144_v0, %v698_v59  ;;  %v16146_v43 = vrot.slane %v16145_v55, 1 }
 0x123   : > { %v2311_v13 = vadd.f32 %v2303_v48, %v2233_v28  ;;  %v2663_v17 = vrot.slane %v2645_v39, %v8348_v11  ;;  %v16148_v4 = vrot.slane %v16102_v14, 2  ;;  %v1671_v42 = vadd.f32 %v16149_v57, %v1587_v33  ;;  %v9756_v48 = vpop.permute.xlu1 %1207  ;;  %v16154_v39 = vld [vmem:[#allocation52_spill] sm:$0xff] }
 0x124   : > { %v765_v38 = vmul.f32 %v16146_v43, %v726_v44  ;;  %v1189_v46 = vmul.f32 %v1172_v22, %v16150_v36  ;;  %v9748_v59 = vmul.f32 %v1176_v35, %v16150_v36  ;;  %v16152_v0 = vrot.slane %v8941_v20, 3 }
 0x125   : > { %v1621_v34 = vmul.f32 %v16148_v4, %v726_v44  ;;  %v833_v29 = vsel %vm830_vm5, %v16153_v49, %v825_v27  ;;  %v1988_v28 = vmul.f32 %v1965_v5, %v16154_v39  ;;  %v9760_v4 = vmul.f32 %v1969_v15, %v16154_v39 }
 0x126   : > { %16151 = vst [vmem:[#allocation14_spill] sm:$0xff] %v9748_v59  ;;  %v2339_v43 = vmul.f32 %v16152_v0, %v726_v44  ;;  %v2688_v33 = vmul.f32 %v2659_v58, %v9673_v52  ;;  %v834_v57 = vsel %vm830_vm5, %v825_v27, %v9621_v32  ;;  %v801_v22 = vrot.slane %v765_v38, %v8348_v11 }
 0x127   : > { %16155 = vst [vmem:[#allocation12_spill] sm:$0xff] %v9760_v4  ;;  %v16156_v44 = vrot.slane %v8569_v62, 2  ;;  %v16157_v49 = vrot.slane %v16056_v3, 2  ;;  %v16158_v7 = vrot.slane %v8739_v31, 3  ;;  %v9773_v5 = vmul.f32 %v2663_v17, %v9673_v52  ;;  %v926_v59 = vpop.permute.xlu1 %925 }
 0x128   : > { %v1651_v15 = vrot.slane %v1621_v34, %v8348_v11  ;;  %v16160_v58 = vrot.slane %v8842_v53, 3  ;;  %v16161_v27 = vrot.slane %v16085_v18, 4  ;;  %v2363_v4 = vrot.slane %v2339_v43, %v8348_v11 }
 0x129   : > { %v864_v35 = vmul.f32 %v16156_v44, %v833_v29  ;;  %v865_v0 = vmul.f32 %v16157_v49, %v834_v57  ;;  %v1703_v36 = vmul.f32 %v16158_v7, %v833_v29  ;;  %16159 = vst [vmem:[#allocation25_spill] sm:$0xff] %v9773_v5  ;;  %v16162_v39 = vrot.slane %v8852_v9, 4 }
 0x12a   : > { %v1704_v26 = vmul.f32 %v16160_v58, %v834_v57  ;;  %v2415_v38 = vmul.f32 %v16161_v27, %v833_v29  ;;  %v9785_v17 = vadd.f32 %v1189_v46, %v1092_v37  ;;  %v835_v29 = vsel %vm830_vm5, %v9621_v32, %v9754_v16 }
 0x12b   : > { %v894_v44 = vrot.slane %v864_v35, %v8348_v11  ;;  %v898_v49 = vrot.slane %v865_v0, %v8348_v11  ;;  %v2416_v7 = vmul.f32 %v16162_v39, %v834_v57  ;;  %v1727_v34 = vrot.slane %v1703_v36, %v8348_v11  ;;  %v9800_v57 = vpop.permute.xlu0 %929  ;;  %v16169_v0 = vld [vmem:[#allocation67_spill] sm:$0xff] }
 0x12c   : > { %v1731_v5 = vrot.slane %v1704_v26, %v8348_v11  ;;  %v9792_v58 = vadd.f32 %v1988_v28, %v1914_v2  ;;  %v9794_v43 = vadd.f32 %v2688_v33, %v2620_v51  ;;  %v9797_v35 = vmul.f32 %v801_v22, %v16097_v12  ;;  %v9818_v22 = vpop.permute.xlu1 %1312 }
 0x12d   : > { %v2433_v39 = vrot.slane %v2415_v38, %v8348_v11  ;;  %v9803_v46 = vmul.f32 %v1651_v15, %v16100_v19  ;;  %v2389_v36 = vadd.f32 %v9580_v56, %v2311_v13  ;;  %v16164_v37 = vrot.slane %v16145_v55, 2 }
 0x12e   : > { %v16165_v32 = vrot.slane %v16102_v14, 3  ;;  %v9811_v51 = vmul.f32 %v2363_v4, %v16101_v63  ;;  %v908_v12 = vmul.f32 %v894_v44, %v8473_v21  ;;  %v9815_v28 = vmul.f32 %v898_v49, %v8473_v21 }
 0x12f   : > { %16163 = vst [vmem:[#allocation60_spill] sm:$0xff] %v9803_v46  ;;  %v866_v26 = vmul.f32 %v16164_v37, %v835_v29  ;;  %v2437_v33 = vrot.slane %v2416_v7, %v8348_v11  ;;  %v1747_v56 = vmul.f32 %v1727_v34, %v8818_v45  ;;  %v9822_v13 = vmul.f32 %v1731_v5, %v8818_v45 }
 0x130   : > { %v1705_v2 = vmul.f32 %v16165_v32, %v835_v29  ;;  %16166 = vst [vmem:[#allocation77_spill] sm:$0xff] %v9811_v51  ;;  %16167 = vst [vmem:[#allocation78_spill] sm:$0xff] %v9815_v28  ;;  %v1218_v15 = vsel %vm1215_vm4, %v16169_v0, %v9756_v48  ;;  %v936_v4 = vsel %vm931_vm7, %v9647_v61, %v9800_v57  ;;  %v16170_v38 = vrot.slane %v8941_v20, 4  ;;  %v16173_v0 = vld [vmem:[#allocation50_spill] sm:$0xff] }
 0x131   : > { %16168 = vst [vmem:[#allocation79_spill] sm:$0xff] %v9822_v13  ;;  %v2459_v27 = vmul.f32 %v2433_v39, %v16118_v6  ;;  %v16171_v49 = vrot.slane %v8554_v1, 6  ;;  %v16172_v34 = vrot.slane %v16041_v60, 7  ;;  %v902_v37 = vrot.slane %v866_v26, %v8348_v11 }
 0x132   : > { %v2417_v44 = vmul.f32 %v16170_v38, %v835_v29  ;;  %v1735_v32 = vrot.slane %v1705_v2, %v8348_v11  ;;  %v2704_v51 = vmul.f32 %v1218_v15, %v16173_v0  ;;  %v16174_v46 = vrot.slane %v16145_v55, 3  ;;  %v16179_v55 = vld [vmem:[#allocation45_spill] sm:$0xff] }
 0x133   : > { %v1250_v7 = vmul.f32 %v16171_v49, %v1218_v15  ;;  %v2026_v5 = vmul.f32 %v16172_v34, %v1218_v15  ;;  %v9843_v39 = vmul.f32 %v2437_v33, %v16118_v6  ;;  %v16176_v49 = vrot.slane %v16102_v14, 4  ;;  %v9849_v34 = vpop.permute.xlu1 %1417 }
 0x134   : > { %v967_v52 = vmul.f32 %v16174_v46, %v936_v4  ;;  %16177 = vst [vmem:[#allocation50_spill] sm:$0xff] %v9849_v34  ;;  %v916_v26 = vadd.f32 %v908_v12, %v9736_v50  ;;  %v1755_v2 = vadd.f32 %v1747_v56, %v1671_v42  ;;  %v16178_v15 = vrot.slane %v8941_v20, 5  ;;  %v16182_v56 = vld [vmem:[#allocation13_spill] sm:$0xff] }
 0x135   : > { %16175 = vst [vmem:[#allocation67_spill] sm:$0xff] %v9843_v39  ;;  %v1277_v29 = vrot.slane %v1250_v7, %v8348_v11  ;;  %v2047_v38 = vrot.slane %v2026_v5, %v8348_v11  ;;  %v1789_v60 = vmul.f32 %v16176_v49, %v936_v4  ;;  %v934_v46 = vsel %vm931_vm7, %v16179_v55, %v926_v59  ;;  %v9860_v49 = vpop.permute.xlu0 %1500 }
 0x136   : > { %v2495_v13 = vmul.f32 %v16178_v15, %v936_v4  ;;  %v2467_v33 = vadd.f32 %v2459_v27, %v2389_v36  ;;  %v2441_v39 = vrot.slane %v2417_v44, %v8348_v11  ;;  %v2719_v7 = vrot.slane %v2704_v51, %v8348_v11  ;;  %v16183_v27 = vld [vmem:[#allocation48_spill] sm:$0xff] }
 0x137   : > { %v935_v5 = vsel %vm931_vm7, %v926_v59, %v9647_v61  ;;  %v9863_v28 = vmul.f32 %v902_v37, %v8473_v21  ;;  %v9866_v42 = vmul.f32 %v1735_v32, %v8818_v45  ;;  %v1003_v50 = vrot.slane %v967_v52, %v8348_v11  ;;  %v9876_v15 = vpop.permute.xlu1 %631 }
 0x138   : > { %v16181_v12 = vrot.slane %v8569_v62, 3  ;;  %v1294_v4 = vmul.f32 %v1277_v29, %v16182_v56  ;;  %v2070_v51 = vmul.f32 %v2047_v38, %v16183_v27  ;;  %v1819_v44 = vrot.slane %v1789_v60, %v8348_v11  ;;  %v16188_v38 = vld [vmem:[#allocation37_spill] sm:$0xff] }
 0x139   : > { %16180 = vst [vmem:[#allocation45_spill] sm:$0xff] %v9866_v42  ;;  %v16184_v61 = vrot.slane %v16056_v3, 3  ;;  %v2519_v21 = vrot.slane %v2495_v13, %v8348_v11  ;;  %v16185_v52 = vrot.slane %v8739_v31, 4  ;;  %v16186_v55 = vrot.slane %v8842_v53, 4 }
 0x13a   : > { %v965_v36 = vmul.f32 %v16181_v12, %v934_v46  ;;  %v9885_v29 = vmul.f32 %v2441_v39, %v16118_v6  ;;  %v2748_v60 = vmul.f32 %v2719_v7, %v16188_v38  ;;  %v16189_v42 = vrot.slane %v16085_v18, 5  ;;  %v16198_v38 = vld [vmem:[#allocation59_spill] sm:$0xff] }
 0x13b   : > { %v966_v59 = vmul.f32 %v16184_v61, %v935_v5  ;;  %v1787_v32 = vmul.f32 %v16185_v52, %v934_v46  ;;  %v1788_v12 = vmul.f32 %v16186_v55, %v935_v5  ;;  %v1504_v13 = vsel %vm635_vm1, %v9675_v40, %v9860_v49 }
 0x13c   : > { %v995_v37 = vrot.slane %v965_v36, %v8348_v11  ;;  %16187 = vst [vmem:[#allocation13_spill] sm:$0xff] %v9885_v29  ;;  %v2493_v61 = vmul.f32 %v16189_v42, %v934_v46  ;;  %v9894_v36 = vmul.f32 %v1003_v50, %v8487_v25  ;;  %v16191_v55 = vrot.slane %v8852_v9, 5  ;;  %v9906_v42 = vpop.permute.xlu0 %1592 }
 0x13d   : > { %v999_v52 = vrot.slane %v966_v59, %v8348_v11  ;;  %v1811_v3 = vrot.slane %v1787_v32, %v8348_v11  ;;  %v9901_v29 = vmul.f32 %v1819_v44, %v9003_v54  ;;  %v1815_v46 = vrot.slane %v1788_v12, %v8348_v11  ;;  %16193 = vst [vmem:[#allocation81_spill] sm:$0xff] %v9906_v42  ;;  %v9915_v44 = vpop.permute.xlu1 %2927 }
 0x13e   : > { %16190 = vst [vmem:[#allocation48_spill] sm:$0xff] %v9894_v36  ;;  %v2494_v39 = vmul.f32 %v16191_v55, %v935_v5  ;;  %v1009_v18 = vmul.f32 %v995_v37, %v8487_v25  ;;  %v2511_v7 = vrot.slane %v2493_v61, %v8348_v11  ;;  %v1302_v50 = vadd.f32 %v1294_v4, %v9785_v17 }
 0x13f   : > { %16192 = vst [vmem:[#allocation80_spill] sm:$0xff] %v9901_v29  ;;  %v2078_v59 = vadd.f32 %v2070_v51, %v9792_v58  ;;  %v9911_v32 = vmul.f32 %v2519_v21, %v16127_v23  ;;  %v16195_v5 = vrot.slane %v16109_v8, 1  ;;  %v2756_v37 = vadd.f32 %v2748_v60, %v9794_v43  ;;  %v16196_v29 = vld [vmem:[#allocation49_spill] sm:$0xff] }
 0x140   : > { %v1831_v12 = vmul.f32 %v1811_v3, %v9003_v54  ;;  %v16197_v61 = vrot.slane %v16196_v29, 2  ;;  %v1323_v17 = vsel %vm1320_vm6, %v16198_v38, %v9818_v22  ;;  %v9925_v58 = vmul.f32 %v999_v52, %v8487_v25  ;;  %v8144_v60 = vld [vmem:[%s15156_s4 + $0x90] sm:$0xff] }
 0x141   : > { %16194 = vst [vmem:[#allocation82_spill] sm:$0xff] %v9911_v32  ;;  %v1538_v55 = vmul.f32 %v16195_v5, %v1504_v13  ;;  %v2515_v4 = vrot.slane %v2494_v39, %v8348_v11  ;;  %v2537_v51 = vmul.f32 %v2511_v7, %v16127_v23  ;;  %v16200_v21 = vrot.slane %v8554_v1, 7 }
 0x142   : > { %v2262_v36 = vmul.f32 %v16197_v61, %v1504_v13  ;;  %16199 = vst [vmem:[#allocation49_spill] sm:$0xff] %v9925_v58  ;;  %v1017_v43 = vadd.f32 %v1009_v18, %v916_v26  ;;  %v9932_v3 = vmul.f32 %v1815_v46, %v9003_v54  ;;  %v2092_v13 = vmul.f32 %v8144_v60, %v1323_v17  ;;  %v16203_v26 = vld [vmem:[#allocation17_spill] sm:$0xff]  ;;  %v16204_v60 = vld [vmem:[#allocation15_spill] sm:$0xff] }
 0x143   : > { %v1355_v5 = vmul.f32 %v16200_v21, %v1323_v17  ;;  %v16202_v38 = vrot.slane %v16173_v0, 1  ;;  %v1571_v52 = vrot.slane %v1538_v55, %v8348_v11  ;;  %v1596_v1 = vsel %vm721_vm3, %v9696_v10, %v9906_v42  ;;  %v8145_v10 = vld [vmem:[%s15156_s4 + $0x60] sm:$0xff] }
 0x144   : > { %16201 = vst [vmem:[#allocation59_spill] sm:$0xff] %v9932_v3  ;;  %v1428_v18 = vsel %vm1425_vm8, %v16203_v26, %v9849_v34  ;;  %v1839_v46 = vadd.f32 %v1831_v12, %v1755_v2  ;;  %v2289_v7 = vrot.slane %v2262_v36, %v8348_v11  ;;  %v2113_v61 = vrot.slane %v2092_v13, %v8348_v11  ;;  %v9958_v2 = vpop.permute.xlu1 %1209  ;;  %v16206_v36 = vld [vmem:[#allocation51_spill] sm:$0xff] }
 0x145   : > { %v2788_v25 = vmul.f32 %v16202_v38, %v1323_v17  ;;  %v1382_v39 = vrot.slane %v1355_v5, %v8348_v11  ;;  %v9950_v17 = vpop.permute.xlu0 %1676  ;;  %v2545_v55 = vadd.f32 %v2537_v51, %v2467_v33  ;;  %v16205_v38 = vrot.slane %v16109_v8, 2  ;;  %v16210_v58 = vld [vmem:[#allocation39_spill] sm:$0xff] }
 0x146   : > { %v1444_v26 = vmul.f32 %v8145_v10, %v1428_v18  ;;  %v2136_v12 = vmul.f32 %v2113_v61, %v16206_v36  ;;  %v16207_v13 = vrot.slane %v16196_v29, 3  ;;  %v16208_v3 = vrot.slane %v8852_v9, 1  ;;  %v16212_v10 = vld [vmem:[#allocation66_spill] sm:$0xff]  ;;  %v16213_v61 = vld [vmem:[#allocation29_spill] sm:$0xff] }
 0x147   : > { %v2803_v21 = vrot.slane %v2788_v25, %v8348_v11  ;;  %v1399_v5 = vmul.f32 %v1382_v39, %v16204_v60  ;;  %v1622_v32 = vmul.f32 %v16205_v38, %v1596_v1  ;;  %v16209_v51 = vrot.slane %v16173_v0, 2 }
 0x148   : > { %v2340_v25 = vmul.f32 %v16207_v13, %v1596_v1  ;;  %v2182_v33 = vmul.f32 %v16208_v3, %v1428_v18  ;;  %v9968_v38 = vadd.f32 %v16210_v58, %v1017_v43  ;;  %v9971_v60 = vmul.f32 %v2515_v4, %v16127_v23  ;;  %v16216_v58 = vld [vmem:[#allocation33_spill] sm:$0xff] }
 0x149   : > { %v2864_v39 = vmul.f32 %v16209_v51, %v1428_v18  ;;  %v2832_v42 = vmul.f32 %v2803_v21, %v16212_v10  ;;  %v1471_v34 = vrot.slane %v1444_v26, %v8348_v11  ;;  %v9976_v36 = vadd.f32 %v16213_v61, %v1839_v46  ;;  %v9997_v51 = vpop.permute.xlu0 %1760 }
 0x14a   : > { %16211 = vst [vmem:[#allocation17_spill] sm:$0xff] %v9971_v60  ;;  %v9979_v1 = vmul.f32 %v1571_v52, %v8708_v24  ;;  %v9982_v3 = vmul.f32 %v2289_v7, %v9396_v30  ;;  %v9986_v43 = vadd.f32 %v16216_v58, %v2545_v55  ;;  %v1407_v4 = vadd.f32 %v1399_v5, %v1302_v50  ;;  %v16217_v7 = vld [vmem:[#allocation73_spill] sm:$0xff]  ;;  %v10006_v5 = vpop.permute.xlu1 %1314  ;;  %v16228_v60 = vld [vmem:[#allocation10_spill] sm:$0xff] }
 0x14b   : > { %v2879_v0 = vrot.slane %v2864_v39, %v8348_v11  ;;  %v1655_v18 = vrot.slane %v1622_v32, %v8348_v11  ;;  %v1680_v21 = vsel %vm830_vm5, %v9754_v16, %v9950_v17  ;;  %v2144_v46 = vadd.f32 %v2136_v12, %v2078_v59  ;;  %16218 = vst [vmem:[#allocation29_spill] sm:$0xff] %v9997_v51  ;;  %v8146_v16 = vld [vmem:[%s15156_s4 + $0x30] sm:$0xff] }
 0x14c   : > { %16214 = vst [vmem:[#allocation39_spill] sm:$0xff] %v9979_v1  ;;  %16215 = vst [vmem:[#allocation66_spill] sm:$0xff] %v9982_v3  ;;  %v2367_v26 = vrot.slane %v2340_v25, %v8348_v11  ;;  %v2203_v52 = vrot.slane %v2182_v33, %v8348_v11  ;;  %v639_v13 = vsel %vm635_vm1, %v16217_v7, %v9876_v15  ;;  %v16219_v12 = vld [vmem:[#allocation36_spill] sm:$0xff]  ;;  %v16220_v33 = vrot.slane %v16109_v8, 3 }
 0x14d   : > { %v2840_v55 = vadd.f32 %v2832_v42, %v2756_v37  ;;  %v1488_v50 = vmul.f32 %v1471_v34, %v8767_v41  ;;  %v640_v32 = vsel %vm635_vm1, %v9876_v15, %v9675_v40  ;;  %v654_v59 = vmul.f32 %v8146_v16, %v639_v13  ;;  %v16222_v34 = vld [vmem:[#allocation54_spill] sm:$0xff] }
 0x14e   : > { %v2908_v25 = vmul.f32 %v2879_v0, %v16219_v12  ;;  %v1706_v39 = vmul.f32 %v16220_v33, %v1680_v21  ;;  %v16221_v42 = vrot.slane %v16196_v29, 4  ;;  %v655_v61 = vmul.f32 %v16222_v34, %v640_v32 }
 0x14f   : > { %v688_v58 = vrot.slane %v654_v59, %v8348_v11  ;;  %v16223_v40 = vrot.slane %v8842_v53, 1  ;;  %v16224_v7 = vrot.slane %v16102_v14, 1  ;;  %v16225_v3 = vrot.slane %v8852_v9, 2 }
 0x150   : > { %v2418_v37 = vmul.f32 %v16221_v42, %v1680_v21  ;;  %v10022_v0 = vmul.f32 %v1655_v18, %v16100_v19  ;;  %v2226_v33 = vmul.f32 %v2203_v52, %v9158_v47  ;;  %v692_v21 = vrot.slane %v655_v61, %v8348_v11 }
 0x151   : > { %v1536_v15 = vmul.f32 %v16223_v40, %v639_v13  ;;  %v1537_v16 = vmul.f32 %v16224_v7, %v640_v32  ;;  %v2260_v1 = vmul.f32 %v16225_v3, %v639_v13  ;;  %v16227_v42 = vrot.slane %v8941_v20, 2  ;;  %v10036_v13 = vpop.permute.xlu0 %1920 }
 0x152   : > { %16226 = vst [vmem:[#allocation33_spill] sm:$0xff] %v10022_v0  ;;  %v1496_v59 = vadd.f32 %v1488_v50, %v1407_v4  ;;  %v699_v53 = vmul.f32 %v688_v58, %v16228_v60  ;;  %v2916_v14 = vadd.f32 %v2908_v25, %v2840_v55  ;;  %v1739_v3 = vrot.slane %v1706_v39, %v8348_v11 }
 0x153   : > { %v2261_v34 = vmul.f32 %v16227_v42, %v640_v32  ;;  %v1563_v40 = vrot.slane %v1536_v15, %v8348_v11  ;;  %v2281_v7 = vrot.slane %v2260_v1, %v8348_v11  ;;  %v700_v18 = vmul.f32 %v692_v21, %v16228_v60  ;;  %v10042_v1 = vpop.permute.xlu1 %1419  ;;  %v16231_v15 = vld [vmem:[#allocation74_spill] sm:$0xff] }
 0x154   : > { %v1764_v52 = vsel %vm931_vm7, %v9800_v57, %v9997_v51  ;;  %v2445_v32 = vrot.slane %v2418_v37, %v8348_v11  ;;  %v1567_v4 = vrot.slane %v1537_v16, %v8348_v11  ;;  %v2234_v55 = vadd.f32 %v2226_v33, %v2144_v46  ;;  %v16234_v33 = vld [vmem:[#allocation43_spill] sm:$0xff]  ;;  %v16243_v51 = vld [vmem:[#allocation76_spill] sm:$0xff] }
 0x155   : > { %v1580_v50 = vmul.f32 %v1563_v40, %v8708_v24  ;;  %v2304_v61 = vmul.f32 %v2281_v7, %v9396_v30  ;;  %v2285_v25 = vrot.slane %v2261_v34, %v8348_v11  ;;  %v16229_v60 = vrot.slane %v16109_v8, 4 }
 0x156   : > { %v16230_v57 = vrot.slane %v16196_v29, 5  ;;  %v816_v21 = vadd.f32 %v16231_v15, %v699_v53  ;;  %v817_v37 = vadd.f32 %v9797_v35, %v700_v18  ;;  %v1925_v42 = vsel %vm1110_vm2, %v10036_v13, 0.0  ;;  %v16237_v18 = vld [vmem:[#allocation16_spill] sm:$0xff] }
 0x157   : > { %v1790_v39 = vmul.f32 %v16229_v60, %v1764_v52  ;;  %v1588_v16 = vadd.f32 %v1580_v50, %v1496_v59  ;;  %v10054_v40 = vmul.f32 %v2367_v26, %v16101_v63  ;;  %v10057_v46 = vmul.f32 %v1739_v3, %v8818_v45  ;;  %v16268_v45 = vld [vmem:[#allocation15_spill] sm:$0xff] }
 0x158   : > { %v2496_v58 = vmul.f32 %v16230_v57, %v1764_v52  ;;  %v2312_v34 = vadd.f32 %v2304_v61, %v2234_v55  ;;  %v16235_v7 = vrot.slane %v16234_v33, 6  ;;  %v10062_v52 = vmul.f32 %v2445_v32, %v16118_v6  ;;  %v1503_v55 = vpop.permute.xlu0 %1502  ;;  %v16239_v57 = vld [vmem:[#allocation78_spill] sm:$0xff] }
 0x159   : > { %16232 = vst [vmem:[#allocation73_spill] sm:$0xff] %v10054_v40  ;;  %16233 = vst [vmem:[#allocation36_spill] sm:$0xff] %v10057_v46  ;;  %v10065_v53 = vmul.f32 %v1567_v4, %v8708_v24  ;;  %v1823_v35 = vrot.slane %v1790_v39, %v8348_v11  ;;  %v2930_v59 = vadd.f32 %v9915_v44, %v2916_v14  ;;  %v16238_v50 = vrot.slane %v16237_v18, 7  ;;  %v16241_v14 = vld [vmem:[#allocation75_spill] sm:$0xff]  ;;  %v16266_v40 = vld [vmem:[#allocation50_spill] sm:$0xff] }
 0x15a   : > { %v1949_v60 = vmul.f32 %v16235_v7, %v1925_v42  ;;  %16236 = vst [vmem:[#allocation10_spill] sm:$0xff] %v10062_v52  ;;  %v10070_v26 = vmul.f32 %v2285_v25, %v9396_v30  ;;  %v2523_v3 = vrot.slane %v2496_v58, %v8348_v11  ;;  %v1219_v32 = vsel %vm1215_vm4, %v9756_v48, %v9958_v2  ;;  %v10087_v58 = vpop.permute.xlu1 %1106  ;;  %v16244_v48 = vld [vmem:[#allocation14_spill] sm:$0xff] }
 0x15b   : > { %v2649_v61 = vmul.f32 %v16238_v50, %v1925_v42  ;;  %v10079_v4 = vadd.f32 %v16239_v57, %v816_v21  ;;  %v10082_v39 = vadd.f32 %v9863_v28, %v817_v37  ;;  %v1672_v15 = vadd.f32 %v16241_v14, %v1588_v16  ;;  %v16247_v16 = vld [vmem:[#allocation63_spill] sm:$0xff] }
 0x15c   : > { %v16242_v25 = vrot.slane %v8569_v62, 6  ;;  %v2390_v42 = vadd.f32 %v16243_v51, %v2312_v34  ;;  %v1985_v50 = vrot.slane %v1949_v60, %v8348_v11  ;;  %v1198_v52 = vadd.f32 %v16244_v48, %v9968_v38  ;;  %v16249_v60 = vld [vmem:[#allocation79_spill] sm:$0xff] }
 0x15d   : > { %16240 = vst [vmem:[#allocation74_spill] sm:$0xff] %v10082_v39  ;;  %v16245_v21 = vrot.slane %v8739_v31, 7  ;;  %v10096_v28 = vmul.f32 %v1823_v35, %v9003_v54  ;;  %v2705_v14 = vmul.f32 %v1219_v32, %v16247_v16  ;;  %v10103_v51 = vmul.f32 %v2523_v3, %v16127_v23  ;;  %v16253_v3 = vld [vmem:[#allocation52_spill] sm:$0xff] }
 0x15e   : > { %v1251_v7 = vmul.f32 %v16242_v25, %v1219_v32  ;;  %v1505_v25 = vsel %vm635_vm1, %v9860_v49, %v1503_v55  ;;  %v2679_v34 = vrot.slane %v2649_v61, %v8348_v11  ;;  %v2241_v31 = vsel %vm635_vm1, %v1503_v55, 0.0  ;;  %v16252_v49 = vld [vmem:[#allocation67_spill] sm:$0xff]  ;;  %v1595_v55 = vpop.permute.xlu0 %1594 }
 0x15f   : > { %v2027_v57 = vmul.f32 %v16245_v21, %v1219_v32  ;;  %16246 = vst [vmem:[#allocation43_spill] sm:$0xff] %v10096_v28  ;;  %16248 = vst [vmem:[#allocation16_spill] sm:$0xff] %v10103_v51  ;;  %v10109_v48 = vadd.f32 %v16249_v60, %v1672_v15  ;;  %v16250_v35 = vrot.slane %v16234_v33, 1  ;;  %v16251_v32 = vrot.slane %v16237_v18, 2  ;;  %v16255_v15 = vld [vmem:[#allocation12_spill] sm:$0xff] }
 0x160   : > { %v1281_v37 = vrot.slane %v1251_v7, %v8348_v11  ;;  %vm2938_vm9 = vcmp.ge.f32.partialorder %v2930_v59, 0.0  ;;  %v10116_v54 = vadd.f32 %v16252_v49, %v2390_v42  ;;  %v10119_v23 = vmul.f32 %v1985_v50, %v16253_v3  ;;  %v16258_v50 = vld [vmem:[#allocation24_spill] sm:$0xff]  ;;  %v16260_v49 = vld [vmem:[#allocation25_spill] sm:$0xff] }
 0x161   : > { %v2051_v38 = vrot.slane %v2027_v57, %v8348_v11  ;;  %v1539_v7 = vmul.f32 %v16250_v35, %v1505_v25  ;;  %v2263_v21 = vmul.f32 %v16251_v32, %v1505_v25  ;;  %v2946_v57 = vmul.f32 0.01, %v2930_v59  ;;  %v16256_v35 = vld [vmem:[#allocation53_spill] sm:$0xff]  ;;  %v10130_v25 = vpop.permute.xlu1 %1211 }
 0x162   : > { %16254 = vst [vmem:[#allocation78_spill] sm:$0xff] %v10119_v23  ;;  %v1295_v61 = vmul.f32 %v1281_v37, %v16182_v56  ;;  %v1997_v60 = vadd.f32 %v16255_v15, %v9976_v36  ;;  %v2723_v51 = vrot.slane %v2705_v14, %v8348_v11  ;;  %v16257_v28 = vrot.slane %v16256_v35, 2 }
 0x163   : > { %v1324_v42 = vsel %vm1320_vm6, %v9818_v22, %v10006_v5  ;;  %v10133_v32 = vmul.f32 %v2679_v34, %v16258_v50  ;;  %v2071_v37 = vmul.f32 %v2051_v38, %v16183_v27  ;;  %v2697_v23 = vadd.f32 %v16260_v49, %v9986_v43  ;;  %v10151_v38 = vld [vmem:[%s15156_s4 + $0xb8] sm:$0xff] }
 0x164   : > { %v2264_v46 = vmul.f32 %v16257_v28, %v2241_v31  ;;  %v10138_v36 = vsel %vm2938_vm9, %v2930_v59, %v2946_v57  ;;  %v1575_v14 = vrot.slane %v1539_v7, %v8348_v11  ;;  %v2293_v28 = vrot.slane %v2263_v21, %v8348_v11  ;;  %16263 = vst [vmem:[#allocation14_spill] sm:$0xff] %v10151_v38  ;;  %v8148_v31 = vld [vmem:[%s15156_s4 + $0x98] sm:$0xff] }
 0x165   : > { %16259 = vst [vmem:[#allocation75_spill] sm:$0xff] %v10133_v32  ;;  %16261 = vst [vmem:[#allocation76_spill] sm:$0xff] %v10138_v36  ;;  %3333 = vrot.lane.b32.xlu1 %v10138_v36, %s8218_s18  ;;  %3265 = vrot.lane.b32.xlu0 %v10138_v36, %s8215_s29  ;;  %v16262_v22 = vrot.slane %v8569_v62, 7  ;;  %v1303_v59 = vadd.f32 %v1295_v61, %v1198_v52  ;;  %v2093_v7 = vmul.f32 %v8148_v31, %v1324_v42  ;;  %v16265_v62 = vld [vmem:[#allocation37_spill] sm:$0xff] }
 0x166   : > { %v16264_v21 = vrot.slane %v16247_v16, 1  ;;  %v2319_v15 = vsel %vm721_vm3, %v1595_v55, 0.0  ;;  %v2749_v49 = vmul.f32 %v2723_v51, %v16265_v62  ;;  %v1429_v52 = vsel %vm1425_vm8, %v16266_v40, %v10042_v1  ;;  %v16267_v31 = vld [vmem:[#allocation81_spill] sm:$0xff]  ;;  %v10180_v40 = vpop.permute.xlu1 %1316 }
 0x167   : > { %v1356_v34 = vmul.f32 %v16262_v22, %v1324_v42  ;;  %v2297_v22 = vrot.slane %v2264_v46, %v8348_v11  ;;  %v2117_v61 = vrot.slane %v2093_v7, %v8348_v11  ;;  %v1597_v38 = vsel %vm721_vm3, %v16267_v31, %v1595_v55  ;;  %v16270_v55 = vld [vmem:[#allocation38_spill] sm:$0xff] }
 0x168   : > { %v2789_v57 = vmul.f32 %v16264_v21, %v1324_v42  ;;  %v8149_v42 = vld [vmem:[%s15156_s4 + $0x68] sm:$0xff]  ;;  %v1679_v21 = vpop.permute.xlu0 %1678  ;;  %v2079_v46 = vadd.f32 %v2071_v37, %v1997_v60  ;;  %v16269_v0 = vrot.slane %v16256_v35, 3  ;;  %v10187_v60 = vmul.f32 %v2293_v28, %v9396_v30 }
 0x169   : > { %v1386_v32 = vrot.slane %v1356_v34, %v8348_v11  ;;  %v1445_v51 = vmul.f32 %v8149_v42, %v1429_v52  ;;  %2968 = vrot.lane.b32.xlu1 %v10138_v36, %s8216_s30  ;;  %3401 = vrot.lane.b32.xlu0 %v10138_v36, %s8221_s19  ;;  %v16273_v31 = vrot.slane %v16234_v33, 2  ;;  %v16274_v8 = vrot.slane %v8941_v20, 1 }
 0x16a   : > { %v2807_v43 = vrot.slane %v2789_v57, %v8348_v11  ;;  %v2342_v6 = vmul.f32 %v16269_v0, %v2319_v15  ;;  %v10184_v57 = vmul.f32 %v1575_v14, %v8708_v24  ;;  %16271 = vst [vmem:[#allocation63_spill] sm:$0xff] %v10187_v60  ;;  %v2757_v15 = vadd.f32 %v2749_v49, %v2697_v23 }
 0x16b   : > { %v1400_v34 = vmul.f32 %v1386_v32, %v16268_v45  ;;  %v16272_v32 = vld [vmem:[#allocation51_spill] sm:$0xff]  ;;  %v1475_v0 = vrot.slane %v1445_v51, %v8348_v11  ;;  %v10193_v42 = vmul.f32 %v16273_v31, %v1597_v38  ;;  %v2183_v39 = vmul.f32 %v16274_v8, %v1429_v52 }
 0x16c   : > { %v2137_v37 = vmul.f32 %v2117_v61, %v16272_v32  ;;  %v2397_v7 = vsel %vm830_vm5, %v1679_v21, 0.0  ;;  %v2833_v24 = vmul.f32 %v2807_v43, %v16212_v10  ;;  %v16275_v14 = vrot.slane %v16237_v18, 3 }
 0x16d   : > { %v1489_v61 = vmul.f32 %v1475_v0, %v8767_v41  ;;  %v16276_v51 = vrot.slane %v16247_v16, 2  ;;  %v10207_v49 = vmul.f32 %v2297_v22, %v9396_v30  ;;  %v1408_v31 = vadd.f32 %v1400_v34, %v1303_v59  ;;  %3469 = vrot.lane.b32.xlu1 %v10138_v36, %s8224_s21 }
 0x16e   : > { %v10201_v28 = vmul.f32 %v16275_v14, %v1597_v38  ;;  %v2375_v60 = vrot.slane %v2342_v6, %v8348_v11  ;;  %v2207_v8 = vrot.slane %v2183_v39, %v8348_v11  ;;  %v2145_v43 = vadd.f32 %v2137_v37, %v2079_v46  ;;  %v16279_v6 = vld [vmem:[#allocation49_spill] sm:$0xff]  ;;  %v16280_v39 = vld [vmem:[#allocation71_spill] sm:$0xff]  ;;  %v10226_v46 = vpop.permute.xlu1 %1421 }
 0x16f   : > { %v2865_v23 = vmul.f32 %v16276_v51, %v1429_v52  ;;  %16277 = vst [vmem:[#allocation79_spill] sm:$0xff] %v10207_v49  ;;  %v1681_v0 = vsel %vm830_vm5, %v9950_v17, %v1679_v21  ;;  %v16278_v16 = vrot.slane %v16256_v35, 4  ;;  %v1497_v22 = vadd.f32 %v1489_v61, %v1408_v31  ;;  %v16283_v31 = vld [vmem:[#allocation11_spill] sm:$0xff]  ;;  %v16288_v17 = vld [vmem:[#allocation32_spill] sm:$0xff] }
 0x170   : > { %v2227_v59 = vmul.f32 %v2207_v8, %v9158_v47  ;;  %v1018_v34 = vadd.f32 %v16279_v6, %v10079_v4  ;;  %v1115_v14 = vsel %vm1110_vm2, %v16280_v39, %v10087_v58  ;;  %v2841_v37 = vadd.f32 %v2833_v24, %v2757_v15 }
 0x171   : > { %v2883_v38 = vrot.slane %v2865_v23, %v8348_v11  ;;  %v10218_v52 = vmul.f32 %v16278_v16, %v2397_v7  ;;  %v10234_v61 = vmul.f32 %v2375_v60, %v16101_v63  ;;  %v16282_v4 = vrot.slane %v16234_v33, 3 }
 0x172   : > { %v2235_v51 = vadd.f32 %v2227_v59, %v2145_v43  ;;  %v16284_v8 = vrot.slane %v16283_v31, 5  ;;  %v16285_v24 = vrot.slane %v16237_v18, 4  ;;  %v1589_v43 = vadd.f32 %v10065_v53, %v1497_v22  ;;  %v16287_v59 = vld [vmem:[#allocation40_spill] sm:$0xff]  ;;  %v16292_v22 = vld [vmem:[#allocation21_spill] sm:$0xff] }
 0x173   : > { %v2909_v7 = vmul.f32 %v2883_v38, %v16219_v12  ;;  %16281 = vst [vmem:[#allocation67_spill] sm:$0xff] %v10234_v61  ;;  %v10238_v23 = vmul.f32 %v16282_v4, %v1681_v0  ;;  %v16286_v38 = vld [vmem:[#allocation59_spill] sm:$0xff]  ;;  %v1094_v21 = vadd.f32 %v16287_v59, %v1018_v34  ;;  %v16289_v30 = vrot.slane %v16288_v17, 6  ;;  %v16297_v61 = vld [vmem:[#allocation65_spill] sm:$0xff] }
 0x174   : > { %v1147_v16 = vmul.f32 %v16284_v8, %v1115_v14  ;;  %v10244_v6 = vmul.f32 %v16285_v24, %v1681_v0  ;;  %v1840_v60 = vadd.f32 %v16286_v38, %v10109_v48  ;;  %v16290_v0 = vld [vmem:[#allocation17_spill] sm:$0xff]  ;;  %v16291_v24 = vrot.slane %v8852_v9, 7 }
 0x175   : > { %v2917_v15 = vadd.f32 %v2909_v7, %v2841_v37  ;;  %v1946_v8 = vmul.f32 %v16289_v30, %v1115_v14  ;;  %v2546_v7 = vadd.f32 %v16290_v0, %v10116_v54  ;;  %v1220_v48 = vsel %vm1215_vm4, %v9958_v2, %v10130_v25  ;;  %v16294_v54 = vld [vmem:[#allocation55_spill] sm:$0xff] }
 0x176   : > { %v1180_v4 = vrot.slane %v1147_v16, %v8348_v11  ;;  %v2646_v39 = vmul.f32 %v16291_v24, %v1115_v14  ;;  %v2313_v53 = vadd.f32 %v10070_v26, %v2235_v51  ;;  %v16293_v30 = vrot.slane %v16283_v31, 6  ;;  %v16295_v24 = vld [vmem:[#allocation47_spill] sm:$0xff] }
 0x177   : > { %v2931_v37 = vadd.f32 %v9915_v44, %v2917_v15  ;;  %v1973_v16 = vrot.slane %v1946_v8, %v8348_v11  ;;  %v1109_v15 = vpop.permute.xlu1 %1108  ;;  %v1916_v0 = vadd.f32 %v16294_v54, %v1840_v60  ;;  %v2622_v2 = vadd.f32 %v16295_v24, %v2546_v7 }
 0x178   : > { %v1191_v34 = vmul.f32 %v1180_v4, %v16292_v22  ;;  %v1252_v38 = vmul.f32 %v16293_v30, %v1220_v48  ;;  %v2667_v9 = vrot.slane %v2646_v39, %v8348_v11  ;;  %v16296_v51 = vrot.slane %v16288_v17, 7 }
 0x179   : > { %vm2939_vm10 = vcmp.ge.f32.partialorder %v2931_v37, 0.0  ;;  %v2947_v59 = vmul.f32 0.01, %v2931_v37  ;;  %v1990_v14 = vmul.f32 %v1973_v16, %v16253_v3  ;;  %v2706_v49 = vmul.f32 %v1220_v48, %v16297_v61 }
 0x17a   : > { %v1285_v26 = vrot.slane %v1252_v38, %v8348_v11  ;;  %v2028_v4 = vmul.f32 %v16296_v51, %v1220_v48  ;;  %v2690_v30 = vmul.f32 %v2667_v9, %v16258_v50  ;;  %v1325_v60 = vsel %vm1320_vm6, %v10006_v5, %v10180_v40  ;;  %v8150_v48 = vld [vmem:[%s15156_s4 + $0xa0] sm:$0xff] }
 0x17b   : > { %v10275_v8 = vsel %vm2939_vm10, %v2931_v37, %v2947_v59  ;;  %v1199_v39 = vadd.f32 %v1191_v34, %v1094_v21  ;;  %v16298_v38 = vrot.slane %v16283_v31, 7  ;;  %v1998_v17 = vadd.f32 %v1990_v14, %v1916_v0  ;;  %v10301_v0 = vpop.permute.xlu1 %1213 }
 0x17c   : > { %v1296_v16 = vmul.f32 %v1285_v26, %v16182_v56  ;;  %v2055_v7 = vrot.slane %v2028_v4, %v8348_v11  ;;  %3034 = vrot.lane.b32.xlu1 %v10275_v8, %s8217_s17  ;;  %v2727_v37 = vrot.slane %v2706_v49, %v8348_v11  ;;  %v2094_v59 = vmul.f32 %v8150_v48, %v1325_v60 }
 0x17d   : > { %v1357_v54 = vmul.f32 %v16298_v38, %v1325_v60  ;;  %v16299_v5 = vrot.slane %v16297_v61, 1  ;;  %2970 = vrot.lane.b32.xlu0 %v10275_v8, %s8216_s30  ;;  %v2698_v34 = vadd.f32 %v2690_v30, %v2622_v2  ;;  %v1430_v49 = vsel %vm1425_vm8, %v10042_v1, %v10226_v46  ;;  %v8151_v2 = vld [vmem:[%s15156_s4 + $0x70] sm:$0xff] }
 0x17e   : > { %v2072_v31 = vmul.f32 %v2055_v7, %v16183_v27  ;;  %v2750_v14 = vmul.f32 %v2727_v37, %v16265_v62  ;;  %v2121_v24 = vrot.slane %v2094_v59, %v8348_v11  ;;  %v1446_v51 = vmul.f32 %v8151_v2, %v1430_v49 }
 0x17f   : > { %v2790_v21 = vmul.f32 %v16299_v5, %v1325_v60  ;;  %v1390_v9 = vrot.slane %v1357_v54, %v8348_v11  ;;  %v1304_v4 = vadd.f32 %v1296_v16, %v1199_v39  ;;  %v16300_v60 = vrot.slane %v16196_v29, 1  ;;  %v16302_v39 = vld [vmem:[#allocation60_spill] sm:$0xff] }
 0x180   : > { %v16301_v1 = vrot.slane %v16297_v61, 2  ;;  %3098 = vrot.lane.b32.xlu1 %v10275_v8, %s8219_s12  ;;  %v2080_v54 = vadd.f32 %v2072_v31, %v1998_v17  ;;  %v2138_v37 = vmul.f32 %v2121_v24, %v16272_v32  ;;  %v1479_v59 = vrot.slane %v1446_v51, %v8348_v11  ;;  %v16303_v51 = vld [vmem:[#allocation54_spill] sm:$0xff] }
 0x181   : > { %v2811_v26 = vrot.slane %v2790_v21, %v8348_v11  ;;  %v1401_v30 = vmul.f32 %v1390_v9, %v16268_v45  ;;  %v2184_v7 = vmul.f32 %v16300_v60, %v1430_v49  ;;  %3032 = vrot.lane.b32.xlu0 %v10138_v36, %s8217_s17  ;;  %v1673_v16 = vadd.f32 %v16302_v39, %v1589_v43  ;;  %v16309_v39 = vld [vmem:[#allocation45_spill] sm:$0xff] }
 0x182   : > { %v2866_v38 = vmul.f32 %v16301_v1, %v1430_v49  ;;  %v2758_v5 = vadd.f32 %v2750_v14, %v2698_v34  ;;  %v2146_v49 = vadd.f32 %v2138_v37, %v2080_v54  ;;  %v1490_v17 = vmul.f32 %v1479_v59, %v8767_v41  ;;  %v10333_v34 = vpop.permute.xlu1 %1318  ;;  %v16305_v14 = vld [vmem:[#allocation77_spill] sm:$0xff] }
 0x183   : > { %v2834_v48 = vmul.f32 %v2811_v26, %v16212_v10  ;;  %v2211_v21 = vrot.slane %v2184_v7, %v8348_v11  ;;  %v1409_v9 = vadd.f32 %v1401_v30, %v1304_v4  ;;  %v1116_v31 = vsel %vm1110_vm2, %v10087_v58, %v1109_v15  ;;  %v16306_v58 = vld [vmem:[#allocation34_spill] sm:$0xff] }
 0x184   : > { %v2887_v61 = vrot.slane %v2866_v38, %v8348_v11  ;;  %v16304_v60 = vrot.slane %v16303_v51, 5  ;;  %3162 = vrot.lane.b32.xlu1 %v10275_v8, %s8222_s20  ;;  %v2391_v4 = vadd.f32 %v16305_v14, %v2313_v53  ;;  %v1922_v7 = vsel %vm1110_vm2, %v1109_v15, %v10036_v13  ;;  %v16310_v13 = vld [vmem:[#allocation39_spill] sm:$0xff] }
 0x185   : > { %v2842_v24 = vadd.f32 %v2834_v48, %v2758_v5  ;;  %v2228_v26 = vmul.f32 %v2211_v21, %v9158_v47  ;;  %v1498_v30 = vadd.f32 %v1490_v17, %v1409_v9  ;;  %v16307_v1 = vrot.slane %v16306_v58, 6  ;;  %3096 = vrot.lane.b32.xlu0 %v10138_v36, %s8219_s12  ;;  %v16311_v21 = vld [vmem:[#allocation74_spill] sm:$0xff] }
 0x186   : > { %v2910_v2 = vmul.f32 %v2887_v61, %v16219_v12  ;;  %v1148_v43 = vmul.f32 %v16304_v60, %v1116_v31  ;;  %v16308_v54 = vrot.slane %v10193_v42, %v8348_v11  ;;  %v1757_v53 = vadd.f32 %v16309_v39, %v1673_v16  ;;  %v16312_v61 = vld [vmem:[#allocation48_spill] sm:$0xff]  ;;  %v16313_v60 = vld [vmem:[#allocation66_spill] sm:$0xff] }
 0x187   : > { %v1947_v38 = vmul.f32 %v16307_v1, %v1116_v31  ;;  %v2236_v48 = vadd.f32 %v2228_v26, %v2146_v49  ;;  %v1743_v5 = vrot.slane %v10238_v23, %v8348_v11  ;;  %v1590_v15 = vadd.f32 %v16310_v13, %v1498_v30  ;;  %v16321_v39 = vld [vmem:[#allocation80_spill] sm:$0xff] }
 0x188   : > { %v10346_v37 = vmul.f32 %v16308_v54, %v16100_v19  ;;  %v2918_v59 = vadd.f32 %v2910_v2, %v2842_v24  ;;  %v1019_v9 = vadd.f32 %v16312_v61, %v16311_v21  ;;  %v1184_v17 = vrot.slane %v1148_v43, %v8348_v11  ;;  %v16314_v19 = vld [vmem:[#allocation35_spill] sm:$0xff]  ;;  %v16317_v2 = vld [vmem:[#allocation62_spill] sm:$0xff]  ;;  %v16319_v54 = vld [vmem:[#allocation13_spill] sm:$0xff]  ;;  %v10379_v21 = vpop.permute.xlu1 %1423 }
 0x189   : > { %v2314_v14 = vadd.f32 %v16313_v60, %v2236_v48  ;;  %v16315_v1 = vrot.slane %v16314_v19, 6  ;;  %v1977_v24 = vrot.slane %v1947_v38, %v8348_v11  ;;  %v16316_v23 = vrot.slane %v10201_v28, %v8348_v11  ;;  %3160 = vrot.lane.b32.xlu0 %v10138_v36, %s8222_s20  ;;  %v16320_v38 = vld [vmem:[#allocation33_spill] sm:$0xff] }
 0x18a   : > { %v2932_v42 = vadd.f32 %v9915_v44, %v2918_v59  ;;  %v2449_v26 = vrot.slane %v10244_v6, %v8348_v11  ;;  %v16318_v43 = vrot.slane %v10218_v52, %v8348_v11  ;;  %v2469_v48 = vadd.f32 %v16319_v54, %v2391_v4  ;;  %v16322_v6 = vld [vmem:[#allocation30_spill] sm:$0xff]  ;;  %v16323_v60 = vld [vmem:[#allocation73_spill] sm:$0xff] }
 0x18b   : > { %v1948_v49 = vmul.f32 %v16315_v1, %v1922_v7  ;;  %v10364_v16 = vmul.f32 %v16316_v23, %v16101_v63  ;;  %v1674_v59 = vadd.f32 %v16320_v38, %v1590_v15  ;;  %v1841_v13 = vadd.f32 %v16321_v39, %v1757_v53  ;;  %v16324_v1 = vld [vmem:[#allocation42_spill] sm:$0xff] }
 0x18c   : > { %v10372_v30 = vmul.f32 %v16318_v43, %v16317_v2  ;;  %vm2940_vm11 = vcmp.ge.f32.partialorder %v2932_v42, 0.0  ;;  %v2948_v28 = vmul.f32 0.01, %v2932_v42  ;;  %v10382_v61 = vmul.f32 %v1743_v5, %v16322_v6  ;;  %v16326_v39 = vld [vmem:[#allocation82_spill] sm:$0xff] }
 0x18d   : > { %v2392_v52 = vadd.f32 %v16323_v60, %v2314_v14  ;;  %v1095_v23 = vadd.f32 %v16324_v1, %v1019_v9  ;;  %v1192_v4 = vmul.f32 %v1184_v17, %v16292_v22  ;;  %v1981_v54 = vrot.slane %v1948_v49, %v8348_v11  ;;  %3267 = vrot.lane.b32.xlu0 %v10275_v8, %s8215_s29  ;;  %v16327_v22 = vld [vmem:[#allocation27_spill] sm:$0xff]  ;;  %v16329_v14 = vld [vmem:[#allocation56_spill] sm:$0xff] }
 0x18e   : > { %v10387_v43 = vsel %vm2940_vm11, %v2932_v42, %v2948_v28  ;;  %v1991_v15 = vmul.f32 %v1977_v24, %v16253_v3  ;;  %v16325_v38 = vrot.slane %v8941_v20, 7  ;;  %v2547_v36 = vadd.f32 %v16326_v39, %v2469_v48  ;;  %v16328_v20 = vld [vmem:[#allocation36_spill] sm:$0xff]  ;;  %v16331_v48 = vld [vmem:[#allocation10_spill] sm:$0xff] }
 0x18f   : > { %v1221_v5 = vsel %vm1215_vm4, %v10130_v25, %v10301_v0  ;;  %v1326_v9 = vsel %vm1320_vm6, %v10180_v40, %v10333_v34  ;;  %3269 = vrot.lane.b32.xlu1 %v10387_v43, %s8215_s29  ;;  %v1917_v42 = vadd.f32 %v16329_v14, %v1841_v13  ;;  %v16330_v25 = vrot.slane %v16303_v51, 6  ;;  %v16333_v60 = vld [vmem:[#allocation72_spill] sm:$0xff]  ;;  %v2003_v14 = vpop.permute.xlu1 %2002 }
 0x190   : > { %v2647_v53 = vmul.f32 %v16325_v38, %v1116_v31  ;;  %v1758_v31 = vadd.f32 %v16328_v20, %v1674_v59  ;;  %v2470_v28 = vadd.f32 %v16331_v48, %v2392_v52  ;;  %v16332_v40 = vrot.slane %v16306_v58, 7 }
 0x191   : > { %v1253_v24 = vmul.f32 %v16330_v25, %v1221_v5  ;;  %v2707_v1 = vmul.f32 %v1221_v5, %v16333_v60  ;;  %v16334_v38 = vrot.slane %v16303_v51, 7  ;;  %v10417_v17 = vmul.f32 %v2449_v26, %v16317_v2  ;;  %v16336_v25 = vld [vmem:[#allocation68_spill] sm:$0xff]  ;;  %3335 = vrot.lane.b32.xlu0 %v10275_v8, %s8218_s18  ;;  %v16337_v51 = vld [vmem:[#allocation43_spill] sm:$0xff] }
 0x192   : > { %v2671_v49 = vrot.slane %v2647_v53, %v8348_v11  ;;  %v2029_v6 = vmul.f32 %v16332_v40, %v1221_v5  ;;  %v1200_v59 = vadd.f32 %v1192_v4, %v1095_v23  ;;  %v10420_v13 = vmul.f32 %v1981_v54, %v16253_v3 }
 0x193   : > { %v1358_v39 = vmul.f32 %v16334_v38, %v1326_v9  ;;  %v16335_v53 = vrot.slane %v16196_v29, 7  ;;  %v1999_v52 = vadd.f32 %v1991_v15, %v1917_v42  ;;  %v2623_v58 = vadd.f32 %v16336_v25, %v2547_v36  ;;  %v10435_v29 = vld [vmem:[%s15156_s4 + $0xa8] sm:$0xff]  ;;  %3337 = vrot.lane.b32.xlu1 %v10387_v43, %s8218_s18 }
 0x194   : > { %v2691_v48 = vmul.f32 %v2671_v49, %v16258_v50  ;;  %v2731_v5 = vrot.slane %v2707_v1, %v8348_v11  ;;  %v1842_v26 = vadd.f32 %v16337_v51, %v1758_v31  ;;  %v1289_v23 = vrot.slane %v1253_v24, %v8348_v11 }
 0x195   : > { %v2648_v20 = vmul.f32 %v16335_v53, %v1922_v7  ;;  %v2059_v3 = vrot.slane %v2029_v6, %v8348_v11  ;;  %v2095_v36 = vmul.f32 %v10435_v29, %v1326_v9  ;;  %v16338_v7 = vld [vmem:[#allocation16_spill] sm:$0xff]  ;;  %v1394_v54 = vrot.slane %v1358_v39, %v8348_v11  ;;  %3403 = vrot.lane.b32.xlu0 %v10275_v8, %s8221_s19 }
 0x196   : > { %v2548_v4 = vadd.f32 %v16338_v7, %v2470_v28  ;;  %v16339_v15 = vrot.slane %v16333_v60, 1  ;;  %v2007_v42 = vsel %vm1215_vm4, %v2003_v14, 0.0  ;;  %v2751_v24 = vmul.f32 %v2731_v5, %v16265_v62  ;;  %v16343_v7 = vld [vmem:[#allocation57_spill] sm:$0xff] }
 0x197   : > { %v2675_v49 = vrot.slane %v2648_v20, %v8348_v11  ;;  %v1431_v40 = vsel %vm1425_vm8, %v10226_v46, %v10379_v21  ;;  %v2004_v6 = vsel %vm1215_vm4, %v10301_v0, %v2003_v14  ;;  %v2699_v1 = vadd.f32 %v2691_v48, %v2623_v58  ;;  %3405 = vrot.lane.b32.xlu1 %v10387_v43, %s8221_s19 }
 0x198   : > { %v2791_v31 = vmul.f32 %v16339_v15, %v1326_v9  ;;  %v2125_v28 = vrot.slane %v2095_v36, %v8348_v11  ;;  %v10457_v9 = vld [vmem:[%s15156_s4 + $0x78] sm:$0xff]  ;;  %v1297_v46 = vmul.f32 %v1289_v23, %v16182_v56  ;;  %v2073_v53 = vmul.f32 %v2059_v3, %v16183_v27  ;;  %v2085_v23 = vpop.permute.xlu1 %2084 }
 0x199   : > { %v1447_v39 = vmul.f32 %v10457_v9, %v1431_v40  ;;  %v16340_v0 = vrot.slane %v16237_v18, 1  ;;  %v16341_v14 = vrot.slane %v16333_v60, 2  ;;  %v1402_v58 = vmul.f32 %v1394_v54, %v16268_v45  ;;  %3471 = vrot.lane.b32.xlu0 %v10275_v8, %s8224_s21 }
 0x19a   : > { %v2815_v38 = vrot.slane %v2791_v31, %v8348_v11  ;;  %v16342_v51 = vrot.slane %v16314_v19, 7  ;;  %v2759_v3 = vadd.f32 %v2751_v24, %v2699_v1  ;;  %v2708_v60 = vmul.f32 %v2004_v6, %v16270_v55  ;;  %v16344_v31 = vld [vmem:[#allocation69_spill] sm:$0xff] }
 0x19b   : > { %v2185_v20 = vmul.f32 %v16340_v0, %v1431_v40  ;;  %v2867_v25 = vmul.f32 %v16341_v14, %v1431_v40  ;;  %v1483_v5 = vrot.slane %v1447_v39, %v8348_v11  ;;  %v1918_v15 = vadd.f32 %v16343_v7, %v1842_v26  ;;  %3473 = vrot.lane.b32.xlu1 %v10387_v43, %s8224_s21 }
 0x19c   : > { %v2835_v48 = vmul.f32 %v2815_v38, %v16212_v10  ;;  %v2030_v56 = vmul.f32 %v16342_v51, %v2004_v6  ;;  %v2624_v40 = vadd.f32 %v16344_v31, %v2548_v4  ;;  %v2139_v45 = vmul.f32 %v2125_v28, %v16272_v32 }
 0x19d   : > { %v2215_v18 = vrot.slane %v2185_v20, %v8348_v11  ;;  %v2891_v36 = vrot.slane %v2867_v25, %v8348_v11  ;;  %v16345_v54 = vrot.slane %v16234_v33, 7  ;;  %v1305_v19 = vadd.f32 %v1297_v46, %v1200_v59  ;;  %v2151_v25 = vpop.permute.xlu1 %2150  ;;  %2972 = vrot.lane.b32.xlu0 %v10387_v43, %s8216_s30 }
 0x19e   : > { %v2843_v24 = vadd.f32 %v2835_v48, %v2759_v3  ;;  %v1491_v1 = vmul.f32 %v1483_v5, %v8767_v41  ;;  %v2081_v26 = vadd.f32 %v2073_v53, %v1999_v52  ;;  %v2063_v6 = vrot.slane %v2030_v56, %v8348_v11  ;;  %v8154_v52 = vld [vmem:[%s15156_s4 + $0xb0] sm:$0xff] }
 0x19f   : > { %v2031_v38 = vmul.f32 %v16345_v54, %v2007_v42  ;;  %v2911_v39 = vmul.f32 %v2891_v36, %v16219_v12  ;;  %v2229_v4 = vmul.f32 %v2215_v18, %v9158_v47  ;;  %v2086_v33 = vsel %vm1320_vm6, %v10333_v34, %v2085_v23 }
 0x1a0   : > { %v2692_v28 = vmul.f32 %v2675_v49, %v16258_v50  ;;  %v1410_v0 = vadd.f32 %v1402_v58, %v1305_v19  ;;  %v2735_v46 = vrot.slane %v2708_v60, %v8348_v11  ;;  %v2147_v41 = vadd.f32 %v2139_v45, %v2081_v26 }
 0x1a1   : > { %v2919_v59 = vadd.f32 %v2911_v39, %v2843_v24  ;;  %v2067_v20 = vrot.slane %v2031_v38, %v8348_v11  ;;  %v10497_v14 = vmul.f32 %v2007_v42, %v16327_v22  ;;  %v2096_v53 = vmul.f32 %v8154_v52, %v2086_v33  ;;  %3036 = vrot.lane.b32.xlu0 %v10387_v43, %s8217_s17  ;;  %v16349_v24 = vld [vmem:[#allocation63_spill] sm:$0xff] }
 0x1a2   : > { %v2000_v34 = vadd.f32 %v10420_v13, %v1918_v15  ;;  %v2700_v49 = vadd.f32 %v2692_v28, %v2624_v40  ;;  %v1499_v58 = vadd.f32 %v1491_v1, %v1410_v0  ;;  %v2237_v5 = vadd.f32 %v2229_v4, %v2147_v41  ;;  %v16350_v4 = vld [vmem:[#allocation14_spill] sm:$0xff] }
 0x1a3   : > { %v2933_v48 = vadd.f32 %v9915_v44, %v2919_v59  ;;  %v2074_v51 = vmul.f32 %v2063_v6, %v16183_v27  ;;  %v2129_v42 = vrot.slane %v2096_v53, %v8348_v11  ;;  %v16346_v56 = vrot.slane %v16270_v55, 1 }
 0x1a4   : > { %v2752_v36 = vmul.f32 %v2735_v46, %v16265_v62  ;;  %v2152_v60 = vsel %vm1425_vm8, %v10379_v21, %v2151_v25  ;;  %v10514_v13 = vmul.f32 %v2067_v20, %v16183_v27  ;;  %v2739_v7 = vrot.slane %v10497_v14, %v8348_v11 }
 0x1a5   : > { %v2792_v3 = vmul.f32 %v16346_v56, %v2086_v33  ;;  %vm2941_vm12 = vcmp.ge.f32.partialorder %v2933_v48, 0.0  ;;  %v2949_v18 = vmul.f32 0.01, %v2933_v48  ;;  %v2089_v15 = vsel %vm1320_vm6, %v2085_v23, 0.0  ;;  %3100 = vrot.lane.b32.xlu0 %v10387_v43, %s8219_s12 }
 0x1a6   : > { %v2140_v45 = vmul.f32 %v2129_v42, %v16272_v32  ;;  %v16347_v54 = vrot.slane %v16256_v35, 1  ;;  %v16348_v27 = vrot.slane %v16270_v55, 2  ;;  %v1591_v19 = vadd.f32 %v10184_v57, %v1499_v58  ;;  %v1763_v55 = vpop.permute.xlu1 %1762 }
 0x1a7   : > { %v2819_v31 = vrot.slane %v2792_v3, %v8348_v11  ;;  %v10522_v40 = vsel %vm2941_vm12, %v2933_v48, %v2949_v18  ;;  %v2315_v1 = vadd.f32 %v16349_v24, %v2237_v5  ;;  %v2082_v23 = vadd.f32 %v2074_v51, %v2000_v34  ;;  %v16352_v48 = vld [vmem:[#allocation29_spill] sm:$0xff]  ;;  %v16356_v24 = vld [vmem:[#allocation46_spill] sm:$0xff] }
 0x1a8   : > { %v2186_v21 = vmul.f32 %v16347_v54, %v2152_v60  ;;  %v2868_v38 = vmul.f32 %v16348_v27, %v2152_v60  ;;  %2974 = vrot.lane.b32.xlu1 %v10522_v40, %s8216_s30  ;;  %v2760_v26 = vadd.f32 %v2752_v36, %v2700_v49  ;;  %v10535_v6 = vmul.f32 %v16350_v4, %v2089_v15  ;;  %v16354_v60 = vld [vmem:[#allocation79_spill] sm:$0xff] }
 0x1a9   : > { %v2836_v39 = vmul.f32 %v2819_v31, %v16212_v10  ;;  %v16351_v28 = vrot.slane %v16327_v22, 1  ;;  %v1775_v0 = vrot.slane %v10457_v9, 4  ;;  %v2481_v59 = vrot.slane %v10435_v29, 5  ;;  %3164 = vrot.lane.b32.xlu0 %v10387_v43, %s8222_s20 }
 0x1aa   : > { %v2219_v35 = vrot.slane %v2186_v21, %v8348_v11  ;;  %v2895_v33 = vrot.slane %v2868_v38, %v8348_v11  ;;  %v2482_v46 = vrot.slane %v8154_v52, 5  ;;  %v2148_v41 = vadd.f32 %v2140_v45, %v2082_v23  ;;  %v10575_v21 = vld [vmem:[%s15156_s4 + $0x8] sm:$0xff]  ;;  %v16355_v38 = vld [vmem:[#allocation5_spill] sm:$0xff] }
 0x1ab   : > { %v10541_v57 = vmul.f32 %v16351_v28, %v2089_v15  ;;  %v2844_v20 = vadd.f32 %v2836_v39, %v2760_v26  ;;  %v2155_v49 = vsel %vm1425_vm8, %v2151_v25, 0.0  ;;  %v1675_v58 = vadd.f32 %v10346_v37, %v1591_v19  ;;  %v16357_v23 = vld [vmem:[#allocation67_spill] sm:$0xff] }
 0x1ac   : > { %v2230_v53 = vmul.f32 %v2219_v35, %v9158_v47  ;;  %v2912_v34 = vmul.f32 %v2895_v33, %v16219_v12  ;;  %v1765_v5 = vsel %vm931_vm7, %v16352_v48, %v1763_v55  ;;  %v2475_v9 = vsel %vm931_vm7, %v1763_v55, 0.0  ;;  %3038 = vrot.lane.b32.xlu1 %v10522_v40, %s8217_s17  ;;  %v16358_v35 = vld [vmem:[#allocation31_spill] sm:$0xff]  ;;  %v16364_v48 = vld [vmem:[#allocation8_spill] sm:$0xff] }
 0x1ad   : > { %v1791_v51 = vmul.f32 %v1775_v0, %v1765_v5  ;;  %v2393_v42 = vadd.f32 %v10364_v16, %v2315_v1  ;;  %v2133_v56 = vrot.slane %v10535_v6, %v8348_v11  ;;  %v2823_v25 = vrot.slane %v10541_v57, %v8348_v11  ;;  %3271 = vrot.lane.b32.xlu0 %v10522_v40, %s8215_s29 }
 0x1ae   : > { %v2238_v29 = vadd.f32 %v2230_v53, %v2148_v41  ;;  %v2920_v52 = vadd.f32 %v2912_v34, %v2844_v20  ;;  %v2497_v37 = vmul.f32 %v2481_v59, %v1765_v5  ;;  %v2498_v3 = vmul.f32 %v2482_v46, %v2475_v9  ;;  %v10605_v53 = vld [vmem:[%s15156_s4] sm:$0xff] }
 0x1af   : > { %v16353_v18 = vrot.slane %v16350_v4, 1  ;;  %v1827_v16 = vrot.slane %v1791_v51, %v8348_v11  ;;  %v1759_v45 = vadd.f32 %v10382_v61, %v1675_v58  ;;  %v2999_v27 = vrot.slane %v10575_v21, %v8348_v11 }
 0x1b0   : > { %v2316_v15 = vadd.f32 %v16354_v60, %v2238_v29  ;;  %v2934_v31 = vadd.f32 %v9915_v44, %v2920_v52  ;;  %v2527_v54 = vrot.slane %v2497_v37, %v8348_v11  ;;  %3102 = vrot.lane.b32.xlu1 %v10522_v40, %s8219_s12  ;;  %v3063_v19 = vrot.slane %v10575_v21, %v16355_v38  ;;  %v16366_v29 = vld [vmem:[#allocation70_spill] sm:$0xff] }
 0x1b1   : > { %v2187_v36 = vmul.f32 %v16353_v18, %v2155_v49  ;;  %v1835_v1 = vmul.f32 %v1827_v16, %v16356_v24  ;;  %v2471_v39 = vadd.f32 %v10417_v17, %v2393_v42  ;;  %v2531_v26 = vrot.slane %v2498_v3, %v8348_v11  ;;  %3339 = vrot.lane.b32.xlu0 %v10522_v40, %s8218_s18  ;;  %v16368_v42 = vld [vmem:[#allocation9_spill] sm:$0xff]  ;;  %v16369_v3 = vld [vmem:[#allocation78_spill] sm:$0xff] }
 0x1b2   : > { %v2394_v61 = vadd.f32 %v16357_v23, %v2316_v15  ;;  %v2950_v6 = vmul.f32 0.01, %v2934_v31  ;;  %v2541_v33 = vmul.f32 %v2527_v54, %v16358_v35  ;;  %v10588_v55 = vmul.f32 0.0, %v2999_v27 }
 0x1b3   : > { %v10590_v28 = vmul.f32 0.0, %v3063_v19  ;;  %v2223_v57 = vrot.slane %v2187_v36, %v8348_v11  ;;  %vm2942_vm13 = vcmp.ge.f32.partialorder %v2934_v31, 0.0  ;;  %v1843_v0 = vadd.f32 %v1835_v1, %v1759_v45  ;;  %v16372_v45 = vld [vmem:[#allocation75_spill] sm:$0xff] }
 0x1b4   : > { %16359 = vst [vmem:[#allocation52_spill] sm:$0xff] %v10588_v55  ;;  %v2472_v59 = vadd.f32 %v10372_v30, %v2394_v61  ;;  %v16361_v17 = vrot.slane %v16327_v22, 2  ;;  %v2549_v41 = vadd.f32 %v2541_v33, %v2471_v39  ;;  %3166 = vrot.lane.b32.xlu1 %v10522_v40, %s8222_s20  ;;  %v2995_v34 = vrot.slane %v10605_v53, %v8348_v11  ;;  %v16363_v30 = vld [vmem:[#allocation61_spill] sm:$0xff] }
 0x1b5   : > { %16360 = vst [vmem:[#allocation12_spill] sm:$0xff] %v10590_v28  ;;  %v10600_v20 = vpack.c.bf16 %v10590_v28, %v10588_v55  ;;  %v1919_v58 = vadd.f32 %v16363_v30, %v1843_v0  ;;  %v2542_v22 = vmul.f32 %v2531_v26, %v16358_v35  ;;  %v3127_v5 = vrot.slane %v10575_v21, %v16364_v48  ;;  %v16377_v26 = vld [vmem:[#allocation26_spill] sm:$0xff] }
 0x1b6   : > { %v2869_v46 = vmul.f32 %v16361_v17, %v2155_v49  ;;  %v3059_v49 = vrot.slane %v10605_v53, %v16355_v38  ;;  %v10615_v9 = vsel %vm2942_vm13, %v2934_v31, %v2950_v6  ;;  %v2625_v52 = vadd.f32 %v16366_v29, %v2549_v41  ;;  %3407 = vrot.lane.b32.xlu0 %v10522_v40, %s8221_s19 }
 0x1b7   : > { %16362 = vst [vmem:[#allocation53_spill] sm:$0xff] %v10600_v20  ;;  %16365 = vst [vmem:[#allocation24_spill] sm:$0xff] %v10615_v9  ;;  %7205 = vmatprep.subr.bf16.mxu0 %v10600_v20  ;;  %v10621_v51 = vmul.f32 0.0, %v2995_v34  ;;  %v3191_v37 = vrot.slane %v10575_v21, %v16368_v42  ;;  %v2001_v18 = vadd.f32 %v16369_v3, %v1919_v58  ;;  %v10628_v15 = vmul.f32 0.0, %v3127_v5  ;;  %v16383_v34 = vld [vmem:[#allocation58_spill] sm:$0xff] }
 0x1b8   : > { %v2550_v36 = vadd.f32 %v2542_v22, %v2472_v59  ;;  %v10626_v60 = vmul.f32 0.0, %v3059_v49  ;;  %v2753_v31 = vmul.f32 %v2739_v7, %v16265_v62  ;;  %v2899_v16 = vrot.slane %v2869_v46, %v8348_v11  ;;  %3273 = vrot.lane.b32.xlu1 %v10615_v9, %s8215_s29  ;;  %v16385_v22 = vld [vmem:[#allocation41_spill] sm:$0xff] }
 0x1b9   : > { %16367 = vst [vmem:[#allocation25_spill] sm:$0xff] %v10621_v51  ;;  %16371 = vst [vmem:[#allocation50_spill] sm:$0xff] %v10628_v15  ;;  %v2701_v54 = vadd.f32 %v16372_v45, %v2625_v52  ;;  %v10638_v27 = vmul.f32 0.0, %v3191_v37  ;;  %v2141_v19 = vmul.f32 %v2133_v56, %v16272_v32  ;;  %v2837_v24 = vmul.f32 %v2823_v25, %v16212_v10  ;;  %v16376_v56 = vld [vmem:[#allocation64_spill] sm:$0xff]  ;;  %v16387_v52 = vld [vmem:[#allocation18_spill] sm:$0xff] }
 0x1ba   : > { %16370 = vst [vmem:[#allocation37_spill] sm:$0xff] %v10626_v60  ;;  %v2083_v1 = vadd.f32 %v10514_v13, %v2001_v18  ;;  %v10645_v23 = vpack.c.bf16 %v10626_v60, %v10621_v51  ;;  %v3123_v61 = vrot.slane %v10605_v53, %v16364_v48  ;;  %v3187_v32 = vrot.slane %v10605_v53, %v16368_v42 }
 0x1bb   : > { %16373 = vst [vmem:[#allocation81_spill] sm:$0xff] %v10638_v27  ;;  %v2761_v14 = vadd.f32 %v2753_v31, %v2701_v54  ;;  %v10651_v7 = vpack.c.bf16 %v10638_v27, %v10628_v15  ;;  %v2231_v13 = vmul.f32 %v2223_v57, %v9158_v47  ;;  %v2743_v25 = vrot.slane %v16376_v56, %v8348_v11  ;;  %v16380_v47 = vld [vmem:[#allocation20_spill] sm:$0xff] }
 0x1bc   : > { %16374 = vst [vmem:[#allocation15_spill] sm:$0xff] %v10645_v23  ;;  %v2149_v39 = vadd.f32 %v2141_v19, %v2083_v1  ;;  %v2626_v6 = vadd.f32 %v16377_v26, %v2550_v36  ;;  %7207 = vmatpush1.bf16.msra.mxu0 %v10645_v23  ;;  %v2913_v33 = vmul.f32 %v2899_v16, %v16219_v12  ;;  %v10666_v59 = vmul.f32 0.0, %v3123_v61  ;;  %v16381_v57 = vld [vmem:[#allocation44_spill] sm:$0xff]  ;;  %v16390_v16 = vld [vmem:[#allocation22_spill] sm:$0xff]  ;;  %v16393_v61 = vld [vmem:[#allocation23_spill] sm:$0xff] }
 0x1bd   : > { %16375 = vst [vmem:[#allocation38_spill] sm:$0xff] %v10651_v7  ;;  %v2845_v0 = vadd.f32 %v2837_v24, %v2761_v14  ;;  %3341 = vrot.lane.b32.xlu1 %v10615_v9, %s8218_s18  ;;  %7209 = vmatprep.subr.bf16.mxu0 %v10651_v7  ;;  %v10668_v17 = vmul.f32 0.0, %v3187_v32  ;;  %v16382_v46 = vrot.slane %v16381_v57, %v8348_v11  ;;  %v16386_v49 = vrot.slane %v16385_v22, 1  ;;  %v4323_v31 = vld [vmem:[%s15159_s7 + $0x8] sm:$0xff] }
 0x1be   : > { %16378 = vst [vmem:[#allocation51_spill] sm:$0xff] %v10666_v59  ;;  %v16384_v30 = vrot.slane %v16383_v34, %v8348_v11  ;;  %v2239_v29 = vadd.f32 %v2231_v13, %v2149_v39  ;;  %v16388_v37 = vrot.slane %v16387_v52, 6  ;;  %3475 = vrot.lane.b32.xlu0 %v10522_v40, %s8224_s21  ;;  %v16391_v45 = vrot.slane %v16390_v16, %v8348_v11  ;;  %v16392_v19 = vld [vmem:[#allocation28_spill] sm:$0xff] }
 0x1bf   : > { %16379 = vst [vmem:[#allocation49_spill] sm:$0xff] %v10668_v17  ;;  %v2309_v41 = vmul.f32 %v16382_v46, %v16380_v47  ;;  %v2794_v5 = vmul.f32 0.0, %v16386_v49  ;;  %v2921_v18 = vadd.f32 %v2913_v33, %v2845_v0  ;;  %v10686_v36 = vpack.c.bf16 %v10668_v17, %v10666_v59  ;;  %7185 = vmatprep.mubr.msk.f32.mxu0 %vm4338_vm14, %v4323_v31  ;;  %v16443_v59 = vld [vmem:[#allocation76_spill] sm:$0xff] }
 0x1c0   : > { %v2694_v58 = vmul.f32 %v16384_v30, %v16258_v50  ;;  %v2575_v3 = vmul.f32 0.0, %v16388_v37  ;;  %v2387_v54 = vmul.f32 %v16391_v45, %v16101_v63  ;;  %v2535_v24 = vrot.slane %v16392_v19, %v8348_v11  ;;  %7187 = vmatprep.mubr.msk.f32.mxu1 %vm4338_vm14, %v4323_v31 }
 0x1c1   : > { %16389 = vst [vmem:[#allocation71_spill] sm:$0xff] %v10686_v36  ;;  %v2317_v1 = vadd.f32 %v2309_v41, %v2239_v29  ;;  %v16394_v32 = vrot.slane %v16393_v61, %v8348_v11  ;;  %v2635_v56 = vrot.slane %v16350_v4, 7  ;;  %v2935_v39 = vadd.f32 %v9915_v44, %v2921_v18  ;;  %3409 = vrot.lane.b32.xlu1 %v10615_v9, %s8221_s19 }
 0x1c2   : > { %v2702_v14 = vadd.f32 %v2694_v58, %v2626_v6  ;;  %7211 = vmatpush1.bf16.msra.mxu0 %v10686_v36  ;;  %v2827_v63 = vrot.slane %v2794_v5, %v8348_v11  ;;  %v16395_v26 = vrot.slane %v16385_v22, 2  ;;  %v2754_v0 = vmul.f32 %v2743_v25, %v16265_v62  ;;  %2976 = vrot.lane.b32.xlu0 %v10615_v9, %s8216_s30  ;;  %v621_v25 = vld [vmem:[%s15156_s4 + $0xf8] sm:$0x7] }
 0x1c3   : > { %v2465_v13 = vmul.f32 %v16394_v32, %v16317_v2  ;;  %v2395_v33 = vadd.f32 %v2387_v54, %v2317_v1  ;;  %v2951_v47 = vmul.f32 0.01, %v2935_v39  ;;  %v2611_v57 = vrot.slane %v2575_v3, %v8348_v11 }
 0x1c4   : > { %v2870_v6 = vmul.f32 0.0, %v16395_v26  ;;  %v2762_v4 = vadd.f32 %v2754_v0, %v2702_v14  ;;  %vm2943_vm15 = vcmp.ge.f32.partialorder %v2935_v39, 0.0  ;;  %v2543_v46 = vmul.f32 %v2535_v24, %v16358_v35  ;;  %v16397_v35 = vld [vmem:[#allocation19_spill] sm:$0xff] }
 0x1c5   : > { %v2473_v2 = vadd.f32 %v2465_v13, %v2395_v33  ;;  %3477 = vrot.lane.b32.xlu1 %v10615_v9, %s8224_s21  ;;  %v2651_v41 = vmul.f32 0.0, %v2635_v56  ;;  %v2838_v30 = vmul.f32 %v2827_v63, %v16212_v10  ;;  %v10725_v49 = vsel %vm2943_vm15, %v2935_v39, %v2951_v47  ;;  %v16399_v26 = vld [vmem:[#allocation3_spill] sm:$0xff] }
 0x1c6   : > { %v2903_v34 = vrot.slane %v2870_v6, %v8348_v11  ;;  %3040 = vrot.lane.b32.xlu0 %v10615_v9, %s8217_s17  ;;  %16396 = vst [vmem:[#allocation11_spill] sm:$0xff] %v10725_v49  ;;  %v2711_v5 = vmul.f32 0.0, %v621_v25  ;;  %v2619_v29 = vmul.f32 %v2611_v57, %v16397_v35  ;;  %v2779_v52 = vrot.slane %v621_v25, 1 }
 0x1c7   : > { %v2551_v58 = vadd.f32 %v2543_v46, %v2473_v2  ;;  %v2846_v22 = vadd.f32 %v2838_v30, %v2762_v4  ;;  %v2687_v37 = vrot.slane %v2651_v41, %v8348_v11  ;;  %v2855_v54 = vrot.slane %v621_v25, 2 }
 0x1c8   : > { %v2914_v3 = vmul.f32 %v2903_v34, %v16219_v12  ;;  %v2747_v16 = vrot.slane %v2711_v5, %v8348_v11  ;;  %v2795_v45 = vmul.f32 0.0, %v2779_v52  ;;  %v10756_v6 = vsub.s32 4, %v16399_v26 }
 0x1c9   : > { %2978 = vrot.lane.b32.xlu1 %v10725_v49, %s8216_s30  ;;  %v2627_v18 = vadd.f32 %v2619_v29, %v2551_v58  ;;  %v2695_v19 = vmul.f32 %v2687_v37, %v16258_v50  ;;  %v2871_v32 = vmul.f32 0.0, %v2855_v54  ;;  %v10759_v33 = vsub.s32 5, %v16399_v26 }
 0x1ca   : > { %3104 = vrot.lane.b32.xlu0 %v10615_v9, %s8219_s12  ;;  %v2922_v31 = vadd.f32 %v2914_v3, %v2846_v22  ;;  %v2755_v14 = vmul.f32 %v2747_v16, %v16265_v62  ;;  %v2831_v61 = vrot.slane %v2795_v45, %v8348_v11  ;;  %16400 = vst [vmem:[#allocation40_spill] sm:$0xff] %v10756_v6  ;;  %v10773_v57 = vsub.s32 6, %v16399_v26 }
 0x1cb   : > { %v2703_v24 = vadd.f32 %v2695_v19, %v2627_v18  ;;  %v2907_v39 = vrot.slane %v2871_v32, %v8348_v11  ;;  %16401 = vst [vmem:[#allocation32_spill] sm:$0xff] %v10759_v33  ;;  %v3296_v2 = vrot.slane %v10605_v53, %v10759_v33  ;;  %v3231_v47 = vrot.slane %v10575_v21, %v10756_v6 }
 0x1cc   : > { %v2936_v1 = vadd.f32 %v9915_v44, %v2922_v31  ;;  %v2839_v50 = vmul.f32 %v2831_v61, %v16212_v10  ;;  %v3227_v10 = vrot.slane %v10605_v53, %v10756_v6  ;;  %16402 = vst [vmem:[#allocation17_spill] sm:$0xff] %v10773_v57  ;;  %v10776_v46 = vsub.s32 7, %v16399_v26  ;;  %v8158_v26 = vld [vmem:[%s15156_s4 + $0x48] sm:$0xff] }
 0x1cd   : > { %3042 = vrot.lane.b32.xlu1 %v10725_v49, %s8217_s17  ;;  %v2763_v13 = vadd.f32 %v2755_v14, %v2703_v24  ;;  %v2915_v0 = vmul.f32 %v2907_v39, %v16219_v12  ;;  %v10782_v12 = vrot.slane %v10575_v21, %v10759_v33  ;;  %v10788_v41 = vmul.f32 0.0, %v3296_v2 }
 0x1ce   : > { %3168 = vrot.lane.b32.xlu0 %v10615_v9, %s8222_s20  ;;  %v2952_v56 = vmul.f32 0.01, %v2936_v1  ;;  %vm2944_vm0 = vcmp.ge.f32.partialorder %v2936_v1, 0.0  ;;  %16403 = vst [vmem:[#allocation21_spill] sm:$0xff] %v10776_v46  ;;  %v10786_v25 = vmul.f32 0.0, %v3227_v10  ;;  %v3364_v34 = vrot.slane %v10605_v53, %v10773_v57 }
 0x1cf   : > { %v2847_v63 = vadd.f32 %v2839_v50, %v2763_v13  ;;  %16404 = vst [vmem:[#allocation55_spill] sm:$0xff] %v10782_v12  ;;  %16406 = vst [vmem:[#allocation65_spill] sm:$0xff] %v10788_v41  ;;  %v3432_v30 = vrot.slane %v10605_v53, %v10776_v46  ;;  %v10799_v35 = vmul.f32 0.0, %v3231_v47  ;;  %v10807_v52 = vrot.slane %v10575_v21, %v10773_v57  ;;  %v8157_v13 = vld [vmem:[%s15156_s4 + $0x40] sm:$0xff] }
 0x1d0   : > { %v10753_v62 = vsel %vm2944_vm0, %v2936_v1, %v2952_v56  ;;  %16405 = vst [vmem:[#allocation47_spill] sm:$0xff] %v10786_v25  ;;  %v10812_v37 = vrot.slane %v10575_v21, %v10776_v46  ;;  %v10820_v3 = vpack.c.bf16 %v10788_v41, %v10786_v25  ;;  %v10822_v18 = vmul.f32 0.0, %v3364_v34  ;;  %v10886_v34 = vld [vmem:[%s15156_s4 + $0x10] sm:$0xff] }
 0x1d1   : > { %3106 = vrot.lane.b32.xlu1 %v10725_v49, %s8219_s12  ;;  %16398 = vst [vmem:[#allocation59_spill] sm:$0xff] %v10753_v62  ;;  %v2923_v4 = vadd.f32 %v2915_v0, %v2847_v63  ;;  %16407 = vst [vmem:[#allocation60_spill] sm:$0xff] %v10799_v35  ;;  %v10824_v31 = vmul.f32 0.0, %v3432_v30  ;;  %v3500_v56 = vrot.slane %v8157_v13, %v8348_v11 }
 0x1d2   : > { %3275 = vrot.lane.b32.xlu0 %v10725_v49, %s8215_s29  ;;  %16408 = vst [vmem:[#allocation54_spill] sm:$0xff] %v10807_v52  ;;  %16409 = vst [vmem:[#allocation77_spill] sm:$0xff] %v10812_v37  ;;  %v10862_v39 = vrot.slane %v8157_v13, %v16355_v38  ;;  %v10869_v0 = vrot.slane %v8158_v26, %v8348_v11  ;;  %v10874_v10 = vrot.slane %v8158_v26, %v16355_v38 }
 0x1d3   : > { %v2937_v5 = vadd.f32 %v9915_v44, %v2923_v4  ;;  %16410 = vst [vmem:[#allocation34_spill] sm:$0xff] %v10820_v3  ;;  %16411 = vst [vmem:[#allocation45_spill] sm:$0xff] %v10822_v18  ;;  %v10840_v1 = vpack.c.bf16 %v10824_v31, %v10822_v18  ;;  %v10877_v2 = vrot.slane %v8157_v13, %v16364_v48  ;;  %v10881_v47 = vmul.f32 0.0, %v3500_v56 }
 0x1d4   : > { %16412 = vst [vmem:[#allocation39_spill] sm:$0xff] %v10824_v31  ;;  %16415 = vst [vmem:[#allocation66_spill] sm:$0xff] %v10862_v39  ;;  %v10890_v30 = vrot.slane %v10886_v34, %v16364_v48  ;;  %v10925_v56 = vrot.slane %v8158_v26, %v16364_v48  ;;  %v10937_v7 = vrot.slane %v10886_v34, %v16355_v38 }
 0x1d5   : > { %3170 = vrot.lane.b32.xlu1 %v10725_v49, %s8222_s20  ;;  %v2953_v16 = vmul.f32 0.01, %v2937_v5  ;;  %vm2945_vm9 = vcmp.ge.f32.partialorder %v2937_v5, 0.0  ;;  %16413 = vst [vmem:[#allocation74_spill] sm:$0xff] %v10840_v1  ;;  %16416 = vst [vmem:[#allocation35_spill] sm:$0xff] %v10869_v0  ;;  %v10948_v20 = vrot.slane %v8157_v13, %v10756_v6  ;;  %v10960_v31 = vrot.slane %v8157_v13, %v10773_v57 }
 0x1d6   : > { %3343 = vrot.lane.b32.xlu0 %v10725_v49, %s8218_s18  ;;  %16417 = vst [vmem:[#allocation62_spill] sm:$0xff] %v10874_v10  ;;  %16418 = vst [vmem:[#allocation13_spill] sm:$0xff] %v10877_v2  ;;  %v10967_v18 = vrot.slane %v8158_v26, %v10759_v33  ;;  %v10974_v25 = vrot.slane %v8157_v13, %v10759_v33 }
 0x1d7   : > { %v10794_v58 = vpop.permute.xlu1 %3333  ;;  %v10796_v22 = vpop.permute.xlu0 %3265  ;;  %v10842_v14 = vsel %vm2945_vm9, %v2937_v5, %v2953_v16  ;;  %16419 = vst [vmem:[#allocation33_spill] sm:$0xff] %v10881_v47  ;;  %16420 = vst [vmem:[#allocation80_spill] sm:$0xff] %v10890_v30  ;;  %v10895_v5 = vld [vmem:[%s15156_s4 + $0x18] sm:$0xff]  ;;  %v10908_v16 = vrot.slane %v8157_v13, %v16368_v42 }
 0x1d8   : > { %v3292_v29 = vsel %vm1110_vm2, 0.0, %v10796_v22  ;;  %v3360_v44 = vsel %vm1215_vm4, 0.0, %v10794_v58  ;;  %16414 = vst [vmem:[#allocation48_spill] sm:$0xff] %v10842_v14  ;;  %16426 = vst [vmem:[#allocation36_spill] sm:$0xff] %v10925_v56  ;;  %v10945_v23 = vrot.slane %v10895_v5, %v16368_v42 }
 0x1d9   : > { %3277 = vrot.lane.b32.xlu1 %v10753_v62, %s8215_s29  ;;  %v3326_v53 = vmul.f32 %v10782_v12, %v3292_v29  ;;  %v3394_v19 = vmul.f32 %v10807_v52, %v3360_v44  ;;  %v10899_v29 = vrot.slane %v10895_v5, %v16364_v48  ;;  %16422 = vst [vmem:[#allocation73_spill] sm:$0xff] %v10908_v16  ;;  %16428 = vst [vmem:[#allocation10_spill] sm:$0xff] %v10937_v7 }
 0x1da   : > { %3411 = vrot.lane.b32.xlu0 %v10725_v49, %s8221_s19  ;;  %16430 = vst [vmem:[#allocation68_spill] sm:$0xff] %v10945_v23  ;;  %16431 = vst [vmem:[#allocation43_spill] sm:$0xff] %v10948_v20 }
 0x1db   : > { %v10826_v45 = vpop.permute.xlu0 %3401  ;;  %v7212_v21 = vpack.c.bf16 %v3326_v53, %v10799_v35  ;;  %v2969_v32 = vpop.permute.xlu1 %2968  ;;  %16421 = vst [vmem:[#allocation30_spill] sm:$0xff] %v10899_v29  ;;  %16434 = vst [vmem:[#allocation69_spill] sm:$0xff] %v10960_v31 }
 0x1dc   : > { %v3428_v54 = vsel %vm1320_vm6, 0.0, %v10826_v45  ;;  %v2991_v63 = vsel %vm635_vm1, 0.0, %v2969_v32  ;;  %16436 = vst [vmem:[#allocation14_spill] sm:$0xff] %v10967_v18  ;;  %16437 = vst [vmem:[#allocation29_spill] sm:$0xff] %v10974_v25 }
 0x1dd   : > { %3345 = vrot.lane.b32.xlu1 %v10753_v62, %s8218_s18  ;;  %v3462_v24 = vmul.f32 %v10812_v37, %v3428_v54  ;;  %7213 = vmatprep.subr.bf16.mxu0 %v7212_v21  ;;  %v10911_v21 = vrot.slane %v8158_v26, %v16368_v42  ;;  %v10915_v54 = vrot.slane %v10895_v5, %v8348_v11 }
 0x1de   : > { %3479 = vrot.lane.b32.xlu0 %v10725_v49, %s8224_s21  ;;  %7215 = vmatpush1.bf16.msra.mxu0 %v10820_v3  ;;  %v10964_v37 = vrot.slane %v10895_v5, %v10759_v33 }
 0x1df   : > { %v7216_v61 = vpack.c.bf16 %v3462_v24, %v3394_v19  ;;  %v10857_v50 = vpop.permute.xlu1 %3469  ;;  %16423 = vst [vmem:[#allocation42_spill] sm:$0xff] %v10911_v21  ;;  %16424 = vst [vmem:[#allocation82_spill] sm:$0xff] %v10915_v54  ;;  %v10919_v19 = vrot.slane %v10895_v5, %v16355_v38  ;;  %v3578_v24 = vmul.f32 %v10862_v39, %v2991_v63 }
 0x1e0   : > { %v3496_v4 = vsel %vm1425_vm8, 0.0, %v10857_v50  ;;  %16435 = vst [vmem:[#allocation63_spill] sm:$0xff] %v10964_v37 }
 0x1e1   : > { %3413 = vrot.lane.b32.xlu1 %v10753_v62, %s8221_s19  ;;  %7217 = vmatprep.subr.bf16.mxu0 %v7216_v61  ;;  %16425 = vst [vmem:[#allocation27_spill] sm:$0xff] %v10919_v19  ;;  %v3530_v3 = vmul.f32 %v10869_v0, %v3496_v4  ;;  %v10951_v4 = vrot.slane %v8158_v26, %v10756_v6 }
 0x1e2   : > { %3538 = vrot.lane.b32.xlu0 %v10753_v62, %s8216_s30  ;;  %7219 = vmatpush1.bf16.msra.mxu0 %v10840_v1  ;;  %v10929_v1 = vrot.slane %v10886_v34, %v8348_v11  ;;  %v7222_v41 = vpack.c.bf16 %v3578_v24, %v10881_v47  ;;  %v10983_v24 = vrot.slane %v8158_v26, %v10773_v57 }
 0x1e3   : > { %16432 = vst [vmem:[#allocation16_spill] sm:$0xff] %v10951_v4  ;;  %v10990_v47 = vrot.slane %v8157_v13, %v10776_v46  ;;  %v4327_v13 = vld [vmem:[%s15160_s8 + $0x8] sm:$0xff] }
 0x1e4   : > { %16427 = vst [vmem:[#allocation56_spill] sm:$0xff] %v10929_v1  ;;  %v3026_v17 = vmul.f32 %v10929_v1, %v2991_v63  ;;  %16438 = vst [vmem:[#allocation79_spill] sm:$0xff] %v10983_v24 }
 0x1e5   : > { %3481 = vrot.lane.b32.xlu1 %v10753_v62, %s8224_s21  ;;  %16440 = vst [vmem:[#allocation67_spill] sm:$0xff] %v10990_v47 }
 0x1e6   : > { %3586 = vrot.lane.b32.xlu0 %v10753_v62, %s8217_s17 }
 0x1e9   : > { %3540 = vrot.lane.b32.xlu1 %v10842_v14, %s8216_s30 }
 0x1ea   : > { %3634 = vrot.lane.b32.xlu0 %v10753_v62, %s8219_s12 }
 0x1ed   : > { %3588 = vrot.lane.b32.xlu1 %v10842_v14, %s8217_s17 }
 0x1ee   : > { %3682 = vrot.lane.b32.xlu0 %v10753_v62, %s8222_s20  ;;  %v10903_v53 = vpop.permute.xlu1 %3034 }
 0x1ef   : > { %v10905_v44 = vpop.permute.xlu0 %2970 }
 0x1f0   : > { %v2980_v61 = vsel %vm635_vm1, %v2969_v32, %v10905_v44  ;;  %v10941_v32 = vrot.slane %v10886_v34, %v16368_v42 }
 0x1f1   : > { %3636 = vrot.lane.b32.xlu1 %v10842_v14, %s8219_s12  ;;  %v3579_v36 = vmul.f32 %v10874_v10, %v2980_v61  ;;  %v10955_v10 = vrot.slane %v10886_v34, %v10759_v33 }
 0x1f2   : > { %3770 = vrot.lane.b32.xlu0 %v10842_v14, %s8215_s29  ;;  %16429 = vst [vmem:[#allocation72_spill] sm:$0xff] %v10941_v32 }
 0x1f3   : > { %16433 = vst [vmem:[#allocation57_spill] sm:$0xff] %v10955_v10  ;;  %v3033_v39 = vpop.permute.xlu0 %3032  ;;  %v7220_v0 = vpack.c.bf16 %v3579_v36, %v3530_v3  ;;  %v10976_v36 = vpop.permute.xlu1 %3098  ;;  %v3027_v3 = vmul.f32 %v10915_v54, %v2980_v61 }
 0x1f4   : > { %v3055_v52 = vsel %vm721_vm3, 0.0, %v3033_v39  ;;  %v3044_v12 = vsel %vm721_vm3, %v3033_v39, %v10903_v53  ;;  %v10987_v39 = vrot.slane %v10886_v34, %v10773_v57 }
 0x1f5   : > { %3684 = vrot.lane.b32.xlu1 %v10842_v14, %s8222_s20  ;;  %7221 = vmatprep.subr.bf16.mxu0 %v7220_v0  ;;  %v3091_v35 = vmul.f32 %v10919_v19, %v3044_v12  ;;  %v3090_v27 = vmul.f32 %v10937_v7, %v3055_v52  ;;  %v10994_v0 = vrot.slane %v10895_v5, %v10756_v6 }
 0x1f6   : > { %3862 = vrot.lane.b32.xlu0 %v10842_v14, %s8221_s19  ;;  %7223 = vmatpush1.bf16.msra.mxu0 %v7222_v41  ;;  %16439 = vst [vmem:[#allocation46_spill] sm:$0xff] %v10987_v39  ;;  %v3763_v19 = vmul.f32 %v10967_v18, %v10275_v8  ;;  %v11002_v7 = vrot.slane %v10895_v5, %v10773_v57 }
 0x1f7   : > { %16441 = vst [vmem:[#allocation31_spill] sm:$0xff] %v10994_v0  ;;  %v3097_v63 = vpop.permute.xlu0 %3096  ;;  %v7256_v61 = vpack.c.bf16 %v3091_v35, %v3027_v3  ;;  %v7258_v41 = vpack.c.bf16 %v3090_v27, %v3026_v17  ;;  %v3762_v35 = vmul.f32 %v10974_v25, %v16443_v59  ;;  %v11013_v27 = vrot.slane %v8158_v26, %v10776_v46  ;;  %v11101_v25 = vld [vmem:[%s15156_s4 + $0x20] sm:$0xff] }
 0x1f8   : > { %16442 = vst [vmem:[#allocation61_spill] sm:$0xff] %v11002_v7  ;;  %v3108_v54 = vsel %vm830_vm5, %v3097_v63, %v10976_v36  ;;  %v3119_v1 = vsel %vm830_vm5, 0.0, %v3097_v63  ;;  %v3626_v17 = vmul.f32 %v10877_v2, %v3055_v52  ;;  %v3627_v15 = vmul.f32 %v10925_v56, %v3044_v12  ;;  %v11034_v52 = vld [vmem:[%s15156_s4 + $0x80] sm:$0xff] }
 0x1f9   : > { %3816 = vrot.lane.b32.xlu1 %v10842_v14, %s8218_s18  ;;  %16444 = vst [vmem:[#allocation70_spill] sm:$0xff] %v11013_v27  ;;  %v3674_v3 = vmul.f32 %v10908_v16, %v3119_v1  ;;  %v3675_v18 = vmul.f32 %v10911_v21, %v3108_v54  ;;  %7257 = vmatprep.subr.bf16.mxu1 %v7256_v61 }
 0x1fa   : > { %7259 = vmatpush1.bf16.msra.mxu1 %v7258_v41  ;;  %v11021_v28 = vmul.f32 %v10994_v0, %v10275_v8  ;;  %v11025_v63 = vrot.slane %v10886_v34, %v10756_v6  ;;  %v11029_v26 = vrot.slane %v10886_v34, %v10776_v46  ;;  %v11038_v12 = vrot.slane %v11034_v52, %v8348_v11  ;;  %v11040_v8 = vpop.permute.xlu1 %3162  ;;  %v11049_v34 = vld [vmem:[%s15156_s4 + $0x88] sm:$0xff] }
 0x1fb   : > { %v3161_v61 = vpop.permute.xlu0 %3160  ;;  %v7224_v41 = vpack.c.bf16 %v3675_v18, %v3627_v15  ;;  %v7226_v0 = vpack.c.bf16 %v3674_v3, %v3626_v17  ;;  %v11044_v21 = vrot.slane %v10895_v5, %v10776_v46  ;;  %v11053_v16 = vrot.slane %v11049_v34, %v8348_v11 }
 0x1fc   : > { %16445 = vst [vmem:[#allocation78_spill] sm:$0xff] %v11025_v63  ;;  %16446 = vst [vmem:[#allocation75_spill] sm:$0xff] %v11029_v26  ;;  %v3155_v56 = vmul.f32 %v10899_v29, %v3108_v54  ;;  %v3172_v15 = vsel %vm931_vm7, %v3161_v61, %v11040_v8  ;;  %v3183_v18 = vsel %vm931_vm7, 0.0, %v3161_v61  ;;  %v11069_v54 = vld [vmem:[%s15156_s4 + $0x50] sm:$0xff]  ;;  %v11165_v55 = vrot.slane %v11049_v34, %v16368_v42 }
 0x1fd   : > { %3908 = vrot.lane.b32.xlu1 %v10842_v14, %s8224_s21  ;;  %16447 = vst [vmem:[#allocation64_spill] sm:$0xff] %v11038_v12  ;;  %16448 = vst [vmem:[#allocation26_spill] sm:$0xff] %v11044_v21  ;;  %v3218_v5 = vmul.f32 %v10941_v32, %v3183_v18  ;;  %v3219_v17 = vmul.f32 %v10945_v23, %v3172_v15  ;;  %v3722_v3 = vmul.f32 %v10948_v20, %v3183_v18 }
 0x1fe   : > { %16449 = vst [vmem:[#allocation20_spill] sm:$0xff] %v11053_v16  ;;  %v3723_v2 = vmul.f32 %v10951_v4, %v3172_v15  ;;  %7225 = vmatprep.subr.bf16.mxu0 %v7224_v41  ;;  %v11073_v61 = vrot.slane %v11069_v54, %v8348_v11  ;;  %v11077_v23 = vrot.slane %v11034_v52, %v16355_v38  ;;  %16465 = vst [vmem:[#allocation88_spill] sm:$0xff] %v11165_v55 }
 0x1ff   : > { %7227 = vmatpush1.bf16.msra.mxu0 %v7226_v0  ;;  %v11082_v0 = vld [vmem:[%s15156_s4 + $0x58] sm:$0xff]  ;;  %v3268_v41 = vpop.permute.xlu0 %3267  ;;  %v7260_v4 = vpack.c.bf16 %v3219_v17, %v3155_v56  ;;  %v7230_v32 = vpack.c.bf16 %v3762_v35, %v3722_v3  ;;  %v11111_v56 = vrot.slane %v11069_v54, %v16355_v38  ;;  %v11115_v35 = vrot.slane %v11034_v52, %v16364_v48 }
 0x200   : > { %16450 = vst [vmem:[#allocation44_spill] sm:$0xff] %v11073_v61  ;;  %16451 = vst [vmem:[#allocation58_spill] sm:$0xff] %v11077_v23  ;;  %v7228_v18 = vpack.c.bf16 %v3763_v19, %v3723_v2  ;;  %v3279_v29 = vsel %vm1110_vm2, %v10796_v22, %v3268_v41  ;;  %v11105_v2 = vrot.slane %v11101_v25, %v8348_v11 }
 0x201   : > { %4335 = vperm.xlu1 %8139, %v4327_v13   ;;  %v3154_v13 = vmul.f32 %v10890_v30, %v3119_v1  ;;  %v3258_v1 = vmul.f32 %v11025_v63, %v16443_v59  ;;  %v11086_v59 = vrot.slane %v11082_v0, %v8348_v11  ;;  %v11088_v15 = vpop.permute.xlu1 %3269  ;;  %v11096_v63 = vrot.slane %v11049_v34, %v16355_v38 }
 0x202   : > { %v3280_v30 = vsel %vm1110_vm2, %v3268_v41, %v11088_v15  ;;  %16454 = vst [vmem:[#allocation22_spill] sm:$0xff] %v11105_v2  ;;  %v3327_v19 = vmul.f32 %v10955_v10, %v3279_v29  ;;  %7229 = vmatprep.subr.bf16.mxu0 %v7228_v18  ;;  %16455 = vst [vmem:[#allocation28_spill] sm:$0xff] %v11111_v56  ;;  %7261 = vmatprep.subr.bf16.mxu1 %v7260_v4 }
 0x203   : > { %16452 = vst [vmem:[#allocation41_spill] sm:$0xff] %v11086_v59  ;;  %v7262_v20 = vpack.c.bf16 %v3218_v5, %v3154_v13  ;;  %16453 = vst [vmem:[#allocation18_spill] sm:$0xff] %v11096_v63  ;;  %v3328_v22 = vmul.f32 %v10964_v37, %v3280_v30  ;;  %7231 = vmatpush1.bf16.msra.mxu0 %v7230_v32  ;;  %v11120_v13 = vld [vmem:[%s15156_s4 + $0x28] sm:$0xff]  ;;  %v11128_v17 = vrot.slane %v11082_v0, %v16355_v38  ;;  %v3336_v4 = vpop.permute.xlu0 %3335 }
 0x204   : > { %16456 = vst [vmem:[#allocation23_spill] sm:$0xff] %v11115_v35  ;;  %v11124_v5 = vrot.slane %v11120_v13, %v8348_v11  ;;  %v11132_v3 = vrot.slane %v11049_v34, %v16364_v48  ;;  %v7266_v41 = vpack.c.bf16 %v3327_v19, %v3258_v1  ;;  %v11137_v18 = vrot.slane %v11101_v25, %v16355_v38 }
 0x205   : > { %16458 = vst [vmem:[#allocation3_spill] sm:$0xff] %v11128_v17  ;;  %7263 = vmatpush1.bf16.msra.mxu1 %v7262_v20  ;;  %v7264_v32 = vpack.c.bf16 %v3328_v22, %v11021_v28  ;;  %v11141_v10 = vrot.slane %v11069_v54, %v16364_v48  ;;  %v3347_v37 = vsel %vm1215_vm4, %v10794_v58, %v3336_v4  ;;  %v11145_v60 = vpop.permute.xlu1 %3337 }
 0x206   : > { %16457 = vst [vmem:[#allocation19_spill] sm:$0xff] %v11124_v5  ;;  %16459 = vst [vmem:[#allocation76_spill] sm:$0xff] %v11132_v3  ;;  %v11149_v20 = vrot.slane %v11034_v52, %v16368_v42  ;;  %v11153_v28 = vrot.slane %v11120_v13, %v16355_v38  ;;  %v11157_v1 = vrot.slane %v11082_v0, %v16364_v48 }
 0x207   : > { %16460 = vst [vmem:[#allocation83_spill] sm:$0xff] %v11137_v18  ;;  %16461 = vst [vmem:[#allocation84_spill] sm:$0xff] %v11141_v10  ;;  %v3808_v19 = vmul.f32 %v10960_v31, %v3279_v29  ;;  %v3854_v22 = vmul.f32 %v10990_v47, %v3347_v37  ;;  %v3348_v58 = vsel %vm1215_vm4, %v3336_v4, %v11145_v60  ;;  %7265 = vmatprep.subr.bf16.mxu1 %v7264_v32  ;;  %v3404_v47 = vpop.permute.xlu0 %3403 }
 0x208   : > { %16462 = vst [vmem:[#allocation85_spill] sm:$0xff] %v11149_v20  ;;  %16463 = vst [vmem:[#allocation86_spill] sm:$0xff] %v11153_v28  ;;  %v3809_v51 = vmul.f32 %v10983_v24, %v3280_v30  ;;  %v3855_v14 = vmul.f32 %v11013_v27, %v3348_v58  ;;  %v11171_v62 = vrot.slane %v11101_v25, %v16364_v48 }
 0x209   : > { %16464 = vst [vmem:[#allocation87_spill] sm:$0xff] %v11157_v1  ;;  %v11175_v29 = vrot.slane %v11069_v54, %v16368_v42  ;;  %7267 = vmatpush1.bf16.msra.mxu1 %v7266_v41  ;;  %v7234_v4 = vpack.c.bf16 %v3854_v22, %v3808_v19  ;;  %v11179_v32 = vrot.slane %v11034_v52, %v10756_v6  ;;  %v11191_v31 = vpop.permute.xlu1 %3405 }
 0x20a   : > { %16466 = vst [vmem:[#allocation89_spill] sm:$0xff] %v11171_v62  ;;  %v11183_v30 = vrot.slane %v11120_v13, %v16364_v48  ;;  %v11187_v27 = vrot.slane %v11082_v0, %v16368_v42  ;;  %v3415_v24 = vsel %vm1320_vm6, %v10826_v45, %v3404_v47  ;;  %v7232_v41 = vpack.c.bf16 %v3855_v14, %v3809_v51 }
 0x20b   : > { %16467 = vst [vmem:[#allocation90_spill] sm:$0xff] %v11175_v29  ;;  %16468 = vst [vmem:[#allocation91_spill] sm:$0xff] %v11179_v32  ;;  %v11195_v19 = vrot.slane %v11049_v34, %v10756_v6  ;;  %v11199_v22 = vrot.slane %v11101_v25, %v16368_v42  ;;  %v3395_v62 = vmul.f32 %v10987_v39, %v3347_v37 }
 0x20c   : > { %16469 = vst [vmem:[#allocation92_spill] sm:$0xff] %v11183_v30  ;;  %16470 = vst [vmem:[#allocation93_spill] sm:$0xff] %v11187_v27  ;;  %v3463_v30 = vmul.f32 %v11029_v26, %v3415_v24  ;;  %v3416_v5 = vsel %vm1320_vm6, %v3404_v47, %v11191_v31  ;;  %v11207_v45 = vrot.slane %v11069_v54, %v10756_v6  ;;  %7233 = vmatprep.subr.bf16.mxu0 %v7232_v41  ;;  %v4326_v47 = vld [vmem:[%s15160_s8] sm:$0xff]  ;;  %v3472_v26 = vpop.permute.xlu0 %3471 }
 0x20d   : > { %16471 = vst [vmem:[#allocation94_spill] sm:$0xff] %v11195_v19  ;;  %16472 = vst [vmem:[#allocation95_spill] sm:$0xff] %v11199_v22  ;;  %v3396_v51 = vmul.f32 %v11002_v7, %v3348_v58  ;;  %v3464_v14 = vmul.f32 %v11044_v21, %v3416_v5  ;;  %v11213_v2 = vrot.slane %v11034_v52, %v10759_v33  ;;  %7235 = vmatpush1.bf16.msra.mxu0 %v7234_v4  ;;  %v11232_v7 = vpop.permute.xlu1 %3473 }
 0x20e   : > { %16473 = vst [vmem:[#allocation96_spill] sm:$0xff] %v11207_v45  ;;  %v11217_v37 = vrot.slane %v11120_v13, %v16368_v42  ;;  %v7270_v39 = vpack.c.bf16 %v3463_v30, %v3395_v62  ;;  %v11224_v58 = vrot.slane %v11082_v0, %v10756_v6  ;;  %v11228_v41 = vrot.slane %v11049_v34, %v10759_v33 }
 0x20f   : > { %16474 = vst [vmem:[#allocation97_spill] sm:$0xff] %v11213_v2  ;;  %4330 = vperm.xlu0 %8140, %v4326_v47   ;;  %v3483_v21 = vsel %vm1425_vm8, %v10857_v50, %v3472_v26  ;;  %16478 = vst [vmem:[#allocation101_spill] sm:$0xff] %v11232_v7  ;;  %v7268_v22 = vpack.c.bf16 %v3464_v14, %v3396_v51  ;;  %v11236_v4 = vrot.slane %v11101_v25, %v10759_v33 }
 0x210   : > { %16475 = vst [vmem:[#allocation98_spill] sm:$0xff] %v11217_v37  ;;  %16476 = vst [vmem:[#allocation99_spill] sm:$0xff] %v11224_v58  ;;  %v11240_v62 = vrot.slane %v11069_v54, %v10773_v57  ;;  %v3900_v30 = vmul.f32 %v11038_v12, %v3415_v24  ;;  %v3946_v37 = vmul.f32 %v11077_v23, %v3483_v21  ;;  %v2973_v23 = vpop.permute.xlu0 %2972 }
 0x211   : > { %16477 = vst [vmem:[#allocation100_spill] sm:$0xff] %v11228_v41  ;;  %16479 = vst [vmem:[#allocation102_spill] sm:$0xff] %v11236_v4  ;;  %v3484_v47 = vsel %vm1425_vm8, %v3472_v26, %v11232_v7  ;;  %v11248_v50 = vrot.slane %v11034_v52, %v10776_v46  ;;  %v3901_v51 = vmul.f32 %v11053_v16, %v3416_v5  ;;  %7269 = vmatprep.subr.bf16.mxu1 %v7268_v22 }
 0x212   : > { %16480 = vst [vmem:[#allocation103_spill] sm:$0xff] %v11240_v62  ;;  %v3947_v14 = vmul.f32 %v11096_v63, %v3484_v47  ;;  %v11254_v4 = vrot.slane %v11082_v0, %v10759_v33  ;;  %v11258_v24 = vrot.slane %v11069_v54, %v10759_v33  ;;  %7271 = vmatpush1.bf16.msra.mxu1 %v7270_v39 }
 0x213   : > { %16481 = vst [vmem:[#allocation104_spill] sm:$0xff] %v11248_v50  ;;  %v7238_v26 = vpack.c.bf16 %v3946_v37, %v3900_v30  ;;  %v11262_v12 = vrot.slane %v11120_v13, %v10759_v33  ;;  %v11266_v5 = vrot.slane %v11082_v0, %v10773_v57  ;;  %v11270_v22 = vrot.slane %v11049_v34, %v10776_v46 }
 0x214   : > { %16482 = vst [vmem:[#allocation105_spill] sm:$0xff] %v11254_v4  ;;  %16483 = vst [vmem:[#allocation106_spill] sm:$0xff] %v11258_v24  ;;  %v7236_v63 = vpack.c.bf16 %v3947_v14, %v3901_v51  ;;  %v11274_v16 = vrot.slane %v11101_v25, %v10773_v57  ;;  %v11278_v39 = vrot.slane %v11049_v34, %v10773_v57  ;;  %v8167_v51 = vld [vmem:[%s15156_s4 + $0xc0] sm:$0x7] }
 0x215   : > { %16484 = vst [vmem:[#allocation107_spill] sm:$0xff] %v11262_v12  ;;  %16485 = vst [vmem:[#allocation108_spill] sm:$0xff] %v11266_v5  ;;  %v11282_v37 = vrot.slane %v11034_v52, %v10773_v57  ;;  %v11286_v30 = vsel %vm635_vm1, %v10905_v44, %v2973_v23  ;;  %v11290_v12 = vrot.slane %v11069_v54, %v10776_v46 }
 0x216   : > { %16486 = vst [vmem:[#allocation109_spill] sm:$0xff] %v11270_v22  ;;  %16487 = vst [vmem:[#allocation110_spill] sm:$0xff] %v11274_v16  ;;  %v11296_v14 = vrot.slane %v8167_v51, %v8348_v11  ;;  %v11300_v34 = vrot.slane %v11120_v13, %v10773_v57  ;;  %7237 = vmatprep.subr.bf16.mxu0 %v7236_v63  ;;  %v11304_v44 = vmul.f32 %v11254_v4, %v10522_v40  ;;  %v8168_v16 = vld [vmem:[%s15156_s4 + $0xc8] sm:$0x7]  ;;  %v3037_v63 = vpop.permute.xlu0 %3036 }
 0x217   : > { %16488 = vst [vmem:[#allocation111_spill] sm:$0xff] %v11278_v39  ;;  %16489 = vst [vmem:[#allocation112_spill] sm:$0xff] %v11282_v37  ;;  %v11308_v52 = vmul.f32 %v11258_v24, %v10387_v43  ;;  %v11312_v54 = vrot.slane %v11082_v0, %v10776_v46  ;;  %v11318_v28 = vrot.slane %v8168_v16, %v8348_v11  ;;  %7239 = vmatpush1.bf16.msra.mxu0 %v7238_v26  ;;  %v11327_v24 = vld [vmem:[%s15156_s4 + $0x90] sm:$0xff] }
 0x218   : > { %16490 = vst [vmem:[#allocation113_spill] sm:$0xff] %v11290_v12  ;;  %16491 = vst [vmem:[#allocation114_spill] sm:$0xff] %v11296_v14  ;;  %v11322_v4 = vrot.slane %v11101_v25, %v10776_v46  ;;  %v11331_v0 = vrot.slane %v11327_v24, %v8348_v11  ;;  %v11338_v26 = vrot.slane %v11120_v13, %v10776_v46 }
 0x219   : > { %16492 = vst [vmem:[#allocation115_spill] sm:$0xff] %v11300_v34  ;;  %16493 = vst [vmem:[#allocation116_spill] sm:$0xff] %v11312_v54  ;;  %v11334_v34 = vrot.slane %v8167_v51, %v16355_v38  ;;  %v3580_v18 = vmul.f32 %v11111_v56, %v11286_v30  ;;  %v11348_v9 = vmul.f32 %v11282_v37, %v10387_v43  ;;  %v11371_v37 = vld [vmem:[%s15156_s4 + $0x60] sm:$0xff] }
 0x21a   : > { %16494 = vst [vmem:[#allocation117_spill] sm:$0xff] %v11318_v28  ;;  %16495 = vst [vmem:[#allocation118_spill] sm:$0xff] %v11322_v4  ;;  %v11344_v4 = vmul.f32 %v11278_v39, %v10522_v40  ;;  %v11363_v56 = vsel %vm721_vm3, %v10903_v53, %v3037_v63  ;;  %v11366_v39 = vrot.slane %v8168_v16, %v16355_v38 }
 0x21b   : > { %16496 = vst [vmem:[#allocation119_spill] sm:$0xff] %v11331_v0  ;;  %16497 = vst [vmem:[#allocation120_spill] sm:$0xff] %v11334_v34  ;;  %v11353_v0 = vld [vmem:[%s15156_s4 + $0x98] sm:$0xff]  ;;  %v11375_v28 = vrot.slane %v11371_v37, %v8348_v11  ;;  %v3531_v14 = vmul.f32 %v11073_v61, %v3483_v21  ;;  %v11405_v61 = vld [vmem:[%s15156_s4 + $0x30] sm:$0xff] }
 0x21c   : > { %16498 = vst [vmem:[#allocation121_spill] sm:$0xff] %v11338_v26  ;;  %v11357_v49 = vrot.slane %v11353_v0, %v8348_v11  ;;  %v11359_v26 = vpop.permute.xlu1 %2974  ;;  %16501 = vst [vmem:[#allocation124_spill] sm:$0xff] %v11366_v39  ;;  %v11389_v39 = vld [vmem:[%s15156_s4 + $0x68] sm:$0xff] }
 0x21d   : > { %16500 = vst [vmem:[#allocation123_spill] sm:$0xff] %v11359_v26  ;;  %16502 = vst [vmem:[#allocation125_spill] sm:$0xff] %v11375_v28  ;;  %v11384_v53 = vsel %vm635_vm1, %v2973_v23, %v11359_v26  ;;  %v11393_v7 = vrot.slane %v11389_v39, %v8348_v11  ;;  %v11397_v28 = vrot.slane %v11353_v0, %v16355_v38  ;;  %v3101_v23 = vpop.permute.xlu0 %3100 }
 0x21e   : > { %16499 = vst [vmem:[#allocation122_spill] sm:$0xff] %v11357_v49  ;;  %v11379_v49 = vrot.slane %v11327_v24, %v16355_v38  ;;  %v3581_v21 = vmul.f32 %v11128_v17, %v11384_v53  ;;  %16506 = vst [vmem:[#allocation129_spill] sm:$0xff] %v11405_v61  ;;  %v11409_v26 = vrot.slane %v11405_v61, %v8348_v11 }
 0x21f   : > { %16504 = vst [vmem:[#allocation127_spill] sm:$0xff] %v11393_v7  ;;  %16505 = vst [vmem:[#allocation128_spill] sm:$0xff] %v11397_v28  ;;  %v11413_v7 = vrot.slane %v11371_v37, %v16355_v38  ;;  %v11419_v17 = vrot.slane %v11327_v24, %v16364_v48  ;;  %v11422_v28 = vrot.slane %v8168_v16, %v16364_v48 }
 0x220   : > { %16503 = vst [vmem:[#allocation126_spill] sm:$0xff] %v11379_v49  ;;  %v3532_v49 = vmul.f32 %v11086_v59, %v3484_v47  ;;  %16507 = vst [vmem:[#allocation130_spill] sm:$0xff] %v11409_v26  ;;  %v4030_v47 = vmul.f32 %v11149_v20, %v11363_v56  ;;  %v7274_v59 = vpack.c.bf16 %v3580_v18, %v3531_v14  ;;  %v11424_v34 = vpop.permute.xlu1 %3038 }
 0x221   : > { %16508 = vst [vmem:[#allocation131_spill] sm:$0xff] %v11413_v7  ;;  %16509 = vst [vmem:[#allocation132_spill] sm:$0xff] %v11419_v17  ;;  %v11428_v26 = vsel %vm830_vm5, %v10976_v36, %v3101_v23  ;;  %v11433_v7 = vld [vmem:[%s15156_s4 + $0x38] sm:$0xff]  ;;  %v11441_v16 = vrot.slane %v11389_v39, %v16355_v38  ;;  %v11447_v36 = vsel %vm721_vm3, %v3037_v63, %v11424_v34 }
 0x222   : > { %16510 = vst [vmem:[#allocation133_spill] sm:$0xff] %v11422_v28  ;;  %v7272_v54 = vpack.c.bf16 %v3581_v21, %v3532_v49  ;;  %16511 = vst [vmem:[#allocation134_spill] sm:$0xff] %v11433_v7  ;;  %v11437_v18 = vrot.slane %v11433_v7, %v8348_v11  ;;  %v3988_v49 = vmul.f32 %v11115_v35, %v11286_v30 }
 0x223   : > { %16513 = vst [vmem:[#allocation136_spill] sm:$0xff] %v11441_v16  ;;  %v11451_v14 = vrot.slane %v11353_v0, %v16364_v48  ;;  %v11454_v21 = vrot.slane %v8167_v51, %v16364_v48  ;;  %v3989_v20 = vmul.f32 %v11132_v3, %v11384_v53  ;;  %v3165_v16 = vpop.permute.xlu0 %3164  ;;  %v11462_v35 = vrot.slane %v11405_v61, %v16355_v38 }
 0x224   : > { %16512 = vst [vmem:[#allocation135_spill] sm:$0xff] %v11437_v18  ;;  %v4031_v18 = vmul.f32 %v11165_v55, %v11447_v36  ;;  %7273 = vmatprep.subr.bf16.mxu1 %v7272_v54  ;;  %v11466_v63 = vrot.slane %v11371_v37, %v16364_v48  ;;  %v3676_v51 = vmul.f32 %v11175_v29, %v11428_v26  ;;  %v11478_v55 = vpop.permute.xlu1 %3102 }
 0x225   : > { %16514 = vst [vmem:[#allocation137_spill] sm:$0xff] %v11451_v14  ;;  %16515 = vst [vmem:[#allocation138_spill] sm:$0xff] %v11454_v21  ;;  %7275 = vmatpush1.bf16.msra.mxu1 %v7274_v59  ;;  %v7242_v14 = vpack.c.bf16 %v4030_v47, %v3988_v49  ;;  %v11472_v3 = vrot.slane %v11327_v24, %v16368_v42  ;;  %v11476_v54 = vrot.slane %v11433_v7, %v16355_v38 }
 0x226   : > { %16516 = vst [vmem:[#allocation139_spill] sm:$0xff] %v11462_v35  ;;  %16517 = vst [vmem:[#allocation140_spill] sm:$0xff] %v11466_v63  ;;  %v7240_v35 = vpack.c.bf16 %v4031_v18, %v3989_v20  ;;  %v11482_v17 = vsel %vm931_vm7, %v11040_v8, %v3165_v16  ;;  %v11486_v59 = vrot.slane %v11389_v39, %v16364_v48 }
 0x227   : > { %16518 = vst [vmem:[#allocation141_spill] sm:$0xff] %v11472_v3  ;;  %16519 = vst [vmem:[#allocation142_spill] sm:$0xff] %v11476_v54  ;;  %v11490_v47 = vrot.slane %v11353_v0, %v16368_v42  ;;  %v3628_v49 = vmul.f32 %v11141_v10, %v11363_v56  ;;  %v11496_v29 = vsel %vm830_vm5, %v3101_v23, %v11478_v55  ;;  %v3272_v10 = vpop.permute.xlu0 %3271 }
 0x228   : > { %16520 = vst [vmem:[#allocation143_spill] sm:$0xff] %v11486_v59  ;;  %v11500_v20 = vrot.slane %v11405_v61, %v16364_v48  ;;  %v11504_v8 = vrot.slane %v11120_v13, %v10756_v6  ;;  %v3629_v18 = vmul.f32 %v11157_v1, %v11447_v36  ;;  %v3677_v54 = vmul.f32 %v11187_v27, %v11496_v29  ;;  %v11526_v27 = vpop.permute.xlu1 %3166 }
 0x229   : > { %16521 = vst [vmem:[#allocation144_spill] sm:$0xff] %v11490_v47  ;;  %7241 = vmatprep.subr.bf16.mxu0 %v7240_v35  ;;  %v11512_v23 = vrot.slane %v11371_v37, %v16368_v42  ;;  %v11516_v63 = vrot.slane %v11327_v24, %v10756_v6  ;;  %v3724_v13 = vmul.f32 %v11207_v45, %v11482_v17 }
 0x22a   : > { %16522 = vst [vmem:[#allocation145_spill] sm:$0xff] %v11500_v20  ;;  %16523 = vst [vmem:[#allocation146_spill] sm:$0xff] %v11504_v8  ;;  %7243 = vmatpush1.bf16.msra.mxu0 %v7242_v14  ;;  %v4114_v1 = vmul.f32 %v11213_v2, %v11482_v17  ;;  %v7278_v20 = vpack.c.bf16 %v3676_v51, %v3628_v49  ;;  %v11524_v35 = vrot.slane %v11433_v7, %v16364_v48 }
 0x22b   : > { %16524 = vst [vmem:[#allocation147_spill] sm:$0xff] %v11512_v23  ;;  %16525 = vst [vmem:[#allocation148_spill] sm:$0xff] %v11516_v63  ;;  %v7276_v59 = vpack.c.bf16 %v3677_v54, %v3629_v18  ;;  %v11530_v23 = vsel %vm1110_vm2, %v11088_v15, %v3272_v10  ;;  %v11534_v14 = vrot.slane %v11389_v39, %v16368_v42 }
 0x22c   : > { %16526 = vst [vmem:[#allocation149_spill] sm:$0xff] %v11524_v35  ;;  %v11538_v45 = vrot.slane %v11353_v0, %v10756_v6  ;;  %v4072_v51 = vmul.f32 %v11179_v32, %v11428_v26  ;;  %v11544_v49 = vsel %vm931_vm7, %v3165_v16, %v11526_v27  ;;  %v11548_v54 = vmul.f32 %v11504_v8, %v10522_v40  ;;  %v3340_v16 = vpop.permute.xlu0 %3339 }
 0x22d   : > { %16527 = vst [vmem:[#allocation150_spill] sm:$0xff] %v11534_v14  ;;  %v11552_v15 = vrot.slane %v11405_v61, %v16368_v42  ;;  %v4073_v18 = vmul.f32 %v11195_v19, %v11496_v29  ;;  %v3725_v2 = vmul.f32 %v11224_v58, %v11544_v49  ;;  %v4115_v32 = vmul.f32 %v11228_v41, %v11544_v49  ;;  %v11571_v58 = vpop.permute.xlu1 %3273 }
 0x22e   : > { %16528 = vst [vmem:[#allocation151_spill] sm:$0xff] %v11538_v45  ;;  %7277 = vmatprep.subr.bf16.mxu1 %v7276_v59  ;;  %v11562_v35 = vrot.slane %v11371_v37, %v10756_v6  ;;  %v4194_v40 = vmul.f32 %v11248_v50, %v11530_v23  ;;  %v7246_v8 = vpack.c.bf16 %v4114_v1, %v4072_v51 }
 0x22f   : > { %16529 = vst [vmem:[#allocation152_spill] sm:$0xff] %v11552_v15  ;;  %7279 = vmatpush1.bf16.msra.mxu1 %v7278_v20  ;;  %v7282_v15 = vpack.c.bf16 %v11308_v52, %v3724_v13  ;;  %v11569_v19 = vrot.slane %v11327_v24, %v10759_v33  ;;  %v7244_v41 = vpack.c.bf16 %v4115_v32, %v4073_v18 }
 0x230   : > { %16530 = vst [vmem:[#allocation153_spill] sm:$0xff] %v11562_v35  ;;  %v7280_v59 = vpack.c.bf16 %v11304_v44, %v3725_v2  ;;  %v11576_v14 = vsel %vm1215_vm4, %v11145_v60, %v3340_v16  ;;  %v11580_v20 = vrot.slane %v11101_v25, %v10756_v6  ;;  %v11584_v1 = vsel %vm1110_vm2, %v3272_v10, %v11571_v58  ;;  %v3408_v2 = vpop.permute.xlu0 %3407 }
 0x231   : > { %16531 = vst [vmem:[#allocation154_spill] sm:$0xff] %v11569_v19  ;;  %v11588_v52 = vrot.slane %v11433_v7, %v16368_v42  ;;  %v11592_v32 = vrot.slane %v11389_v39, %v10756_v6  ;;  %v11596_v60 = vrot.slane %v11353_v0, %v10759_v33  ;;  %v4195_v25 = vmul.f32 %v11270_v22, %v11584_v1  ;;  %v11615_v18 = vpop.permute.xlu1 %3341  ;;  %v16546_v22 = vld [vmem:[#allocation120_spill] sm:$0xff] }
 0x232   : > { %16532 = vst [vmem:[#allocation155_spill] sm:$0xff] %v11580_v20  ;;  %7245 = vmatprep.subr.bf16.mxu0 %v7244_v41  ;;  %7281 = vmatprep.subr.bf16.mxu1 %v7280_v59  ;;  %v11602_v10 = vrot.slane %v11405_v61, %v10759_v33  ;;  %v11606_v44 = vrot.slane %v11371_v37, %v10773_v57  ;;  %16539 = vst [vmem:[#allocation162_spill] sm:$0xff] %v11615_v18 }
 0x233   : > { %16533 = vst [vmem:[#allocation156_spill] sm:$0xff] %v11588_v52  ;;  %16534 = vst [vmem:[#allocation157_spill] sm:$0xff] %v11592_v32  ;;  %7247 = vmatpush1.bf16.msra.mxu0 %v7246_v8  ;;  %7283 = vmatpush1.bf16.msra.mxu1 %v7282_v15  ;;  %v3856_v13 = vmul.f32 %v11290_v12, %v11576_v14  ;;  %v7250_v51 = vpack.c.bf16 %v4194_v40, %v11348_v9  ;;  %v16550_v52 = vld [vmem:[#allocation101_spill] sm:$0xff]  ;;  %v16573_v32 = vld [vmem:[#allocation128_spill] sm:$0xff] }
 0x234   : > { %16535 = vst [vmem:[#allocation158_spill] sm:$0xff] %v11596_v60  ;;  %16536 = vst [vmem:[#allocation159_spill] sm:$0xff] %v11602_v10  ;;  %v11613_v41 = vrot.slane %v11327_v24, %v10776_v46  ;;  %v7248_v59 = vpack.c.bf16 %v4195_v25, %v11344_v4  ;;  %v11620_v50 = vsel %vm1320_vm6, %v11191_v31, %v3408_v2  ;;  %v16543_v25 = vld [vmem:[#allocation116_spill] sm:$0xff]  ;;  %v3476_v12 = vpop.permute.xlu0 %3475 }
 0x235   : > { %16537 = vst [vmem:[#allocation160_spill] sm:$0xff] %v11606_v44  ;;  %v11624_v8 = vmul.f32 %v11580_v20, %v10387_v43  ;;  %v11628_v15 = vrot.slane %v11433_v7, %v10759_v33  ;;  %v3810_v9 = vmul.f32 %v11240_v62, %v11530_v23  ;;  %v11634_v40 = vsel %vm1215_vm4, %v3340_v16, %v11615_v18  ;;  %v16553_v44 = vld [vmem:[#allocation114_spill] sm:$0xff]  ;;  %v16564_v18 = vld [vmem:[#allocation11_spill] sm:$0xff] }
 0x236   : > { %16538 = vst [vmem:[#allocation161_spill] sm:$0xff] %v11613_v41  ;;  %v11638_v4 = vrot.slane %v11389_v39, %v10773_v57  ;;  %v11642_v31 = vrot.slane %v11353_v0, %v10776_v46  ;;  %v3811_v43 = vmul.f32 %v11266_v5, %v11584_v1  ;;  %v3857_v20 = vmul.f32 %v16543_v25, %v11634_v40  ;;  %v11661_v5 = vld [vmem:[%s15156_s4 + $0xd0] sm:$0x7] }
 0x237   : > { %16540 = vst [vmem:[#allocation163_spill] sm:$0xff] %v11628_v15  ;;  %7249 = vmatprep.subr.bf16.mxu0 %v7248_v59  ;;  %v11650_v16 = vrot.slane %v11405_v61, %v10773_v57  ;;  %v11654_v62 = vrot.slane %v11371_v37, %v10776_v46  ;;  %v4274_v10 = vmul.f32 %v16546_v22, %v11620_v50 }
 0x238   : > { %16541 = vst [vmem:[#allocation164_spill] sm:$0xff] %v11638_v4  ;;  %16542 = vst [vmem:[#allocation165_spill] sm:$0xff] %v11642_v31  ;;  %7251 = vmatpush1.bf16.msra.mxu0 %v7250_v51  ;;  %v7286_v15 = vpack.c.bf16 %v3856_v13, %v3810_v9  ;;  %v11665_v59 = vrot.slane %v11661_v5, %v8348_v11  ;;  %v11669_v25 = vrot.slane %v11433_v7, %v10773_v57  ;;  %v2977_v4 = vpop.permute.xlu0 %2976 }
 0x239   : > { %16544 = vst [vmem:[#allocation166_spill] sm:$0xff] %v11650_v16  ;;  %16545 = vst [vmem:[#allocation167_spill] sm:$0xff] %v11654_v62  ;;  %v11671_v16 = vpop.permute.xlu1 %3409  ;;  %v7284_v51 = vpack.c.bf16 %v3857_v20, %v3811_v43  ;;  %v11675_v22 = vsel %vm1425_vm8, %v16550_v52, %v3476_v12  ;;  %v11679_v13 = vrot.slane %v11353_v0, %v10773_v57  ;;  %v11698_v0 = vld [vmem:[%s15156_s4 + $0xd8] sm:$0x7] }
 0x23a   : > { %16547 = vst [vmem:[#allocation168_spill] sm:$0xff] %v11665_v59  ;;  %16548 = vst [vmem:[#allocation169_spill] sm:$0xff] %v11669_v25  ;;  %v11683_v9 = vrot.slane %v11327_v24, %v10773_v57  ;;  %v4234_v62 = vmul.f32 %v16553_v44, %v11576_v14  ;;  %v11689_v25 = vsel %vm1320_vm6, %v3408_v2, %v11671_v16  ;;  %v16556_v52 = vld [vmem:[#allocation117_spill] sm:$0xff]  ;;  %v16557_v44 = vld [vmem:[#allocation124_spill] sm:$0xff] }
 0x23b   : > { %16549 = vst [vmem:[#allocation170_spill] sm:$0xff] %v11671_v16  ;;  %16551 = vst [vmem:[#allocation101_spill] sm:$0xff] %v11679_v13  ;;  %v11693_v20 = vrot.slane %v11389_v39, %v10776_v46  ;;  %v11702_v24 = vrot.slane %v11698_v0, %v8348_v11  ;;  %v4235_v43 = vmul.f32 %v16556_v52, %v11634_v40  ;;  %7285 = vmatprep.subr.bf16.mxu1 %v7284_v51  ;;  %v11715_v57 = vld [vmem:[%s15156_s4 + $0xa0] sm:$0xff] }
 0x23c   : > { %16552 = vst [vmem:[#allocation171_spill] sm:$0xff] %v11683_v9  ;;  %v4275_v2 = vmul.f32 %v16557_v44, %v11689_v25  ;;  %v11710_v59 = vrot.slane %v11405_v61, %v10776_v46  ;;  %7287 = vmatpush1.bf16.msra.mxu1 %v7286_v15  ;;  %v16560_v52 = vld [vmem:[#allocation126_spill] sm:$0xff]  ;;  %v7254_v44 = vpack.c.bf16 %v4274_v10, %v4234_v62  ;;  %v16566_v15 = vld [vmem:[#allocation24_spill] sm:$0xff] }
 0x23d   : > { %16554 = vst [vmem:[#allocation172_spill] sm:$0xff] %v11693_v20  ;;  %16555 = vst [vmem:[#allocation173_spill] sm:$0xff] %v11702_v24  ;;  %v11719_v24 = vrot.slane %v11715_v57, %v8348_v11  ;;  %v3948_v20 = vmul.f32 %v16560_v52, %v11675_v22  ;;  %v11725_v51 = vrot.slane %v11661_v5, %v16355_v38  ;;  %v11731_v61 = vpop.permute.xlu1 %3477  ;;  %v11744_v62 = vld [vmem:[%s15156_s4 + $0xa8] sm:$0xff] }
 0x23e   : > { %16558 = vst [vmem:[#allocation174_spill] sm:$0xff] %v11710_v59  ;;  %v11729_v59 = vrot.slane %v11433_v7, %v10776_v46  ;;  %16563 = vst [vmem:[#allocation178_spill] sm:$0xff] %v11731_v61  ;;  %v7252_v35 = vpack.c.bf16 %v4275_v2, %v4235_v43  ;;  %v11735_v16 = vmul.f32 %v11679_v13, %v16564_v18  ;;  %v16568_v52 = vld [vmem:[#allocation83_spill] sm:$0xff]  ;;  %v16571_v46 = vld [vmem:[#allocation86_spill] sm:$0xff] }
 0x23f   : > { %16559 = vst [vmem:[#allocation175_spill] sm:$0xff] %v11719_v24  ;;  %16561 = vst [vmem:[#allocation176_spill] sm:$0xff] %v11725_v51  ;;  %v11739_v24 = vmul.f32 %v11683_v9, %v16566_v15  ;;  %v11748_v10 = vrot.slane %v11744_v62, %v8348_v11  ;;  %v3092_v43 = vmul.f32 %v16568_v52, %v11363_v56  ;;  %v16569_v2 = vld [vmem:[#allocation119_spill] sm:$0xff] }
 0x240   : > { %16562 = vst [vmem:[#allocation177_spill] sm:$0xff] %v11729_v59  ;;  %16565 = vst [vmem:[#allocation11_spill] sm:$0xff] %v11735_v16  ;;  %v3902_v13 = vmul.f32 %v16569_v2, %v11620_v50  ;;  %v11756_v59 = vsel %vm1425_vm8, %v3476_v12, %v11731_v61  ;;  %v11760_v9 = vrot.slane %v11698_v0, %v16355_v38  ;;  %v16572_v16 = vld [vmem:[#allocation122_spill] sm:$0xff]  ;;  %7253 = vmatprep.subr.bf16.mxu0 %v7252_v35  ;;  %v3041_v2 = vpop.permute.xlu0 %3040 }
 0x241   : > { %16567 = vst [vmem:[#allocation24_spill] sm:$0xff] %v11748_v10  ;;  %v3093_v51 = vmul.f32 %v16571_v46, %v11447_v36  ;;  %v3903_v10 = vmul.f32 %v16572_v16, %v11689_v25  ;;  %v3949_v56 = vmul.f32 %v16573_v32, %v11756_v59  ;;  %v4315_v52 = vmul.f32 %v11422_v28, %v11756_v59  ;;  %v16574_v12 = vld [vmem:[#allocation22_spill] sm:$0xff]  ;;  %v11779_v36 = vld [vmem:[%s15156_s4 + $0x70] sm:$0xff]  ;;  %v16578_v46 = vld [vmem:[#allocation19_spill] sm:$0xff] }
 0x242   : > { %16570 = vst [vmem:[#allocation179_spill] sm:$0xff] %v11760_v9  ;;  %v3028_v61 = vmul.f32 %v16574_v12, %v11286_v30  ;;  %7255 = vmatpush1.bf16.msra.mxu0 %v7254_v44  ;;  %v7290_v7 = vpack.c.bf16 %v3948_v20, %v3902_v13  ;;  %v11774_v9 = vrot.slane %v11389_v39, %v10759_v33  ;;  %16576 = vst [vmem:[#allocation181_spill] sm:$0xff] %v11779_v36  ;;  %v16579_v30 = vld [vmem:[#allocation98_spill] sm:$0xff]  ;;  %v11789_v13 = vpop.permute.xlu1 %2978 }
 0x243   : > { %v11783_v35 = vrot.slane %v11779_v36, %v8348_v11  ;;  %v3029_v32 = vmul.f32 %v16578_v46, %v11384_v53  ;;  %v3221_v44 = vmul.f32 %v16579_v30, %v11544_v49  ;;  %4397 = vmatprep.subr.mxu0 %v4315_v52  ;;  %v7288_v39 = vpack.c.bf16 %v3949_v56, %v3903_v10  ;;  %v11800_v28 = vld [vmem:[%s15159_s7] sm:$0xff]  ;;  %v11809_v49 = vld [vmem:[%s15156_s4 + $0x78] sm:$0xff]  ;;  %v16584_v10 = vld [vmem:[#allocation92_spill] sm:$0xff] }
 0x244   : > { %16575 = vst [vmem:[#allocation180_spill] sm:$0xff] %v11774_v9  ;;  %v11793_v20 = vsel %vm721_vm3, %v11424_v34, %v3041_v2  ;;  %v4314_v12 = vmul.f32 %v11454_v21, %v11675_v22  ;;  %v11804_v53 = vrot.slane %v11715_v57, %v16355_v38  ;;  %16581 = vst [vmem:[#allocation184_spill] sm:$0xff] %v11809_v49  ;;  %v16585_v30 = vld [vmem:[#allocation123_spill] sm:$0xff] }
 0x245   : > { %16577 = vst [vmem:[#allocation182_spill] sm:$0xff] %v11783_v35  ;;  %v11813_v34 = vrot.slane %v11809_v49, %v8348_v11  ;;  %v11817_v52 = vrot.slane %v11744_v62, %v16355_v38  ;;  %v3157_v56 = vmul.f32 %v16584_v10, %v11496_v29  ;;  %v11823_v46 = vsel %vm635_vm1, %v16585_v30, %v2977_v4  ;;  %v11828_v35 = vld [vmem:[%s15159_s7 + $0x18] sm:$0xff]  ;;  %v16586_v11 = vld [vmem:[#allocation95_spill] sm:$0xff] }
 0x246   : > { %16580 = vst [vmem:[#allocation183_spill] sm:$0xff] %v11804_v53  ;;  %7289 = vmatprep.subr.bf16.mxu1 %v7288_v39  ;;  %v7308_v21 = vpack.c.bf16 %v3093_v51, %v3029_v32  ;;  %v7310_v16 = vpack.c.bf16 %v3092_v43, %v3028_v61  ;;  %v3220_v53 = vmul.f32 %v16586_v11, %v11482_v17  ;;  %v16587_v61 = vld [vmem:[#allocation107_spill] sm:$0xff]  ;;  %v11841_v51 = vpop.permute.xlu1 %3042 }
 0x247   : > { %16582 = vst [vmem:[#allocation185_spill] sm:$0xff] %v11813_v34  ;;  %16583 = vst [vmem:[#allocation186_spill] sm:$0xff] %v11817_v52  ;;  %v3105_v34 = vpop.permute.xlu0 %3104  ;;  %v11834_v52 = vsel %vm635_vm1, %v2977_v4, %v11789_v13  ;;  %4398 = vmatpush1.msra.mxu0 %v4314_v12  ;;  %7291 = vmatpush1.bf16.msra.mxu1 %v7290_v7  ;;  %v4032_v29 = vmul.f32 %v11472_v3, %v11793_v20  ;;  %v16589_v4 = vld [vmem:[#allocation89_spill] sm:$0xff]  ;;  %v16590_v7 = vld [vmem:[#allocation132_spill] sm:$0xff] }
 0x248   : > { %v3330_v32 = vmul.f32 %v16587_v61, %v11584_v1  ;;  %4410 = vmatmul.mubr.f32.vlgmr.msra.gmra.mrb[0].mxu0 %v11800_v28  ;;  %7309 = vmatprep.subr.bf16.mxu0 %v7308_v21  ;;  %v7312_v43 = vpack.c.bf16 %v3221_v44, %v3157_v56  ;;  %v11845_v17 = vrot.slane %v11371_v37, %v10759_v33  ;;  %v11860_v21 = vld [vmem:[%s15159_s7 + $0x10] sm:$0xff]  ;;  %v16594_v56 = vld [vmem:[#allocation102_spill] sm:$0xff] }
 0x249   : > { %v3156_v12 = vmul.f32 %v16589_v4, %v11428_v26  ;;  %v3990_v30 = vmul.f32 %v16590_v7, %v11823_v46  ;;  %v11853_v39 = vsel %vm721_vm3, %v3041_v2, %v11841_v51  ;;  %7311 = vmatpush1.bf16.msra.mxu0 %v7310_v16  ;;  %7186 = vmatprep.mubr.msk.f32.mxu0 %vm4338_vm14, %v11828_v35  ;;  %v16591_v37 = vld [vmem:[#allocation137_spill] sm:$0xff] }
 0x24a   : > { %16588 = vst [vmem:[#allocation123_spill] sm:$0xff] %v11845_v17  ;;  %v3991_v1 = vmul.f32 %v16591_v37, %v11834_v52  ;;  %v4033_v26 = vmul.f32 %v11490_v47, %v11853_v39  ;;  %7313 = vmatprep.subr.bf16.mxu0 %v7312_v43  ;;  %v11868_v2 = vrot.slane %v11779_v36, %v16355_v38  ;;  %v16595_v43 = vld [vmem:[#allocation121_spill] sm:$0xff]  ;;  %v11883_v7 = vpop.permute.xlu1 %3106 }
 0x24b   : > { %v3169_v44 = vpop.permute.xlu0 %3168  ;;  %v11872_v16 = vrot.slane %v11715_v57, %v16364_v48  ;;  %v3329_v61 = vmul.f32 %v16594_v56, %v11530_v23  ;;  %v7314_v3 = vpack.c.bf16 %v3220_v53, %v3156_v12  ;;  %v7294_v11 = vpack.c.bf16 %v4032_v29, %v3990_v30  ;;  %v16600_v30 = vld [vmem:[#allocation118_spill] sm:$0xff] }
 0x24c   : > { %16592 = vst [vmem:[#allocation187_spill] sm:$0xff] %v11868_v2  ;;  %v11878_v37 = vmul.f32 %v11774_v9, %v16564_v18  ;;  %v3466_v47 = vmul.f32 %v16595_v43, %v11689_v25  ;;  %4416 = vmatmul.mubr.f32.gmra.mrb[2].mxu0 %v11860_v21  ;;  %v7292_v4 = vpack.c.bf16 %v4033_v26, %v3991_v1 }
 0x24d   : > { %16593 = vst [vmem:[#allocation188_spill] sm:$0xff] %v11872_v16  ;;  %v7316_v10 = vpack.c.bf16 %v3330_v32, %v11548_v54  ;;  %v11888_v2 = vsel %vm931_vm7, %v11526_v27, %v3169_v44  ;;  %7315 = vmatpush1.bf16.msra.mxu0 %v7314_v3  ;;  %v11892_v23 = vmul.f32 %v11845_v17, %v16566_v15  ;;  %v11905_v54 = vld [vmem:[%s15159_s7 + $0x8] sm:$0xff] }
 0x24e   : > { %v11896_v53 = vrot.slane %v11809_v49, %v16355_v38  ;;  %v11900_v25 = vrot.slane %v11744_v62, %v16364_v48  ;;  %7189 = vmatprep.mubr.msk.f32.mxu0 %vm4338_vm14, %v11905_v54  ;;  %v16598_v27 = vld [vmem:[#allocation115_spill] sm:$0xff]  ;;  %v11913_v29 = vsel %vm830_vm5, %v11478_v55, %v3105_v34  ;;  %7293 = vmatprep.subr.bf16.mxu1 %v7292_v4  ;;  %v11930_v17 = vpop.permute.xlu1 %3170 }
 0x24f   : > { %v3398_v3 = vmul.f32 %v16598_v27, %v11634_v40  ;;  %7317 = vmatprep.subr.bf16.mxu0 %v7316_v10  ;;  %v3276_v32 = vpop.permute.xlu0 %3275  ;;  %v11917_v12 = vrot.slane %v11698_v0, %v16364_v48  ;;  %v3465_v1 = vmul.f32 %v16600_v30, %v11620_v50  ;;  %v11923_v26 = vsel %vm830_vm5, %v3105_v34, %v11883_v7  ;;  %v16601_v10 = vld [vmem:[#allocation136_spill] sm:$0xff] }
 0x250   : > { %16596 = vst [vmem:[#allocation189_spill] sm:$0xff] %v11896_v53  ;;  %16597 = vst [vmem:[#allocation190_spill] sm:$0xff] %v11900_v25  ;;  %7295 = vmatpush1.bf16.msra.mxu1 %v7294_v11  ;;  %v4116_v40 = vmul.f32 %v11569_v19, %v11888_v2  ;;  %v7318_v55 = vpack.c.bf16 %v3329_v61, %v11624_v8  ;;  %v3583_v4 = vmul.f32 %v16601_v10, %v11834_v52  ;;  %v16603_v11 = vld [vmem:[#allocation110_spill] sm:$0xff] }
 0x251   : > { %16599 = vst [vmem:[#allocation191_spill] sm:$0xff] %v11917_v12  ;;  %v7320_v0 = vpack.c.bf16 %v3466_v47, %v3398_v3  ;;  %v11934_v9 = vsel %vm1110_vm2, %v11571_v58, %v3276_v32  ;;  %v11938_v50 = vrot.slane %v11661_v5, %v16364_v48  ;;  %v3397_v34 = vmul.f32 %v16603_v11, %v11576_v14  ;;  %v16605_v58 = vld [vmem:[#allocation127_spill] sm:$0xff] }
 0x252   : > { %v4074_v8 = vmul.f32 %v11516_v63, %v11913_v29  ;;  %v11946_v61 = vsel %vm931_vm7, %v3169_v44, %v11930_v17  ;;  %7319 = vmatpush1.bf16.msra.mxu0 %v7318_v55  ;;  %v11950_v47 = vrot.slane %v11779_v36, %v16364_v48  ;;  %v3534_v3 = vmul.f32 %v16605_v58, %v11756_v59  ;;  %v16607_v55 = vld [vmem:[#allocation131_spill] sm:$0xff]  ;;  %v16608_v58 = vld [vmem:[#allocation150_spill] sm:$0xff]  ;;  %v11968_v27 = vpop.permute.xlu1 %3277 }
 0x253   : > { %16602 = vst [vmem:[#allocation192_spill] sm:$0xff] %v11938_v50  ;;  %v4075_v5 = vmul.f32 %v11538_v45, %v11923_v26  ;;  %v4117_v14 = vmul.f32 %v11596_v60, %v11946_v61  ;;  %7321 = vmatprep.subr.bf16.mxu0 %v7320_v0  ;;  %v3344_v10 = vpop.permute.xlu0 %3343  ;;  %v11960_v44 = vrot.slane %v11715_v57, %v16368_v42  ;;  %v16610_v45 = vld [vmem:[#allocation125_spill] sm:$0xff] }
 0x254   : > { %16604 = vst [vmem:[#allocation193_spill] sm:$0xff] %v11950_v47  ;;  %v3582_v30 = vmul.f32 %v16607_v55, %v11823_v46  ;;  %v4196_v43 = vmul.f32 %v11613_v41, %v11934_v9  ;;  %v7322_v11 = vpack.c.bf16 %v3465_v1, %v3397_v34  ;;  %v7298_v59 = vpack.c.bf16 %v4116_v40, %v4074_v8  ;;  %v16620_v41 = vld [vmem:[#allocation11_spill] sm:$0xff]  ;;  %v16621_v47 = vld [vmem:[#allocation170_spill] sm:$0xff] }
 0x255   : > { %16606 = vst [vmem:[#allocation194_spill] sm:$0xff] %v11960_v44  ;;  %v3679_v19 = vmul.f32 %v16608_v58, %v11923_v26  ;;  %v7296_v60 = vpack.c.bf16 %v4117_v14, %v4075_v5  ;;  %v7324_v0 = vpack.c.bf16 %v3583_v4, %v3534_v3  ;;  %v11972_v56 = vrot.slane %v11809_v49, %v16364_v48  ;;  %v16613_v4 = vld [vmem:[#allocation143_spill] sm:$0xff]  ;;  %v16616_v58 = vld [vmem:[#allocation134_spill] sm:$0xff] }
 0x256   : > { %v3533_v63 = vmul.f32 %v16610_v45, %v11675_v22  ;;  %v11978_v55 = vsel %vm1110_vm2, %v3276_v32, %v11968_v27  ;;  %7323 = vmatpush1.bf16.msra.mxu0 %v7322_v11  ;;  %v11982_v1 = vrot.slane %v11744_v62, %v16368_v42  ;;  %v11986_v40 = vrot.slane %v11779_v36, %v16368_v42  ;;  %v16615_v11 = vld [vmem:[#allocation147_spill] sm:$0xff] }
 0x257   : > { %16609 = vst [vmem:[#allocation195_spill] sm:$0xff] %v11972_v56  ;;  %v3631_v34 = vmul.f32 %v16613_v4, %v11853_v39  ;;  %v4197_v8 = vmul.f32 %v11642_v31, %v11978_v55  ;;  %7297 = vmatprep.subr.bf16.mxu1 %v7296_v60  ;;  %7325 = vmatprep.subr.bf16.mxu0 %v7324_v0  ;;  %v3412_v22 = vpop.permute.xlu0 %3411  ;;  %v16618_v31 = vld [vmem:[#allocation157_spill] sm:$0xff]  ;;  %v12005_v0 = vpop.permute.xlu1 %3345 }
 0x258   : > { %16611 = vst [vmem:[#allocation196_spill] sm:$0xff] %v11982_v1  ;;  %16612 = vst [vmem:[#allocation197_spill] sm:$0xff] %v11986_v40  ;;  %v11994_v32 = vrot.slane %v11715_v57, %v10756_v6  ;;  %v3678_v3 = vmul.f32 %v16615_v11, %v11913_v29  ;;  %7299 = vmatpush1.bf16.msra.mxu1 %v7298_v59  ;;  %v7326_v5 = vpack.c.bf16 %v3582_v30, %v3533_v63  ;;  %v16622_v63 = vld [vmem:[#allocation140_spill] sm:$0xff] }
 0x259   : > { %v7302_v14 = vpack.c.bf16 %v4196_v43, %v11739_v24  ;;  %v12001_v4 = vrot.slane %v16616_v58, %v10756_v6  ;;  %v3727_v60 = vmul.f32 %v16618_v31, %v11946_v61  ;;  %16619 = vst [vmem:[#allocation199_spill] sm:$0xff] %v12005_v0  ;;  %v7300_v45 = vpack.c.bf16 %v4197_v8, %v16620_v41  ;;  %v16628_v8 = vld [vmem:[#allocation153_spill] sm:$0xff]  ;;  %v16629_v31 = vld [vmem:[#allocation176_spill] sm:$0xff] }
 0x25a   : > { %16614 = vst [vmem:[#allocation198_spill] sm:$0xff] %v11994_v32  ;;  %v7328_v48 = vpack.c.bf16 %v3679_v19, %v3631_v34  ;;  %v12010_v40 = vsel %vm1320_vm6, %v16621_v47, %v3412_v22  ;;  %v3630_v30 = vmul.f32 %v16622_v63, %v11793_v20  ;;  %v12016_v24 = vsel %vm1215_vm4, %v3344_v10, %v12005_v0  ;;  %v16625_v19 = vld [vmem:[#allocation162_spill] sm:$0xff] }
 0x25b   : > { %16617 = vst [vmem:[#allocation134_spill] sm:$0xff] %v12001_v4  ;;  %7327 = vmatpush1.bf16.msra.mxu0 %v7326_v5  ;;  %v12020_v43 = vrot.slane %v11809_v49, %v16368_v42  ;;  %v12024_v41 = vrot.slane %v11744_v62, %v10756_v6  ;;  %v12028_v47 = vsel %vm1215_vm4, %v16625_v19, %v3344_v10  ;;  %v3480_v58 = vpop.permute.xlu0 %3479  ;;  %v16632_v19 = vld [vmem:[#allocation172_spill] sm:$0xff]  ;;  %v12048_v42 = vpop.permute.xlu1 %3413 }
 0x25c   : > { %7301 = vmatprep.subr.bf16.mxu1 %v7300_v45  ;;  %7329 = vmatprep.subr.bf16.mxu0 %v7328_v48  ;;  %v12032_v59 = vrot.slane %v11779_v36, %v10756_v6  ;;  %v12036_v34 = vrot.slane %v11715_v57, %v10759_v33  ;;  %v3726_v5 = vmul.f32 %v16628_v8, %v11888_v2  ;;  %v16630_v45 = vld [vmem:[#allocation129_spill] sm:$0xff] }
 0x25d   : > { %16623 = vst [vmem:[#allocation11_spill] sm:$0xff] %v12020_v43  ;;  %16624 = vst [vmem:[#allocation170_spill] sm:$0xff] %v12024_v41  ;;  %7303 = vmatpush1.bf16.msra.mxu1 %v7302_v14  ;;  %v4276_v11 = vmul.f32 %v16629_v31, %v12010_v40  ;;  %v7330_v10 = vpack.c.bf16 %v3678_v3, %v3630_v30  ;;  %v12044_v48 = vrot.slane %v16630_v45, %v10756_v6  ;;  %v16634_v14 = vld [vmem:[#allocation17_spill] sm:$0xff]  ;;  %v16636_v3 = vld [vmem:[#allocation168_spill] sm:$0xff] }
 0x25e   : > { %16626 = vst [vmem:[#allocation162_spill] sm:$0xff] %v12032_v59  ;;  %16627 = vst [vmem:[#allocation200_spill] sm:$0xff] %v12036_v34  ;;  %v3859_v63 = vmul.f32 %v16632_v19, %v12016_v24  ;;  %v7332_v59 = vpack.c.bf16 %v11878_v37, %v3727_v60  ;;  %v12053_v36 = vmul.f32 %v12001_v4, %v16564_v18  ;;  %v16639_v37 = vld [vmem:[#allocation164_spill] sm:$0xff]  ;;  %v16640_v4 = vld [vmem:[#allocation173_spill] sm:$0xff] }
 0x25f   : > { %16631 = vst [vmem:[#allocation129_spill] sm:$0xff] %v12044_v48  ;;  %16633 = vst [vmem:[#allocation201_spill] sm:$0xff] %v12048_v42  ;;  %v12057_v8 = vrot.slane %v11715_v57, %v16634_v14  ;;  %v4236_v30 = vmul.f32 %v16636_v3, %v12028_v47  ;;  %v12063_v45 = vsel %vm1320_vm6, %v3412_v22, %v12048_v42  ;;  %7331 = vmatpush1.bf16.msra.mxu0 %v7330_v10  ;;  %v16641_v3 = vld [vmem:[#allocation179_spill] sm:$0xff]  ;;  %v3539_v22 = vpop.permute.xlu0 %3538 }
 0x260   : > { %v12067_v19 = vrot.slane %v11809_v49, %v10756_v6  ;;  %v12071_v18 = vrot.slane %v11744_v62, %v10759_v33  ;;  %v3813_v60 = vmul.f32 %v16639_v37, %v11978_v55  ;;  %v4237_v31 = vmul.f32 %v16640_v4, %v12016_v24  ;;  %7333 = vmatprep.subr.bf16.mxu0 %v7332_v59  ;;  %v16643_v6 = vld [vmem:[#allocation167_spill] sm:$0xff]  ;;  %v16644_v4 = vld [vmem:[#allocation178_spill] sm:$0xff]  ;;  %v12094_v59 = vpop.permute.xlu1 %3481 }
 0x261   : > { %16635 = vst [vmem:[#allocation17_spill] sm:$0xff] %v12057_v8  ;;  %v4277_v0 = vmul.f32 %v16641_v3, %v12063_v45  ;;  %v12081_v10 = vrot.slane %v11809_v49, %v16634_v14  ;;  %v7334_v56 = vpack.c.bf16 %v11892_v23, %v3726_v5  ;;  %v7306_v33 = vpack.c.bf16 %v4276_v11, %v4236_v30  ;;  %v16646_v49 = vld [vmem:[#allocation59_spill] sm:$0xff]  ;;  %v16648_v11 = vld [vmem:[#allocation160_spill] sm:$0xff] }
 0x262   : > { %16637 = vst [vmem:[#allocation202_spill] sm:$0xff] %v12067_v19  ;;  %16638 = vst [vmem:[#allocation203_spill] sm:$0xff] %v12071_v18  ;;  %v3858_v19 = vmul.f32 %v16643_v6, %v12028_v47  ;;  %v12088_v37 = vmul.f32 %v12044_v48, %v16566_v15  ;;  %v12092_v42 = vsel %vm1425_vm8, %v16644_v4, %v3480_v58  ;;  %v16647_v6 = vld [vmem:[#allocation139_spill] sm:$0xff]  ;;  %v16649_v4 = vld [vmem:[#allocation21_spill] sm:$0xff] }
 0x263   : > { %16642 = vst [vmem:[#allocation204_spill] sm:$0xff] %v12081_v10  ;;  %16645 = vst [vmem:[#allocation178_spill] sm:$0xff] %v12094_v59  ;;  %v7304_v3 = vpack.c.bf16 %v4277_v0, %v4237_v31  ;;  %v7336_v43 = vpack.c.bf16 %v3859_v63, %v3813_v60  ;;  %v12098_v10 = vmul.f32 %v12057_v8, %v16646_v49  ;;  %7335 = vmatpush1.bf16.msra.mxu0 %v7334_v56  ;;  %v16651_v31 = vld [vmem:[#allocation142_spill] sm:$0xff]  ;;  %v16652_v63 = vld [vmem:[#allocation24_spill] sm:$0xff] }
 0x264   : > { %v3094_v23 = vmul.f32 %v16647_v6, %v11793_v20  ;;  %v3812_v5 = vmul.f32 %v16648_v11, %v11934_v9  ;;  %v12106_v15 = vsel %vm1425_vm8, %v3480_v58, %v12094_v59  ;;  %v12110_v30 = vrot.slane %v11715_v57, %v16649_v4  ;;  %v16653_v20 = vld [vmem:[#allocation186_spill] sm:$0xff]  ;;  %v3587_v11 = vpop.permute.xlu0 %3586  ;;  %v16655_v56 = vld [vmem:[#allocation183_spill] sm:$0xff]  ;;  %v16657_v59 = vld [vmem:[#allocation156_spill] sm:$0xff] }
 0x265   : > { %v3095_v0 = vmul.f32 %v16651_v31, %v11853_v39  ;;  %v3905_v60 = vmul.f32 %v16652_v63, %v12063_v45  ;;  %v3951_v8 = vmul.f32 %v16653_v20, %v12106_v15  ;;  %7305 = vmatprep.subr.bf16.mxu1 %v7304_v3  ;;  %7337 = vmatprep.subr.bf16.mxu0 %v7336_v43  ;;  %v16654_v58 = vld [vmem:[#allocation130_spill] sm:$0xff]  ;;  %v16656_v31 = vld [vmem:[#allocation135_spill] sm:$0xff]  ;;  %v12128_v3 = vpop.permute.xlu1 %3540 }
 0x266   : > { %16650 = vst [vmem:[#allocation59_spill] sm:$0xff] %v12110_v30  ;;  %v3030_v48 = vmul.f32 %v16654_v58, %v11823_v46  ;;  %v3950_v6 = vmul.f32 %v16655_v56, %v12092_v42  ;;  %7307 = vmatpush1.bf16.msra.mxu1 %v7306_v33  ;;  %v4317_v57 = vmul.f32 %v11917_v12, %v12106_v15  ;;  %v16658_v56 = vld [vmem:[#allocation175_spill] sm:$0xff] }
 0x267   : > { %v7338_v39 = vpack.c.bf16 %v3858_v19, %v3812_v5  ;;  %v3031_v63 = vmul.f32 %v16656_v31, %v11834_v52  ;;  %v3223_v20 = vmul.f32 %v16657_v59, %v11946_v61  ;;  %v7340_v43 = vpack.c.bf16 %v3951_v8, %v3905_v60  ;;  %v16660_v61 = vld [vmem:[#allocation149_spill] sm:$0xff] }
 0x268   : > { %v12132_v46 = vsel %vm721_vm3, %v11841_v51, %v3587_v11  ;;  %v3904_v33 = vmul.f32 %v16658_v56, %v12010_v40  ;;  %4474 = vmatprep.subr.mxu1 %v4317_v57  ;;  %v4316_v19 = vmul.f32 %v11938_v50, %v12092_v42  ;;  %v12140_v52 = vrot.slane %v11744_v62, %v16649_v4  ;;  %v3635_v56 = vpop.permute.xlu0 %3634  ;;  %v16661_v57 = vld [vmem:[#allocation152_spill] sm:$0xff] }
 0x269   : > { %7339 = vmatpush1.bf16.msra.mxu0 %v7338_v39  ;;  %v3159_v5 = vmul.f32 %v16660_v61, %v11923_v26  ;;  %v12146_v8 = vsel %vm635_vm1, %v11789_v13, %v3539_v22  ;;  %v7360_v51 = vpack.c.bf16 %v3095_v0, %v3031_v63  ;;  %v7362_v60 = vpack.c.bf16 %v3094_v23, %v3030_v48  ;;  %v16662_v26 = vld [vmem:[#allocation163_spill] sm:$0xff]  ;;  %v12156_v13 = vpop.permute.xlu1 %3588 }
 0x26a   : > { %16659 = vst [vmem:[#allocation21_spill] sm:$0xff] %v12140_v52  ;;  %7341 = vmatprep.subr.bf16.mxu0 %v7340_v43  ;;  %v3222_v39 = vmul.f32 %v16661_v57, %v11888_v2  ;;  %v3543_v59 = vsel %vm635_vm1, %v3539_v22, %v12128_v3  ;;  %4475 = vmatpush1.msra.mxu1 %v4316_v19  ;;  %v12162_v2 = vld [vmem:[%s15156_s4 + $0xe0] sm:$0x7]  ;;  %v16663_v22 = vld [vmem:[#allocation4_spill] sm:$0xff] }
 0x26b   : > { %v4034_v58 = vmul.f32 %v11960_v44, %v12132_v46  ;;  %v7342_v31 = vpack.c.bf16 %v3950_v6, %v3904_v33  ;;  %v3332_v61 = vmul.f32 %v16662_v26, %v11978_v55  ;;  %4487 = vmatmul.mubr.f32.vlgmr.msra.gmra.mrb[0].mxu1 %v11800_v28  ;;  %7361 = vmatprep.subr.bf16.mxu1 %v7360_v51  ;;  %v16665_v6 = vld [vmem:[#allocation145_spill] sm:$0xff] }
 0x26c   : > { %v7364_v48 = vpack.c.bf16 %v3223_v20, %v3159_v5  ;;  %v12166_v23 = vrot.slane %v12162_v2, %v16663_v22  ;;  %v3158_v0 = vmul.f32 %v16665_v6, %v11913_v29  ;;  %v3992_v55 = vmul.f32 %v11872_v16, %v12146_v8  ;;  %7363 = vmatpush1.bf16.msra.mxu1 %v7362_v60  ;;  %v16666_v20 = vld [vmem:[#allocation159_spill] sm:$0xff]  ;;  %v3683_v29 = vpop.permute.xlu0 %3682  ;;  %v16669_v60 = vld [vmem:[#allocation177_spill] sm:$0xff]  ;;  %v16765_v6 = vld [vmem:[#allocation10_spill] sm:$0xff] }
 0x26d   : > { %v12174_v63 = vsel %vm721_vm3, %v3587_v11, %v12156_v13  ;;  %7343 = vmatpush1.bf16.msra.mxu0 %v7342_v31  ;;  %v3331_v43 = vmul.f32 %v16666_v20, %v11934_v9  ;;  %v3993_v33 = vmul.f32 %v11900_v25, %v3543_v59  ;;  %7188 = vmatprep.mubr.msk.f32.mxu1 %vm4338_vm14, %v11828_v35  ;;  %v12186_v11 = vld [vmem:[%s15156_s4 + $0xe8] sm:$0x7]  ;;  %v12198_v44 = vpop.permute.xlu1 %3636 }
 0x26e   : > { %16664 = vst [vmem:[#allocation205_spill] sm:$0xff] %v12166_v23  ;;  %v4035_v19 = vmul.f32 %v11982_v1, %v12174_v63  ;;  %7365 = vmatprep.subr.bf16.mxu1 %v7364_v48  ;;  %v7346_v5 = vpack.c.bf16 %v4034_v58, %v3992_v55  ;;  %v7366_v51 = vpack.c.bf16 %v3222_v39, %v3158_v0  ;;  %v16670_v55 = vld [vmem:[#allocation174_spill] sm:$0xff] }
 0x26f   : > { %v12190_v9 = vrot.slane %v12186_v11, %v16663_v22  ;;  %v12194_v31 = vrot.slane %v11744_v62, %v16634_v14  ;;  %v3468_v48 = vmul.f32 %v16669_v60, %v12063_v45  ;;  %4493 = vmatmul.mubr.f32.gmra.mrb[2].mxu1 %v11860_v21  ;;  %v7368_v39 = vpack.c.bf16 %v3332_v61, %v12053_v36  ;;  %v16673_v36 = vld [vmem:[#allocation169_spill] sm:$0xff] }
 0x270   : > { %v7344_v58 = vpack.c.bf16 %v4035_v19, %v3993_v33  ;;  %v12204_v0 = vsel %vm931_vm7, %v11930_v17, %v3683_v29  ;;  %v3467_v1 = vmul.f32 %v16670_v55, %v12010_v40  ;;  %7367 = vmatpush1.bf16.msra.mxu1 %v7366_v51  ;;  %v12210_v62 = vrot.slane %v12162_v2, %v16355_v38  ;;  %v3771_v33 = vpop.permute.xlu0 %3770  ;;  %v16674_v19 = vld [vmem:[#allocation166_spill] sm:$0xff] }
 0x271   : > { %16667 = vst [vmem:[#allocation206_spill] sm:$0xff] %v12190_v9  ;;  %16668 = vst [vmem:[#allocation207_spill] sm:$0xff] %v12194_v31  ;;  %v12214_v45 = vrot.slane %v12186_v11, %v16355_v38  ;;  %7191 = vmatprep.mubr.msk.f32.mxu1 %vm4338_vm14, %v11905_v54  ;;  %v3400_v61 = vmul.f32 %v16673_v36, %v12016_v24  ;;  %v3638_v17 = vsel %vm830_vm5, %v11883_v7, %v3635_v56  ;;  %v12232_v16 = vpop.permute.xlu1 %3684 }
 0x272   : > { %16671 = vst [vmem:[#allocation208_spill] sm:$0xff] %v12210_v62  ;;  %7345 = vmatprep.subr.bf16.mxu0 %v7344_v58  ;;  %7369 = vmatprep.subr.bf16.mxu1 %v7368_v39  ;;  %v7370_v40 = vpack.c.bf16 %v3331_v43, %v12088_v37  ;;  %v3399_v51 = vmul.f32 %v16674_v19, %v12028_v47  ;;  %v12230_v24 = vsel %vm1110_vm2, %v3771_v33, 0.0  ;;  %v16675_v43 = vld [vmem:[#allocation48_spill] sm:$0xff] }
 0x273   : > { %16672 = vst [vmem:[#allocation209_spill] sm:$0xff] %v12214_v45  ;;  %v3639_v60 = vsel %vm830_vm5, %v3635_v56, %v12198_v44  ;;  %7347 = vmatpush1.bf16.msra.mxu0 %v7346_v5  ;;  %v4118_v54 = vmul.f32 %v12036_v34, %v12204_v0  ;;  %v7372_v7 = vpack.c.bf16 %v3468_v48, %v3400_v61  ;;  %v16676_v48 = vld [vmem:[#allocation182_spill] sm:$0xff] }
 0x274   : > { %v12236_v37 = vsel %vm1110_vm2, %v11968_v27, %v3771_v33  ;;  %v4199_v47 = vmul.f32 %v12140_v52, %v12230_v24  ;;  %v4159_v56 = vmul.f32 %v12194_v31, %v16675_v43  ;;  %v3585_v5 = vmul.f32 %v11896_v53, %v3543_v59  ;;  %7371 = vmatpush1.bf16.msra.mxu1 %v7370_v40  ;;  %v16677_v27 = vld [vmem:[#allocation187_spill] sm:$0xff]  ;;  %v3863_v25 = vpop.permute.xlu0 %3862  ;;  %v16678_v59 = vld [vmem:[#allocation185_spill] sm:$0xff]  ;;  %v16764_v31 = vld [vmem:[#allocation62_spill] sm:$0xff] }
 0x275   : > { %v4076_v58 = vmul.f32 %v11994_v32, %v3638_v17  ;;  %v3687_v39 = vsel %vm931_vm7, %v3683_v29, %v12232_v16  ;;  %v7374_v34 = vpack.c.bf16 %v3467_v1, %v3399_v51  ;;  %v3535_v61 = vmul.f32 %v16676_v48, %v12092_v42  ;;  %7373 = vmatprep.subr.bf16.mxu1 %v7372_v7  ;;  %v16679_v42 = vld [vmem:[#allocation11_spill] sm:$0xff]  ;;  %v3817_v51 = vpop.permute.xlu1 %3816 }
 0x276   : > { %v3584_v33 = vmul.f32 %v16677_v27, %v12146_v8  ;;  %v4077_v52 = vmul.f32 %v12024_v41, %v3639_v60  ;;  %v4119_v36 = vmul.f32 %v12071_v18, %v3687_v39  ;;  %v3536_v53 = vmul.f32 %v16678_v59, %v12106_v15  ;;  %v16680_v27 = vld [vmem:[#allocation201_spill] sm:$0xff] }
 0x277   : > { %v7350_v32 = vpack.c.bf16 %v4118_v54, %v4076_v58  ;;  %v4198_v29 = vmul.f32 %v12110_v30, %v12236_v37  ;;  %v12257_v1 = vsel %vm1320_vm6, %v3863_v25, 0.0  ;;  %v3681_v40 = vmul.f32 %v16679_v42, %v3639_v60  ;;  %v16681_v58 = vld [vmem:[#allocation32_spill] sm:$0xff]  ;;  %v16684_v60 = vld [vmem:[#allocation195_spill] sm:$0xff] }
 0x278   : > { %v7348_v8 = vpack.c.bf16 %v4119_v36, %v4077_v52  ;;  %v12262_v48 = vsel %vm1320_vm6, %v16680_v27, %v3863_v25  ;;  %v7352_v7 = vpack.c.bf16 %v4199_v47, %v4159_v56  ;;  %v3821_v18 = vsel %vm1215_vm4, %v3817_v51, 0.0  ;;  %7375 = vmatpush1.bf16.msra.mxu1 %v7374_v34  ;;  %v16682_v30 = vld [vmem:[#allocation184_spill] sm:$0xff]  ;;  %v16685_v36 = vld [vmem:[#allocation199_spill] sm:$0xff]  ;;  %v16686_v56 = vld [vmem:[#allocation197_spill] sm:$0xff] }
 0x279   : > { %v7376_v15 = vpack.c.bf16 %v3585_v5, %v3536_v53  ;;  %v4279_v54 = vmul.f32 %v12214_v45, %v12257_v1  ;;  %v12269_v41 = vrot.slane %v16682_v30, %v16681_v58  ;;  %v7378_v59 = vpack.c.bf16 %v3584_v33, %v3535_v61  ;;  %v16687_v27 = vld [vmem:[#allocation202_spill] sm:$0xff]  ;;  %v3909_v33 = vpop.permute.xlu1 %3908  ;;  %v16698_v45 = vld [vmem:[#allocation204_spill] sm:$0xff] }
 0x27a   : > { %v3633_v52 = vmul.f32 %v16684_v60, %v12174_v63  ;;  %v3818_v25 = vsel %vm1215_vm4, %v16685_v36, %v3817_v51  ;;  %v4239_v47 = vmul.f32 %v12190_v9, %v3821_v18  ;;  %7349 = vmatprep.subr.bf16.mxu0 %v7348_v8  ;;  %v3680_v34 = vmul.f32 %v16686_v56, %v3638_v17  ;;  %v16689_v8 = vld [vmem:[#allocation193_spill] sm:$0xff]  ;;  %v16762_v56 = vld [vmem:[#allocation66_spill] sm:$0xff] }
 0x27b   : > { %16683 = vst [vmem:[#allocation48_spill] sm:$0xff] %v12269_v41  ;;  %v7354_v53 = vpack.c.bf16 %v4198_v29, %v12098_v10  ;;  %7377 = vmatprep.subr.bf16.mxu1 %v7376_v15  ;;  %7351 = vmatpush1.bf16.msra.mxu0 %v7350_v32  ;;  %v4278_v5 = vmul.f32 %v12210_v62, %v12262_v48  ;;  %v16690_v10 = vld [vmem:[#allocation181_spill] sm:$0xff]  ;;  %v16695_v15 = vld [vmem:[#allocation8_spill] sm:$0xff]  ;;  %v3913_v62 = vsel %vm1425_vm8, %v3909_v33, 0.0 }
 0x27c   : > { %v3729_v61 = vmul.f32 %v16687_v27, %v3687_v39  ;;  %v12283_v63 = vrot.slane %v16682_v30, %v16649_v4  ;;  %7353 = vmatprep.subr.bf16.mxu0 %v7352_v7  ;;  %v7380_v51 = vpack.c.bf16 %v3681_v40, %v3633_v52  ;;  %v7356_v36 = vpack.c.bf16 %v4279_v54, %v4239_v47  ;;  %v12303_v40 = vld [vmem:[%s15156_s4 + $0xb8] sm:$0xff] }
 0x27d   : > { %v3632_v17 = vmul.f32 %v16689_v8, %v12132_v46  ;;  %v12289_v29 = vrot.slane %v16690_v10, %v16681_v58  ;;  %v12293_v32 = vrot.slane %v16690_v10, %v16634_v14  ;;  %v4238_v39 = vmul.f32 %v12166_v23, %v3818_v25  ;;  %7379 = vmatpush1.bf16.msra.mxu1 %v7378_v59  ;;  %v16697_v52 = vld [vmem:[#allocation162_spill] sm:$0xff] }
 0x27e   : > { %16688 = vst [vmem:[#allocation201_spill] sm:$0xff] %v12283_v63  ;;  %v12298_v30 = vrot.slane %v16690_v10, %v16649_v4  ;;  %v12307_v46 = vrot.slane %v12303_v40, %v16663_v22  ;;  %7381 = vmatprep.subr.bf16.mxu1 %v7380_v51  ;;  %v3769_v7 = vmul.f32 %v12269_v41, %v16675_v43  ;;  %v16755_v41 = vld [vmem:[#allocation39_spill] sm:$0xff] }
 0x27f   : > { %16691 = vst [vmem:[#allocation32_spill] sm:$0xff] %v12289_v29  ;;  %16692 = vst [vmem:[#allocation184_spill] sm:$0xff] %v12293_v32  ;;  %v12313_v59 = vrot.slane %v12186_v11, %v16695_v15  ;;  %v7382_v54 = vpack.c.bf16 %v3680_v34, %v3632_v17  ;;  %v3728_v47 = vmul.f32 %v16697_v52, %v12204_v0  ;;  %7355 = vmatpush1.bf16.msra.mxu0 %v7354_v53  ;;  %v12330_v0 = vld [vmem:[%s15156_s4 + $0xb0] sm:$0xff] }
 0x280   : > { %16693 = vst [vmem:[#allocation199_spill] sm:$0xff] %v12298_v30  ;;  %16694 = vst [vmem:[#allocation181_spill] sm:$0xff] %v12307_v46  ;;  %v7358_v10 = vpack.c.bf16 %v4278_v5, %v4238_v39  ;;  %v3815_v23 = vmul.f32 %v16698_v45, %v12230_v24  ;;  %v3861_v51 = vmul.f32 %v12283_v63, %v3821_v18  ;;  %7357 = vmatprep.subr.bf16.mxu0 %v7356_v36  ;;  %v16702_v24 = vld [vmem:[#allocation178_spill] sm:$0xff]  ;;  %v16703_v36 = vld [vmem:[#allocation9_spill] sm:$0xff] }
 0x281   : > { %16696 = vst [vmem:[#allocation8_spill] sm:$0xff] %v12313_v59  ;;  %v12323_v43 = vrot.slane %v12303_v40, %v16355_v38  ;;  %v7384_v11 = vpack.c.bf16 %v3769_v7, %v3729_v61  ;;  %v3768_v34 = vmul.f32 %v12289_v29, %v16646_v49  ;;  %v12334_v53 = vrot.slane %v12330_v0, %v16663_v22 }
 0x282   : > { %v12338_v18 = vrot.slane %v12162_v2, %v16695_v15  ;;  %7383 = vmatpush1.bf16.msra.mxu1 %v7382_v54  ;;  %v3910_v5 = vsel %vm1425_vm8, %v16702_v24, %v3909_v33  ;;  %v4319_v49 = vmul.f32 %v12313_v59, %v3913_v62  ;;  %v3987_v61 = vrot.slane %v12303_v40, %v16695_v15 }
 0x283   : > { %16699 = vst [vmem:[#allocation210_spill] sm:$0xff] %v12323_v43  ;;  %16700 = vst [vmem:[#allocation211_spill] sm:$0xff] %v12334_v53  ;;  %7385 = vmatprep.subr.bf16.mxu1 %v7384_v11  ;;  %v4029_v17 = vrot.slane %v12303_v40, %v16703_v36  ;;  %v7386_v39 = vpack.c.bf16 %v3768_v34, %v3728_v47  ;;  %v3814_v7 = vmul.f32 %v12293_v32, %v12236_v37  ;;  %v16705_v47 = vld [vmem:[#allocation40_spill] sm:$0xff] }
 0x284   : > { %16701 = vst [vmem:[#allocation212_spill] sm:$0xff] %v12338_v18  ;;  %v3860_v2 = vmul.f32 %v12298_v30, %v3818_v25  ;;  %v12352_v54 = vrot.slane %v12330_v0, %v16355_v38  ;;  %7359 = vmatpush1.bf16.msra.mxu0 %v7358_v10  ;;  %v3907_v33 = vmul.f32 %v12307_v46, %v12257_v1  ;;  %v12362_v34 = vmul.f32 0.0, %v3987_v61 }
 0x285   : > { %v3953_v11 = vmul.f32 %v12323_v43, %v3913_v62  ;;  %4551 = vmatprep.subr.mxu0 %v4319_v49  ;;  %v7388_v24 = vpack.c.bf16 %v3861_v51, %v3815_v23  ;;  %v4318_v63 = vmul.f32 %v12338_v18, %v3910_v5  ;;  %v4071_v37 = vrot.slane %v12303_v40, %v16705_v47 }
 0x286   : > { %16704 = vst [vmem:[#allocation178_spill] sm:$0xff] %v12352_v54  ;;  %7387 = vmatpush1.bf16.msra.mxu1 %v7386_v39  ;;  %v4113_v25 = vrot.slane %v12303_v40, %v16681_v58  ;;  %16706 = vst [vmem:[#allocation9_spill] sm:$0xff] %v12362_v34  ;;  %v12364_v10 = vmul.f32 0.0, %v4029_v17  ;;  %v12368_v1 = vrot.slane %v12330_v0, %v16703_v36  ;;  %v3997_v49 = vsel %vm721_vm3, %v12156_v13, 0.0 }
 0x287   : > { %7389 = vmatprep.subr.bf16.mxu1 %v7388_v24  ;;  %v7390_v62 = vpack.c.bf16 %v3860_v2, %v3814_v7  ;;  %v3906_v23 = vmul.f32 %v12334_v53, %v12262_v48  ;;  %v3952_v51 = vmul.f32 %v12352_v54, %v3910_v5  ;;  %v7392_v61 = vpack.c.bf16 %v3953_v11, %v3907_v33 }
 0x288   : > { %16707 = vst [vmem:[#allocation40_spill] sm:$0xff] %v12364_v10  ;;  %16708 = vst [vmem:[#allocation213_spill] sm:$0xff] %v12368_v1  ;;  %4552 = vmatpush1.msra.mxu0 %v4318_v63  ;;  %v12378_v17 = vrot.slane %v12330_v0, %v16695_v15  ;;  %v12382_v36 = vmul.f32 0.0, %v4071_v37  ;;  %v12384_v48 = vmul.f32 0.0, %v4113_v25  ;;  %v4153_v63 = vrot.slane %v12303_v40, %v16634_v14 }
 0x289   : > { %4564 = vmatmul.mubr.f32.vlgmr.msra.gmra.mrb[4].mxu0 %v11800_v28  ;;  %v3955_v13 = vsel %vm635_vm1, %v12128_v3, 0.0  ;;  %v12392_v5 = vpack.c.bf16 %v12364_v10, %v12362_v34  ;;  %v4193_v39 = vrot.slane %v12303_v40, %v16649_v4  ;;  %v4036_v7 = vmul.f32 %v12368_v1, %v3997_v49  ;;  %v16751_v34 = vld [vmem:[#allocation65_spill] sm:$0xff] }
 0x28a   : > { %16709 = vst [vmem:[#allocation214_spill] sm:$0xff] %v12378_v17  ;;  %7391 = vmatpush1.bf16.msra.mxu1 %v7390_v62  ;;  %7190 = vmatprep.mubr.msk.f32.mxu0 %vm4338_vm14, %v11828_v35  ;;  %16710 = vst [vmem:[#allocation215_spill] sm:$0xff] %v12382_v36  ;;  %v12399_v2 = vrot.slane %v12330_v0, %v16681_v58  ;;  %v7394_v33 = vpack.c.bf16 %v3952_v51, %v3906_v23  ;;  %v4081_v3 = vsel %vm931_vm7, %v12232_v16, 0.0 }
 0x28b   : > { %16711 = vst [vmem:[#allocation216_spill] sm:$0xff] %v12384_v48  ;;  %7393 = vmatprep.subr.bf16.mxu1 %v7392_v61  ;;  %16712 = vst [vmem:[#allocation217_spill] sm:$0xff] %v12392_v5  ;;  %v12403_v11 = vrot.slane %v12330_v0, %v16705_v47  ;;  %v4149_v24 = vrot.slane %v12330_v0, %v16634_v14  ;;  %v3994_v40 = vmul.f32 %v12378_v17, %v3955_v13  ;;  %v8186_v14 = vld [vmem:[%s15156_s4 + $0xf8] sm:$0x7] }
 0x28c   : > { %16713 = vst [vmem:[#allocation218_spill] sm:$0xff] %v12399_v2  ;;  %v12413_v58 = vpack.c.bf16 %v12384_v48, %v12382_v36  ;;  %v12415_v37 = vmul.f32 0.0, %v4153_v63  ;;  %v4189_v47 = vrot.slane %v12330_v0, %v16649_v4  ;;  %v4039_v16 = vsel %vm830_vm5, %v12198_v44, 0.0  ;;  %v8187_v0 = vld [vmem:[%s15156_s4 + $0xf0] sm:$0x7] }
 0x28d   : > { %16714 = vst [vmem:[#allocation219_spill] sm:$0xff] %v12403_v11  ;;  %4570 = vmatmul.mubr.f32.gmra.mrb[6].mxu0 %v11860_v21  ;;  %v12422_v25 = vmul.f32 0.0, %v4193_v39  ;;  %v4233_v62 = vrot.slane %v8186_v14, %v16663_v22  ;;  %v4273_v23 = vrot.slane %v8186_v14, %v16355_v38  ;;  %v7398_v51 = vpack.c.bf16 %v4036_v7, %v3994_v40 }
 0x28e   : > { %7395 = vmatpush1.bf16.msra.mxu1 %v7394_v33  ;;  %16715 = vst [vmem:[#allocation220_spill] sm:$0xff] %v12413_v58  ;;  %16716 = vst [vmem:[#allocation221_spill] sm:$0xff] %v12415_v37  ;;  %v4120_v49 = vmul.f32 %v12399_v2, %v4081_v3  ;;  %v12430_v61 = vmul.f32 0.0, %v4149_v24  ;;  %v4078_v4 = vmul.f32 %v12403_v11, %v4039_v16  ;;  %v12433_v44 = vmul.f32 0.0, %v4189_v47 }
 0x28f   : > { %7397 = vmatprep.subr.bf16.mxu1 %v12392_v5  ;;  %16717 = vst [vmem:[#allocation222_spill] sm:$0xff] %v12422_v25  ;;  %v4229_v63 = vrot.slane %v8187_v0, %v16663_v22  ;;  %v4269_v13 = vrot.slane %v8187_v0, %v16355_v38  ;;  %v12443_v39 = vpack.c.bf16 %v12422_v25, %v12415_v37  ;;  %v12445_v7 = vmul.f32 0.0, %v4233_v62 }
 0x290   : > { %16718 = vst [vmem:[#allocation223_spill] sm:$0xff] %v12430_v61  ;;  %16719 = vst [vmem:[#allocation224_spill] sm:$0xff] %v12433_v44  ;;  %v12447_v33 = vmul.f32 0.0, %v4273_v23  ;;  %v7402_v3 = vpack.c.bf16 %v4120_v49, %v4078_v4  ;;  %v12451_v24 = vpack.c.bf16 %v12433_v44, %v12430_v61  ;;  %v4313_v62 = vrot.slane %v8186_v14, %v16695_v15 }
 0x291   : > { %16720 = vst [vmem:[#allocation225_spill] sm:$0xff] %v12443_v39  ;;  %16721 = vst [vmem:[#allocation226_spill] sm:$0xff] %v12445_v7  ;;  %v12453_v40 = vmul.f32 0.0, %v4229_v63  ;;  %v12455_v47 = vmul.f32 0.0, %v4269_v13  ;;  %v16731_v63 = vld [vmem:[#allocation52_spill] sm:$0xff]  ;;  %v7434_v54 = vpack.c.bf16 %v16751_v34, %v16751_v34  ;;  %v16752_v34 = vld [vmem:[#allocation54_spill] sm:$0xff]  ;;  %v7442_v27 = vpack.c.bf16 %v16755_v41, %v16755_v41 }
 0x292   : > { %7399 = vmatpush1.bf16.msra.mxu1 %v7398_v51  ;;  %16722 = vst [vmem:[#allocation227_spill] sm:$0xff] %v12447_v33  ;;  %16723 = vst [vmem:[#allocation228_spill] sm:$0xff] %v12451_v24  ;;  %v12460_v16 = vpack.c.bf16 %v12447_v33, %v12445_v7  ;;  %v4309_v51 = vrot.slane %v8187_v0, %v16695_v15  ;;  %v12470_v49 = vmul.f32 0.0, %v4313_v62  ;;  %v16730_v15 = vld [vmem:[#allocation25_spill] sm:$0xff]  ;;  %v12483_v0 = vpop.permute.xlu0 %4330 }
 0x293   : > { %7401 = vmatprep.subr.bf16.mxu1 %v12413_v58  ;;  %16724 = vst [vmem:[#allocation229_spill] sm:$0xff] %v12453_v40  ;;  %16725 = vst [vmem:[#allocation230_spill] sm:$0xff] %v12455_v47  ;;  %v12466_v23 = vpack.c.bf16 %v12455_v47, %v12453_v40  ;;  %v7414_v14 = vpack.c.bf16 %v16730_v15, %v16730_v15  ;;  %v7412_v13 = vpack.c.bf16 %v16731_v63, %v16731_v63 }
 0x294   : > { %16726 = vst [vmem:[#allocation231_spill] sm:$0xff] %v12460_v16  ;;  %16728 = vst [vmem:[#allocation233_spill] sm:$0xff] %v12470_v49  ;;  %v12473_v4 = vmul.f32 0.0, %v4309_v51 }
 0x295   : > { %16727 = vst [vmem:[#allocation232_spill] sm:$0xff] %v12466_v23  ;;  %7413 = vmatprep.subr.bf16.mxu0 %v7412_v13 }
 0x296   : > { %7403 = vmatpush1.bf16.msra.mxu1 %v7402_v3  ;;  %16729 = vst [vmem:[#allocation234_spill] sm:$0xff] %v12473_v4  ;;  %7415 = vmatpush1.bf16.msra.mxu0 %v7414_v14 }
 0x297   : > { %7405 = vmatprep.subr.bf16.mxu1 %v12443_v39 }
 0x29a   : > { %7407 = vmatpush1.bf16.msra.mxu1 %v12451_v24  ;;  %v12493_v24 = vpop.permute.xlu1 %4335 }
 0x29b   : > { %7409 = vmatprep.subr.bf16.mxu1 %v12460_v16 }
 0x29e   : > { %7411 = vmatpush1.bf16.msra.mxu1 %v12466_v23  ;;  %v16732_v23 = vld [vmem:[#allocation37_spill] sm:$0xff] }
 0x29f   : > { %4628 = vmatprep.subr.mxu1 %v12470_v49  ;;  %v5638_v49 = vld [vmem:[%s15161_s9 + $0x8] sm:$0xff] }
 0x2a0   : > { %5715 = vmatprep.mubr.f32.mxu0 %v5638_v49 }
 0x2a2   : > { %4629 = vmatpush1.msra.mxu1 %v12473_v4 }
 0x2a3   : > { %4641 = vmatmul.mubr.f32.vlgmr.msra.gmra.mrb[4].mxu1 %v11800_v28  ;;  %v7418_v28 = vpack.c.bf16 %v16732_v23, %v16732_v23  ;;  %v16734_v23 = vld [vmem:[#allocation50_spill] sm:$0xff] }
 0x2a4   : > { %7192 = vmatprep.mubr.msk.f32.mxu1 %vm4338_vm14, %v11828_v35  ;;  %v7420_v14 = vpack.c.bf16 %v16734_v23, %v16734_v23 }
 0x2a7   : > { %4647 = vmatmul.mubr.f32.gmra.mrb[6].mxu1 %v11860_v21  ;;  %v16733_v21 = vld [vmem:[#allocation12_spill] sm:$0xff] }
 0x2a8   : > { %v7416_v16 = vpack.c.bf16 %v16733_v21, %v16733_v21  ;;  %v16735_v21 = vld [vmem:[#allocation51_spill] sm:$0xff]  ;;  %5857 = vmatprep.mubr.f32.mxu1 %v5638_v49 }
 0x2aa   : > { %7417 = vmatprep.subr.bf16.mxu0 %v7416_v16  ;;  %v7422_v16 = vpack.c.bf16 %v16735_v21, %v16735_v21 }
 0x2ab   : > { %7419 = vmatpush1.bf16.msra.mxu0 %v7418_v28 }
 0x2ac   : > { %7421 = vmatprep.subr.bf16.mxu0 %v7420_v14  ;;  %v16738_v14 = vld [vmem:[#allocation81_spill] sm:$0xff] }
 0x2af   : > { %7423 = vmatpush1.bf16.msra.mxu0 %v7422_v16 }
 0x31b   : > { %v4411_v3 = vpop.f32.mrb[0].mxu0 }
 0x31c   : > { %v4412_v62 = vadd.f32 %v4411_v3, %v12483_v0  ;;  %v4413_v51 = vpop.f32.mrb[1].mxu0 }
 0x31d   : > { %v4414_v35 = vadd.f32 %v4413_v51, %v12483_v0 }
 0x31e   : > { %vm4653_vm10 = vcmp.ge.f32.partialorder %v4412_v62, 0.0  ;;  %v4669_v15 = vmul.f32 0.01, %v4412_v62 }
 0x31f   : > { %vm4654_vm11 = vcmp.ge.f32.partialorder %v4414_v35, 0.0  ;;  %v4670_v63 = vmul.f32 0.01, %v4414_v35  ;;  %v4417_v39 = vpop.f32.mrb[2].mxu0 }
 0x320   : > { %v4685_v3 = vsel %vm4653_vm10, %v4412_v62, %v4669_v15  ;;  %v4418_v13 = vadd.f32 %v4417_v39, %v12493_v24  ;;  %v4419_v58 = vpop.f32.mrb[3].mxu0  ;;  %v16736_v39 = vld [vmem:[#allocation29_spill] sm:$0xff] }
 0x321   : > { %v12496_v5 = vsel %vm4654_vm11, %v4414_v35, %v4670_v63  ;;  %4713 = vrot.lane.b32.xlu1 %v4685_v3, %s8216_s30  ;;  %v12506_v15 = vmul.f32 %v4685_v3, %v16736_v39  ;;  %v16737_v35 = vld [vmem:[#allocation78_spill] sm:$0xff] }
 0x322   : > { %vm4661_vm12 = vcmp.ge.f32.partialorder %v4418_v13, 0.0  ;;  %v4677_v51 = vmul.f32 0.01, %v4418_v13  ;;  %4715 = vrot.lane.b32.xlu0 %v12496_v5, %s8216_s30  ;;  %v12513_v63 = vmul.f32 %v4685_v3, %v16737_v35 }
 0x324   : > { %v4693_v62 = vsel %vm4661_vm12, %v4418_v13, %v4677_v51  ;;  %v7424_v13 = vpack.c.bf16 %v16738_v14, %v16738_v14  ;;  %v16739_v51 = vld [vmem:[#allocation49_spill] sm:$0xff]  ;;  %v16741_v14 = vld [vmem:[#allocation47_spill] sm:$0xff] }
 0x325   : > { %4773 = vrot.lane.b32.xlu1 %v4685_v3, %s8217_s17  ;;  %v12510_v28 = vmul.f32 %v4693_v62, %v16736_v39  ;;  %v12516_v23 = vmul.f32 %v4693_v62, %v16737_v35  ;;  %v7426_v21 = vpack.c.bf16 %v16739_v51, %v16739_v51  ;;  %v16740_v35 = vld [vmem:[#allocation60_spill] sm:$0xff]  ;;  %v7430_v38 = vpack.c.bf16 %v16741_v14, %v16741_v14 }
 0x326   : > { %4775 = vrot.lane.b32.xlu0 %v12496_v5, %s8217_s17  ;;  %7425 = vmatprep.subr.bf16.mxu0 %v7424_v13  ;;  %v7428_v39 = vpack.c.bf16 %v16740_v35, %v16740_v35  ;;  %v4420_v13 = vadd.f32 %v4419_v58, %v12493_v24 }
 0x327   : > { %7427 = vmatpush1.bf16.msra.mxu0 %v7426_v21 }
 0x328   : > { %7429 = vmatprep.subr.bf16.mxu0 %v7428_v39  ;;  %v4678_v21 = vmul.f32 0.01, %v4420_v13  ;;  %vm4662_vm13 = vcmp.ge.f32.partialorder %v4420_v13, 0.0 }
 0x329   : > { %4967 = vrot.lane.b32.xlu1 %v4685_v3, %s8215_s29 }
 0x32a   : > { %4835 = vrot.lane.b32.xlu0 %v12496_v5, %s8219_s12  ;;  %v12547_v22 = vsel %vm4662_vm13, %v4420_v13, %v4678_v21 }
 0x32b   : > { %7431 = vmatpush1.bf16.msra.mxu0 %v7430_v38 }
 0x32d   : > { %4833 = vrot.lane.b32.xlu1 %v4685_v3, %s8219_s12 }
 0x32e   : > { %4895 = vrot.lane.b32.xlu0 %v12496_v5, %s8222_s20 }
 0x331   : > { %5037 = vrot.lane.b32.xlu1 %v4685_v3, %s8218_s18 }
 0x332   : > { %4981 = vrot.lane.b32.xlu0 %v4693_v62, %s8215_s29 }
 0x335   : > { %4893 = vrot.lane.b32.xlu1 %v4685_v3, %s8222_s20 }
 0x336   : > { %5051 = vrot.lane.b32.xlu0 %v4693_v62, %s8218_s18 }
 0x339   : > { %5107 = vrot.lane.b32.xlu1 %v4685_v3, %s8221_s19 }
 0x33a   : > { %5121 = vrot.lane.b32.xlu0 %v4693_v62, %s8221_s19 }
 0x33d   : > { %5177 = vrot.lane.b32.xlu1 %v4685_v3, %s8224_s21 }
 0x33e   : > { %v4488_v51 = vpop.f32.mrb[0].mxu1  ;;  %5191 = vrot.lane.b32.xlu0 %v4693_v62, %s8224_s21 }
 0x33f   : > { %v4490_v39 = vpop.f32.mrb[1].mxu1  ;;  %v4489_v58 = vadd.f32 %v4488_v51, %v12483_v0 }
 0x340   : > { %v4491_v16 = vadd.f32 %v4490_v39, %v12483_v0 }
 0x341   : > { %4969 = vrot.lane.b32.xlu1 %v12496_v5, %s8215_s29  ;;  %v4671_v3 = vmul.f32 0.01, %v4489_v58  ;;  %vm4655_vm15 = vcmp.ge.f32.partialorder %v4489_v58, 0.0 }
 0x342   : > { %v4494_v38 = vpop.f32.mrb[2].mxu1  ;;  %4727 = vrot.lane.b32.xlu0 %v12547_v22, %s8216_s30  ;;  %v4672_v35 = vmul.f32 0.01, %v4491_v16  ;;  %vm4656_vm0 = vcmp.ge.f32.partialorder %v4491_v16, 0.0 }
 0x343   : > { %v4496_v14 = vpop.f32.mrb[3].mxu1  ;;  %v12566_v13 = vsel %vm4655_vm15, %v4489_v58, %v4671_v3 }
 0x344   : > { %16742 = vst [vmem:[#allocation25_spill] sm:$0xff] %v12566_v13  ;;  %v12585_v4 = vsel %vm4656_vm0, %v4491_v16, %v4672_v35 }
 0x345   : > { %5039 = vrot.lane.b32.xlu1 %v12496_v5, %s8218_s18  ;;  %16743 = vst [vmem:[#allocation52_spill] sm:$0xff] %v12585_v4 }
 0x346   : > { %4787 = vrot.lane.b32.xlu0 %v12547_v22, %s8217_s17 }
 0x349   : > { %5109 = vrot.lane.b32.xlu1 %v12496_v5, %s8221_s19 }
 0x34a   : > { %4847 = vrot.lane.b32.xlu0 %v12547_v22, %s8219_s12 }
 0x34d   : > { %5179 = vrot.lane.b32.xlu1 %v12496_v5, %s8224_s21 }
 0x34e   : > { %4907 = vrot.lane.b32.xlu0 %v12547_v22, %s8222_s20 }
 0x351   : > { %4725 = vrot.lane.b32.xlu1 %v4693_v62, %s8216_s30 }
 0x352   : > { %4971 = vrot.lane.b32.xlu0 %v12566_v13, %s8215_s29 }
 0x355   : > { %4785 = vrot.lane.b32.xlu1 %v4693_v62, %s8217_s17 }
 0x356   : > { %5041 = vrot.lane.b32.xlu0 %v12566_v13, %s8218_s18 }
 0x359   : > { %4845 = vrot.lane.b32.xlu1 %v4693_v62, %s8219_s12 }
 0x35a   : > { %5111 = vrot.lane.b32.xlu0 %v12566_v13, %s8221_s19 }
 0x35c   : > { %v4565_v51 = vpop.f32.mrb[4].mxu0 }
 0x35d   : > { %v4567_v21 = vpop.f32.mrb[5].mxu0  ;;  %4905 = vrot.lane.b32.xlu1 %v4693_v62, %s8222_s20  ;;  %v4495_v62 = vadd.f32 %v4494_v38, %v12493_v24  ;;  %v4566_v49 = vadd.f32 %v4565_v51, %v12483_v0 }
 0x35e   : > { %5181 = vrot.lane.b32.xlu0 %v12566_v13, %s8224_s21 }
 0x35f   : > { %v4679_v35 = vmul.f32 0.01, %v4495_v62  ;;  %vm4663_vm9 = vcmp.ge.f32.partialorder %v4495_v62, 0.0  ;;  %vm4657_vm11 = vcmp.ge.f32.partialorder %v4566_v49, 0.0 }
 0x360   : > { %v12578_v58 = vpop.f32.mrb[6].mxu0 }
 0x361   : > { %v12580_v3 = vpop.f32.mrb[7].mxu0  ;;  %4983 = vrot.lane.b32.xlu1 %v12547_v22, %s8215_s29  ;;  %v12604_v16 = vsel %vm4663_vm9, %v4495_v62, %v4679_v35  ;;  %v4497_v35 = vadd.f32 %v4496_v14, %v12493_v24  ;;  %v4572_v30 = vadd.f32 %v12578_v58, %v12493_v24 }
 0x362   : > { %4719 = vrot.lane.b32.xlu0 %v12585_v4, %s8216_s30  ;;  %16744 = vst [vmem:[#allocation37_spill] sm:$0xff] %v12604_v16 }
 0x363   : > { %v4680_v33 = vmul.f32 0.01, %v4497_v35  ;;  %vm4664_vm10 = vcmp.ge.f32.partialorder %v4497_v35, 0.0  ;;  %v4681_v45 = vmul.f32 0.01, %v4572_v30  ;;  %vm4665_vm13 = vcmp.ge.f32.partialorder %v4572_v30, 0.0 }
 0x365   : > { %5053 = vrot.lane.b32.xlu1 %v12547_v22, %s8218_s18  ;;  %v12634_v40 = vsel %vm4664_vm10, %v4497_v35, %v4680_v33  ;;  %v4673_v33 = vmul.f32 0.01, %v4566_v49 }
 0x366   : > { %4779 = vrot.lane.b32.xlu0 %v12585_v4, %s8217_s17  ;;  %16745 = vst [vmem:[#allocation12_spill] sm:$0xff] %v12634_v40 }
 0x367   : > { %v12653_v14 = vsel %vm4657_vm11, %v4566_v49, %v4673_v33  ;;  %v4568_v33 = vadd.f32 %v4567_v21, %v12483_v0  ;;  %vm5647_vm11 = vcmask 392192  }
 0x368   : > { %16746 = vst [vmem:[#allocation50_spill] sm:$0xff] %v12653_v14 }
 0x369   : > { %5123 = vrot.lane.b32.xlu1 %v12547_v22, %s8221_s19  ;;  %v4674_v61 = vmul.f32 0.01, %v4568_v33  ;;  %vm4658_vm12 = vcmp.ge.f32.partialorder %v4568_v33, 0.0 }
 0x36a   : > { %4839 = vrot.lane.b32.xlu0 %v12585_v4, %s8219_s12 }
 0x36b   : > { %v12688_v2 = vsel %vm4658_vm12, %v4568_v33, %v4674_v61  ;;  %v16750_v61 = vld [vmem:[#allocation55_spill] sm:$0xff] }
 0x36c   : > { %16749 = vst [vmem:[#allocation49_spill] sm:$0xff] %v12688_v2 }
 0x36d   : > { %5193 = vrot.lane.b32.xlu1 %v12547_v22, %s8224_s21 }
 0x36e   : > { %4899 = vrot.lane.b32.xlu0 %v12585_v4, %s8222_s20 }
 0x371   : > { %4717 = vrot.lane.b32.xlu1 %v12566_v13, %s8216_s30 }
 0x372   : > { %4985 = vrot.lane.b32.xlu0 %v12604_v16, %s8215_s29 }
 0x375   : > { %4777 = vrot.lane.b32.xlu1 %v12566_v13, %s8217_s17 }
 0x376   : > { %v12608_v39 = vpop.f32.mrb[4].mxu1  ;;  %5055 = vrot.lane.b32.xlu0 %v12604_v16, %s8218_s18 }
 0x377   : > { %v12612_v38 = vpop.f32.mrb[5].mxu1 }
 0x379   : > { %4837 = vrot.lane.b32.xlu1 %v12566_v13, %s8219_s12 }
 0x37a   : > { %v12619_v47 = vpop.f32.mrb[6].mxu1  ;;  %5125 = vrot.lane.b32.xlu0 %v12604_v16, %s8221_s19 }
 0x37b   : > { %v12623_v62 = vpop.f32.mrb[7].mxu1 }
 0x37d   : > { %4897 = vrot.lane.b32.xlu1 %v12566_v13, %s8222_s20 }
 0x37e   : > { %5195 = vrot.lane.b32.xlu0 %v12604_v16, %s8224_s21 }
 0x381   : > { %4973 = vrot.lane.b32.xlu1 %v12585_v4, %s8215_s29 }
 0x382   : > { %4731 = vrot.lane.b32.xlu0 %v12634_v40, %s8216_s30 }
 0x385   : > { %5043 = vrot.lane.b32.xlu1 %v12585_v4, %s8218_s18 }
 0x386   : > { %4791 = vrot.lane.b32.xlu0 %v12634_v40, %s8217_s17 }
 0x389   : > { %5113 = vrot.lane.b32.xlu1 %v12585_v4, %s8221_s19 }
 0x38a   : > { %4851 = vrot.lane.b32.xlu0 %v12634_v40, %s8219_s12 }
 0x38d   : > { %5183 = vrot.lane.b32.xlu1 %v12585_v4, %s8224_s21 }
 0x38e   : > { %4911 = vrot.lane.b32.xlu0 %v12634_v40, %s8222_s20 }
 0x391   : > { %4729 = vrot.lane.b32.xlu1 %v12604_v16, %s8216_s30 }
 0x392   : > { %4975 = vrot.lane.b32.xlu0 %v12653_v14, %s8215_s29 }
 0x393   : > { %v12659_v51 = vpop.permute.xlu1 %4713 }
 0x394   : > { %v12661_v35 = vpop.permute.xlu0 %4715 }
 0x395   : > { %16747 = vst [vmem:[#allocation51_spill] sm:$0xff] %v12661_v35  ;;  %4789 = vrot.lane.b32.xlu1 %v12604_v16, %s8217_s17  ;;  %v4737_v52 = vsel %vm635_vm1, %v12659_v51, %v12661_v35 }
 0x396   : > { %5045 = vrot.lane.b32.xlu0 %v12653_v14, %s8218_s18 }
 0x397   : > { %v12667_v7 = vpop.permute.xlu1 %4773 }
 0x398   : > { %v12669_v49 = vpop.permute.xlu0 %4775 }
 0x399   : > { %16748 = vst [vmem:[#allocation81_spill] sm:$0xff] %v12669_v49  ;;  %4849 = vrot.lane.b32.xlu1 %v12604_v16, %s8219_s12  ;;  %v4797_v8 = vsel %vm721_vm3, %v12667_v7, %v12669_v49 }
 0x39a   : > { %5115 = vrot.lane.b32.xlu0 %v12653_v14, %s8221_s19 }
 0x39b   : > { %v12676_v44 = vpop.permute.xlu1 %4967 }
 0x39c   : > { %v12678_v25 = vpop.permute.xlu0 %4835  ;;  %v5021_v48 = vsel %vm1110_vm2, 0.0, %v12676_v44 }
 0x39d   : > { %4909 = vrot.lane.b32.xlu1 %v12604_v16, %s8222_s20  ;;  %v5023_v33 = vmul.f32 %v5021_v48, %v16750_v61 }
 0x39e   : > { %5185 = vrot.lane.b32.xlu0 %v12653_v14, %s8224_s21 }
 0x39f   : > { %v12684_v37 = vpop.permute.xlu1 %4833 }
 0x3a0   : > { %v12686_v21 = vpop.permute.xlu0 %4895 }
 0x3a1   : > { %4987 = vrot.lane.b32.xlu1 %v12634_v40, %s8215_s29 }
 0x3a2   : > { %4723 = vrot.lane.b32.xlu0 %v12688_v2, %s8216_s30 }
 0x3a3   : > { %v12696_v11 = vpop.permute.xlu1 %5037 }
 0x3a4   : > { %v12698_v36 = vpop.permute.xlu0 %4981  ;;  %v5091_v43 = vsel %vm1215_vm4, 0.0, %v12696_v11 }
 0x3a5   : > { %v5022_v1 = vsel %vm1110_vm2, 0.0, %v12698_v36  ;;  %5057 = vrot.lane.b32.xlu1 %v12634_v40, %s8218_s18  ;;  %v5093_v48 = vmul.f32 %v5091_v43, %v16752_v34 }
 0x3a6   : > { %v5030_v10 = vmul.f32 %v5022_v1, %v16750_v61  ;;  %4783 = vrot.lane.b32.xlu0 %v12688_v2, %s8217_s17 }
 0x3a7   : > { %v12708_v17 = vpop.permute.xlu1 %4893 }
 0x3a8   : > { %v12714_v53 = vpop.permute.xlu0 %5051  ;;  %v7432_v46 = vpack.c.bf16 %v5030_v10, %v5023_v33  ;;  %v16753_v33 = vld [vmem:[#allocation45_spill] sm:$0xff] }
 0x3a9   : > { %5127 = vrot.lane.b32.xlu1 %v12634_v40, %s8221_s19  ;;  %v5092_v1 = vsel %vm1215_vm4, 0.0, %v12714_v53  ;;  %v7438_v18 = vpack.c.bf16 %v16753_v33, %v16753_v33 }
 0x3aa   : > { %7433 = vmatprep.subr.bf16.mxu0 %v7432_v46  ;;  %4843 = vrot.lane.b32.xlu0 %v12688_v2, %s8219_s12  ;;  %v5100_v61 = vmul.f32 %v5092_v1, %v16752_v34  ;;  %v16754_v46 = vld [vmem:[#allocation77_spill] sm:$0xff] }
 0x3ab   : > { %v12726_v32 = vpop.permute.xlu1 %5107  ;;  %7435 = vmatpush1.bf16.msra.mxu0 %v7434_v54 }
 0x3ac   : > { %v5161_v10 = vsel %vm1320_vm6, 0.0, %v12726_v32  ;;  %v12730_v58 = vpop.permute.xlu0 %5121  ;;  %v7436_v43 = vpack.c.bf16 %v5100_v61, %v5093_v48  ;;  %v12750_v61 = vsel %vm4665_vm13, %v4572_v30, %v4681_v45  ;;  %v16757_v48 = vld [vmem:[#allocation35_spill] sm:$0xff]  ;;  %v16759_v45 = vld [vmem:[#allocation33_spill] sm:$0xff] }
 0x3ad   : > { %v5163_v59 = vmul.f32 %v5161_v10, %v16754_v46  ;;  %v5162_v29 = vsel %vm1320_vm6, 0.0, %v12730_v58  ;;  %5197 = vrot.lane.b32.xlu1 %v12634_v40, %s8224_s21  ;;  %16756 = vst [vmem:[#allocation47_spill] sm:$0xff] %v12750_v61  ;;  %v7446_v30 = vpack.c.bf16 %v16759_v45, %v16759_v45  ;;  %v12802_v45 = vadd.f32 %v12608_v39, %v12483_v0 }
 0x3ae   : > { %v5170_v54 = vmul.f32 %v5162_v29, %v16754_v46  ;;  %4903 = vrot.lane.b32.xlu0 %v12688_v2, %s8222_s20  ;;  %7437 = vmatprep.subr.bf16.mxu0 %v7436_v43 }
 0x3af   : > { %v12742_v1 = vpop.permute.xlu1 %5177  ;;  %7439 = vmatpush1.bf16.msra.mxu0 %v7438_v18  ;;  %vm4659_vm0 = vcmp.ge.f32.partialorder %v12802_v45, 0.0 }
 0x3b0   : > { %v5231_v33 = vsel %vm1425_vm8, 0.0, %v12742_v1  ;;  %v12746_v10 = vpop.permute.xlu0 %5191  ;;  %v7440_v34 = vpack.c.bf16 %v5170_v54, %v5163_v59  ;;  %v4574_v54 = vadd.f32 %v12580_v3, %v12493_v24  ;;  %v4759_v3 = vsel %vm635_vm1, 0.0, %v12659_v51  ;;  %v16763_v51 = vld [vmem:[#allocation82_spill] sm:$0xff] }
 0x3b1   : > { %v5233_v29 = vmul.f32 %v5231_v33, %v16757_v48  ;;  %v5232_v46 = vsel %vm1425_vm8, 0.0, %v12746_v10  ;;  %4721 = vrot.lane.b32.xlu1 %v12653_v14, %s8216_s30  ;;  %v5265_v42 = vmul.f32 %v4759_v3, %v16762_v56 }
 0x3b2   : > { %v5240_v43 = vmul.f32 %v5232_v46, %v16757_v48  ;;  %7441 = vmatprep.subr.bf16.mxu0 %v7440_v34  ;;  %4989 = vrot.lane.b32.xlu0 %v12750_v61, %s8215_s29  ;;  %vm4666_vm15 = vcmp.ge.f32.partialorder %v4574_v54, 0.0  ;;  %v16761_v48 = vld [vmem:[#allocation56_spill] sm:$0xff] }
 0x3b3   : > { %v12760_v59 = vpop.permute.xlu1 %4969  ;;  %7443 = vmatpush1.bf16.msra.mxu0 %v7442_v27  ;;  %v4761_v9 = vmul.f32 %v4759_v3, %v16761_v48  ;;  %v5266_v3 = vmul.f32 %v4737_v52, %v16764_v31 }
 0x3b4   : > { %v12762_v18 = vpop.permute.xlu0 %4727  ;;  %v7444_v41 = vpack.c.bf16 %v5240_v43, %v5233_v29  ;;  %v4682_v29 = vmul.f32 0.01, %v4574_v54 }
 0x3b5   : > { %16758 = vst [vmem:[#allocation65_spill] sm:$0xff] %v12762_v18  ;;  %4781 = vrot.lane.b32.xlu1 %v12653_v14, %s8217_s17 }
 0x3b6   : > { %7445 = vmatprep.subr.bf16.mxu0 %v7444_v41  ;;  %5059 = vrot.lane.b32.xlu0 %v12750_v61, %s8218_s18 }
 0x3b7   : > { %v12770_v34 = vpop.permute.xlu1 %5039  ;;  %7447 = vmatpush1.bf16.msra.mxu0 %v7446_v30  ;;  %v12794_v30 = vsel %vm4666_vm15, %v4574_v54, %v4682_v29  ;;  %v4819_v54 = vsel %vm721_vm3, 0.0, %v12667_v7  ;;  %v4762_v7 = vmul.f32 %v4737_v52, %v16763_v51 }
 0x3b8   : > { %v12772_v46 = vpop.permute.xlu0 %4787  ;;  %16760 = vst [vmem:[#allocation45_spill] sm:$0xff] %v12794_v30  ;;  %v4821_v50 = vmul.f32 %v4819_v54, %v16765_v6 }
 0x3b9   : > { %4841 = vrot.lane.b32.xlu1 %v12653_v14, %s8219_s12 }
 0x3ba   : > { %5129 = vrot.lane.b32.xlu0 %v12750_v61, %s8221_s19 }
 0x3bb   : > { %v12780_v27 = vpop.permute.xlu1 %5109 }
 0x3bc   : > { %v12782_v33 = vpop.permute.xlu0 %4847 }
 0x3bd   : > { %4901 = vrot.lane.b32.xlu1 %v12653_v14, %s8222_s20 }
 0x3be   : > { %5199 = vrot.lane.b32.xlu0 %v12750_v61, %s8224_s21 }
 0x3bf   : > { %v12788_v43 = vpop.permute.xlu1 %5179 }
 0x3c0   : > { %v12792_v41 = vpop.permute.xlu0 %4907 }
 0x3c1   : > { %4977 = vrot.lane.b32.xlu1 %v12688_v2, %s8215_s29 }
 0x3c2   : > { %4735 = vrot.lane.b32.xlu0 %v12794_v30, %s8216_s30 }
 0x3c3   : > { %v4726_v29 = vpop.permute.xlu1 %4725 }
 0x3c4   : > { %v4742_v39 = vsel %vm635_vm1, %v4726_v29, %v12762_v18  ;;  %v4760_v60 = vsel %vm635_vm1, 0.0, %v4726_v29  ;;  %v12817_v55 = vpop.permute.xlu0 %4971  ;;  %v16766_v29 = vld [vmem:[#allocation13_spill] sm:$0xff]  ;;  %v16768_v18 = vld [vmem:[#allocation36_spill] sm:$0xff] }
 0x3c5   : > { %v4767_v19 = vmul.f32 %v4760_v60, %v16761_v48  ;;  %v4768_v26 = vmul.f32 %v4742_v39, %v16763_v51  ;;  %v5273_v20 = vmul.f32 %v4760_v60, %v16762_v56  ;;  %v5274_v57 = vmul.f32 %v4742_v39, %v16764_v31  ;;  %5047 = vrot.lane.b32.xlu1 %v12688_v2, %s8218_s18  ;;  %v16767_v48 = vld [vmem:[#allocation27_spill] sm:$0xff] }
 0x3c6   : > { %v5297_v12 = vmul.f32 %v4819_v54, %v16766_v29  ;;  %4795 = vrot.lane.b32.xlu0 %v12794_v30, %s8217_s17  ;;  %v4822_v14 = vmul.f32 %v4797_v8, %v16767_v48  ;;  %v4879_v60 = vsel %vm830_vm5, 0.0, %v12684_v37 }
 0x3c7   : > { %v7450_v39 = vpack.c.bf16 %v5273_v20, %v5265_v42  ;;  %v7522_v56 = vpack.c.bf16 %v4767_v19, %v4761_v9  ;;  %v4786_v13 = vpop.permute.xlu1 %4785  ;;  %v7448_v16 = vpack.c.bf16 %v5274_v57, %v5266_v3  ;;  %v7520_v54 = vpack.c.bf16 %v4768_v26, %v4762_v7  ;;  %v16769_v19 = vld [vmem:[#allocation80_spill] sm:$0xff]  ;;  %v16770_v26 = vld [vmem:[#allocation73_spill] sm:$0xff] }
 0x3c8   : > { %v4802_v51 = vsel %vm721_vm3, %v4786_v13, %v12772_v46  ;;  %v4820_v52 = vsel %vm721_vm3, 0.0, %v4786_v13  ;;  %v12837_v31 = vpop.permute.xlu0 %5041  ;;  %v5298_v20 = vmul.f32 %v4797_v8, %v16768_v18  ;;  %v4857_v9 = vsel %vm830_vm5, %v12684_v37, %v12678_v25 }
 0x3c9   : > { %v4827_v4 = vmul.f32 %v4820_v52, %v16765_v6  ;;  %v4828_v40 = vmul.f32 %v4802_v51, %v16767_v48  ;;  %v5305_v49 = vmul.f32 %v4820_v52, %v16766_v29  ;;  %v5306_v35 = vmul.f32 %v4802_v51, %v16768_v18  ;;  %5117 = vrot.lane.b32.xlu1 %v12688_v2, %s8221_s19  ;;  %v16771_v29 = vld [vmem:[#allocation30_spill] sm:$0xff] }
 0x3ca   : > { %v4881_v57 = vmul.f32 %v4879_v60, %v16769_v19  ;;  %7449 = vmatprep.subr.bf16.mxu0 %v7448_v16  ;;  %7521 = vmatprep.subr.bf16.mxu1 %v7520_v54  ;;  %v5329_v42 = vmul.f32 %v4879_v60, %v16770_v26  ;;  %v4939_v13 = vsel %vm931_vm7, 0.0, %v12708_v17  ;;  %v16821_v6 = vld [vmem:[#allocation90_spill] sm:$0xff] }
 0x3cb   : > { %v7454_v7 = vpack.c.bf16 %v5305_v49, %v5297_v12  ;;  %v7526_v51 = vpack.c.bf16 %v4827_v4, %v4821_v50  ;;  %7451 = vmatpush1.bf16.msra.mxu0 %v7450_v39  ;;  %v4846_v3 = vpop.permute.xlu1 %4845  ;;  %4855 = vrot.lane.b32.xlu0 %v12794_v30, %s8219_s12  ;;  %v7452_v52 = vpack.c.bf16 %v5306_v35, %v5298_v20  ;;  %v16772_v4 = vld [vmem:[#allocation42_spill] sm:$0xff] }
 0x3cc   : > { %7523 = vmatpush1.bf16.msra.mxu1 %v7522_v56  ;;  %v4862_v8 = vsel %vm830_vm5, %v4846_v3, %v12782_v33  ;;  %v4880_v37 = vsel %vm830_vm5, 0.0, %v4846_v3  ;;  %v12858_v16 = vpop.permute.xlu0 %5111  ;;  %v7524_v60 = vpack.c.bf16 %v4828_v40, %v4822_v14  ;;  %v4675_v56 = vmul.f32 0.01, %v12802_v45  ;;  %v16773_v14 = vld [vmem:[#allocation43_spill] sm:$0xff] }
 0x3cd   : > { %v4887_v54 = vmul.f32 %v4880_v37, %v16769_v19  ;;  %v4888_v12 = vmul.f32 %v4862_v8, %v16771_v29  ;;  %v5337_v50 = vmul.f32 %v4880_v37, %v16770_v26  ;;  %v5338_v49 = vmul.f32 %v4862_v8, %v16772_v4  ;;  %4733 = vrot.lane.b32.xlu1 %v12750_v61, %s8216_s30  ;;  %v16775_v19 = vld [vmem:[#allocation68_spill] sm:$0xff] }
 0x3ce   : > { %v4882_v39 = vmul.f32 %v4857_v9, %v16771_v29  ;;  %v5330_v35 = vmul.f32 %v4857_v9, %v16772_v4  ;;  %7453 = vmatprep.subr.bf16.mxu0 %v7452_v52  ;;  %7525 = vmatprep.subr.bf16.mxu1 %v7524_v60  ;;  %v4917_v40 = vsel %vm931_vm7, %v12708_v17, %v12686_v21  ;;  %v16774_v17 = vld [vmem:[#allocation72_spill] sm:$0xff] }
 0x3cf   : > { %v5361_v20 = vmul.f32 %v4939_v13, %v16773_v14  ;;  %v7458_v3 = vpack.c.bf16 %v5337_v50, %v5329_v42  ;;  %v7530_v8 = vpack.c.bf16 %v4887_v54, %v4881_v57  ;;  %7455 = vmatpush1.bf16.msra.mxu0 %v7454_v7  ;;  %v4906_v37 = vpop.permute.xlu1 %4905  ;;  %4915 = vrot.lane.b32.xlu0 %v12794_v30, %s8222_s20  ;;  %v16776_v7 = vld [vmem:[#allocation16_spill] sm:$0xff] }
 0x3d0   : > { %7527 = vmatpush1.bf16.msra.mxu1 %v7526_v51  ;;  %v4922_v26 = vsel %vm931_vm7, %v4906_v37, %v12792_v41  ;;  %v4940_v9 = vsel %vm931_vm7, 0.0, %v4906_v37  ;;  %v12879_v52 = vpop.permute.xlu0 %5181  ;;  %v7456_v60 = vpack.c.bf16 %v5338_v49, %v5330_v35  ;;  %v7528_v18 = vpack.c.bf16 %v4888_v12, %v4882_v39 }
 0x3d1   : > { %v4947_v4 = vmul.f32 %v4940_v9, %v16774_v17  ;;  %v4948_v42 = vmul.f32 %v4922_v26, %v16775_v19  ;;  %v5369_v57 = vmul.f32 %v4940_v9, %v16773_v14  ;;  %v5370_v54 = vmul.f32 %v4922_v26, %v16776_v7  ;;  %4793 = vrot.lane.b32.xlu1 %v12750_v61, %s8217_s17  ;;  %v16778_v26 = vld [vmem:[#allocation14_spill] sm:$0xff]  ;;  %v16779_v9 = vld [vmem:[#allocation31_spill] sm:$0xff] }
 0x3d2   : > { %v4941_v51 = vmul.f32 %v4939_v13, %v16774_v17  ;;  %v4942_v50 = vmul.f32 %v4917_v40, %v16775_v19  ;;  %v5362_v37 = vmul.f32 %v4917_v40, %v16776_v7  ;;  %7457 = vmatprep.subr.bf16.mxu0 %v7456_v60  ;;  %7529 = vmatprep.subr.bf16.mxu1 %v7528_v18  ;;  %v16817_v17 = vld [vmem:[#allocation87_spill] sm:$0xff] }
 0x3d3   : > { %v12893_v12 = vsel %vm4659_vm0, %v12802_v45, %v4675_v56  ;;  %v7462_v49 = vpack.c.bf16 %v5369_v57, %v5361_v20  ;;  %7459 = vmatpush1.bf16.msra.mxu0 %v7458_v3  ;;  %v4984_v39 = vpop.permute.xlu1 %4983  ;;  %v5386_v35 = vmul.f32 %v12547_v22, %v16778_v26  ;;  %v4960_v13 = vmul.f32 %v12547_v22, %v16779_v9 }
 0x3d4   : > { %16777 = vst [vmem:[#allocation39_spill] sm:$0xff] %v12893_v12  ;;  %v7534_v14 = vpack.c.bf16 %v4947_v4, %v4941_v51  ;;  %7531 = vmatpush1.bf16.msra.mxu1 %v7530_v8  ;;  %4979 = vrot.lane.b32.xlu0 %v12893_v12, %s8215_s29  ;;  %v12901_v18 = vpop.permute.xlu0 %4719  ;;  %v7460_v40 = vpack.c.bf16 %v5370_v54, %v5362_v37 }
 0x3d5   : > { %v7532_v60 = vpack.c.bf16 %v4948_v42, %v4942_v50  ;;  %4853 = vrot.lane.b32.xlu1 %v12750_v61, %s8219_s12  ;;  %v5378_v45 = vmul.f32 %v12496_v5, %v16778_v26  ;;  %v4954_v56 = vmul.f32 %v12496_v5, %v16779_v9  ;;  %v4649_v5 = vadd.f32 %v12619_v47, %v12493_v24 }
 0x3d6   : > { %7461 = vmatprep.subr.bf16.mxu0 %v7460_v40  ;;  %v16781_v8 = vpack.c.bf16 %v12510_v28, %v12506_v15  ;;  %v4645_v47 = vadd.f32 %v12612_v38, %v12483_v0  ;;  %v5001_v0 = vsel %vm1110_vm2, %v12698_v36, %v4984_v39  ;;  %v4995_v50 = vsel %vm1110_vm2, %v12676_v44, %v12760_v59 }
 0x3d7   : > { %7533 = vmatprep.subr.bf16.mxu1 %v7532_v60  ;;  %7463 = vmatpush1.bf16.msra.mxu0 %v7462_v49  ;;  %v5054_v22 = vpop.permute.xlu1 %5053  ;;  %v7464_v4 = vpack.c.bf16 %v5386_v35, %v5378_v45  ;;  %v7536_v20 = vpack.c.bf16 %v4960_v13, %v4954_v56  ;;  %v4683_v54 = vmul.f32 0.01, %v4649_v5  ;;  %vm4667_vm9 = vcmp.ge.f32.partialorder %v4649_v5, 0.0  ;;  %v16787_v13 = vld [vmem:[#allocation69_spill] sm:$0xff]  ;;  %v16788_v60 = vld [vmem:[#allocation63_spill] sm:$0xff] }
 0x3d8   : > { %7535 = vmatpush1.bf16.msra.mxu1 %v7534_v14  ;;  %5049 = vrot.lane.b32.xlu0 %v12893_v12, %s8218_s18  ;;  %v12911_v3 = vpop.permute.xlu0 %4779  ;;  %v16782_v14 = vpack.c.bf16 %v12516_v23, %v12513_v63  ;;  %v4676_v63 = vmul.f32 0.01, %v4645_v47  ;;  %vm4660_vm10 = vcmp.ge.f32.partialorder %v4645_v47, 0.0  ;;  %v4996_v37 = vsel %vm1110_vm2, %v12760_v59, %v12817_v55  ;;  %v16789_v45 = vld [vmem:[#allocation79_spill] sm:$0xff]  ;;  %v16790_v59 = vld [vmem:[#allocation57_spill] sm:$0xff] }
 0x3d9   : > { %16780 = vst [vmem:[#allocation235_spill] sm:$0xff] %v12911_v3  ;;  %7465 = vmatprep.subr.bf16.mxu0 %v7464_v4  ;;  %7537 = vmatprep.subr.bf16.mxu1 %v7536_v20  ;;  %v12941_v23 = vsel %vm4667_vm9, %v4649_v5, %v4683_v54  ;;  %v5065_v49 = vsel %vm1215_vm4, %v12696_v11, %v12770_v34  ;;  %v16792_v54 = vld [vmem:[#allocation67_spill] sm:$0xff] }
 0x3da   : > { %4913 = vrot.lane.b32.xlu1 %v12750_v61, %s8222_s20  ;;  %16785 = vst [vmem:[#allocation238_spill] sm:$0xff] %v12941_v23  ;;  %v12964_v35 = vsel %vm4660_vm10, %v4645_v47, %v4676_v63  ;;  %v5413_v40 = vmul.f32 %v5001_v0, %v16787_v13  ;;  %v5024_v20 = vmul.f32 %v4995_v50, %v16790_v59 }
 0x3db   : > { %7467 = vmatpush1.bf16.msra.mxu0 %v16781_v8  ;;  %v12920_v42 = vpop.permute.xlu1 %5123  ;;  %16786 = vst [vmem:[#allocation239_spill] sm:$0xff] %v12964_v35  ;;  %v5405_v11 = vmul.f32 %v4995_v50, %v16787_v13  ;;  %v5406_v5 = vmul.f32 %v4996_v37, %v16789_v45  ;;  %v5433_v63 = vmul.f32 %v5065_v49, %v16792_v54  ;;  %v16794_v13 = vld [vmem:[#allocation70_spill] sm:$0xff] }
 0x3dc   : > { %7539 = vmatpush1.bf16.msra.mxu1 %v16782_v14  ;;  %5119 = vrot.lane.b32.xlu0 %v12893_v12, %s8221_s19  ;;  %v12927_v57 = vpop.permute.xlu0 %4839  ;;  %v16791_v14 = vld [vmem:[#allocation46_spill] sm:$0xff]  ;;  %v5071_v9 = vsel %vm1215_vm4, %v12714_v53, %v5054_v22  ;;  %v5135_v50 = vsel %vm1320_vm6, %v12726_v32, %v12780_v27 }
 0x3dd   : > { %16783 = vst [vmem:[#allocation236_spill] sm:$0xff] %v12927_v57  ;;  %v5094_v47 = vmul.f32 %v5065_v49, %v16791_v14  ;;  %v5101_v19 = vmul.f32 %v5071_v9, %v16791_v14 }
 0x3de   : > { %5187 = vrot.lane.b32.xlu1 %v12688_v2, %s8224_s21 }
 0x3df   : > { %v12933_v15 = vpop.permute.xlu1 %5193 }
 0x3e0   : > { %5189 = vrot.lane.b32.xlu0 %v12893_v12, %s8224_s21  ;;  %v12937_v28 = vpop.permute.xlu0 %4899 }
 0x3e1   : > { %16784 = vst [vmem:[#allocation237_spill] sm:$0xff] %v12937_v28 }
 0x3e2   : > { %4991 = vrot.lane.b32.xlu1 %v12794_v30, %s8215_s29 }
 0x3e3   : > { %v12943_v51 = vpop.permute.xlu1 %4717 }
 0x3e4   : > { %4993 = vrot.lane.b32.xlu0 %v12941_v23, %s8215_s29  ;;  %v12949_v38 = vpop.permute.xlu0 %4985 }
 0x3e5   : > { %v5002_v36 = vsel %vm1110_vm2, %v4984_v39, %v12949_v38  ;;  %v5031_v39 = vmul.f32 %v5001_v0, %v16790_v59  ;;  %v5066_v0 = vsel %vm1215_vm4, %v12770_v34, %v12837_v31  ;;  %v5441_v34 = vmul.f32 %v5071_v9, %v16792_v54  ;;  %v16795_v9 = vld [vmem:[#allocation75_spill] sm:$0xff] }
 0x3e6   : > { %5061 = vrot.lane.b32.xlu1 %v12794_v30, %s8218_s18  ;;  %v5032_v44 = vmul.f32 %v5002_v36, %v16788_v60  ;;  %v5414_v56 = vmul.f32 %v5002_v36, %v16789_v45  ;;  %v5025_v36 = vmul.f32 %v4996_v37, %v16788_v60  ;;  %v7470_v45 = vpack.c.bf16 %v5413_v40, %v5405_v11  ;;  %v16793_v37 = vld [vmem:[#allocation61_spill] sm:$0xff] }
 0x3e7   : > { %v12969_v4 = vpop.permute.xlu1 %4777  ;;  %v7542_v32 = vpack.c.bf16 %v5031_v39, %v5024_v20  ;;  %v5095_v40 = vmul.f32 %v5066_v0, %v16793_v37  ;;  %v5164_v20 = vmul.f32 %v5135_v50, %v16795_v9  ;;  %v5206_v11 = vsel %vm1425_vm8, %v12788_v43, %v12879_v52  ;;  %v16796_v39 = vld [vmem:[#allocation26_spill] sm:$0xff] }
 0x3e8   : > { %5063 = vrot.lane.b32.xlu0 %v12941_v23, %s8218_s18  ;;  %v12977_v8 = vpop.permute.xlu0 %5055  ;;  %v7468_v49 = vpack.c.bf16 %v5414_v56, %v5406_v5  ;;  %v7540_v26 = vpack.c.bf16 %v5032_v44, %v5025_v36  ;;  %v5434_v56 = vmul.f32 %v5066_v0, %v16794_v13  ;;  %v5136_v44 = vsel %vm1320_vm6, %v12780_v27, %v12858_v16  ;;  %v16797_v27 = vld [vmem:[#allocation20_spill] sm:$0xff] }
 0x3e9   : > { %v5072_v59 = vsel %vm1215_vm4, %v5054_v22, %v12977_v8  ;;  %v5165_v14 = vmul.f32 %v5136_v44, %v16796_v39 }
 0x3ea   : > { %5131 = vrot.lane.b32.xlu1 %v12794_v30, %s8221_s19  ;;  %v5102_v60 = vmul.f32 %v5072_v59, %v16793_v37  ;;  %v5442_v53 = vmul.f32 %v5072_v59, %v16794_v13  ;;  %7469 = vmatprep.subr.bf16.mxu0 %v7468_v49  ;;  %v5141_v59 = vsel %vm1320_vm6, %v12730_v58, %v12920_v42  ;;  %v16798_v13 = vld [vmem:[#allocation64_spill] sm:$0xff] }
 0x3eb   : > { %v12996_v7 = vpop.permute.xlu1 %4837  ;;  %7541 = vmatprep.subr.bf16.mxu1 %v7540_v26  ;;  %7471 = vmatpush1.bf16.msra.mxu0 %v7470_v45  ;;  %v7474_v37 = vpack.c.bf16 %v5441_v34, %v5433_v63  ;;  %v7546_v45 = vpack.c.bf16 %v5101_v19, %v5094_v47  ;;  %v5469_v54 = vmul.f32 %v5141_v59, %v16798_v13  ;;  %v16799_v47 = vld [vmem:[#allocation41_spill] sm:$0xff]  ;;  %v16800_v34 = vld [vmem:[#allocation18_spill] sm:$0xff] }
 0x3ec   : > { %5133 = vrot.lane.b32.xlu0 %v12941_v23, %s8221_s19  ;;  %v13002_v22 = vpop.permute.xlu0 %5125  ;;  %7543 = vmatpush1.bf16.msra.mxu1 %v7542_v32  ;;  %v7472_v58 = vpack.c.bf16 %v5442_v53, %v5434_v56  ;;  %v7544_v26 = vpack.c.bf16 %v5102_v60, %v5095_v40  ;;  %v5171_v32 = vmul.f32 %v5141_v59, %v16795_v9 }
 0x3ed   : > { %v5142_v5 = vsel %vm1320_vm6, %v12920_v42, %v13002_v22  ;;  %v5211_v60 = vsel %vm1425_vm8, %v12746_v10, %v12933_v15  ;;  %v5461_v63 = vmul.f32 %v5135_v50, %v16798_v13  ;;  %v5205_v19 = vsel %vm1425_vm8, %v12742_v1, %v12788_v43  ;;  %v13052_v1 = vld [vmem:[%s15161_s9] sm:$0xff] }
 0x3ee   : > { %v5172_v36 = vmul.f32 %v5142_v5, %v16796_v39  ;;  %v5470_v0 = vmul.f32 %v5142_v5, %v16797_v27  ;;  %5201 = vrot.lane.b32.xlu1 %v12794_v30, %s8224_s21  ;;  %v5462_v5 = vmul.f32 %v5136_v44, %v16797_v27  ;;  %7473 = vmatprep.subr.bf16.mxu0 %v7472_v58  ;;  %v16816_v39 = vld [vmem:[#allocation84_spill] sm:$0xff] }
 0x3ef   : > { %v13023_v49 = vpop.permute.xlu1 %4897  ;;  %7545 = vmatprep.subr.bf16.mxu1 %v7544_v26  ;;  %v5235_v53 = vmul.f32 %v5206_v11, %v16799_v47  ;;  %7475 = vmatpush1.bf16.msra.mxu0 %v7474_v37  ;;  %v5490_v40 = vmul.f32 %v5206_v11, %v16800_v34  ;;  %v7550_v43 = vpack.c.bf16 %v5171_v32, %v5164_v20  ;;  %v16801_v37 = vld [vmem:[#allocation44_spill] sm:$0xff]  ;;  %v13067_v32 = vld [vmem:[%s15161_s9 + $0x18] sm:$0xff] }
 0x3f0   : > { %5203 = vrot.lane.b32.xlu0 %v12941_v23, %s8224_s21  ;;  %v13029_v42 = vpop.permute.xlu0 %5195  ;;  %7547 = vmatpush1.bf16.msra.mxu1 %v7546_v45  ;;  %v7476_v10 = vpack.c.bf16 %v5470_v0, %v5462_v5  ;;  %v7548_v44 = vpack.c.bf16 %v5172_v36, %v5165_v14  ;;  %v5241_v59 = vmul.f32 %v5211_v60, %v16801_v37  ;;  %v16802_v36 = vld [vmem:[#allocation58_spill] sm:$0xff] }
 0x3f1   : > { %v5212_v56 = vsel %vm1425_vm8, %v12933_v15, %v13029_v42  ;;  %v7478_v14 = vpack.c.bf16 %v5469_v54, %v5461_v63  ;;  %v5497_v0 = vmul.f32 %v5211_v60, %v16802_v36  ;;  %v5234_v26 = vmul.f32 %v5205_v19, %v16801_v37 }
 0x3f2   : > { %5249 = vrot.lane.b32.xlu1 %v12893_v12, %s8216_s30  ;;  %v5242_v11 = vmul.f32 %v5212_v56, %v16799_v47  ;;  %v5498_v58 = vmul.f32 %v5212_v56, %v16800_v34  ;;  %7477 = vmatprep.subr.bf16.mxu0 %v7476_v10  ;;  %v5489_v5 = vmul.f32 %v5205_v19, %v16802_v36  ;;  %v16814_v34 = vld [vmem:[#allocation28_spill] sm:$0xff] }
 0x3f3   : > { %v13047_v50 = vpop.permute.xlu1 %4973  ;;  %7549 = vmatprep.subr.bf16.mxu1 %v7548_v44  ;;  %5716 = vmatmul.mubr.f32.vlgmr.msra.gmra.mrb[8].mxu0 %v13052_v1  ;;  %v7554_v60 = vpack.c.bf16 %v5241_v59, %v5234_v26  ;;  %v16806_v59 = vld [vmem:[#allocation51_spill] sm:$0xff] }
 0x3f4   : > { %5251 = vrot.lane.b32.xlu0 %v12964_v35, %s8216_s30  ;;  %v13059_v15 = vpop.permute.xlu0 %4731  ;;  %7551 = vmatpush1.bf16.msra.mxu1 %v7550_v43  ;;  %v7480_v20 = vpack.c.bf16 %v5498_v58, %v5490_v40  ;;  %v7552_v45 = vpack.c.bf16 %v5242_v11, %v5235_v53  ;;  %v7482_v53 = vpack.c.bf16 %v5497_v0, %v5489_v5  ;;  %v16811_v5 = vld [vmem:[#allocation23_spill] sm:$0xff] }
 0x3f5   : > { %7479 = vmatpush1.bf16.msra.mxu0 %v7478_v14  ;;  %7193 = vmatprep.mubr.msk.f32.mxu0 %vm5647_vm11, %v13067_v32  ;;  %v4651_v40 = vadd.f32 %v12623_v62, %v12493_v24  ;;  %v13101_v24 = vsel %vm635_vm1, %v16806_v59, %v12943_v51  ;;  %v13106_v62 = vsel %vm635_vm1, %v12943_v51, %v12901_v18  ;;  %v16808_v14 = vld [vmem:[#allocation65_spill] sm:$0xff] }
 0x3f6   : > { %5281 = vrot.lane.b32.xlu1 %v12893_v12, %s8217_s17  ;;  %7481 = vmatprep.subr.bf16.mxu0 %v7480_v20  ;;  %v16813_v59 = vld [vmem:[#allocation81_spill] sm:$0xff]  ;;  %v5267_v9 = vmul.f32 %v13101_v24, %v16814_v34 }
 0x3f7   : > { %v13072_v54 = vpop.permute.xlu1 %5043  ;;  %7553 = vmatprep.subr.bf16.mxu1 %v7552_v45  ;;  %v4684_v44 = vmul.f32 0.01, %v4651_v40  ;;  %vm4668_vm12 = vcmp.ge.f32.partialorder %v4651_v40, 0.0  ;;  %v16810_v45 = vld [vmem:[#allocation3_spill] sm:$0xff] }
 0x3f8   : > { %v13074_v63 = vpop.permute.xlu0 %4791  ;;  %5283 = vrot.lane.b32.xlu0 %v12964_v35, %s8217_s17  ;;  %7555 = vmatpush1.bf16.msra.mxu1 %v7554_v60  ;;  %v5268_v51 = vmul.f32 %v13106_v62, %v16810_v45  ;;  %v5509_v60 = vmul.f32 %v13101_v24, %v16811_v5 }
 0x3f9   : > { %16803 = vst [vmem:[#allocation240_spill] sm:$0xff] %v13074_v63  ;;  %7483 = vmatpush1.bf16.msra.mxu0 %v7482_v53  ;;  %v13110_v58 = vsel %vm4668_vm12, %v4651_v40, %v4684_v44  ;;  %v16812_v53 = vld [vmem:[#allocation76_spill] sm:$0xff] }
 0x3fa   : > { %5313 = vrot.lane.b32.xlu1 %v12893_v12, %s8219_s12  ;;  %16807 = vst [vmem:[#allocation51_spill] sm:$0xff] %v13110_v58  ;;  %v5510_v40 = vmul.f32 %v13106_v62, %v16812_v53 }
 0x3fb   : > { %v13082_v19 = vpop.permute.xlu1 %5113 }
 0x3fc   : > { %v13086_v56 = vpop.permute.xlu0 %4851  ;;  %5315 = vrot.lane.b32.xlu0 %v12964_v35, %s8219_s12 }
 0x3fd   : > { %16804 = vst [vmem:[#allocation241_spill] sm:$0xff] %v13086_v56 }
 0x3fe   : > { %5345 = vrot.lane.b32.xlu1 %v12893_v12, %s8222_s20 }
 0x3ff   : > { %v13092_v10 = vpop.permute.xlu1 %5183 }
 0x400   : > { %v13094_v43 = vpop.permute.xlu0 %4911  ;;  %5347 = vrot.lane.b32.xlu0 %v12964_v35, %s8222_s20 }
 0x401   : > { %16805 = vst [vmem:[#allocation242_spill] sm:$0xff] %v13094_v43 }
 0x402   : > { %5253 = vrot.lane.b32.xlu1 %v12941_v23, %s8216_s30 }
 0x403   : > { %v4730_v11 = vpop.permute.xlu1 %4729 }
 0x404   : > { %v13114_v0 = vsel %vm635_vm1, %v16808_v14, %v4730_v11  ;;  %v13118_v26 = vsel %vm635_vm1, %v4730_v11, %v13059_v15  ;;  %v13120_v20 = vpop.permute.xlu0 %4975  ;;  %5255 = vrot.lane.b32.xlu0 %v13110_v58, %s8216_s30  ;;  %v13135_v11 = vsel %vm721_vm3, %v16813_v59, %v12969_v4  ;;  %v13140_v14 = vsel %vm721_vm3, %v12969_v4, %v12911_v3 }
 0x405   : > { %16809 = vst [vmem:[#allocation65_spill] sm:$0xff] %v13120_v20  ;;  %v5276_v44 = vmul.f32 %v13118_v26, %v16810_v45  ;;  %v5516_v37 = vmul.f32 %v13114_v0, %v16811_v5  ;;  %v5517_v47 = vmul.f32 %v13118_v26, %v16812_v53  ;;  %v5275_v27 = vmul.f32 %v13114_v0, %v16814_v34  ;;  %v16819_v34 = vld [vmem:[#allocation85_spill] sm:$0xff] }
 0x406   : > { %5285 = vrot.lane.b32.xlu1 %v12941_v23, %s8217_s17  ;;  %v5299_v29 = vmul.f32 %v13135_v11, %v16816_v39 }
 0x407   : > { %v4790_v45 = vpop.permute.xlu1 %4789  ;;  %v7556_v59 = vpack.c.bf16 %v5276_v44, %v5268_v51  ;;  %v7484_v13 = vpack.c.bf16 %v5517_v47, %v5510_v40  ;;  %v7486_v53 = vpack.c.bf16 %v5516_v37, %v5509_v60  ;;  %v5300_v51 = vmul.f32 %v13140_v14, %v16817_v17  ;;  %v16818_v44 = vld [vmem:[#allocation88_spill] sm:$0xff] }
 0x408   : > { %v13152_v36 = vsel %vm721_vm3, %v12772_v46, %v4790_v45  ;;  %v13156_v4 = vsel %vm721_vm3, %v4790_v45, %v13074_v63  ;;  %v13158_v5 = vpop.permute.xlu0 %5045  ;;  %v5528_v46 = vmul.f32 %v13140_v14, %v16818_v44  ;;  %5287 = vrot.lane.b32.xlu0 %v13110_v58, %s8217_s17  ;;  %v13173_v47 = vsel %vm830_vm5, %v12678_v25, %v12996_v7  ;;  %v16832_v63 = vld [vmem:[#allocation12_spill] sm:$0xff] }
 0x409   : > { %16815 = vst [vmem:[#allocation81_spill] sm:$0xff] %v13158_v5  ;;  %v13178_v37 = vsel %vm830_vm5, %v12996_v7, %v12927_v57  ;;  %v5535_v45 = vmul.f32 %v13156_v4, %v16818_v44  ;;  %7485 = vmatprep.subr.bf16.mxu0 %v7484_v13  ;;  %7557 = vmatprep.subr.bf16.mxu1 %v7556_v59 }
 0x40a   : > { %v5307_v60 = vmul.f32 %v13152_v36, %v16816_v39  ;;  %v5308_v40 = vmul.f32 %v13156_v4, %v16817_v17  ;;  %v5534_v25 = vmul.f32 %v13152_v36, %v16819_v34  ;;  %5317 = vrot.lane.b32.xlu1 %v12941_v23, %s8219_s12  ;;  %7487 = vmatpush1.bf16.msra.mxu0 %v7486_v53  ;;  %v16822_v53 = vld [vmem:[#allocation93_spill] sm:$0xff] }
 0x40b   : > { %v4850_v7 = vpop.permute.xlu1 %4849  ;;  %v7558_v48 = vpack.c.bf16 %v5275_v27, %v5267_v9  ;;  %v7488_v39 = vpack.c.bf16 %v5535_v45, %v5528_v46  ;;  %v5527_v17 = vmul.f32 %v13135_v11, %v16819_v34  ;;  %v5331_v12 = vmul.f32 %v13173_v47, %v16821_v6  ;;  %v16823_v27 = vld [vmem:[#allocation91_spill] sm:$0xff] }
 0x40c   : > { %v13192_v44 = vsel %vm830_vm5, %v12782_v33, %v4850_v7  ;;  %v13196_v13 = vsel %vm830_vm5, %v4850_v7, %v13086_v56  ;;  %v13198_v59 = vpop.permute.xlu0 %5115  ;;  %v5332_v9 = vmul.f32 %v13178_v37, %v16822_v53  ;;  %v5545_v33 = vmul.f32 %v13173_v47, %v16823_v27  ;;  %5319 = vrot.lane.b32.xlu0 %v13110_v58, %s8219_s12  ;;  %v16824_v7 = vld [vmem:[#allocation94_spill] sm:$0xff] }
 0x40d   : > { %16820 = vst [vmem:[#allocation243_spill] sm:$0xff] %v13198_v59  ;;  %v5546_v61 = vmul.f32 %v13178_v37, %v16824_v7  ;;  %v13215_v46 = vsel %vm931_vm7, %v13023_v49, %v12937_v28  ;;  %7559 = vmatpush1.bf16.msra.mxu1 %v7558_v48  ;;  %v5339_v45 = vmul.f32 %v13192_v44, %v16821_v6 }
 0x40e   : > { %16825 = vst [vmem:[#allocation244_spill] sm:$0xff] %v13215_v46  ;;  %7489 = vmatprep.subr.bf16.mxu0 %v7488_v39  ;;  %v5340_v34 = vmul.f32 %v13196_v13, %v16822_v53  ;;  %v5552_v2 = vmul.f32 %v13192_v44, %v16823_v27  ;;  %v5553_v30 = vmul.f32 %v13196_v13, %v16824_v7 }
 0x40f   : > { %v7560_v56 = vpack.c.bf16 %v5308_v40, %v5300_v51  ;;  %5349 = vrot.lane.b32.xlu1 %v12941_v23, %s8222_s20  ;;  %v4910_v28 = vpop.permute.xlu1 %4909  ;;  %v7490_v57 = vpack.c.bf16 %v5534_v25, %v5527_v17  ;;  %v7562_v48 = vpack.c.bf16 %v5307_v60, %v5299_v29  ;;  %v13240_v51 = vsel %vm931_vm7, %v12686_v21, %v13023_v49  ;;  %v16827_v40 = vld [vmem:[#allocation99_spill] sm:$0xff]  ;;  %v16828_v17 = vld [vmem:[#allocation100_spill] sm:$0xff]  ;;  %v16830_v49 = vld [vmem:[#allocation97_spill] sm:$0xff] }
 0x410   : > { %v13229_v6 = vsel %vm931_vm7, %v12792_v41, %v4910_v28  ;;  %v13233_v39 = vsel %vm931_vm7, %v4910_v28, %v13094_v43  ;;  %v13235_v53 = vpop.permute.xlu0 %5185  ;;  %v5364_v27 = vmul.f32 %v13215_v46, %v16827_v40  ;;  %v5564_v29 = vmul.f32 %v13215_v46, %v16828_v17  ;;  %5351 = vrot.lane.b32.xlu0 %v13110_v58, %s8222_s20  ;;  %v16829_v41 = vld [vmem:[#allocation96_spill] sm:$0xff] }
 0x411   : > { %16826 = vst [vmem:[#allocation245_spill] sm:$0xff] %v13235_v53  ;;  %7561 = vmatprep.subr.bf16.mxu1 %v7560_v56  ;;  %7491 = vmatpush1.bf16.msra.mxu0 %v7490_v57  ;;  %v5371_v28 = vmul.f32 %v13229_v6, %v16829_v41  ;;  %v5372_v60 = vmul.f32 %v13233_v39, %v16827_v40  ;;  %v16831_v40 = vld [vmem:[#allocation111_spill] sm:$0xff] }
 0x412   : > { %7563 = vmatpush1.bf16.msra.mxu1 %v7562_v48  ;;  %v5571_v21 = vmul.f32 %v13233_v39, %v16828_v17  ;;  %v5570_v25 = vmul.f32 %v13229_v6, %v16830_v49  ;;  %v7492_v7 = vpack.c.bf16 %v5553_v30, %v5546_v61  ;;  %v7564_v23 = vpack.c.bf16 %v5340_v34, %v5332_v9 }
 0x413   : > { %5393 = vrot.lane.b32.xlu1 %v12964_v35, %s8215_s29  ;;  %v7494_v56 = vpack.c.bf16 %v5552_v2, %v5545_v33  ;;  %v4988_v57 = vpop.permute.xlu1 %4987  ;;  %v5363_v48 = vmul.f32 %v13240_v51, %v16829_v41  ;;  %v7566_v43 = vpack.c.bf16 %v5339_v45, %v5331_v12  ;;  %v5584_v46 = vmul.f32 %v16832_v63, %v16831_v40  ;;  %v16833_v2 = vld [vmem:[#allocation105_spill] sm:$0xff]  ;;  %v16834_v45 = vld [vmem:[#allocation52_spill] sm:$0xff] }
 0x414   : > { %v13260_v3 = vpop.permute.xlu0 %4723  ;;  %v5563_v17 = vmul.f32 %v13240_v51, %v16830_v49  ;;  %7493 = vmatprep.subr.bf16.mxu0 %v7492_v7  ;;  %7565 = vmatprep.subr.bf16.mxu1 %v7564_v23  ;;  %v7496_v61 = vpack.c.bf16 %v5571_v21, %v5564_v29  ;;  %v7568_v30 = vpack.c.bf16 %v5372_v60, %v5364_v27  ;;  %v16836_v27 = vld [vmem:[#allocation112_spill] sm:$0xff]  ;;  %v16837_v7 = vld [vmem:[#allocation37_spill] sm:$0xff]  ;;  %v16838_v60 = vld [vmem:[#allocation106_spill] sm:$0xff] }
 0x415   : > { %7495 = vmatpush1.bf16.msra.mxu0 %v7494_v56  ;;  %v5388_v34 = vmul.f32 %v16832_v63, %v16833_v2  ;;  %5395 = vrot.lane.b32.xlu0 %v13110_v58, %s8215_s29  ;;  %v7570_v9 = vpack.c.bf16 %v5371_v28, %v5363_v48  ;;  %v5578_v41 = vmul.f32 %v16834_v45, %v16831_v40  ;;  %v16851_v40 = vld [vmem:[#allocation104_spill] sm:$0xff] }
 0x416   : > { %7567 = vmatpush1.bf16.msra.mxu1 %v7566_v43  ;;  %7497 = vmatprep.subr.bf16.mxu0 %v7496_v61  ;;  %v7498_v12 = vpack.c.bf16 %v5570_v25, %v5563_v17  ;;  %v5380_v23 = vmul.f32 %v16834_v45, %v16833_v2  ;;  %v5583_v29 = vmul.f32 %v16837_v7, %v16836_v27  ;;  %v16839_v25 = vld [vmem:[#allocation25_spill] sm:$0xff] }
 0x417   : > { %v5058_v33 = vpop.permute.xlu1 %5057  ;;  %7569 = vmatprep.subr.bf16.mxu1 %v7568_v30  ;;  %5421 = vrot.lane.b32.xlu1 %v12964_v35, %s8218_s18  ;;  %v5387_v17 = vmul.f32 %v16837_v7, %v16838_v60  ;;  %v7500_v28 = vpack.c.bf16 %v5584_v46, %v5578_v41  ;;  %v5577_v56 = vmul.f32 %v16839_v25, %v16836_v27 }
 0x418   : > { %v13276_v43 = vpop.permute.xlu0 %4783  ;;  %v7572_v21 = vpack.c.bf16 %v5388_v34, %v5380_v23  ;;  %v5379_v48 = vmul.f32 %v16839_v25, %v16838_v60 }
 0x419   : > { %16835 = vst [vmem:[#allocation12_spill] sm:$0xff] %v13276_v43  ;;  %7499 = vmatpush1.bf16.msra.mxu0 %v7498_v12  ;;  %5423 = vrot.lane.b32.xlu0 %v13110_v58, %s8218_s18  ;;  %v7502_v30 = vpack.c.bf16 %v5583_v29, %v5577_v56 }
 0x41a   : > { %7571 = vmatpush1.bf16.msra.mxu1 %v7570_v9  ;;  %7501 = vmatprep.subr.bf16.mxu0 %v7500_v28  ;;  %v7574_v46 = vpack.c.bf16 %v5387_v17, %v5379_v48  ;;  %v5641_v9 = vld [vmem:[%s15162_s10] sm:$0xff]  ;;  %v13312_v17 = vsel %vm1110_vm2, %v13047_v50, %v13120_v20  ;;  %v13316_v28 = vsel %vm1110_vm2, %v12949_v38, %v4988_v57  ;;  %v16847_v48 = vld [vmem:[#allocation108_spill] sm:$0xff] }
 0x41b   : > { %v5128_v61 = vpop.permute.xlu1 %5127  ;;  %7573 = vmatprep.subr.bf16.mxu1 %v7572_v21  ;;  %5449 = vrot.lane.b32.xlu1 %v12964_v35, %s8221_s19  ;;  %16843 = vst [vmem:[#allocation246_spill] sm:$0xff] %v13312_v17  ;;  %16844 = vst [vmem:[#allocation247_spill] sm:$0xff] %v13316_v28  ;;  %v13321_v21 = vsel %vm1110_vm2, %v12817_v55, %v13047_v50  ;;  %v13336_v38 = vsel %vm1215_vm4, %v12837_v31, %v13072_v54  ;;  %v16850_v50 = vld [vmem:[#allocation103_spill] sm:$0xff] }
 0x41c   : > { %v13290_v41 = vpop.permute.xlu0 %4843  ;;  %16845 = vst [vmem:[#allocation248_spill] sm:$0xff] %v13321_v21  ;;  %16849 = vst [vmem:[#allocation250_spill] sm:$0xff] %v13336_v38  ;;  %v5595_v60 = vmul.f32 %v13316_v28, %v16851_v40  ;;  %v5407_v49 = vmul.f32 %v13321_v21, %v16850_v50  ;;  %v5408_v31 = vmul.f32 %v13312_v17, %v16847_v48 }
 0x41d   : > { %16840 = vst [vmem:[#allocation52_spill] sm:$0xff] %v13290_v41  ;;  %7503 = vmatpush1.bf16.msra.mxu0 %v7502_v30  ;;  %5451 = vrot.lane.b32.xlu0 %v13110_v58, %s8221_s19  ;;  %v13364_v20 = vsel %vm1215_vm4, %v13072_v54, %v13158_v5  ;;  %v16856_v5 = vld [vmem:[#allocation116_spill] sm:$0xff] }
 0x41e   : > { %7575 = vmatpush1.bf16.msra.mxu1 %v7574_v46  ;;  %v16848_v46 = vld [vmem:[#allocation109_spill] sm:$0xff] }
 0x41f   : > { %v13294_v34 = vpop.permute.xlu1 %5197  ;;  %5477 = vrot.lane.b32.xlu1 %v12964_v35, %s8224_s21  ;;  %v5590_v55 = vmul.f32 %v13312_v17, %v16848_v46  ;;  %v13359_v35 = vsel %vm1320_vm6, %v12858_v16, %v13082_v19 }
 0x420   : > { %v13298_v12 = vpop.permute.xlu0 %4903 }
 0x421   : > { %16841 = vst [vmem:[#allocation37_spill] sm:$0xff] %v13298_v12  ;;  %5479 = vrot.lane.b32.xlu0 %v13110_v58, %s8224_s21  ;;  %v5589_v58 = vmul.f32 %v13321_v21, %v16851_v40  ;;  %v16855_v12 = vld [vmem:[#allocation117_spill] sm:$0xff] }
 0x422   : > { %v5602_v41 = vmul.f32 %v13364_v20, %v16855_v12 }
 0x423   : > { %v13305_v23 = vpop.permute.xlu1 %4721  ;;  %5644 = vperm.xlu1 %8139, %v5641_v9  }
 0x424   : > { %v13307_v29 = vpop.permute.xlu0 %4989 }
 0x425   : > { %16842 = vst [vmem:[#allocation25_spill] sm:$0xff] %v13307_v29  ;;  %v13325_v56 = vsel %vm1110_vm2, %v4988_v57, %v13307_v29  ;;  %v5415_v57 = vmul.f32 %v13316_v28, %v16850_v50 }
 0x426   : > { %16846 = vst [vmem:[#allocation249_spill] sm:$0xff] %v13325_v56  ;;  %v5416_v30 = vmul.f32 %v13325_v56, %v16847_v48  ;;  %v5596_v9 = vmul.f32 %v13325_v56, %v16848_v46  ;;  %v13354_v46 = vsel %vm1215_vm4, %v12977_v8, %v5058_v33  ;;  %v16853_v48 = vld [vmem:[#allocation113_spill] sm:$0xff]  ;;  %v16854_v8 = vld [vmem:[#allocation114_spill] sm:$0xff]  ;;  %v16858_v56 = vld [vmem:[#allocation119_spill] sm:$0xff] }
 0x427   : > { %v13331_v27 = vpop.permute.xlu1 %4781  ;;  %v5435_v29 = vmul.f32 %v13336_v38, %v16853_v48  ;;  %v5601_v21 = vmul.f32 %v13336_v38, %v16854_v8  ;;  %v5607_v54 = vmul.f32 %v13354_v46, %v16854_v8  ;;  %v5463_v38 = vmul.f32 %v13359_v35, %v16858_v56 }
 0x428   : > { %v13344_v2 = vpop.permute.xlu0 %5059  ;;  %v7504_v40 = vpack.c.bf16 %v5596_v9, %v5590_v55  ;;  %v7576_v28 = vpack.c.bf16 %v5416_v30, %v5408_v31  ;;  %v7506_v9 = vpack.c.bf16 %v5595_v60, %v5589_v58  ;;  %v7578_v55 = vpack.c.bf16 %v5415_v57, %v5407_v49  ;;  %v16859_v60 = vld [vmem:[#allocation120_spill] sm:$0xff] }
 0x429   : > { %16852 = vst [vmem:[#allocation251_spill] sm:$0xff] %v13344_v2  ;;  %v13368_v50 = vsel %vm1215_vm4, %v5058_v33, %v13344_v2  ;;  %v5443_v30 = vmul.f32 %v13354_v46, %v16853_v48  ;;  %v13392_v31 = vsel %vm1320_vm6, %v13002_v22, %v5128_v61  ;;  %v5436_v58 = vmul.f32 %v13364_v20, %v16856_v5 }
 0x42a   : > { %v5608_v16 = vmul.f32 %v13368_v50, %v16855_v12  ;;  %v5444_v33 = vmul.f32 %v13368_v50, %v16856_v5  ;;  %7505 = vmatprep.subr.bf16.mxu0 %v7504_v40  ;;  %7577 = vmatprep.subr.bf16.mxu1 %v7576_v28  ;;  %v13399_v40 = vsel %vm1320_vm6, %v13082_v19, %v13198_v59  ;;  %v16860_v28 = vld [vmem:[#allocation124_spill] sm:$0xff] }
 0x42b   : > { %v13376_v17 = vpop.permute.xlu1 %4841  ;;  %7507 = vmatpush1.bf16.msra.mxu0 %v7506_v9  ;;  %7579 = vmatpush1.bf16.msra.mxu1 %v7578_v55  ;;  %v5613_v57 = vmul.f32 %v13359_v35, %v16859_v60  ;;  %v13410_v22 = vsel %vm1425_vm8, %v13092_v10, %v13235_v53  ;;  %v5619_v9 = vmul.f32 %v13392_v31, %v16859_v60  ;;  %v16861_v55 = vld [vmem:[#allocation122_spill] sm:$0xff] }
 0x42c   : > { %v13382_v2 = vpop.permute.xlu0 %5129  ;;  %v7508_v5 = vpack.c.bf16 %v5608_v16, %v5602_v41  ;;  %v7580_v48 = vpack.c.bf16 %v5444_v33, %v5436_v58  ;;  %v7510_v8 = vpack.c.bf16 %v5607_v54, %v5601_v21  ;;  %v13425_v53 = vsel %vm1425_vm8, %v12879_v52, %v13092_v10  ;;  %v16863_v10 = vld [vmem:[#allocation133_spill] sm:$0xff] }
 0x42d   : > { %16857 = vst [vmem:[#allocation252_spill] sm:$0xff] %v13382_v2  ;;  %v13403_v49 = vsel %vm1320_vm6, %v5128_v61, %v13382_v2  ;;  %v5614_v41 = vmul.f32 %v13399_v40, %v16860_v28  ;;  %v13432_v16 = vsel %vm1425_vm8, %v13029_v42, %v13294_v34  ;;  %v7582_v60 = vpack.c.bf16 %v5443_v30, %v5435_v29  ;;  %v16864_v42 = vld [vmem:[#allocation128_spill] sm:$0xff] }
 0x42e   : > { %v5620_v12 = vmul.f32 %v13403_v49, %v16860_v28  ;;  %v5472_v61 = vmul.f32 %v13403_v49, %v16861_v55  ;;  %7509 = vmatprep.subr.bf16.mxu0 %v7508_v5  ;;  %v5464_v21 = vmul.f32 %v13399_v40, %v16861_v55  ;;  %v5471_v54 = vmul.f32 %v13392_v31, %v16858_v56 }
 0x42f   : > { %v13414_v19 = vpop.permute.xlu1 %4901  ;;  %7581 = vmatprep.subr.bf16.mxu1 %v7580_v48  ;;  %7511 = vmatpush1.bf16.msra.mxu0 %v7510_v8  ;;  %v5626_v33 = vmul.f32 %v13410_v22, %v16863_v10  ;;  %v5492_v48 = vmul.f32 %v13410_v22, %v16864_v42  ;;  %v16866_v8 = vld [vmem:[#allocation138_spill] sm:$0xff]  ;;  %v7514_v28 = vpack.c.bf16 %v5619_v9, %v5613_v57 }
 0x430   : > { %v13420_v59 = vpop.permute.xlu0 %5199  ;;  %7583 = vmatpush1.bf16.msra.mxu1 %v7582_v60  ;;  %v7512_v30 = vpack.c.bf16 %v5620_v12, %v5614_v41  ;;  %v7584_v55 = vpack.c.bf16 %v5472_v61, %v5464_v21  ;;  %v5625_v60 = vmul.f32 %v13425_v53, %v16866_v8  ;;  %v16868_v41 = vld [vmem:[#allocation126_spill] sm:$0xff] }
 0x431   : > { %16862 = vst [vmem:[#allocation253_spill] sm:$0xff] %v13420_v59  ;;  %v13441_v52 = vsel %vm1425_vm8, %v13294_v34, %v13420_v59  ;;  %v5631_v34 = vmul.f32 %v13432_v16, %v16866_v8  ;;  %v16867_v59 = vld [vmem:[#allocation19_spill] sm:$0xff]  ;;  %v16869_v61 = vld [vmem:[#allocation22_spill] sm:$0xff]  ;;  %v16897_v8 = vld [vmem:[#allocation237_spill] sm:$0xff] }
 0x432   : > { %v5500_v5 = vmul.f32 %v13441_v52, %v16864_v42  ;;  %v5632_v29 = vmul.f32 %v13441_v52, %v16863_v10  ;;  %v4770_v2 = vmul.f32 %v13118_v26, %v16867_v59  ;;  %7513 = vmatprep.subr.bf16.mxu0 %v7512_v30  ;;  %v5499_v10 = vmul.f32 %v13432_v16, %v16868_v41 }
 0x433   : > { %v13449_v58 = vpop.permute.xlu1 %4977  ;;  %7585 = vmatprep.subr.bf16.mxu1 %v7584_v55  ;;  %7515 = vmatpush1.bf16.msra.mxu0 %v7514_v28  ;;  %v7586_v42 = vpack.c.bf16 %v5471_v54, %v5463_v38  ;;  %v4764_v57 = vmul.f32 %v13106_v62, %v16867_v59  ;;  %v5491_v26 = vmul.f32 %v13425_v53, %v16868_v41  ;;  %v16870_v38 = vld [vmem:[#allocation86_spill] sm:$0xff] }
 0x434   : > { %16865 = vst [vmem:[#allocation254_spill] sm:$0xff] %v13449_v58  ;;  %v13455_v56 = vpop.permute.xlu0 %4735  ;;  %v7516_v12 = vpack.c.bf16 %v5632_v29, %v5626_v33  ;;  %v7588_v58 = vpack.c.bf16 %v5500_v5, %v5492_v48  ;;  %5858 = vmatmul.mubr.f32.vlgmr.msra.gmra.mrb[8].mxu1 %v13052_v1  ;;  %v4769_v21 = vmul.f32 %v13114_v0, %v16869_v61  ;;  %v13483_v0 = vld [vmem:[%s15161_s9 + $0x10] sm:$0xff]  ;;  %v16871_v5 = vld [vmem:[#allocation83_spill] sm:$0xff] }
 0x435   : > { %7587 = vmatpush1.bf16.msra.mxu1 %v7586_v42  ;;  %v7518_v33 = vpack.c.bf16 %v5631_v34, %v5625_v60  ;;  %7194 = vmatprep.mubr.msk.f32.mxu1 %vm5647_vm11, %v13067_v32  ;;  %v4830_v62 = vmul.f32 %v13156_v4, %v16870_v38  ;;  %v7628_v1 = vpack.c.bf16 %v4770_v2, %v4764_v57  ;;  %v16872_v29 = vld [vmem:[#allocation92_spill] sm:$0xff]  ;;  %v16875_v57 = vld [vmem:[#allocation98_spill] sm:$0xff] }
 0x436   : > { %7517 = vmatprep.subr.bf16.mxu0 %v7516_v12  ;;  %7589 = vmatprep.subr.bf16.mxu1 %v7588_v58  ;;  %v4763_v28 = vmul.f32 %v13101_v24, %v16869_v61  ;;  %v7590_v54 = vpack.c.bf16 %v5499_v10, %v5491_v26  ;;  %v4824_v42 = vmul.f32 %v13140_v14, %v16870_v38  ;;  %v13501_v14 = vld [vmem:[%s15161_s9 + $0x8] sm:$0xff]  ;;  %v16898_v38 = vld [vmem:[#allocation102_spill] sm:$0xff] }
 0x437   : > { %v13466_v9 = vpop.permute.xlu1 %5047  ;;  %7519 = vmatpush1.bf16.msra.mxu0 %v7518_v33  ;;  %v4829_v4 = vmul.f32 %v13152_v36, %v16871_v5  ;;  %v4890_v24 = vmul.f32 %v13196_v13, %v16872_v29  ;;  %v4823_v30 = vmul.f32 %v13135_v11, %v16871_v5  ;;  %v4884_v36 = vmul.f32 %v13178_v37, %v16872_v29  ;;  %v16874_v13 = vld [vmem:[#allocation89_spill] sm:$0xff]  ;;  %v16900_v5 = vld [vmem:[#allocation115_spill] sm:$0xff] }
 0x438   : > { %v13472_v55 = vpop.permute.xlu0 %4795  ;;  %7629 = vmatprep.subr.bf16.mxu0 %v7628_v1  ;;  %v7630_v2 = vpack.c.bf16 %v4769_v21, %v4763_v28  ;;  %v7632_v10 = vpack.c.bf16 %v4830_v62, %v4824_v42  ;;  %v4889_v48 = vmul.f32 %v13192_v44, %v16874_v13  ;;  %v13511_v11 = vsel %vm635_vm1, %v12901_v18, %v13305_v23  ;;  %v16877_v62 = vld [vmem:[#allocation132_spill] sm:$0xff] }
 0x439   : > { %7591 = vmatpush1.bf16.msra.mxu1 %v7590_v54  ;;  %v13516_v34 = vsel %vm635_vm1, %v13305_v23, %v13260_v3  ;;  %v7634_v44 = vpack.c.bf16 %v4829_v4, %v4823_v30  ;;  %v4883_v18 = vmul.f32 %v13173_v47, %v16874_v13  ;;  %v4950_v26 = vmul.f32 %v13233_v39, %v16875_v57  ;;  %v16876_v23 = vld [vmem:[#allocation146_spill] sm:$0xff]  ;;  %v16880_v39 = vld [vmem:[#allocation244_spill] sm:$0xff]  ;;  %v16891_v13 = vld [vmem:[#allocation107_spill] sm:$0xff] }
 0x43a   : > { %5787 = vmatmul.mubr.f32.vlgmr.msra.gmra.mrb[8].mxu0 %v13483_v0  ;;  %v7636_v21 = vpack.c.bf16 %v4890_v24, %v4884_v36  ;;  %v4956_v33 = vmul.f32 %v16834_v45, %v16876_v23  ;;  %v5511_v1 = vmul.f32 %v13511_v11, %v16877_v62  ;;  %v4944_v4 = vmul.f32 %v16880_v39, %v16875_v57  ;;  %v16882_v36 = vld [vmem:[#allocation240_spill] sm:$0xff] }
 0x43b   : > { %v13487_v32 = vpop.permute.xlu1 %5117  ;;  %7631 = vmatpush1.bf16.msra.mxu0 %v7630_v2  ;;  %5999 = vmatprep.mubr.f32.mxu0 %v13501_v14  ;;  %v16881_v2 = vld [vmem:[#allocation95_spill] sm:$0xff]  ;;  %v4962_v30 = vmul.f32 %v16832_v63, %v16876_v23  ;;  %v13617_v61 = vsel %vm931_vm7, %v16897_v8, %v13414_v19 }
 0x43c   : > { %7633 = vmatprep.subr.bf16.mxu0 %v7632_v10  ;;  %v4949_v45 = vmul.f32 %v13229_v6, %v16881_v2  ;;  %v7638_v10 = vpack.c.bf16 %v4889_v48, %v4883_v18  ;;  %v13559_v6 = vsel %vm721_vm3, %v13331_v27, %v13276_v43  ;;  %v16883_v48 = vld [vmem:[#allocation155_spill] sm:$0xff]  ;;  %v4943_v39 = vmul.f32 %v13240_v51, %v16881_v2  ;;  %v16892_v2 = vld [vmem:[#allocation249_spill] sm:$0xff]  ;;  %v16947_v43 = vld [vmem:[#allocation192_spill] sm:$0xff] }
 0x43d   : > { %v13496_v58 = vpop.permute.xlu0 %4855  ;;  %v4955_v18 = vmul.f32 %v16839_v25, %v16883_v48  ;;  %v4961_v63 = vmul.f32 %v16837_v7, %v16883_v48  ;;  %v16888_v7 = vld [vmem:[#allocation141_spill] sm:$0xff]  ;;  %v5034_v29 = vmul.f32 %v16892_v2, %v16891_v13 }
 0x43e   : > { %16873 = vst [vmem:[#allocation255_spill] sm:$0xff] %v13496_v58  ;;  %v7642_v23 = vpack.c.bf16 %v4949_v45, %v4943_v39 }
 0x43f   : > { %v4734_v60 = vpop.permute.xlu1 %4733  ;;  %7635 = vmatpush1.bf16.msra.mxu0 %v7634_v44  ;;  %v7646_v39 = vpack.c.bf16 %v4961_v63, %v4955_v18  ;;  %v16901_v18 = vld [vmem:[#allocation37_spill] sm:$0xff] }
 0x440   : > { %v13520_v12 = vsel %vm635_vm1, %v13059_v15, %v4734_v60  ;;  %v13524_v37 = vsel %vm635_vm1, %v4734_v60, %v13455_v56  ;;  %v16878_v15 = vld [vmem:[#allocation137_spill] sm:$0xff]  ;;  %7637 = vmatprep.subr.bf16.mxu0 %v7636_v21  ;;  %v7640_v21 = vpack.c.bf16 %v4950_v26, %v4944_v4  ;;  %v16887_v26 = vld [vmem:[#allocation52_spill] sm:$0xff]  ;;  %v13626_v63 = vsel %vm931_vm7, %v13414_v19, %v16901_v18 }
 0x441   : > { %v5512_v28 = vmul.f32 %v13516_v34, %v16878_v15  ;;  %v5518_v54 = vmul.f32 %v13520_v12, %v16877_v62  ;;  %v5519_v42 = vmul.f32 %v13524_v37, %v16878_v15  ;;  %v13540_v47 = vpop.permute.xlu0 %4915  ;;  %v13579_v25 = vsel %vm830_vm5, %v13376_v17, %v16887_v26  ;;  %v16946_v26 = vld [vmem:[#allocation157_spill] sm:$0xff] }
 0x442   : > { %16879 = vst [vmem:[#allocation256_spill] sm:$0xff] %v13540_v47  ;;  %v5097_v19 = vmul.f32 %v13364_v20, %v16900_v5 }
 0x443   : > { %v4794_v24 = vpop.permute.xlu1 %4793  ;;  %v7592_v62 = vpack.c.bf16 %v5519_v42, %v5512_v28  ;;  %v7594_v15 = vpack.c.bf16 %v5518_v54, %v5511_v1  ;;  %v16885_v1 = vld [vmem:[#allocation144_spill] sm:$0xff]  ;;  %7639 = vmatpush1.bf16.msra.mxu0 %v7638_v10 }
 0x444   : > { %v13550_v60 = vsel %vm721_vm3, %v16882_v36, %v4794_v24  ;;  %v13554_v44 = vsel %vm721_vm3, %v4794_v24, %v13472_v55  ;;  %v16884_v24 = vld [vmem:[#allocation235_spill] sm:$0xff]  ;;  %7641 = vmatprep.subr.bf16.mxu0 %v7640_v21  ;;  %v5530_v36 = vmul.f32 %v13559_v6, %v16885_v1  ;;  %v16889_v10 = vld [vmem:[#allocation236_spill] sm:$0xff] }
 0x445   : > { %v13570_v28 = vsel %vm721_vm3, %v16884_v24, %v13331_v27  ;;  %v5537_v54 = vmul.f32 %v13554_v44, %v16885_v1  ;;  %7593 = vmatprep.subr.bf16.mxu1 %v7592_v62  ;;  %v5536_v51 = vmul.f32 %v13550_v60, %v16888_v7  ;;  %v7644_v27 = vpack.c.bf16 %v4962_v30, %v4956_v33  ;;  %v16890_v62 = vld [vmem:[#allocation241_spill] sm:$0xff]  ;;  %v16893_v30 = vld [vmem:[#allocation148_spill] sm:$0xff]  ;;  %v16896_v1 = vld [vmem:[#allocation246_spill] sm:$0xff] }
 0x446   : > { %v13574_v42 = vpop.permute.xlu0 %4979  ;;  %7595 = vmatpush1.bf16.msra.mxu1 %v7594_v15  ;;  %v13588_v24 = vsel %vm830_vm5, %v16889_v10, %v13376_v17  ;;  %v5529_v15 = vmul.f32 %v13570_v28, %v16888_v7  ;;  %v16894_v17 = vld [vmem:[#allocation151_spill] sm:$0xff]  ;;  %v5027_v7 = vmul.f32 %v16896_v1, %v16891_v13  ;;  %v16902_v13 = vld [vmem:[#allocation242_spill] sm:$0xff] }
 0x447   : > { %16886 = vst [vmem:[#allocation244_spill] sm:$0xff] %v13574_v42  ;;  %v4854_v4 = vpop.permute.xlu1 %4853  ;;  %v5548_v10 = vmul.f32 %v13579_v25, %v16894_v17  ;;  %7643 = vmatpush1.bf16.msra.mxu0 %v7642_v23  ;;  %v7596_v2 = vpack.c.bf16 %v5537_v54, %v5530_v36  ;;  %v5104_v54 = vmul.f32 %v13368_v50, %v16900_v5  ;;  %v16903_v50 = vld [vmem:[#allocation248_spill] sm:$0xff] }
 0x448   : > { %v13592_v48 = vsel %vm830_vm5, %v16890_v62, %v4854_v4  ;;  %v13600_v33 = vsel %vm830_vm5, %v4854_v4, %v13496_v58  ;;  %v5547_v4 = vmul.f32 %v13588_v24, %v16893_v30  ;;  %7645 = vmatprep.subr.bf16.mxu0 %v7644_v27  ;;  %v7598_v57 = vpack.c.bf16 %v5536_v51, %v5529_v15 }
 0x449   : > { %v5554_v21 = vmul.f32 %v13592_v48, %v16893_v30  ;;  %v5555_v62 = vmul.f32 %v13600_v33, %v16894_v17  ;;  %v16899_v17 = vld [vmem:[#allocation247_spill] sm:$0xff]  ;;  %7597 = vmatprep.subr.bf16.mxu1 %v7596_v2  ;;  %v7648_v27 = vpack.c.bf16 %v5034_v29, %v5027_v7  ;;  %v16904_v2 = vld [vmem:[#allocation154_spill] sm:$0xff]  ;;  %v7652_v30 = vpack.c.bf16 %v5104_v54, %v5097_v19 }
 0x44a   : > { %v13608_v45 = vpop.permute.xlu0 %5049  ;;  %v5033_v23 = vmul.f32 %v16899_v17, %v16898_v38  ;;  %7599 = vmatpush1.bf16.msra.mxu1 %v7598_v57  ;;  %v5026_v17 = vmul.f32 %v16903_v50, %v16898_v38  ;;  %v16907_v7 = vld [vmem:[#allocation110_spill] sm:$0xff]  ;;  %v16909_v50 = vld [vmem:[#allocation45_spill] sm:$0xff] }
 0x44b   : > { %16895 = vst [vmem:[#allocation240_spill] sm:$0xff] %v13608_v45  ;;  %v7600_v36 = vpack.c.bf16 %v5555_v62, %v5548_v10  ;;  %v7602_v15 = vpack.c.bf16 %v5554_v21, %v5547_v4  ;;  %v5565_v10 = vmul.f32 %v13617_v61, %v16904_v2  ;;  %7647 = vmatpush1.bf16.msra.mxu0 %v7646_v39  ;;  %v16908_v39 = vld [vmem:[#allocation101_spill] sm:$0xff]  ;;  %v16916_v54 = vld [vmem:[#allocation118_spill] sm:$0xff] }
 0x44c   : > { %v4914_v1 = vpop.permute.xlu1 %4913  ;;  %7649 = vmatprep.subr.bf16.mxu0 %v7648_v27  ;;  %v5103_v20 = vmul.f32 %v13354_v46, %v16907_v7  ;;  %v7650_v4 = vpack.c.bf16 %v5033_v23, %v5026_v17  ;;  %v5586_v5 = vmul.f32 %v16909_v50, %v16908_v39  ;;  %v16910_v38 = vld [vmem:[#allocation121_spill] sm:$0xff]  ;;  %v16914_v17 = vld [vmem:[#allocation171_spill] sm:$0xff]  ;;  %v5173_v19 = vmul.f32 %v13392_v31, %v16916_v54 }
 0x44d   : > { %v13630_v8 = vsel %vm931_vm7, %v16902_v13, %v4914_v1  ;;  %v13634_v51 = vsel %vm931_vm7, %v4914_v1, %v13540_v47  ;;  %v16906_v13 = vld [vmem:[#allocation158_spill] sm:$0xff]  ;;  %7601 = vmatprep.subr.bf16.mxu1 %v7600_v36  ;;  %v5174_v59 = vmul.f32 %v13403_v49, %v16910_v38  ;;  %v16913_v46 = vld [vmem:[#allocation49_spill] sm:$0xff]  ;;  %v5167_v23 = vmul.f32 %v13399_v40, %v16910_v38  ;;  %v16915_v49 = vld [vmem:[#allocation47_spill] sm:$0xff] }
 0x44e   : > { %v13642_v57 = vpop.permute.xlu0 %5119  ;;  %v5566_v62 = vmul.f32 %v13626_v63, %v16906_v13  ;;  %v5572_v1 = vmul.f32 %v13630_v8, %v16904_v2  ;;  %v5573_v29 = vmul.f32 %v13634_v51, %v16906_v13  ;;  %7603 = vmatpush1.bf16.msra.mxu1 %v7602_v15  ;;  %v16911_v13 = vld [vmem:[#allocation250_spill] sm:$0xff]  ;;  %v5580_v18 = vmul.f32 %v16913_v46, %v16908_v39  ;;  %v16918_v39 = vld [vmem:[#allocation25_spill] sm:$0xff] }
 0x44f   : > { %16905 = vst [vmem:[#allocation235_spill] sm:$0xff] %v13642_v57  ;;  %v5096_v27 = vmul.f32 %v16911_v13, %v16907_v7  ;;  %7651 = vmatpush1.bf16.msra.mxu0 %v7650_v4  ;;  %v5585_v15 = vmul.f32 %v16915_v49, %v16914_v17  ;;  %v5166_v4 = vmul.f32 %v13359_v35, %v16916_v54  ;;  %v16920_v7 = vld [vmem:[#allocation125_spill] sm:$0xff]  ;;  %v16931_v54 = vld [vmem:[#allocation143_spill] sm:$0xff] }
 0x450   : > { %v13652_v21 = vpop.permute.xlu1 %5187  ;;  %v7604_v2 = vpack.c.bf16 %v5573_v29, %v5566_v62  ;;  %v7606_v41 = vpack.c.bf16 %v5572_v1, %v5565_v10  ;;  %7653 = vmatprep.subr.bf16.mxu0 %v7652_v30  ;;  %v16917_v10 = vld [vmem:[#allocation127_spill] sm:$0xff]  ;;  %v7608_v1 = vpack.c.bf16 %v5586_v5, %v5580_v18  ;;  %v7656_v30 = vpack.c.bf16 %v5174_v59, %v5167_v23  ;;  %v16921_v5 = vld [vmem:[#allocation254_spill] sm:$0xff]  ;;  %v16923_v59 = vld [vmem:[#allocation65_spill] sm:$0xff] }
 0x451   : > { %v5244_v13 = vmul.f32 %v13441_v52, %v16917_v10  ;;  %v7654_v29 = vpack.c.bf16 %v5103_v20, %v5096_v27  ;;  %v5237_v31 = vmul.f32 %v13410_v22, %v16917_v10  ;;  %v5243_v52 = vmul.f32 %v13432_v16, %v16920_v7 }
 0x452   : > { %v13660_v36 = vpop.permute.xlu0 %5189  ;;  %7605 = vmatprep.subr.bf16.mxu1 %v7604_v2  ;;  %v16919_v2 = vld [vmem:[#allocation50_spill] sm:$0xff]  ;;  %v13687_v18 = vsel %vm1110_vm2, %v16921_v5, %v13574_v42  ;;  %v5236_v20 = vmul.f32 %v13425_v53, %v16920_v7  ;;  %v16928_v53 = vld [vmem:[#allocation131_spill] sm:$0xff]  ;;  %v16933_v42 = vld [vmem:[#allocation140_spill] sm:$0xff] }
 0x453   : > { %16912 = vst [vmem:[#allocation236_spill] sm:$0xff] %v13660_v36  ;;  %7607 = vmatpush1.bf16.msra.mxu1 %v7606_v41  ;;  %v5579_v38 = vmul.f32 %v16919_v2, %v16914_v17  ;;  %7655 = vmatpush1.bf16.msra.mxu0 %v7654_v29  ;;  %v13694_v41 = vsel %vm1110_vm2, %v16923_v59, %v16921_v5  ;;  %v16925_v17 = vld [vmem:[#allocation136_spill] sm:$0xff]  ;;  %v16926_v5 = vld [vmem:[#allocation165_spill] sm:$0xff] }
 0x454   : > { %v4992_v62 = vpop.permute.xlu1 %4991  ;;  %7609 = vmatprep.subr.bf16.mxu1 %v7608_v1  ;;  %7657 = vmatprep.subr.bf16.mxu0 %v7656_v30  ;;  %v7658_v1 = vpack.c.bf16 %v5173_v19, %v5166_v4  ;;  %v7660_v29 = vpack.c.bf16 %v5244_v13, %v5237_v31  ;;  %v5278_v10 = vmul.f32 %v13524_v37, %v16925_v17 }
 0x455   : > { %v13676_v40 = vsel %vm1110_vm2, %v16918_v39, %v4992_v62  ;;  %v7610_v16 = vpack.c.bf16 %v5585_v15, %v5579_v38  ;;  %v16924_v39 = vld [vmem:[#allocation161_spill] sm:$0xff]  ;;  %v5592_v30 = vmul.f32 %v13687_v18, %v16926_v5  ;;  %v16927_v38 = vld [vmem:[#allocation251_spill] sm:$0xff]  ;;  %v5269_v59 = vmul.f32 %v13511_v11, %v16928_v53 }
 0x456   : > { %v13689_v35 = vpop.permute.xlu0 %4993  ;;  %v5597_v27 = vmul.f32 %v13676_v40, %v16924_v39  ;;  %v5591_v19 = vmul.f32 %v13694_v41, %v16924_v39  ;;  %v13721_v13 = vsel %vm1215_vm4, %v13466_v9, %v13608_v45  ;;  %v7662_v31 = vpack.c.bf16 %v5243_v52, %v5236_v20  ;;  %v16932_v45 = vld [vmem:[#allocation168_spill] sm:$0xff] }
 0x457   : > { %16922 = vst [vmem:[#allocation241_spill] sm:$0xff] %v13689_v35  ;;  %v13698_v22 = vsel %vm1110_vm2, %v4992_v62, %v13689_v35  ;;  %7611 = vmatpush1.bf16.msra.mxu1 %v7610_v16  ;;  %7659 = vmatpush1.bf16.msra.mxu0 %v7658_v1  ;;  %v5270_v16 = vmul.f32 %v13516_v34, %v16925_v17 }
 0x458   : > { %v5062_v23 = vpop.permute.xlu1 %5061  ;;  %v5598_v62 = vmul.f32 %v13698_v22, %v16926_v5  ;;  %7661 = vmatprep.subr.bf16.mxu0 %v7660_v29  ;;  %v5277_v1 = vmul.f32 %v13520_v12, %v16928_v53  ;;  %v5310_v52 = vmul.f32 %v13554_v44, %v16931_v54  ;;  %v7614_v20 = vpack.c.bf16 %v5597_v27, %v5591_v19  ;;  %v16934_v29 = vld [vmem:[#allocation173_spill] sm:$0xff]  ;;  %v16935_v19 = vld [vmem:[#allocation252_spill] sm:$0xff] }
 0x459   : > { %v13712_v15 = vsel %vm1215_vm4, %v16927_v38, %v5062_v23  ;;  %v16930_v38 = vld [vmem:[#allocation81_spill] sm:$0xff]  ;;  %v5309_v47 = vmul.f32 %v13550_v60, %v16933_v42 }
 0x45a   : > { %v13723_v4 = vpop.permute.xlu0 %5063  ;;  %v13730_v5 = vsel %vm1215_vm4, %v16930_v38, %v13466_v9  ;;  %v7612_v7 = vpack.c.bf16 %v5598_v62, %v5592_v30  ;;  %v5609_v17 = vmul.f32 %v13712_v15, %v16932_v45  ;;  %v5301_v9 = vmul.f32 %v13570_v28, %v16933_v42 }
 0x45b   : > { %16929 = vst [vmem:[#allocation249_spill] sm:$0xff] %v13723_v4  ;;  %v13734_v39 = vsel %vm1215_vm4, %v5062_v23, %v13723_v4  ;;  %v5604_v38 = vmul.f32 %v13721_v13, %v16934_v29  ;;  %v7664_v30 = vpack.c.bf16 %v5278_v10, %v5270_v16  ;;  %v5302_v62 = vmul.f32 %v13559_v6, %v16931_v54  ;;  %v16938_v54 = vld [vmem:[#allocation150_spill] sm:$0xff] }
 0x45c   : > { %v5132_v35 = vpop.permute.xlu1 %5131  ;;  %v5610_v23 = vmul.f32 %v13734_v39, %v16934_v29  ;;  %7613 = vmatprep.subr.bf16.mxu1 %v7612_v7  ;;  %v5603_v27 = vmul.f32 %v13730_v5, %v16932_v45  ;;  %7663 = vmatpush1.bf16.msra.mxu0 %v7662_v31  ;;  %v13763_v7 = vsel %vm1320_vm6, %v13487_v32, %v13642_v57  ;;  %v16939_v57 = vld [vmem:[#allocation176_spill] sm:$0xff] }
 0x45d   : > { %v13754_v53 = vsel %vm1320_vm6, %v16935_v19, %v5132_v35  ;;  %7615 = vmatpush1.bf16.msra.mxu1 %v7614_v20  ;;  %7665 = vmatprep.subr.bf16.mxu0 %v7664_v30  ;;  %v16937_v19 = vld [vmem:[#allocation243_spill] sm:$0xff]  ;;  %v7666_v45 = vpack.c.bf16 %v5277_v1, %v5269_v59  ;;  %v7668_v29 = vpack.c.bf16 %v5310_v52, %v5302_v62  ;;  %v16941_v1 = vld [vmem:[#allocation253_spill] sm:$0xff] }
 0x45e   : > { %v13756_v4 = vpop.permute.xlu0 %5133  ;;  %v7616_v16 = vpack.c.bf16 %v5610_v23, %v5604_v38  ;;  %v13772_v31 = vsel %vm1320_vm6, %v16937_v19, %v13487_v32  ;;  %v7618_v20 = vpack.c.bf16 %v5609_v17, %v5603_v27  ;;  %v5342_v42 = vmul.f32 %v13600_v33, %v16938_v54  ;;  %v16940_v38 = vld [vmem:[#allocation179_spill] sm:$0xff] }
 0x45f   : > { %16936 = vst [vmem:[#allocation246_spill] sm:$0xff] %v13756_v4  ;;  %v13767_v10 = vsel %vm1320_vm6, %v5132_v35, %v13756_v4  ;;  %v13779_v30 = vsel %vm1425_vm8, %v13652_v21, %v13660_v36  ;;  %v5621_v35 = vmul.f32 %v13754_v53, %v16939_v57  ;;  %v5334_v17 = vmul.f32 %v13579_v25, %v16938_v54  ;;  %v16943_v19 = vld [vmem:[#allocation147_spill] sm:$0xff]  ;;  %v16944_v36 = vld [vmem:[#allocation245_spill] sm:$0xff] }
 0x460   : > { %v5622_v23 = vmul.f32 %v13767_v10, %v16940_v38  ;;  %7617 = vmatprep.subr.bf16.mxu1 %v7616_v16  ;;  %v5202_v32 = vpop.permute.xlu1 %5201  ;;  %v5616_v59 = vmul.f32 %v13763_v7, %v16940_v38  ;;  %7667 = vmatpush1.bf16.msra.mxu0 %v7666_v45  ;;  %v5615_v27 = vmul.f32 %v13772_v31, %v16939_v57  ;;  %v16945_v45 = vld [vmem:[#allocation191_spill] sm:$0xff] }
 0x461   : > { %v13791_v52 = vsel %vm1425_vm8, %v16941_v1, %v5202_v32  ;;  %7619 = vmatpush1.bf16.msra.mxu1 %v7618_v20  ;;  %v5341_v16 = vmul.f32 %v13592_v48, %v16943_v19  ;;  %7669 = vmatprep.subr.bf16.mxu0 %v7668_v29  ;;  %v7670_v38 = vpack.c.bf16 %v5309_v47, %v5301_v9 }
 0x462   : > { %v13793_v62 = vpop.permute.xlu0 %5203  ;;  %v13806_v1 = vsel %vm1425_vm8, %v16944_v36, %v13652_v21  ;;  %v5628_v20 = vmul.f32 %v13779_v30, %v16945_v45  ;;  %v7620_v4 = vpack.c.bf16 %v5622_v23, %v5616_v59  ;;  %v5374_v29 = vmul.f32 %v13634_v51, %v16946_v26  ;;  %v16948_v36 = vld [vmem:[#allocation135_spill] sm:$0xff] }
 0x463   : > { %16942 = vst [vmem:[#allocation237_spill] sm:$0xff] %v13793_v62  ;;  %v13801_v54 = vsel %vm1425_vm8, %v5202_v32, %v13793_v62  ;;  %v7622_v58 = vpack.c.bf16 %v5621_v35, %v5615_v27  ;;  %v5633_v32 = vmul.f32 %v13791_v52, %v16947_v43  ;;  %v7672_v9 = vpack.c.bf16 %v5342_v42, %v5334_v17  ;;  %v16949_v17 = vld [vmem:[#allocation153_spill] sm:$0xff] }
 0x464   : > { %v5634_v57 = vmul.f32 %v13801_v54, %v16945_v45  ;;  %v13816_v47 = vpop.permute.xlu1 %5249  ;;  %v5333_v21 = vmul.f32 %v13588_v24, %v16943_v19  ;;  %v4772_v62 = vmul.f32 %v13524_v37, %v16948_v36  ;;  %7621 = vmatprep.subr.bf16.mxu1 %v7620_v4  ;;  %7671 = vmatpush1.bf16.msra.mxu0 %v7670_v38  ;;  %v16950_v4 = vld [vmem:[#allocation130_spill] sm:$0xff]  ;;  %v16951_v19 = vld [vmem:[#allocation180_spill] sm:$0xff] }
 0x465   : > { %v5366_v35 = vmul.f32 %v13626_v63, %v16946_v26  ;;  %v5627_v59 = vmul.f32 %v13806_v1, %v16947_v43  ;;  %7623 = vmatpush1.bf16.msra.mxu1 %v7622_v58  ;;  %7673 = vmatprep.subr.bf16.mxu0 %v7672_v9  ;;  %v4766_v42 = vmul.f32 %v13516_v34, %v16948_v36  ;;  %v16952_v9 = vld [vmem:[#allocation142_spill] sm:$0xff] }
 0x466   : > { %v13822_v45 = vpop.permute.xlu0 %5251  ;;  %v7624_v23 = vpack.c.bf16 %v5634_v57, %v5628_v20  ;;  %v5373_v27 = vmul.f32 %v13630_v8, %v16949_v17  ;;  %v7674_v37 = vpack.c.bf16 %v5341_v16, %v5333_v21  ;;  %v4771_v38 = vmul.f32 %v13520_v12, %v16950_v4 }
 0x467   : > { %v7626_v57 = vpack.c.bf16 %v5633_v32, %v5627_v59  ;;  %v7676_v26 = vpack.c.bf16 %v5374_v29, %v5366_v35  ;;  %v5390_v43 = vmul.f32 %v16909_v50, %v16951_v19  ;;  %v5365_v58 = vmul.f32 %v13617_v61, %v16949_v17  ;;  %v16954_v35 = vld [vmem:[#allocation139_spill] sm:$0xff] }
 0x468   : > { %7625 = vmatprep.subr.bf16.mxu1 %v7624_v23  ;;  %v13834_v20 = vpop.permute.xlu1 %5281  ;;  %v4832_v34 = vmul.f32 %v13554_v44, %v16952_v9  ;;  %7675 = vmatpush1.bf16.msra.mxu0 %v7674_v37  ;;  %v7736_v36 = vpack.c.bf16 %v4772_v62, %v4766_v42  ;;  %v4765_v16 = vmul.f32 %v13511_v11, %v16950_v4  ;;  %v16953_v23 = vld [vmem:[#allocation123_spill] sm:$0xff]  ;;  %v16956_v4 = vld [vmem:[#allocation149_spill] sm:$0xff] }
 0x469   : > { %7627 = vmatpush1.bf16.msra.mxu1 %v7626_v57  ;;  %7677 = vmatprep.subr.bf16.mxu0 %v7676_v26  ;;  %v5382_v29 = vmul.f32 %v16913_v46, %v16951_v19  ;;  %v4826_v32 = vmul.f32 %v13559_v6, %v16952_v9  ;;  %v7678_v21 = vpack.c.bf16 %v5373_v27, %v5365_v58  ;;  %v16955_v26 = vld [vmem:[#allocation164_spill] sm:$0xff]  ;;  %v16957_v27 = vld [vmem:[#allocation134_spill] sm:$0xff] }
 0x46a   : > { %v13844_v12 = vpop.permute.xlu0 %5283  ;;  %7737 = vmatprep.subr.bf16.mxu1 %v7736_v36  ;;  %v5381_v44 = vmul.f32 %v16919_v2, %v16953_v23  ;;  %v5389_v62 = vmul.f32 %v16915_v49, %v16953_v23  ;;  %v4831_v11 = vmul.f32 %v13550_v60, %v16954_v35  ;;  %v5418_v59 = vmul.f32 %v13698_v22, %v16955_v26 }
 0x46b   : > { %v7738_v37 = vpack.c.bf16 %v4771_v38, %v4765_v16  ;;  %v7680_v57 = vpack.c.bf16 %v5390_v43, %v5382_v29  ;;  %v4892_v6 = vmul.f32 %v13600_v33, %v16956_v4  ;;  %v7740_v36 = vpack.c.bf16 %v4832_v34, %v4826_v32  ;;  %v16958_v38 = vld [vmem:[#allocation129_spill] sm:$0xff]  ;;  %v16959_v34 = vld [vmem:[#allocation160_spill] sm:$0xff] }
 0x46c   : > { %v13858_v42 = vpop.permute.xlu1 %5313  ;;  %5929 = vmatmul.mubr.f32.vlgmr.msra.gmra.mrb[8].mxu1 %v13483_v0  ;;  %7679 = vmatpush1.bf16.msra.mxu0 %v7678_v21  ;;  %v13865_v58 = vmul.f32 %v16913_v46, %v16957_v27  ;;  %v4825_v60 = vmul.f32 %v13570_v28, %v16954_v35  ;;  %v5410_v9 = vmul.f32 %v13687_v18, %v16955_v26  ;;  %v16960_v28 = vld [vmem:[#allocation145_spill] sm:$0xff]  ;;  %v16961_v32 = vld [vmem:[#allocation172_spill] sm:$0xff] }
 0x46d   : > { %7739 = vmatpush1.bf16.msra.mxu1 %v7738_v37  ;;  %7681 = vmatprep.subr.bf16.mxu0 %v7680_v57  ;;  %v13875_v33 = vmul.f32 %v16915_v49, %v16958_v38  ;;  %v4886_v0 = vmul.f32 %v13579_v25, %v16956_v4  ;;  %v5417_v46 = vmul.f32 %v13676_v40, %v16959_v34  ;;  %v16962_v4 = vld [vmem:[#allocation156_spill] sm:$0xff] }
 0x46e   : > { %v13871_v43 = vpop.permute.xlu0 %5315  ;;  %7741 = vmatprep.subr.bf16.mxu1 %v7740_v36  ;;  %v7682_v16 = vpack.c.bf16 %v5389_v62, %v5381_v44  ;;  %6141 = vmatprep.mubr.f32.mxu1 %v13501_v14  ;;  %v4891_v29 = vmul.f32 %v13592_v48, %v16960_v28  ;;  %v5446_v21 = vmul.f32 %v13734_v39, %v16961_v32  ;;  %v16965_v36 = vld [vmem:[#allocation238_spill] sm:$0xff] }
 0x46f   : > { %v7742_v49 = vpack.c.bf16 %v4831_v11, %v4825_v60  ;;  %v7684_v57 = vpack.c.bf16 %v5418_v59, %v5410_v9  ;;  %v5409_v25 = vmul.f32 %v13694_v41, %v16959_v34  ;;  %v4952_v35 = vmul.f32 %v13634_v51, %v16962_v4 }
 0x470   : > { %v13886_v37 = vpop.permute.xlu1 %5345  ;;  %7683 = vmatpush1.bf16.msra.mxu0 %v7682_v16  ;;  %v7744_v44 = vpack.c.bf16 %v4892_v6, %v4886_v0  ;;  %v4964_v14 = vmul.f32 %v16909_v50, %v16957_v27  ;;  %v4885_v48 = vmul.f32 %v13588_v24, %v16960_v28  ;;  %v5438_v62 = vmul.f32 %v13721_v13, %v16961_v32  ;;  %v16963_v6 = vld [vmem:[#allocation167_spill] sm:$0xff]  ;;  %v16964_v24 = vld [vmem:[#allocation17_spill] sm:$0xff]  ;;  %v16966_v0 = vld [vmem:[#allocation152_spill] sm:$0xff] }
 0x471   : > { %7743 = vmatpush1.bf16.msra.mxu1 %v7742_v49  ;;  %7685 = vmatprep.subr.bf16.mxu0 %v7684_v57  ;;  %v13902_v11 = vmul.f32 %v16919_v2, %v16958_v38  ;;  %v4946_v51 = vmul.f32 %v13626_v63, %v16962_v4  ;;  %v7686_v59 = vpack.c.bf16 %v5417_v46, %v5409_v25  ;;  %v16967_v49 = vld [vmem:[#allocation24_spill] sm:$0xff]  ;;  %v16975_v32 = vld [vmem:[#allocation163_spill] sm:$0xff] }
 0x472   : > { %v13898_v9 = vpop.permute.xlu0 %5347  ;;  %v5445_v50 = vmul.f32 %v13712_v15, %v16963_v6  ;;  %7745 = vmatprep.subr.bf16.mxu1 %v7744_v44  ;;  %v13910_v60 = vmul.f32 %v16965_v36, %v16964_v24  ;;  %v4951_v16 = vmul.f32 %v13630_v8, %v16966_v0  ;;  %v5474_v57 = vmul.f32 %v13767_v10, %v16967_v49 }
 0x473   : > { %v7746_v38 = vpack.c.bf16 %v4891_v29, %v4885_v48  ;;  %v7688_v27 = vpack.c.bf16 %v5446_v21, %v5438_v62  ;;  %v5437_v63 = vmul.f32 %v13730_v5, %v16963_v6  ;;  %v7748_v46 = vpack.c.bf16 %v4952_v35, %v4946_v51  ;;  %v16968_v21 = vld [vmem:[#allocation39_spill] sm:$0xff]  ;;  %v16976_v6 = vld [vmem:[#allocation166_spill] sm:$0xff] }
 0x474   : > { %v5254_v2 = vpop.permute.xlu1 %5253  ;;  %7687 = vmatpush1.bf16.msra.mxu0 %v7686_v59  ;;  %v7752_v25 = vpack.c.bf16 %v4964_v14, %v13865_v58  ;;  %v7754_v44 = vpack.c.bf16 %v13875_v33, %v13902_v11  ;;  %v4945_v4 = vmul.f32 %v13617_v61, %v16966_v0  ;;  %v5466_v8 = vmul.f32 %v13763_v7, %v16967_v49  ;;  %v16969_v62 = vld [vmem:[#allocation175_spill] sm:$0xff] }
 0x475   : > { %7747 = vmatpush1.bf16.msra.mxu1 %v7746_v38  ;;  %7689 = vmatprep.subr.bf16.mxu0 %v7688_v27  ;;  %v13929_v48 = vmul.f32 %v16968_v21, %v16964_v24  ;;  %v7690_v35 = vpack.c.bf16 %v5445_v50, %v5437_v63  ;;  %v5473_v58 = vmul.f32 %v13754_v53, %v16969_v62  ;;  %v16970_v33 = vld [vmem:[#allocation207_spill] sm:$0xff]  ;;  %v16973_v27 = vld [vmem:[#allocation186_spill] sm:$0xff] }
 0x476   : > { %v13925_v29 = vpop.permute.xlu0 %5255  ;;  %7749 = vmatprep.subr.bf16.mxu1 %v7748_v46  ;;  %v16971_v14 = vld [vmem:[#allocation239_spill] sm:$0xff]  ;;  %v5502_v38 = vmul.f32 %v13801_v54, %v16973_v27  ;;  %v7750_v49 = vpack.c.bf16 %v4951_v16, %v4945_v4  ;;  %v7692_v24 = vpack.c.bf16 %v5474_v57, %v5466_v8  ;;  %v5465_v34 = vmul.f32 %v13772_v31, %v16969_v62 }
 0x477   : > { %v13935_v11 = vmul.f32 %v16971_v14, %v16970_v33  ;;  %v16972_v61 = vld [vmem:[#allocation51_spill] sm:$0xff]  ;;  %v5036_v26 = vmul.f32 %v13698_v22, %v16975_v32  ;;  %v13957_v4 = vmul.f32 %v13730_v5, %v16976_v6  ;;  %v5029_v16 = vmul.f32 %v13687_v18, %v16975_v32  ;;  %v16978_v18 = vld [vmem:[#allocation174_spill] sm:$0xff] }
 0x478   : > { %v13939_v51 = vmul.f32 %v16972_v61, %v16970_v33  ;;  %v5286_v59 = vpop.permute.xlu1 %5285  ;;  %v16974_v63 = vld [vmem:[#allocation159_spill] sm:$0xff]  ;;  %v13953_v33 = vsel %vm635_vm1, %v5254_v2, %v13925_v29  ;;  %7691 = vmatpush1.bf16.msra.mxu0 %v7690_v35  ;;  %v7694_v8 = vpack.c.bf16 %v5473_v58, %v5465_v34  ;;  %v13972_v5 = vsel %vm635_vm1, %v13816_v47, %v13822_v45 }
 0x479   : > { %v5028_v46 = vmul.f32 %v13694_v41, %v16974_v63  ;;  %v5494_v41 = vmul.f32 %v13779_v30, %v16973_v27  ;;  %7751 = vmatpush1.bf16.msra.mxu1 %v7750_v49  ;;  %7693 = vmatprep.subr.bf16.mxu0 %v7692_v24  ;;  %v5035_v22 = vmul.f32 %v13676_v40, %v16974_v63  ;;  %v16977_v50 = vld [vmem:[#allocation183_spill] sm:$0xff]  ;;  %v16979_v49 = vld [vmem:[#allocation190_spill] sm:$0xff]  ;;  %v16980_v63 = vld [vmem:[#allocation169_spill] sm:$0xff] }
 0x47a   : > { %v13963_v57 = vpop.permute.xlu0 %5287  ;;  %v5501_v35 = vmul.f32 %v13791_v52, %v16977_v50  ;;  %7753 = vmatprep.subr.bf16.mxu1 %v7752_v25  ;;  %v13976_v32 = vmul.f32 %v13772_v31, %v16978_v18  ;;  %v13980_v24 = vsel %vm635_vm1, %v13455_v56, %v5254_v2  ;;  %v5521_v40 = vmul.f32 %v13953_v33, %v16979_v49  ;;  %v13987_v58 = vld [vmem:[%s15161_s9] sm:$0xff]  ;;  %v13997_v2 = vld [vmem:[%s15161_s9 + $0x18] sm:$0xff] }
 0x47b   : > { %6000 = vmatmul.mubr.f32.vlgmr.msra.gmra.mrb[10].mxu0 %v13987_v58  ;;  %v7696_v25 = vpack.c.bf16 %v5502_v38, %v5494_v41  ;;  %v5493_v31 = vmul.f32 %v13806_v1, %v16977_v50  ;;  %v5106_v62 = vmul.f32 %v13734_v39, %v16980_v63  ;;  %v7756_v56 = vpack.c.bf16 %v5036_v26, %v5029_v16  ;;  %v16981_v50 = vld [vmem:[#allocation188_spill] sm:$0xff] }
 0x47c   : > { %v5318_v34 = vpop.permute.xlu1 %5317  ;;  %7695 = vmatpush1.bf16.msra.mxu0 %v7694_v8  ;;  %7195 = vmatprep.mubr.msk.f32.mxu0 %vm5647_vm11, %v13997_v2  ;;  %v14004_v38 = vsel %vm635_vm1, %v13260_v3, %v13816_v47  ;;  %v5514_v41 = vmul.f32 %v13972_v5, %v16979_v49  ;;  %v14010_v39 = vsel %vm721_vm3, %v5286_v59, %v13963_v57 }
 0x47d   : > { %7755 = vmatpush1.bf16.msra.mxu1 %v7754_v44  ;;  %7697 = vmatprep.subr.bf16.mxu0 %v7696_v25  ;;  %v5099_v16 = vmul.f32 %v13721_v13, %v16980_v63  ;;  %v7758_v8 = vpack.c.bf16 %v5035_v22, %v5028_v46  ;;  %v7698_v27 = vpack.c.bf16 %v5501_v35, %v5493_v31  ;;  %v16982_v46 = vld [vmem:[#allocation177_spill] sm:$0xff]  ;;  %v16983_v31 = vld [vmem:[#allocation196_spill] sm:$0xff] }
 0x47e   : > { %v14012_v26 = vpop.permute.xlu0 %5319  ;;  %v5520_v3 = vmul.f32 %v13980_v24, %v16981_v50  ;;  %7757 = vmatprep.subr.bf16.mxu1 %v7756_v56  ;;  %v5105_v47 = vmul.f32 %v13712_v15, %v16976_v6  ;;  %v14023_v49 = vsel %vm721_vm3, %v13834_v20, %v13844_v12  ;;  %v14027_v44 = vsel %vm721_vm3, %v13472_v55, %v5286_v59  ;;  %v16984_v63 = vld [vmem:[#allocation12_spill] sm:$0xff] }
 0x47f   : > { %v7700_v13 = vpack.c.bf16 %v5521_v40, %v5514_v41  ;;  %v5176_v22 = vmul.f32 %v13767_v10, %v16982_v46  ;;  %v5513_v35 = vmul.f32 %v14004_v38, %v16981_v50  ;;  %v5539_v15 = vmul.f32 %v14010_v39, %v16983_v31  ;;  %v16989_v50 = vld [vmem:[#allocation52_spill] sm:$0xff] }
 0x480   : > { %7699 = vmatpush1.bf16.msra.mxu0 %v7698_v27  ;;  %v7760_v56 = vpack.c.bf16 %v5106_v62, %v5099_v16  ;;  %v5175_v6 = vmul.f32 %v13754_v53, %v16978_v18  ;;  %v14040_v55 = vsel %vm721_vm3, %v16984_v63, %v13834_v20  ;;  %v5324_v59 = vsel %vm830_vm5, %v5318_v34, %v14012_v26  ;;  %v16985_v53 = vld [vmem:[#allocation194_spill] sm:$0xff]  ;;  %v16986_v63 = vld [vmem:[#allocation185_spill] sm:$0xff] }
 0x481   : > { %v5350_v25 = vpop.permute.xlu1 %5349  ;;  %7759 = vmatpush1.bf16.msra.mxu1 %v7758_v8  ;;  %7701 = vmatprep.subr.bf16.mxu0 %v7700_v13  ;;  %v5169_v40 = vmul.f32 %v13763_v7, %v16982_v46  ;;  %v5532_v62 = vmul.f32 %v14023_v49, %v16983_v31  ;;  %v7702_v27 = vpack.c.bf16 %v5520_v3, %v5513_v35  ;;  %v16987_v13 = vld [vmem:[#allocation255_spill] sm:$0xff]  ;;  %v16988_v35 = vld [vmem:[#allocation170_spill] sm:$0xff] }
 0x482   : > { %v14044_v10 = vpop.permute.xlu0 %5351  ;;  %v5538_v41 = vmul.f32 %v14027_v44, %v16985_v53  ;;  %7761 = vmatprep.subr.bf16.mxu1 %v7760_v56  ;;  %v7762_v20 = vpack.c.bf16 %v5105_v47, %v13957_v4  ;;  %v5246_v16 = vmul.f32 %v13801_v54, %v16986_v63  ;;  %v5322_v8 = vsel %vm830_vm5, %v13858_v42, %v13871_v43 }
 0x483   : > { %v14060_v7 = vsel %vm830_vm5, %v16987_v13, %v5318_v34  ;;  %v5531_v3 = vmul.f32 %v14040_v55, %v16985_v53  ;;  %v5557_v46 = vmul.f32 %v5324_v59, %v16988_v35  ;;  %v7704_v56 = vpack.c.bf16 %v5539_v15, %v5532_v62 }
 0x484   : > { %7703 = vmatpush1.bf16.msra.mxu0 %v7702_v27  ;;  %v7764_v4 = vpack.c.bf16 %v5176_v22, %v5169_v40  ;;  %v5239_v54 = vmul.f32 %v13779_v30, %v16986_v63  ;;  %v7766_v47 = vpack.c.bf16 %v5175_v6, %v13976_v32  ;;  %v5321_v31 = vsel %vm830_vm5, %v16989_v50, %v13858_v42  ;;  %v16990_v27 = vld [vmem:[#allocation198_spill] sm:$0xff]  ;;  %v16992_v6 = vld [vmem:[#allocation256_spill] sm:$0xff] }
 0x485   : > { %v5394_v18 = vpop.permute.xlu1 %5393  ;;  %v14073_v34 = vsel %vm931_vm7, %v5350_v25, %v14044_v10  ;;  %7763 = vmatpush1.bf16.msra.mxu1 %v7762_v20  ;;  %v5550_v13 = vmul.f32 %v5322_v8, %v16988_v35  ;;  %v7706_v53 = vpack.c.bf16 %v5538_v41, %v5531_v3  ;;  %v5556_v22 = vmul.f32 %v14060_v7, %v16990_v27  ;;  %v16991_v30 = vld [vmem:[#allocation182_spill] sm:$0xff]  ;;  %v16993_v41 = vld [vmem:[#allocation189_spill] sm:$0xff]  ;;  %v16994_v3 = vld [vmem:[#allocation203_spill] sm:$0xff] }
 0x486   : > { %7705 = vmatprep.subr.bf16.mxu0 %v7704_v56  ;;  %7765 = vmatprep.subr.bf16.mxu1 %v7764_v4  ;;  %v5245_v32 = vmul.f32 %v13791_v52, %v16991_v30  ;;  %v14083_v42 = vsel %vm931_vm7, %v13886_v37, %v13898_v9  ;;  %v14087_v50 = vsel %vm931_vm7, %v16992_v6, %v5350_v25  ;;  %v16995_v25 = vld [vmem:[#allocation37_spill] sm:$0xff] }
 0x487   : > { %v5396_v15 = vpop.permute.xlu0 %5395  ;;  %v7768_v40 = vpack.c.bf16 %v5246_v16, %v5239_v54  ;;  %v5549_v62 = vmul.f32 %v5321_v31, %v16990_v27  ;;  %v5280_v20 = vmul.f32 %v13953_v33, %v16993_v41  ;;  %v5575_v56 = vmul.f32 %v14073_v34, %v16994_v3 }
 0x488   : > { %7707 = vmatpush1.bf16.msra.mxu0 %v7706_v53  ;;  %v7708_v52 = vpack.c.bf16 %v5557_v46, %v5550_v13  ;;  %v5238_v4 = vmul.f32 %v13806_v1, %v16991_v30  ;;  %v5272_v63 = vmul.f32 %v13972_v5, %v16993_v41  ;;  %v5353_v16 = vsel %vm931_vm7, %v16995_v25, %v13886_v37  ;;  %v16996_v46 = vld [vmem:[#allocation200_spill] sm:$0xff]  ;;  %v16997_v5 = vld [vmem:[#allocation187_spill] sm:$0xff] }
 0x489   : > { %v5422_v54 = vpop.permute.xlu1 %5421  ;;  %7767 = vmatpush1.bf16.msra.mxu1 %v7766_v47  ;;  %v7716_v33 = vpack.c.bf16 %v13939_v51, %v13935_v11  ;;  %v5568_v6 = vmul.f32 %v14083_v42, %v16994_v3  ;;  %v7710_v53 = vpack.c.bf16 %v5556_v22, %v5549_v62  ;;  %v5574_v13 = vmul.f32 %v14087_v50, %v16996_v46  ;;  %v16998_v47 = vld [vmem:[#allocation195_spill] sm:$0xff] }
 0x48a   : > { %7709 = vmatprep.subr.bf16.mxu0 %v7708_v52  ;;  %7769 = vmatprep.subr.bf16.mxu1 %v7768_v40  ;;  %v7770_v1 = vpack.c.bf16 %v5245_v32, %v5238_v4  ;;  %v5271_v30 = vmul.f32 %v14004_v38, %v16997_v5  ;;  %v5279_v37 = vmul.f32 %v13980_v24, %v16997_v5  ;;  %v16999_v40 = vld [vmem:[#allocation193_spill] sm:$0xff]  ;;  %v17000_v4 = vld [vmem:[#allocation11_spill] sm:$0xff]  ;;  %v14120_v3 = vsel %vm1110_vm2, %v5394_v18, 0.0  ;;  %v17001_v5 = vld [vmem:[#allocation244_spill] sm:$0xff] }
 0x48b   : > { %v5312_v25 = vmul.f32 %v14010_v39, %v16998_v47  ;;  %v5424_v11 = vpop.permute.xlu0 %5423  ;;  %v5304_v51 = vmul.f32 %v14023_v49, %v16998_v47  ;;  %v5567_v22 = vmul.f32 %v5353_v16, %v16996_v46  ;;  %v7712_v62 = vpack.c.bf16 %v5575_v56, %v5568_v6  ;;  %v17007_v47 = vld [vmem:[#allocation240_spill] sm:$0xff] }
 0x48c   : > { %7711 = vmatpush1.bf16.msra.mxu0 %v7710_v53  ;;  %v7772_v52 = vpack.c.bf16 %v5280_v20, %v5272_v63  ;;  %v5311_v32 = vmul.f32 %v14027_v44, %v16999_v40  ;;  %v5344_v38 = vmul.f32 %v5324_v59, %v17000_v4  ;;  %v14123_v24 = vsel %vm1110_vm2, %v5396_v15, 0.0  ;;  %v17002_v53 = vld [vmem:[#allocation241_spill] sm:$0xff] }
 0x48d   : > { %7771 = vmatpush1.bf16.msra.mxu1 %v7770_v1  ;;  %v7714_v39 = vpack.c.bf16 %v5574_v13, %v5567_v22  ;;  %v14127_v49 = vsel %vm1110_vm2, %v17001_v5, %v5394_v18  ;;  %v14131_v63 = vsel %vm1110_vm2, %v17002_v53, %v5396_v15  ;;  %7713 = vmatprep.subr.bf16.mxu0 %v7712_v62  ;;  %v5450_v56 = vpop.permute.xlu1 %5449  ;;  %v17003_v13 = vld [vmem:[#allocation21_spill] sm:$0xff]  ;;  %v14141_v15 = vsel %vm1215_vm4, %v5422_v54, 0.0 }
 0x48e   : > { %7773 = vmatprep.subr.bf16.mxu1 %v7772_v52  ;;  %v5303_v44 = vmul.f32 %v14040_v55, %v16999_v40  ;;  %v5336_v59 = vmul.f32 %v5322_v8, %v17000_v4  ;;  %v7774_v20 = vpack.c.bf16 %v5279_v37, %v5271_v30  ;;  %v7776_v1 = vpack.c.bf16 %v5312_v25, %v5304_v51  ;;  %v17004_v55 = vld [vmem:[#allocation197_spill] sm:$0xff]  ;;  %v17005_v30 = vld [vmem:[#allocation59_spill] sm:$0xff]  ;;  %v17006_v51 = vld [vmem:[#allocation162_spill] sm:$0xff] }
 0x48f   : > { %v5452_v6 = vpop.permute.xlu0 %5451  ;;  %v5594_v22 = vmul.f32 %v14120_v3, %v17003_v13  ;;  %v5600_v18 = vmul.f32 %v14123_v24, %v17003_v13  ;;  %v14144_v5 = vsel %vm1215_vm4, %v5424_v11, 0.0  ;;  %v5335_v62 = vmul.f32 %v5321_v31, %v17004_v55  ;;  %v17008_v31 = vld [vmem:[#allocation206_spill] sm:$0xff] }
 0x490   : > { %7715 = vmatpush1.bf16.msra.mxu0 %v7714_v39  ;;  %v5343_v8 = vmul.f32 %v14060_v7, %v17004_v55  ;;  %v5593_v37 = vmul.f32 %v14127_v49, %v17005_v30  ;;  %v5599_v25 = vmul.f32 %v14131_v63, %v17005_v30  ;;  %v5367_v52 = vmul.f32 %v5353_v16, %v17006_v51  ;;  %v17009_v55 = vld [vmem:[#allocation249_spill] sm:$0xff]  ;;  %v17010_v30 = vld [vmem:[#allocation202_spill] sm:$0xff] }
 0x491   : > { %7775 = vmatpush1.bf16.msra.mxu1 %v7774_v20  ;;  %v7778_v53 = vpack.c.bf16 %v5311_v32, %v5303_v44  ;;  %7717 = vmatprep.subr.bf16.mxu0 %v7716_v33  ;;  %v7780_v40 = vpack.c.bf16 %v5344_v38, %v5336_v59  ;;  %v14156_v39 = vsel %vm1215_vm4, %v17007_v47, %v5422_v54  ;;  %v14169_v33 = vsel %vm1320_vm6, %v5450_v56, 0.0 }
 0x492   : > { %7777 = vmatprep.subr.bf16.mxu1 %v7776_v1  ;;  %v5606_v7 = vmul.f32 %v14141_v15, %v17008_v31  ;;  %v14162_v4 = vsel %vm1215_vm4, %v17009_v55, %v5424_v11  ;;  %v5612_v20 = vmul.f32 %v14144_v5, %v17008_v31  ;;  %v5376_v16 = vmul.f32 %v14073_v34, %v17010_v30  ;;  %v5478_v34 = vpop.permute.xlu1 %5477  ;;  %v17012_v55 = vld [vmem:[#allocation205_spill] sm:$0xff] }
 0x493   : > { %v14172_v32 = vsel %vm1320_vm6, %v5452_v6, 0.0  ;;  %v17011_v54 = vpack.c.bf16 %v13910_v60, %v13929_v48  ;;  %v7720_v47 = vpack.c.bf16 %v5600_v18, %v5594_v22  ;;  %v5368_v11 = vmul.f32 %v14083_v42, %v17010_v30  ;;  %v5480_v1 = vpop.permute.xlu0 %5479  ;;  %v17013_v60 = vld [vmem:[#allocation235_spill] sm:$0xff]  ;;  %v17014_v42 = vld [vmem:[#allocation209_spill] sm:$0xff]  ;;  %v17015_v18 = vld [vmem:[#allocation246_spill] sm:$0xff] }
 0x494   : > { %v7782_v38 = vpack.c.bf16 %v5343_v8, %v5335_v62  ;;  %v5375_v44 = vmul.f32 %v14087_v50, %v17006_v51  ;;  %v7722_v59 = vpack.c.bf16 %v5599_v25, %v5593_v37  ;;  %v5605_v31 = vmul.f32 %v14156_v39, %v17012_v55  ;;  %v17138_v30 = vld [vmem:[#allocation122_spill] sm:$0xff] }
 0x495   : > { %7719 = vmatpush1.bf16.msra.mxu0 %v17011_v54  ;;  %7779 = vmatpush1.bf16.msra.mxu1 %v7778_v53  ;;  %v5611_v35 = vmul.f32 %v14162_v4, %v17012_v55  ;;  %v5453_v48 = vsel %vm1320_vm6, %v17013_v60, %v5450_v56  ;;  %v5618_v22 = vmul.f32 %v14169_v33, %v17014_v42  ;;  %v5487_v37 = vsel %vm1425_vm8, %v5478_v34, 0.0  ;;  %v17016_v54 = vld [vmem:[#allocation48_spill] sm:$0xff] }
 0x496   : > { %7721 = vmatprep.subr.bf16.mxu0 %v7720_v47  ;;  %7781 = vmatprep.subr.bf16.mxu1 %v7780_v40  ;;  %v5454_v50 = vsel %vm1320_vm6, %v17015_v18, %v5452_v6  ;;  %v5624_v62 = vmul.f32 %v14172_v32, %v17014_v42  ;;  %v7724_v8 = vpack.c.bf16 %v5612_v20, %v5606_v7  ;;  %v5488_v25 = vsel %vm1425_vm8, %v5480_v1, 0.0  ;;  %v17017_v6 = vld [vmem:[#allocation32_spill] sm:$0xff] }
 0x497   : > { %v7784_v53 = vpack.c.bf16 %v5376_v16, %v5368_v11  ;;  %v5392_v56 = vmul.f32 %v16972_v61, %v17016_v54  ;;  %v7786_v40 = vpack.c.bf16 %v5375_v44, %v5367_v52  ;;  %v5384_v47 = vmul.f32 %v16971_v14, %v17016_v54  ;;  %v17018_v7 = vld [vmem:[#allocation208_spill] sm:$0xff]  ;;  %v17021_v52 = vld [vmem:[#allocation237_spill] sm:$0xff] }
 0x498   : > { %v5391_v60 = vmul.f32 %v16965_v36, %v17017_v6  ;;  %v7726_v18 = vpack.c.bf16 %v5611_v35, %v5605_v31  ;;  %v5617_v20 = vmul.f32 %v5453_v48, %v17018_v7  ;;  %v5623_v51 = vmul.f32 %v5454_v50, %v17018_v7  ;;  %v17019_v55 = vld [vmem:[#allocation236_spill] sm:$0xff] }
 0x499   : > { %7723 = vmatpush1.bf16.msra.mxu0 %v7722_v59  ;;  %7783 = vmatpush1.bf16.msra.mxu1 %v7782_v38  ;;  %v5481_v16 = vsel %vm1425_vm8, %v17019_v55, %v5478_v34  ;;  %v17020_v11 = vld [vmem:[#allocation8_spill] sm:$0xff]  ;;  %v5482_v38 = vsel %vm1425_vm8, %v17021_v52, %v5480_v1  ;;  %v7728_v14 = vpack.c.bf16 %v5624_v62, %v5618_v22  ;;  %v17026_v52 = vld [vmem:[#allocation199_spill] sm:$0xff] }
 0x49a   : > { %7725 = vmatprep.subr.bf16.mxu0 %v7724_v8  ;;  %7785 = vmatprep.subr.bf16.mxu1 %v7784_v53  ;;  %v5630_v61 = vmul.f32 %v5487_v37, %v17020_v11  ;;  %v5636_v44 = vmul.f32 %v5488_v25, %v17020_v11  ;;  %v17022_v59 = vld [vmem:[#allocation204_spill] sm:$0xff]  ;;  %v7788_v31 = vpack.c.bf16 %v5392_v56, %v5384_v47  ;;  %v17025_v56 = vld [vmem:[#allocation201_spill] sm:$0xff] }
 0x49b   : > { %v5412_v36 = vmul.f32 %v14120_v3, %v17022_v59  ;;  %v5420_v35 = vmul.f32 %v14123_v24, %v17022_v59  ;;  %v5383_v34 = vmul.f32 %v16968_v21, %v17017_v6  ;;  %v7730_v55 = vpack.c.bf16 %v5623_v51, %v5617_v20  ;;  %v17023_v8 = vld [vmem:[#allocation212_spill] sm:$0xff] }
 0x49c   : > { %v5629_v53 = vmul.f32 %v5481_v16, %v17023_v8  ;;  %v5635_v1 = vmul.f32 %v5482_v38, %v17023_v8  ;;  %v17024_v22 = vld [vmem:[#allocation184_spill] sm:$0xff]  ;;  %v5448_v21 = vmul.f32 %v14144_v5, %v17025_v56 }
 0x49d   : > { %7727 = vmatpush1.bf16.msra.mxu0 %v7726_v18  ;;  %7787 = vmatpush1.bf16.msra.mxu1 %v7786_v40  ;;  %v5411_v62 = vmul.f32 %v14127_v49, %v17024_v22  ;;  %v5419_v3 = vmul.f32 %v14131_v63, %v17024_v22  ;;  %v7790_v24 = vpack.c.bf16 %v5391_v60, %v5383_v34  ;;  %v17027_v60 = vld [vmem:[#allocation181_spill] sm:$0xff]  ;;  %v17070_v22 = vld [vmem:[#allocation42_spill] sm:$0xff]  ;;  %v17134_v7 = vld [vmem:[#allocation124_spill] sm:$0xff] }
 0x49e   : > { %7729 = vmatprep.subr.bf16.mxu0 %v7728_v14  ;;  %7789 = vmatprep.subr.bf16.mxu1 %v7788_v31  ;;  %v7732_v18 = vpack.c.bf16 %v5636_v44, %v5630_v61  ;;  %v5440_v40 = vmul.f32 %v14141_v15, %v17025_v56  ;;  %v7792_v51 = vpack.c.bf16 %v5420_v35, %v5412_v36  ;;  %v17028_v44 = vld [vmem:[#allocation53_spill] sm:$0xff]  ;;  %v17029_v36 = vld [vmem:[#allocation211_spill] sm:$0xff]  ;;  %v17139_v42 = vld [vmem:[#allocation128_spill] sm:$0xff] }
 0x49f   : > { %v7734_v47 = vpack.c.bf16 %v5635_v1, %v5629_v53  ;;  %v7794_v20 = vpack.c.bf16 %v5419_v3, %v5411_v62  ;;  %v5439_v49 = vmul.f32 %v14156_v39, %v17026_v52  ;;  %v5447_v63 = vmul.f32 %v14162_v4, %v17026_v52  ;;  %v14239_v4 = vld [vmem:[%s15161_s9 + $0x10] sm:$0xff]  ;;  %v17032_v53 = vld [vmem:[#allocation38_spill] sm:$0xff]  ;;  %v17130_v56 = vld [vmem:[#allocation103_spill] sm:$0xff] }
 0x4a0   : > { %v5468_v61 = vmul.f32 %v14169_v33, %v17027_v60  ;;  %v5476_v15 = vmul.f32 %v14172_v32, %v17027_v60  ;;  %v7796_v5 = vpack.c.bf16 %v5448_v21, %v5440_v40  ;;  %v5467_v35 = vmul.f32 %v5453_v48, %v17029_v36  ;;  %v17030_v33 = vld [vmem:[#allocation210_spill] sm:$0xff] }
 0x4a1   : > { %7731 = vmatpush1.bf16.msra.mxu0 %v7730_v55  ;;  %7791 = vmatpush1.bf16.msra.mxu1 %v7790_v24  ;;  %v7798_v14 = vpack.c.bf16 %v5447_v63, %v5439_v49  ;;  %v5475_v39 = vmul.f32 %v5454_v50, %v17029_v36  ;;  %v5496_v32 = vmul.f32 %v5487_v37, %v17030_v33  ;;  %v17031_v55 = vld [vmem:[#allocation15_spill] sm:$0xff]  ;;  %v17033_v50 = vld [vmem:[#allocation178_spill] sm:$0xff]  ;;  %v5508_v3 = vsel %vm635_vm1, %v13925_v29, 0.0  ;;  %v17065_v36 = vld [vmem:[#allocation77_spill] sm:$0xff] }
 0x4a2   : > { %7733 = vmatprep.subr.bf16.mxu0 %v7732_v18  ;;  %7793 = vmatprep.subr.bf16.mxu1 %v7792_v51  ;;  %v5504_v31 = vmul.f32 %v5488_v25, %v17030_v33  ;;  %v7800_v34 = vpack.c.bf16 %v5476_v15, %v5468_v61  ;;  %v5495_v1 = vmul.f32 %v5481_v16, %v17033_v50  ;;  %v17034_v24 = vld [vmem:[#allocation71_spill] sm:$0xff]  ;;  %v5507_v25 = vsel %vm635_vm1, %v13822_v45, 0.0  ;;  %v17035_v18 = vld [vmem:[#allocation9_spill] sm:$0xff]  ;;  %v17072_v33 = vld [vmem:[#allocation36_spill] sm:$0xff] }
 0x4a3   : > { %v7802_v48 = vpack.c.bf16 %v5475_v39, %v5467_v35  ;;  %v5503_v62 = vmul.f32 %v5482_v38, %v17033_v50  ;;  %v7808_v16 = vpack.c.bf16 %v17035_v18, %v17035_v18  ;;  %v17036_v38 = vld [vmem:[#allocation214_spill] sm:$0xff]  ;;  %v5526_v29 = vsel %vm721_vm3, %v13963_v57, 0.0  ;;  %v17039_v15 = vld [vmem:[#allocation215_spill] sm:$0xff] }
 0x4a4   : > { %v7804_v37 = vpack.c.bf16 %v5504_v31, %v5496_v32  ;;  %v5522_v40 = vmul.f32 %v5508_v3, %v17036_v38  ;;  %v5525_v51 = vsel %vm721_vm3, %v13844_v12, 0.0  ;;  %v5544_v63 = vsel %vm830_vm5, %v14012_v26, 0.0  ;;  %v17041_v32 = vld [vmem:[#allocation216_spill] sm:$0xff]  ;;  %v17047_v18 = vld [vmem:[#allocation226_spill] sm:$0xff] }
 0x4a5   : > { %7735 = vmatpush1.bf16.msra.mxu0 %v7734_v47  ;;  %7795 = vmatpush1.bf16.msra.mxu1 %v7794_v20  ;;  %v7806_v21 = vpack.c.bf16 %v5503_v62, %v5495_v1  ;;  %v17038_v20 = vld [vmem:[#allocation213_spill] sm:$0xff]  ;;  %v5543_v57 = vsel %vm830_vm5, %v13871_v43, 0.0  ;;  %v7816_v12 = vpack.c.bf16 %v17039_v15, %v17039_v15  ;;  %v5562_v35 = vsel %vm931_vm7, %v14044_v10, 0.0  ;;  %v17044_v62 = vld [vmem:[#allocation223_spill] sm:$0xff] }
 0x4a6   : > { %7845 = vmatprep.subr.bf16.mxu0 %v17028_v44  ;;  %7797 = vmatprep.subr.bf16.mxu1 %v7796_v5  ;;  %v5540_v49 = vmul.f32 %v5526_v29, %v17038_v20  ;;  %v5533_v61 = vmul.f32 %v5525_v51, %v17038_v20  ;;  %v17040_v44 = vld [vmem:[#allocation219_spill] sm:$0xff]  ;;  %v5561_v26 = vsel %vm931_vm7, %v13898_v9, 0.0  ;;  %v7820_v43 = vpack.c.bf16 %v17041_v32, %v17041_v32  ;;  %v17045_v9 = vld [vmem:[#allocation222_spill] sm:$0xff]  ;;  %v17064_v20 = vld [vmem:[#allocation68_spill] sm:$0xff] }
 0x4a7   : > { %v5551_v39 = vmul.f32 %v5543_v57, %v17040_v44  ;;  %v7826_v3 = vpack.c.bf16 %v17044_v62, %v17044_v62  ;;  %v17049_v29 = vld [vmem:[#allocation227_spill] sm:$0xff]  ;;  %v17050_v51 = vld [vmem:[#allocation230_spill] sm:$0xff] }
 0x4a8   : > { %6071 = vmatmul.mubr.f32.vlgmr.msra.gmra.mrb[10].mxu0 %v14239_v4  ;;  %v7814_v5 = vpack.c.bf16 %v5540_v49, %v5533_v61  ;;  %v17052_v49 = vld [vmem:[#allocation234_spill] sm:$0xff]  ;;  %v14305_v61 = vpop.permute.xlu1 %5644 }
 0x4a9   : > { %7847 = vmatpush1.bf16.msra.mxu0 %v17031_v55  ;;  %7799 = vmatpush1.bf16.msra.mxu1 %v7798_v14  ;;  %v5558_v14 = vmul.f32 %v5544_v63, %v17040_v44  ;;  %v7842_v63 = vpack.c.bf16 %v17052_v49, %v17052_v49  ;;  %v17061_v49 = vld [vmem:[#allocation62_spill] sm:$0xff]  ;;  %v17062_v44 = vld [vmem:[#allocation72_spill] sm:$0xff] }
 0x4aa   : > { %7849 = vmatprep.subr.bf16.mxu0 %v17032_v53  ;;  %7801 = vmatprep.subr.bf16.mxu1 %v7800_v34  ;;  %v17042_v34 = vld [vmem:[#allocation218_spill] sm:$0xff] }
 0x4ab   : > { %v7818_v31 = vpack.c.bf16 %v5558_v14, %v5551_v39  ;;  %v5576_v55 = vmul.f32 %v5562_v35, %v17042_v34  ;;  %v5569_v53 = vmul.f32 %v5561_v26, %v17042_v34 }
 0x4ac   : > { %6142 = vmatmul.mubr.f32.vlgmr.msra.gmra.mrb[10].mxu1 %v13987_v58  ;;  %v5515_v58 = vmul.f32 %v5507_v25, %v17036_v38 }
 0x4ad   : > { %7851 = vmatpush1.bf16.msra.mxu0 %v17034_v24  ;;  %7803 = vmatpush1.bf16.msra.mxu1 %v7802_v48  ;;  %v17043_v48 = vld [vmem:[#allocation221_spill] sm:$0xff]  ;;  %v7822_v1 = vpack.c.bf16 %v5576_v55, %v5569_v53  ;;  %v17046_v24 = vld [vmem:[#allocation224_spill] sm:$0xff] }
 0x4ae   : > { %7196 = vmatprep.mubr.msk.f32.mxu1 %vm5647_vm11, %v13997_v2  ;;  %7805 = vmatprep.subr.bf16.mxu1 %v7804_v37  ;;  %v17037_v2 = vld [vmem:[#allocation40_spill] sm:$0xff]  ;;  %v7810_v47 = vpack.c.bf16 %v5522_v40, %v5515_v58  ;;  %v7824_v10 = vpack.c.bf16 %v17043_v48, %v17043_v48  ;;  %v7828_v37 = vpack.c.bf16 %v17045_v9, %v17045_v9  ;;  %v17048_v40 = vld [vmem:[#allocation229_spill] sm:$0xff] }
 0x4af   : > { %v7812_v45 = vpack.c.bf16 %v17037_v2, %v17037_v2  ;;  %v7830_v25 = vpack.c.bf16 %v17046_v24, %v17046_v24  ;;  %v7836_v58 = vpack.c.bf16 %v17049_v29, %v17049_v29  ;;  %v7838_v2 = vpack.c.bf16 %v17050_v51, %v17050_v51 }
 0x4b1   : > { %7807 = vmatpush1.bf16.msra.mxu1 %v7806_v21  ;;  %v7834_v21 = vpack.c.bf16 %v17048_v40, %v17048_v40  ;;  %v17053_v40 = vld [vmem:[#allocation5_spill] sm:$0xff] }
 0x4b2   : > { %7809 = vmatprep.subr.bf16.mxu1 %v7808_v16  ;;  %v7832_v16 = vpack.c.bf16 %v17047_v18, %v17047_v18  ;;  %v14399_v18 = vld [vmem:[%s15163_s11] sm:$0x3] }
 0x4b5   : > { %7811 = vmatpush1.bf16.msra.mxu1 %v7810_v47 }
 0x4b6   : > { %7813 = vmatprep.subr.bf16.mxu1 %v7812_v45  ;;  %v17051_v45 = vld [vmem:[#allocation233_spill] sm:$0xff] }
 0x4b7   : > { %v7840_v47 = vpack.c.bf16 %v17051_v45, %v17051_v45 }
 0x4b9   : > { %7815 = vmatpush1.bf16.msra.mxu1 %v7814_v5 }
 0x4ba   : > { %7817 = vmatprep.subr.bf16.mxu1 %v7816_v12 }
 0x4bd   : > { %7819 = vmatpush1.bf16.msra.mxu1 %v7818_v31 }
 0x4be   : > { %7821 = vmatprep.subr.bf16.mxu1 %v7820_v43 }
 0x4c1   : > { %7823 = vmatpush1.bf16.msra.mxu1 %v7822_v1 }
 0x4c2   : > { %7825 = vmatprep.subr.bf16.mxu1 %v7824_v10 }
 0x4c5   : > { %7827 = vmatpush1.bf16.msra.mxu1 %v7826_v3 }
 0x4c6   : > { %7829 = vmatprep.subr.bf16.mxu1 %v7828_v37 }
 0x4c9   : > { %7831 = vmatpush1.bf16.msra.mxu1 %v7830_v25 }
 0x4ca   : > { %7833 = vmatprep.subr.bf16.mxu1 %v7832_v16 }
 0x4cd   : > { %7835 = vmatpush1.bf16.msra.mxu1 %v7834_v21  ;;  %v14404_v21 = vrot.slane %v14399_v18, %v17053_v40 }
 0x4ce   : > { %7837 = vmatprep.subr.bf16.mxu1 %v7836_v58 }
 0x4cf   : > { %7197 = vmatprep.mubr.msk.f32.mxu0 %vm4338_vm14, %v14404_v21 }
 0x4d1   : > { %7839 = vmatpush1.bf16.msra.mxu1 %v7838_v2 }
 0x4d2   : > { %7841 = vmatprep.subr.bf16.mxu1 %v7840_v47 }
 0x4d5   : > { %7843 = vmatpush1.bf16.msra.mxu1 %v7842_v63 }
 0x4d8   : > { %6213 = vmatmul.mubr.f32.vlgmr.msra.gmra.mrb[10].mxu1 %v14239_v4 }
 0x4d9   : > { %7198 = vmatprep.mubr.msk.f32.mxu1 %vm4338_vm14, %v14404_v21 }
 0x50d   : > { %v5788_v57 = vpop.f32.mrb[8].mxu0 }
 0x50e   : > { %v8052_v15 = vadd.f32 %v5788_v57, %v14305_v61  ;;  %v5790_v12 = vpop.f32.mrb[9].mxu0 }
 0x50f   : > { %v8053_v35 = vadd.f32 %v5790_v12, %v14305_v61 }
 0x510   : > { %vm6219_vm13 = vcmp.ge.f32.partialorder %v8052_v15, 0.0  ;;  %v6227_v5 = vmul.f32 0.01, %v8052_v15 }
 0x511   : > { %v6228_v39 = vmul.f32 0.01, %v8053_v35  ;;  %vm6220_vm15 = vcmp.ge.f32.partialorder %v8053_v35, 0.0 }
 0x512   : > { %v14308_v14 = vsel %vm6219_vm13, %v8052_v15, %v6227_v5 }
 0x513   : > { %6411 = vrot.lane.b32.xlu1 %v14308_v14, %s8218_s18  ;;  %6249 = vrot.lane.b32.xlu0 %v14308_v14, %s8216_s30  ;;  %v14319_v4 = vsel %vm6220_vm15, %v8053_v35, %v6228_v39  ;;  %v17054_v39 = vld [vmem:[#allocation10_spill] sm:$0xff] }
 0x517   : > { %6481 = vrot.lane.b32.xlu1 %v14308_v14, %s8224_s21  ;;  %6279 = vrot.lane.b32.xlu0 %v14308_v14, %s8217_s17 }
 0x51b   : > { %6251 = vrot.lane.b32.xlu1 %v14319_v4, %s8216_s30  ;;  %6309 = vrot.lane.b32.xlu0 %v14308_v14, %s8219_s12 }
 0x51f   : > { %6281 = vrot.lane.b32.xlu1 %v14319_v4, %s8217_s17  ;;  %6339 = vrot.lane.b32.xlu0 %v14308_v14, %s8222_s20 }
 0x523   : > { %6311 = vrot.lane.b32.xlu1 %v14319_v4, %s8219_s12  ;;  %6376 = vrot.lane.b32.xlu0 %v14308_v14, %s8215_s29 }
 0x527   : > { %6341 = vrot.lane.b32.xlu1 %v14319_v4, %s8222_s20  ;;  %6446 = vrot.lane.b32.xlu0 %v14308_v14, %s8221_s19 }
 0x52b   : > { %6378 = vrot.lane.b32.xlu1 %v14319_v4, %s8215_s29  ;;  %6413 = vrot.lane.b32.xlu0 %v14319_v4, %s8218_s18 }
 0x52f   : > { %6448 = vrot.lane.b32.xlu1 %v14319_v4, %s8221_s19  ;;  %6483 = vrot.lane.b32.xlu0 %v14319_v4, %s8224_s21 }
 0x53f   : > { %v5930_v26 = vpop.f32.mrb[8].mxu1 }
 0x540   : > { %v8054_v32 = vadd.f32 %v5930_v26, %v14305_v61  ;;  %v5932_v43 = vpop.f32.mrb[9].mxu1 }
 0x541   : > { %v8055_v53 = vadd.f32 %v5932_v43, %v14305_v61  ;;  %v17055_v43 = vld [vmem:[#allocation82_spill] sm:$0xff] }
 0x542   : > { %vm6221_vm0 = vcmp.ge.f32.partialorder %v8054_v32, 0.0  ;;  %v6229_v31 = vmul.f32 0.01, %v8054_v32 }
 0x543   : > { %v6230_v48 = vmul.f32 0.01, %v8055_v53  ;;  %vm6222_vm9 = vcmp.ge.f32.partialorder %v8055_v53, 0.0 }
 0x544   : > { %v14346_v55 = vsel %vm6221_vm0, %v8054_v32, %v6229_v31 }
 0x545   : > { %6415 = vrot.lane.b32.xlu1 %v14346_v55, %s8218_s18  ;;  %6380 = vrot.lane.b32.xlu0 %v14346_v55, %s8215_s29  ;;  %v14361_v10 = vsel %vm6222_vm9, %v8055_v53, %v6230_v48  ;;  %v17056_v53 = vld [vmem:[#allocation27_spill] sm:$0xff] }
 0x549   : > { %6253 = vrot.lane.b32.xlu1 %v14346_v55, %s8216_s30  ;;  %6450 = vrot.lane.b32.xlu0 %v14346_v55, %s8221_s19 }
 0x54d   : > { %6485 = vrot.lane.b32.xlu1 %v14346_v55, %s8224_s21  ;;  %6283 = vrot.lane.b32.xlu0 %v14346_v55, %s8217_s17 }
 0x551   : > { %6285 = vrot.lane.b32.xlu1 %v14361_v10, %s8217_s17  ;;  %6313 = vrot.lane.b32.xlu0 %v14346_v55, %s8219_s12 }
 0x555   : > { %6315 = vrot.lane.b32.xlu1 %v14361_v10, %s8219_s12  ;;  %6343 = vrot.lane.b32.xlu0 %v14346_v55, %s8222_s20 }
 0x559   : > { %6345 = vrot.lane.b32.xlu1 %v14361_v10, %s8222_s20  ;;  %6255 = vrot.lane.b32.xlu0 %v14361_v10, %s8216_s30 }
 0x55d   : > { %6382 = vrot.lane.b32.xlu0 %v14361_v10, %s8215_s29 }
 0x561   : > { %6417 = vrot.lane.b32.xlu0 %v14361_v10, %s8218_s18 }
 0x565   : > { %6452 = vrot.lane.b32.xlu0 %v14361_v10, %s8221_s19 }
 0x569   : > { %6487 = vrot.lane.b32.xlu0 %v14361_v10, %s8224_s21 }
 0x57b   : > { %v6072_v1 = vpop.f32.mrb[10].mxu0 }
 0x57c   : > { %v8056_v62 = vadd.f32 %v6072_v1, %v14305_v61  ;;  %v6074_v3 = vpop.f32.mrb[11].mxu0  ;;  %v17057_v1 = vld [vmem:[#allocation56_spill] sm:$0xff] }
 0x57d   : > { %v8057_v16 = vadd.f32 %v6074_v3, %v14305_v61 }
 0x57e   : > { %vm6223_vm10 = vcmp.ge.f32.partialorder %v8056_v62, 0.0  ;;  %v6231_v9 = vmul.f32 0.01, %v8056_v62 }
 0x57f   : > { %v6232_v51 = vmul.f32 0.01, %v8057_v16  ;;  %vm6224_vm11 = vcmp.ge.f32.partialorder %v8057_v16, 0.0 }
 0x580   : > { %v14384_v37 = vsel %vm6223_vm10, %v8056_v62, %v6231_v9 }
 0x581   : > { %6257 = vrot.lane.b32.xlu0 %v14384_v37, %s8216_s30  ;;  %6384 = vrot.lane.b32.xlu1 %v14384_v37, %s8215_s29  ;;  %v14422_v63 = vsel %vm6224_vm11, %v8057_v16, %v6232_v51 }
 0x585   : > { %6287 = vrot.lane.b32.xlu0 %v14384_v37, %s8217_s17  ;;  %6419 = vrot.lane.b32.xlu1 %v14384_v37, %s8218_s18  ;;  %v14394_v24 = vpop.permute.xlu1 %6411  ;;  %v6250_v25 = vpop.permute.xlu0 %6249 }
 0x586   : > { %v6272_v12 = vsel %vm635_vm1, 0.0, %v6250_v25  ;;  %v6438_v16 = vsel %vm1215_vm4, 0.0, %v14394_v24 }
 0x587   : > { %v6273_v62 = vmul.f32 %v6272_v12, %v17057_v1 }
 0x589   : > { %6317 = vrot.lane.b32.xlu0 %v14384_v37, %s8219_s12  ;;  %6454 = vrot.lane.b32.xlu1 %v14384_v37, %s8221_s19  ;;  %v14414_v29 = vpop.permute.xlu1 %6481  ;;  %v6280_v58 = vpop.permute.xlu0 %6279 }
 0x58a   : > { %v6302_v57 = vsel %vm721_vm3, 0.0, %v6280_v58 }
 0x58b   : > { %v6303_v26 = vmul.f32 %v6302_v57, %v17054_v39  ;;  %v17058_v39 = vld [vmem:[#allocation55_spill] sm:$0xff] }
 0x58d   : > { %6347 = vrot.lane.b32.xlu0 %v14384_v37, %s8222_s20  ;;  %6489 = vrot.lane.b32.xlu1 %v14384_v37, %s8224_s21  ;;  %v14420_v2 = vpop.permute.xlu1 %6251  ;;  %v6310_v47 = vpop.permute.xlu0 %6309  ;;  %v7898_v40 = vpack.c.bf16 %v6303_v26, %v6273_v62 }
 0x58e   : > { %v6261_v15 = vsel %vm635_vm1, %v6250_v25, %v14420_v2  ;;  %v6332_v1 = vsel %vm830_vm5, 0.0, %v6310_v47 }
 0x58f   : > { %v6274_v31 = vmul.f32 %v6261_v15, %v17055_v43  ;;  %v6526_v45 = vmul.f32 %v6261_v15, %v17061_v49  ;;  %v17067_v49 = vld [vmem:[#allocation35_spill] sm:$0xff] }
 0x591   : > { %6386 = vrot.lane.b32.xlu0 %v14422_v63, %s8215_s29  ;;  %6259 = vrot.lane.b32.xlu1 %v14422_v63, %s8216_s30  ;;  %v14432_v5 = vpop.permute.xlu1 %6281  ;;  %v6340_v35 = vpop.permute.xlu0 %6339 }
 0x592   : > { %v6291_v32 = vsel %vm721_vm3, %v6280_v58, %v14432_v5  ;;  %v6362_v51 = vsel %vm931_vm7, 0.0, %v6340_v35 }
 0x593   : > { %v6304_v48 = vmul.f32 %v6291_v32, %v17056_v53  ;;  %v6363_v34 = vmul.f32 %v6362_v51, %v17062_v44  ;;  %v17066_v44 = vld [vmem:[#allocation34_spill] sm:$0xff]  ;;  %v6542_v52 = vmul.f32 %v6291_v32, %v17072_v33  ;;  %v17079_v32 = vld [vmem:[#allocation29_spill] sm:$0xff] }
 0x595   : > { %6421 = vrot.lane.b32.xlu0 %v14422_v63, %s8218_s18  ;;  %6289 = vrot.lane.b32.xlu1 %v14422_v63, %s8217_s17  ;;  %v14444_v3 = vpop.permute.xlu1 %6311  ;;  %v14446_v9 = vpop.permute.xlu0 %6376  ;;  %v7896_v25 = vpack.c.bf16 %v6304_v48, %v6274_v31  ;;  %v17059_v31 = vld [vmem:[#allocation54_spill] sm:$0xff]  ;;  %v6508_v48 = vsel %vm1425_vm8, 0.0, %v14414_v29 }
 0x596   : > { %v6403_v58 = vsel %vm1110_vm2, 0.0, %v14446_v9  ;;  %v6321_v53 = vsel %vm830_vm5, %v6310_v47, %v14444_v3  ;;  %v6439_v26 = vmul.f32 %v6438_v16, %v17059_v31  ;;  %v17063_v31 = vld [vmem:[#allocation30_spill] sm:$0xff]  ;;  %v6509_v15 = vmul.f32 %v6508_v48, %v17067_v49  ;;  %v17074_v49 = vld [vmem:[#allocation73_spill] sm:$0xff] }
 0x597   : > { %v6404_v43 = vmul.f32 %v6403_v58, %v17058_v39  ;;  %7897 = vmatprep.subr.bf16.mxu1 %v7896_v25  ;;  %v17060_v39 = vld [vmem:[#allocation60_spill] sm:$0xff]  ;;  %v6334_v38 = vmul.f32 %v6321_v53, %v17063_v31  ;;  %v17069_v31 = vld [vmem:[#allocation66_spill] sm:$0xff] }
 0x598   : > { %7899 = vmatpush1.bf16.msra.mxu1 %v7898_v40  ;;  %v6525_v8 = vmul.f32 %v6272_v12, %v17069_v31  ;;  %v17076_v12 = vld [vmem:[#allocation13_spill] sm:$0xff] }
 0x599   : > { %6456 = vrot.lane.b32.xlu0 %v14422_v63, %s8221_s19  ;;  %6319 = vrot.lane.b32.xlu1 %v14422_v63, %s8219_s12  ;;  %v14464_v62 = vpop.permute.xlu1 %6341  ;;  %v14466_v58 = vpop.permute.xlu0 %6446  ;;  %v7852_v25 = vpack.c.bf16 %v6404_v43, %v17060_v39 }
 0x59a   : > { %v6351_v40 = vsel %vm931_vm7, %v6340_v35, %v14464_v62  ;;  %v6473_v16 = vsel %vm1320_vm6, 0.0, %v14466_v58  ;;  %v17068_v35 = vld [vmem:[#allocation80_spill] sm:$0xff] }
 0x59b   : > { %v6364_v47 = vmul.f32 %v6351_v40, %v17064_v20  ;;  %v6474_v50 = vmul.f32 %v6473_v16, %v17065_v36  ;;  %7853 = vmatprep.subr.bf16.mxu0 %v7852_v25  ;;  %v6333_v43 = vmul.f32 %v6332_v1, %v17068_v35  ;;  %v6558_v36 = vmul.f32 %v6321_v53, %v17070_v22  ;;  %v17071_v16 = vld [vmem:[#allocation74_spill] sm:$0xff]  ;;  %v17078_v53 = vld [vmem:[#allocation43_spill] sm:$0xff] }
 0x59c   : > { %7855 = vmatpush1.bf16.msra.mxu0 %v17066_v44  ;;  %v7860_v25 = vpack.c.bf16 %v6526_v45, %v6509_v15  ;;  %v17073_v44 = vld [vmem:[#allocation33_spill] sm:$0xff]  ;;  %v6557_v35 = vmul.f32 %v6332_v1, %v17074_v49  ;;  %v17077_v22 = vld [vmem:[#allocation14_spill] sm:$0xff]  ;;  %v6581_v15 = vmul.f32 %v14308_v14, %v17079_v32 }
 0x59d   : > { %6491 = vrot.lane.b32.xlu0 %v14422_v63, %s8224_s21  ;;  %6349 = vrot.lane.b32.xlu1 %v14422_v63, %s8222_s20  ;;  %v7856_v39 = vpack.c.bf16 %v6474_v50, %v6439_v26  ;;  %v7900_v60 = vpack.c.bf16 %v6364_v47, %v6334_v38  ;;  %v7902_v20 = vpack.c.bf16 %v6363_v34, %v6333_v43  ;;  %v17075_v50 = vld [vmem:[#allocation16_spill] sm:$0xff]  ;;  %v6414_v43 = vpop.permute.xlu0 %6413 }
 0x59e   : > { %v7862_v48 = vpack.c.bf16 %v6525_v8, %v17073_v44  ;;  %v6574_v38 = vmul.f32 %v6351_v40, %v17075_v50  ;;  %v7864_v26 = vpack.c.bf16 %v6558_v36, %v6542_v52  ;;  %v6541_v34 = vmul.f32 %v6302_v57, %v17076_v12  ;;  %v6379_v57 = vpop.permute.xlu1 %6378 }
 0x59f   : > { %7857 = vmatprep.subr.bf16.mxu0 %v7856_v39  ;;  %7901 = vmatprep.subr.bf16.mxu1 %v7900_v60  ;;  %v6582_v60 = vmul.f32 %v14319_v4, %v17077_v22  ;;  %v6573_v47 = vmul.f32 %v6362_v51, %v17078_v53  ;;  %v6390_v36 = vsel %vm1110_vm2, %v14446_v9, %v6379_v57  ;;  %v17086_v53 = vld [vmem:[#allocation79_spill] sm:$0xff] }
 0x5a0   : > { %7859 = vmatpush1.bf16.msra.mxu0 %v17071_v16  ;;  %7903 = vmatpush1.bf16.msra.mxu1 %v7902_v20  ;;  %v7866_v45 = vpack.c.bf16 %v6557_v35, %v6541_v34  ;;  %v17082_v35 = vld [vmem:[#allocation69_spill] sm:$0xff]  ;;  %v17084_v34 = vld [vmem:[#allocation70_spill] sm:$0xff] }
 0x5a1   : > { %7861 = vmatprep.subr.bf16.mxu0 %v7860_v25  ;;  %v7868_v33 = vpack.c.bf16 %v6582_v60, %v6574_v38  ;;  %v7870_v8 = vpack.c.bf16 %v6581_v15, %v6573_v47  ;;  %v6484_v20 = vpop.permute.xlu0 %6483  ;;  %v6425_v25 = vsel %vm1215_vm4, %v14394_v24, %v6414_v43  ;;  %v6595_v50 = vmul.f32 %v6390_v36, %v17082_v35  ;;  %v17083_v38 = vld [vmem:[#allocation67_spill] sm:$0xff] }
 0x5a2   : > { %v6449_v51 = vpop.permute.xlu1 %6448  ;;  %v6609_v9 = vmul.f32 %v6425_v25, %v17083_v38  ;;  %v17085_v60 = vld [vmem:[#allocation63_spill] sm:$0xff]  ;;  %v17090_v38 = vld [vmem:[#allocation26_spill] sm:$0xff] }
 0x5a3   : > { %v6460_v32 = vsel %vm1320_vm6, %v14466_v58, %v6449_v51 }
 0x5a4   : > { %7863 = vmatpush1.bf16.msra.mxu0 %v7862_v48  ;;  %v17081_v48 = vld [vmem:[#allocation31_spill] sm:$0xff] }
 0x5a5   : > { %7865 = vmatprep.subr.bf16.mxu0 %v7864_v26  ;;  %v6370_v49 = vmul.f32 %v14319_v4, %v17081_v48  ;;  %v17087_v4 = vld [vmem:[#allocation57_spill] sm:$0xff] }
 0x5a6   : > { %v17089_v48 = vld [vmem:[#allocation61_spill] sm:$0xff] }
 0x5a8   : > { %7867 = vmatpush1.bf16.msra.mxu0 %v7866_v45 }
 0x5a9   : > { %7869 = vmatprep.subr.bf16.mxu0 %v7868_v33  ;;  %v6405_v33 = vmul.f32 %v6390_v36, %v17087_v4  ;;  %v17095_v4 = vld [vmem:[#allocation20_spill] sm:$0xff] }
 0x5ab   : > { %v6214_v1 = vpop.f32.mrb[10].mxu1 }
 0x5ac   : > { %v8058_v52 = vadd.f32 %v6214_v1, %v14305_v61  ;;  %v6216_v40 = vpop.f32.mrb[11].mxu1  ;;  %7871 = vmatpush1.bf16.msra.mxu0 %v7870_v8 }
 0x5ad   : > { %v8059_v12 = vadd.f32 %v6216_v40, %v14305_v61 }
 0x5ae   : > { %vm6225_vm12 = vcmp.ge.f32.partialorder %v8058_v52, 0.0  ;;  %v6233_v39 = vmul.f32 0.01, %v8058_v52 }
 0x5af   : > { %v6234_v36 = vmul.f32 0.01, %v8059_v12  ;;  %vm6226_vm13 = vcmp.ge.f32.partialorder %v8059_v12, 0.0 }
 0x5b0   : > { %v14499_v31 = vsel %vm6225_vm12, %v8058_v52, %v6233_v39  ;;  %v17088_v52 = vld [vmem:[#allocation78_spill] sm:$0xff]  ;;  %v6495_v39 = vsel %vm1425_vm8, %v14414_v29, %v6484_v20 }
 0x5b1   : > { %17080 = vst [vmem:[#allocation247_spill] sm:$0xff] %v14499_v31  ;;  %6517 = vrot.lane.b32.xlu0 %v14499_v31, %s8216_s30  ;;  %6388 = vrot.lane.b32.xlu1 %v14499_v31, %s8215_s29  ;;  %v6369_v40 = vmul.f32 %v14308_v14, %v17088_v52 }
 0x5b5   : > { %6533 = vrot.lane.b32.xlu0 %v14499_v31, %s8217_s17  ;;  %6423 = vrot.lane.b32.xlu1 %v14499_v31, %s8218_s18 }
 0x5b7   : > { %v14513_v16 = vpop.permute.xlu1 %6415  ;;  %v14515_v44 = vpop.permute.xlu0 %6380 }
 0x5b8   : > { %v6426_v24 = vsel %vm1215_vm4, %v6414_v43, %v14513_v16  ;;  %v6391_v26 = vsel %vm1110_vm2, %v6379_v57, %v14515_v44  ;;  %v7874_v57 = vpack.c.bf16 %v6609_v9, %v6595_v50  ;;  %v17093_v9 = vld [vmem:[#allocation64_spill] sm:$0xff] }
 0x5b9   : > { %v6610_v22 = vmul.f32 %v6426_v24, %v17084_v34  ;;  %v6406_v45 = vmul.f32 %v6391_v26, %v17085_v60  ;;  %v6596_v47 = vmul.f32 %v6391_v26, %v17086_v53  ;;  %6549 = vrot.lane.b32.xlu0 %v14499_v31, %s8219_s12  ;;  %6458 = vrot.lane.b32.xlu1 %v14499_v31, %s8221_s19  ;;  %v17091_v34 = vld [vmem:[#allocation75_spill] sm:$0xff]  ;;  %v17094_v60 = vld [vmem:[#allocation58_spill] sm:$0xff] }
 0x5ba   : > { %v6441_v35 = vmul.f32 %v6426_v24, %v17089_v48  ;;  %v7906_v26 = vpack.c.bf16 %v6405_v33, %v6369_v40  ;;  %v6623_v24 = vmul.f32 %v6460_v32, %v17093_v9  ;;  %v17100_v9 = vld [vmem:[#allocation88_spill] sm:$0xff] }
 0x5bb   : > { %v6254_v15 = vpop.permute.xlu1 %6253  ;;  %v14536_v8 = vpop.permute.xlu0 %6450  ;;  %v7872_v61 = vpack.c.bf16 %v6610_v22, %v6596_v47  ;;  %v7904_v1 = vpack.c.bf16 %v6406_v45, %v6370_v49  ;;  %v6475_v22 = vmul.f32 %v6460_v32, %v17091_v34  ;;  %v17092_v49 = vld [vmem:[#allocation46_spill] sm:$0xff]  ;;  %v6637_v45 = vmul.f32 %v6495_v39, %v17094_v60  ;;  %v17097_v34 = vld [vmem:[#allocation28_spill] sm:$0xff] }
 0x5bc   : > { %v6461_v43 = vsel %vm1320_vm6, %v6449_v51, %v14536_v8  ;;  %v6440_v50 = vmul.f32 %v6425_v25, %v17092_v49  ;;  %v14558_v47 = vsel %vm6226_vm13, %v8059_v12, %v6234_v36  ;;  %v14576_v36 = vsel %vm635_vm1, %v14420_v2, %v6254_v15  ;;  %v17099_v49 = vld [vmem:[#allocation85_spill] sm:$0xff] }
 0x5bd   : > { %v6476_v58 = vmul.f32 %v6461_v43, %v17090_v38  ;;  %7873 = vmatprep.subr.bf16.mxu0 %v7872_v61  ;;  %7905 = vmatprep.subr.bf16.mxu1 %v7904_v1  ;;  %v6624_v33 = vmul.f32 %v6461_v43, %v17095_v4  ;;  %v17096_v61 = vld [vmem:[#allocation18_spill] sm:$0xff] }
 0x5be   : > { %6565 = vrot.lane.b32.xlu0 %v14499_v31, %s8222_s20  ;;  %6493 = vrot.lane.b32.xlu1 %v14499_v31, %s8224_s21  ;;  %v7910_v52 = vpack.c.bf16 %v6475_v22, %v6440_v50  ;;  %v6712_v43 = vld [vmem:[#allocation2] sm:$0x1]  ;;  %v6527_v22 = vmul.f32 %v14576_v36, %v17097_v34 }
 0x5bf   : > { %7875 = vmatpush1.bf16.msra.mxu0 %v7874_v57  ;;  %v14551_v14 = vpop.permute.xlu1 %6485  ;;  %v6284_v29 = vpop.permute.xlu0 %6283  ;;  %v7908_v51 = vpack.c.bf16 %v6476_v58, %v6441_v35  ;;  %7907 = vmatpush1.bf16.msra.mxu1 %v7906_v26  ;;  %v7878_v57 = vpack.c.bf16 %v6637_v45, %v6623_v24  ;;  %v17101_v45 = vld [vmem:[#allocation100_spill] sm:$0xff]  ;;  %v17146_v31 = vld [vmem:[#allocation138_spill] sm:$0xff] }
 0x5c0   : > { %v6496_v53 = vsel %vm1425_vm8, %v6484_v20, %v14551_v14  ;;  %v14580_v48 = vsel %vm721_vm3, %v14432_v5, %v6284_v29 }
 0x5c1   : > { %v6638_v1 = vmul.f32 %v6496_v53, %v17096_v61  ;;  %7909 = vmatprep.subr.bf16.mxu1 %v7908_v51  ;;  %v6656_v50 = vmul.f32 %v14580_v48, %v17099_v49  ;;  %v17103_v61 = vld [vmem:[#allocation76_spill] sm:$0xff] }
 0x5c2   : > { %6589 = vrot.lane.b32.xlu0 %v14558_v47, %s8215_s29  ;;  %6519 = vrot.lane.b32.xlu1 %v14558_v47, %s8216_s30  ;;  %s7182_s29 = sshll.u32 %s17257_s16, 3 }
 0x5c3   : > { %v14566_v25 = vpop.permute.xlu1 %6285  ;;  %v6314_v32 = vpop.permute.xlu0 %6313  ;;  %v7876_v40 = vpack.c.bf16 %v6638_v1, %v6624_v33  ;;  %7911 = vmatpush1.bf16.msra.mxu1 %v7910_v52 }
 0x5c4   : > { %v14584_v35 = vsel %vm721_vm3, %v6284_v29, %v14566_v25  ;;  %v17098_v29 = vld [vmem:[#allocation41_spill] sm:$0xff] }
 0x5c5   : > { %7877 = vmatprep.subr.bf16.mxu0 %v7876_v40  ;;  %v6511_v51 = vmul.f32 %v6496_v53, %v17098_v29  ;;  %v6657_v24 = vmul.f32 %v14584_v35, %v17100_v9  ;;  %v17104_v53 = vld [vmem:[#allocation23_spill] sm:$0xff]  ;;  %v14625_v40 = vsel %vm830_vm5, %v14444_v3, %v6314_v32  ;;  %v17107_v29 = vld [vmem:[#allocation94_spill] sm:$0xff]  ;;  %v17109_v3 = vld [vmem:[#allocation97_spill] sm:$0xff] }
 0x5c6   : > { %6617 = vrot.lane.b32.xlu0 %v14558_v47, %s8221_s19  ;;  %7879 = vmatpush1.bf16.msra.mxu0 %v7878_v57  ;;  %v6647_v52 = vmul.f32 %v14576_v36, %v17104_v53  ;;  %v17105_v57 = vld [vmem:[#allocation93_spill] sm:$0xff] }
 0x5c7   : > { %6535 = vrot.lane.b32.xlu1 %v14558_v47, %s8217_s17  ;;  %v14572_v20 = vpop.permute.xlu1 %6315  ;;  %v6344_v12 = vpop.permute.xlu0 %6343 }
 0x5c8   : > { %v14594_v2 = vsel %vm830_vm5, %v6314_v32, %v14572_v20  ;;  %v14613_v60 = vsel %vm931_vm7, %v14464_v62, %v6344_v12 }
 0x5c9   : > { %v6560_v62 = vmul.f32 %v14594_v2, %v17105_v57  ;;  %v6666_v49 = vmul.f32 %v14594_v2, %v17107_v29  ;;  %v6674_v32 = vmul.f32 %v14613_v60, %v17109_v3  ;;  %v17110_v57 = vld [vmem:[#allocation90_spill] sm:$0xff]  ;;  %v17112_v29 = vld [vmem:[#allocation99_spill] sm:$0xff] }
 0x5ca   : > { %6715 = vperm.xlu0 %8140, %v6712_v43   ;;  %v17106_v43 = vld [vmem:[#allocation44_spill] sm:$0xff]  ;;  %v6559_v59 = vmul.f32 %v14625_v40, %v17110_v57  ;;  %v17118_v3 = vld [vmem:[#allocation114_spill] sm:$0xff] }
 0x5cb   : > { %6551 = vrot.lane.b32.xlu1 %v14558_v47, %s8219_s12  ;;  %v14588_v38 = vpop.permute.xlu1 %6345  ;;  %v14590_v58 = vpop.permute.xlu0 %6255  ;;  %v6510_v34 = vmul.f32 %v6495_v39, %v17106_v43  ;;  %v17111_v39 = vld [vmem:[#allocation91_spill] sm:$0xff] }
 0x5cc   : > { %v14598_v5 = vsel %vm931_vm7, %v6344_v12, %v14588_v38  ;;  %v14602_v26 = vsel %vm635_vm1, %v6254_v15, %v14590_v58  ;;  %v17102_v15 = vld [vmem:[#allocation3_spill] sm:$0xff]  ;;  %v6665_v43 = vmul.f32 %v14625_v40, %v17111_v39  ;;  %v17120_v39 = vld [vmem:[#allocation120_spill] sm:$0xff] }
 0x5cd   : > { %v6675_v4 = vmul.f32 %v14598_v5, %v17101_v45  ;;  %v6528_v33 = vmul.f32 %v14602_v26, %v17102_v15  ;;  %v6648_v1 = vmul.f32 %v14602_v26, %v17103_v61  ;;  %v7882_v15 = vpack.c.bf16 %v6656_v50, %v6647_v52  ;;  %v17108_v61 = vld [vmem:[#allocation87_spill] sm:$0xff] }
 0x5ce   : > { %v6544_v53 = vmul.f32 %v14584_v35, %v17108_v61  ;;  %v7914_v11 = vpack.c.bf16 %v6527_v22, %v6510_v34 }
 0x5cf   : > { %6567 = vrot.lane.b32.xlu1 %v14558_v47, %s8222_s20  ;;  %v6383_v12 = vpop.permute.xlu0 %6382  ;;  %v7880_v9 = vpack.c.bf16 %v6657_v24, %v6648_v1  ;;  %v7912_v45 = vpack.c.bf16 %v6528_v33, %v6511_v51  ;;  %v7884_v6 = vpack.c.bf16 %v6675_v4, %v6666_v49  ;;  %v6576_v51 = vmul.f32 %v14598_v5, %v17112_v29  ;;  %v17113_v33 = vld [vmem:[#allocation84_spill] sm:$0xff]  ;;  %v17114_v4 = vld [vmem:[#allocation105_spill] sm:$0xff]  ;;  %s489_s20 = scalar_lea.vmem %s15165_s13, %s7182_s29 }
 0x5d0   : > { %v7916_v24 = vpack.c.bf16 %v6560_v62, %v6544_v53  ;;  %v6543_v22 = vmul.f32 %v14580_v48, %v17113_v33  ;;  %v7886_v1 = vpack.c.bf16 %v6674_v32, %v6665_v43  ;;  %v6584_v52 = vmul.f32 %v14361_v10, %v17114_v4  ;;  %v17115_v49 = vld [vmem:[#allocation96_spill] sm:$0xff]  ;;  %v17122_v4 = vld [vmem:[#allocation126_spill] sm:$0xff] }
 0x5d1   : > { %7881 = vmatprep.subr.bf16.mxu0 %v7880_v9  ;;  %7913 = vmatprep.subr.bf16.mxu1 %v7912_v45  ;;  %v6575_v9 = vmul.f32 %v14613_v60, %v17115_v49  ;;  %v14691_v49 = vsel %vm1110_vm2, %v14515_v44, %v6383_v12 }
 0x5d2   : > { %7883 = vmatpush1.bf16.msra.mxu0 %v7882_v15  ;;  %7915 = vmatpush1.bf16.msra.mxu1 %v7914_v11  ;;  %v7918_v34 = vpack.c.bf16 %v6559_v59, %v6543_v22  ;;  %v7920_v15 = vpack.c.bf16 %v6584_v52, %v6576_v51  ;;  %v17116_v11 = vld [vmem:[#allocation106_spill] sm:$0xff]  ;;  %v17121_v22 = vld [vmem:[#allocation119_spill] sm:$0xff] }
 0x5d3   : > { %6603 = vrot.lane.b32.xlu1 %v14558_v47, %s8218_s18  ;;  %v6418_v50 = vpop.permute.xlu0 %6417  ;;  %7885 = vmatprep.subr.bf16.mxu0 %v7884_v6  ;;  %v6583_v6 = vmul.f32 %v14346_v55, %v17116_v11  ;;  %v17117_v59 = vld [vmem:[#allocation110_spill] sm:$0xff]  ;;  %v17123_v11 = vld [vmem:[#allocation104_spill] sm:$0xff]  ;;  %s494_s18 = scalar_lea.vmem %s15166_s14, %s7182_s29 }
 0x5d4   : > { %7917 = vmatprep.subr.bf16.mxu1 %v7916_v24  ;;  %v6427_v45 = vsel %vm1215_vm4, %v14513_v16, %v6418_v50  ;;  %v17119_v16 = vld [vmem:[#allocation118_spill] sm:$0xff] }
 0x5d5   : > { %v14661_v53 = vmul.f32 %v6427_v45, %v17117_v59  ;;  %v14664_v32 = vmul.f32 %v6427_v45, %v17118_v3  ;;  %v7922_v29 = vpack.c.bf16 %v6583_v6, %v6575_v9  ;;  %v6687_v6 = vmul.f32 %v14691_v49, %v17123_v11  ;;  %v17125_v3 = vld [vmem:[#allocation111_spill] sm:$0xff] }
 0x5d6   : > { %7887 = vmatpush1.bf16.msra.mxu0 %v7886_v1  ;;  %7919 = vmatpush1.bf16.msra.mxu1 %v7918_v34 }
 0x5d7   : > { %6631 = vrot.lane.b32.xlu1 %v14558_v47, %s8224_s21  ;;  %v6453_v62 = vpop.permute.xlu0 %6452  ;;  %7921 = vmatprep.subr.bf16.mxu1 %v7920_v15 }
 0x5d8   : > { %v6462_v61 = vsel %vm1320_vm6, %v14536_v8, %v6453_v62  ;;  %v17128_v8 = vld [vmem:[#allocation108_spill] sm:$0xff] }
 0x5d9   : > { %v14667_v57 = vmul.f32 %v6462_v61, %v17119_v16  ;;  %v14670_v43 = vmul.f32 %v6462_v61, %v17120_v39  ;;  %v14681_v1 = vmul.f32 %v6462_v61, %v17121_v22  ;;  %v17124_v61 = vld [vmem:[#allocation109_spill] sm:$0xff]  ;;  %v17126_v16 = vld [vmem:[#allocation112_spill] sm:$0xff] }
 0x5da   : > { %7923 = vmatpush1.bf16.msra.mxu1 %v7922_v29  ;;  %v6681_v44 = vmul.f32 %v14346_v55, %v17126_v16  ;;  %v17129_v16 = vld [vmem:[#allocation116_spill] sm:$0xff] }
 0x5db   : > { %v7894_v51 = vpack.c.bf16 %v14670_v43, %v14664_v32  ;;  %v6488_v24 = vpop.permute.xlu0 %6487  ;;  %v6682_v32 = vmul.f32 %v14361_v10, %v17125_v3 }
 0x5dc   : > { %v14678_v33 = vsel %vm1425_vm8, %v14551_v14, %v6488_v24  ;;  %v7890_v22 = vpack.c.bf16 %v6687_v6, %v6681_v44  ;;  %v17131_v44 = vld [vmem:[#allocation140_spill] sm:$0xff] }
 0x5dd   : > { %v14685_v52 = vmul.f32 %v14678_v33, %v17122_v4  ;;  %v17127_v4 = vld [vmem:[#allocation113_spill] sm:$0xff] }
 0x5de   : > { %v6611_v11 = vmul.f32 %v6427_v45, %v17127_v4  ;;  %v17133_v4 = vld [vmem:[#allocation117_spill] sm:$0xff] }
 0x5f3   : > { %v14693_v9 = vpop.permute.xlu0 %6257  ;;  %v14695_v15 = vpop.permute.xlu1 %6384 }
 0x5f4   : > { %v14699_v14 = vsel %vm1110_vm2, %v6383_v12, %v14695_v15 }
 0x5f5   : > { %v6688_v59 = vmul.f32 %v14699_v14, %v17124_v61  ;;  %v6598_v61 = vmul.f32 %v14699_v14, %v17128_v8 }
 0x5f7   : > { %v14709_v39 = vpop.permute.xlu0 %6287  ;;  %v14711_v43 = vpop.permute.xlu1 %6419  ;;  %v7888_v29 = vpack.c.bf16 %v6688_v59, %v6682_v32 }
 0x5f8   : > { %v14715_v12 = vsel %vm1215_vm4, %v6418_v50, %v14711_v43  ;;  %v14723_v3 = vsel %vm721_vm3, %v14566_v25, %v14709_v39  ;;  %v6597_v50 = vmul.f32 %v14691_v49, %v17130_v56  ;;  %v17132_v56 = vld [vmem:[#allocation147_spill] sm:$0xff] }
 0x5f9   : > { %v6612_v34 = vmul.f32 %v14715_v12, %v17129_v16  ;;  %7889 = vmatprep.subr.bf16.mxu0 %v7888_v29  ;;  %v14742_v29 = vmul.f32 %v14723_v3, %v17131_v44  ;;  %v6694_v16 = vmul.f32 %v14715_v12, %v17133_v4 }
 0x5fa   : > { %7891 = vmatpush1.bf16.msra.mxu0 %v7890_v22  ;;  %v7926_v32 = vpack.c.bf16 %v6611_v11, %v6597_v50 }
 0x5fb   : > { %v14729_v59 = vpop.permute.xlu0 %6317  ;;  %v14731_v6 = vpop.permute.xlu1 %6454  ;;  %v7924_v8 = vpack.c.bf16 %v6612_v34, %v6598_v61  ;;  %v14757_v34 = vmul.f32 %v14384_v37, %v16953_v23 }
 0x5fc   : > { %v6324_v45 = vsel %vm830_vm5, %v14572_v20, %v14729_v59  ;;  %v14738_v25 = vsel %vm1320_vm6, %v6453_v62, %v14731_v6  ;;  %v17137_v20 = vld [vmem:[#allocation19_spill] sm:$0xff] }
 0x5fd   : > { %v14745_v22 = vmul.f32 %v6324_v45, %v17132_v56  ;;  %v6700_v54 = vmul.f32 %v14738_v25, %v17134_v7  ;;  %7925 = vmatprep.subr.bf16.mxu1 %v7924_v8  ;;  %v14762_v61 = vmul.f32 %v6324_v45, %v16960_v28  ;;  %v17136_v28 = vld [vmem:[#allocation154_spill] sm:$0xff] }
 0x5fe   : > { %7927 = vmatpush1.bf16.msra.mxu1 %v7926_v32  ;;  %v17135_v32 = vld [vmem:[#allocation148_spill] sm:$0xff] }
 0x5ff   : > { %v14753_v62 = vpop.permute.xlu0 %6347  ;;  %v14759_v11 = vpop.permute.xlu1 %6489  ;;  %v7892_v8 = vpack.c.bf16 %v6700_v54, %v6694_v16  ;;  %v14772_v44 = vmul.f32 %v6324_v45, %v17135_v32  ;;  %v17140_v45 = vld [vmem:[#allocation133_spill] sm:$0xff]  ;;  %v17141_v16 = vld [vmem:[#allocation83_spill] sm:$0xff] }
 0x600   : > { %v6354_v7 = vsel %vm931_vm7, %v14588_v38, %v14753_v62  ;;  %v14769_v50 = vsel %vm1425_vm8, %v6488_v24, %v14759_v11  ;;  %v6276_v38 = vmul.f32 %v14602_v26, %v17137_v20  ;;  %v6626_v24 = vmul.f32 %v14738_v25, %v17138_v30  ;;  %v17142_v30 = vld [vmem:[#allocation86_spill] sm:$0xff]  ;;  %v17147_v26 = vld [vmem:[#allocation92_spill] sm:$0xff] }
 0x601   : > { %v14775_v23 = vmul.f32 %v6354_v7, %v16966_v0  ;;  %v14778_v56 = vmul.f32 %v6354_v7, %v16949_v17  ;;  %v14781_v4 = vmul.f32 %v6354_v7, %v17136_v28  ;;  %v6640_v54 = vmul.f32 %v14769_v50, %v17139_v42  ;;  %7893 = vmatprep.subr.bf16.mxu0 %v7892_v8  ;;  %v17143_v20 = vld [vmem:[#allocation98_spill] sm:$0xff] }
 0x602   : > { %v6706_v0 = vmul.f32 %v14769_v50, %v17140_v45  ;;  %v6305_v17 = vmul.f32 %v14580_v48, %v17141_v16  ;;  %7895 = vmatpush1.bf16.msra.mxu0 %v7894_v51  ;;  %v6306_v42 = vmul.f32 %v14584_v35, %v17142_v30  ;;  %v6366_v8 = vmul.f32 %v14598_v5, %v17143_v20  ;;  %v17144_v45 = vld [vmem:[#allocation4_spill] sm:$0xff]  ;;  %v17145_v7 = vld [vmem:[#allocation22_spill] sm:$0xff] }
 0x603   : > { %v14803_v28 = vpop.permute.xlu1 %6259  ;;  %v7928_v48 = vpack.c.bf16 %v6640_v54, %v6626_v24  ;;  %v14807_v16 = vrot.slane %v14399_v18, %v17144_v45  ;;  %v6275_v32 = vmul.f32 %v14576_v36, %v17145_v7  ;;  %v6705_v51 = vmul.f32 %v14678_v33, %v17146_v31  ;;  %v17151_v54 = vld [vmem:[#allocation89_spill] sm:$0xff] }
 0x604   : > { %6786 = vmatprep.subr.mxu0 %v6706_v0  ;;  %v6336_v35 = vmul.f32 %v14594_v2, %v17147_v26  ;;  %v7948_v30 = vpack.c.bf16 %v6306_v42, %v6276_v38  ;;  %v17148_v0 = vld [vmem:[#allocation95_spill] sm:$0xff]  ;;  %v14820_v18 = vsel %vm635_vm1, %v14693_v9, %v14803_v28  ;;  %v17149_v36 = vpack.c.bf16 %v14685_v52, %v14681_v1  ;;  %v17152_v7 = vld [vmem:[#allocation141_spill] sm:$0xff]  ;;  %v17155_v26 = vld [vmem:[#allocation146_spill] sm:$0xff] }
 0x605   : > { %7929 = vmatprep.subr.bf16.mxu1 %v7928_v48  ;;  %v7950_v5 = vpack.c.bf16 %v6305_v17, %v6275_v32  ;;  %v6365_v20 = vmul.f32 %v14613_v60, %v17148_v0  ;;  %v14828_v31 = vsel %vm635_vm1, %v14590_v58, %v14693_v9  ;;  %v17150_v2 = vld [vmem:[#allocation107_spill] sm:$0xff]  ;;  %v6335_v17 = vmul.f32 %v14625_v40, %v17151_v54  ;;  %v17153_v52 = vld [vmem:[#allocation137_spill] sm:$0xff] }
 0x606   : > { %6787 = vmatpush1.msra.mxu0 %v6705_v51  ;;  %7931 = vmatpush1.bf16.msra.mxu1 %v17149_v36  ;;  %v6408_v38 = vmul.f32 %v14699_v14, %v17150_v2  ;;  %v7952_v24 = vpack.c.bf16 %v6366_v8, %v6336_v35  ;;  %v6658_v1 = vmul.f32 %v14723_v3, %v17152_v7  ;;  %v17154_v14 = vld [vmem:[#allocation144_spill] sm:$0xff]  ;;  %v17156_v8 = vld [vmem:[#allocation102_spill] sm:$0xff]  ;;  %v17158_v35 = vld [vmem:[#allocation121_spill] sm:$0xff] }
 0x607   : > { %6799 = vmatmul.mubr.f32.vlgmr.msra.gmra.mrb[12].mxu0 %v14807_v16  ;;  %7949 = vmatprep.subr.bf16.mxu0 %v7948_v30  ;;  %v14833_v60 = vpop.permute.xlu1 %6289  ;;  %v6650_v9 = vmul.f32 %v14820_v18, %v17153_v52  ;;  %v6372_v42 = vmul.f32 %v14361_v10, %v17155_v26  ;;  %v7954_v40 = vpack.c.bf16 %v6365_v20, %v6335_v17  ;;  %v17159_v2 = vld [vmem:[#allocation155_spill] sm:$0xff]  ;;  %v17161_v7 = vld [vmem:[#allocation136_spill] sm:$0xff] }
 0x608   : > { %v14842_v58 = vsel %vm721_vm3, %v14709_v39, %v14833_v60  ;;  %7951 = vmatpush1.bf16.msra.mxu0 %v7950_v5  ;;  %7199 = vmatprep.mubr.msk.f32.mxu0 %vm4338_vm14, %v14404_v21  ;;  %v6407_v48 = vmul.f32 %v14691_v49, %v17156_v8  ;;  %v17157_v39 = vld [vmem:[#allocation132_spill] sm:$0xff]  ;;  %v6478_v30 = vmul.f32 %v14738_v25, %v17158_v35  ;;  %v17160_v54 = vld [vmem:[#allocation115_spill] sm:$0xff]  ;;  %v6387_v25 = vpop.permute.xlu0 %6386  ;;  %v17166_v8 = vld [vmem:[#allocation150_spill] sm:$0xff] }
 0x609   : > { %v6659_v32 = vmul.f32 %v14842_v58, %v17154_v14  ;;  %7953 = vmatprep.subr.bf16.mxu0 %v7952_v24  ;;  %v6649_v51 = vmul.f32 %v14828_v31, %v17157_v39  ;;  %v7956_v36 = vpack.c.bf16 %v6408_v38, %v6372_v42  ;;  %v6371_v10 = vmul.f32 %v14346_v55, %v17159_v2  ;;  %v17163_v14 = vld [vmem:[#allocation151_spill] sm:$0xff] }
 0x60a   : > { %v6443_v20 = vmul.f32 %v14715_v12, %v17160_v54  ;;  %v6530_v38 = vmul.f32 %v14820_v18, %v17161_v7  ;;  %v17165_v42 = vld [vmem:[#allocation131_spill] sm:$0xff]  ;;  %v14910_v7 = vsel %vm1110_vm2, %v14695_v15, %v6387_v25 }
 0x60b   : > { %v14858_v5 = vpop.permute.xlu1 %6319  ;;  %v7932_v0 = vpack.c.bf16 %v6659_v32, %v6650_v9  ;;  %v7934_v24 = vpack.c.bf16 %v6658_v1, %v6649_v51  ;;  %v7958_v49 = vpack.c.bf16 %v6407_v48, %v6371_v10  ;;  %v17162_v1 = vld [vmem:[#allocation127_spill] sm:$0xff]  ;;  %v17164_v32 = vld [vmem:[#allocation158_spill] sm:$0xff]  ;;  %v17167_v51 = vld [vmem:[#allocation125_spill] sm:$0xff]  ;;  %v17170_v10 = vpack.c.bf16 %v14781_v4, %v14772_v44 }
 0x60c   : > { %7955 = vmatpush1.bf16.msra.mxu0 %v7954_v40  ;;  %v14867_v17 = vsel %vm830_vm5, %v14729_v59, %v14858_v5  ;;  %v7960_v55 = vpack.c.bf16 %v6478_v30, %v6443_v20  ;;  %v6513_v9 = vmul.f32 %v14769_v50, %v17162_v1  ;;  %v6529_v40 = vmul.f32 %v14828_v31, %v17165_v42  ;;  %v6422_v30 = vpop.permute.xlu0 %6421 }
 0x60d   : > { %7933 = vmatprep.subr.bf16.mxu1 %v7932_v0  ;;  %7957 = vmatprep.subr.bf16.mxu0 %v7956_v36  ;;  %v6668_v59 = vmul.f32 %v14867_v17, %v17163_v14  ;;  %v6562_v48 = vmul.f32 %v14867_v17, %v17166_v8  ;;  %v6512_v35 = vmul.f32 %v14678_v33, %v17167_v51  ;;  %v17169_v0 = vld [vmem:[#allocation143_spill] sm:$0xff]  ;;  %v17179_v8 = vld [vmem:[#allocation164_spill] sm:$0xff] }
 0x60e   : > { %7935 = vmatpush1.bf16.msra.mxu1 %v7934_v24  ;;  %v17168_v50 = vpack.c.bf16 %v14667_v57, %v14661_v53  ;;  %v6546_v36 = vmul.f32 %v14842_v58, %v17169_v0  ;;  %v17171_v24 = vld [vmem:[#allocation157_spill] sm:$0xff]  ;;  %v6586_v53 = vmul.f32 %v14422_v63, %v16951_v19  ;;  %v17173_v44 = vpack.c.bf16 %v14757_v34, %v14778_v56  ;;  %v17177_v14 = vld [vmem:[#allocation171_spill] sm:$0xff]  ;;  %v17181_v51 = vld [vmem:[#allocation160_spill] sm:$0xff] }
 0x60f   : > { %v14871_v52 = vpop.permute.xlu1 %6349  ;;  %v7966_v2 = vpack.c.bf16 %v6529_v40, %v6512_v35  ;;  %v17175_v34 = vld [vmem:[#allocation165_spill] sm:$0xff]  ;;  %v6599_v35 = vmul.f32 %v14910_v7, %v17181_v51  ;;  %v17192_v51 = vld [vmem:[#allocation175_spill] sm:$0xff] }
 0x610   : > { %v14876_v12 = vsel %vm931_vm7, %v14753_v62, %v14871_v52  ;;  %7959 = vmatpush1.bf16.msra.mxu0 %v7958_v49  ;;  %v7964_v62 = vpack.c.bf16 %v6530_v38, %v6513_v9  ;;  %v7968_v20 = vpack.c.bf16 %v6562_v48, %v6546_v36  ;;  %v6457_v57 = vpop.permute.xlu0 %6456  ;;  %v17172_v49 = vpack.c.bf16 %v14745_v22, %v14742_v29  ;;  %v17176_v9 = vld [vmem:[#allocation101_spill] sm:$0xff] }
 0x611   : > { %v6677_v26 = vmul.f32 %v14876_v12, %v17164_v32  ;;  %7961 = vmatprep.subr.bf16.mxu0 %v7960_v55  ;;  %v6578_v54 = vmul.f32 %v14876_v12, %v17171_v24  ;;  %v17174_v55 = vld [vmem:[#allocation161_spill] sm:$0xff]  ;;  %v14920_v29 = vsel %vm1215_vm4, %v14711_v43, %v6422_v30  ;;  %v6684_v15 = vmul.f32 %v14422_v63, %v17176_v9 }
 0x612   : > { %v6689_v1 = vmul.f32 %v14910_v7, %v17174_v55 }
 0x613   : > { %v7936_v39 = vpack.c.bf16 %v6677_v26, %v6668_v59  ;;  %v7972_v33 = vpack.c.bf16 %v6586_v53, %v6578_v54  ;;  %v6683_v59 = vmul.f32 %v14384_v37, %v17177_v14 }
 0x614   : > { %7963 = vmatpush1.bf16.msra.mxu0 %v17168_v50  ;;  %v6492_v4 = vpop.permute.xlu0 %6491  ;;  %v14944_v50 = vsel %vm1320_vm6, %v14731_v6, %v6457_v57 }
 0x615   : > { %7937 = vmatprep.subr.bf16.mxu1 %v7936_v39  ;;  %7965 = vmatprep.subr.bf16.mxu0 %v7964_v62  ;;  %v7942_v40 = vpack.c.bf16 %v6689_v1, %v6683_v59  ;;  %v17180_v39 = vld [vmem:[#allocation172_spill] sm:$0xff]  ;;  %v14959_v55 = vsel %vm1425_vm8, %v14759_v11, %v6492_v4  ;;  %v17187_v59 = vld [vmem:[#allocation142_spill] sm:$0xff] }
 0x616   : > { %7939 = vmatpush1.bf16.msra.mxu1 %v17170_v10  ;;  %v17182_v10 = vld [vmem:[#allocation176_spill] sm:$0xff]  ;;  %v17189_v11 = vld [vmem:[#allocation186_spill] sm:$0xff] }
 0x617   : > { %v6701_v24 = vmul.f32 %v14944_v50, %v17182_v10  ;;  %v17195_v10 = vld [vmem:[#allocation156_spill] sm:$0xff] }
 0x618   : > { %7967 = vmatpush1.bf16.msra.mxu0 %v7966_v2 }
 0x619   : > { %7969 = vmatprep.subr.bf16.mxu0 %v7968_v20  ;;  %v17183_v20 = vld [vmem:[#allocation173_spill] sm:$0xff] }
 0x61c   : > { %7971 = vmatpush1.bf16.msra.mxu0 %v17172_v49  ;;  %v17185_v49 = vld [vmem:[#allocation168_spill] sm:$0xff] }
 0x61d   : > { %7973 = vmatprep.subr.bf16.mxu0 %v7972_v33  ;;  %v17184_v33 = vld [vmem:[#allocation179_spill] sm:$0xff] }
 0x620   : > { %7975 = vmatpush1.bf16.msra.mxu0 %v17173_v44  ;;  %v6695_v44 = vmul.f32 %v14920_v29, %v17185_v49  ;;  %v17197_v49 = vld [vmem:[#allocation149_spill] sm:$0xff] }
 0x623   : > { %v14912_v38 = vpop.permute.xlu1 %6388  ;;  %v14922_v22 = vpop.permute.xlu0 %6517 }
 0x624   : > { %v6395_v19 = vsel %vm1110_vm2, %v6387_v25, %v14912_v38  ;;  %v17178_v25 = vld [vmem:[#allocation167_spill] sm:$0xff] }
 0x625   : > { %v6690_v56 = vmul.f32 %v6395_v19, %v17175_v34  ;;  %v6613_v26 = vmul.f32 %v14920_v29, %v17178_v25  ;;  %v6600_v48 = vmul.f32 %v6395_v19, %v17179_v8  ;;  %v7946_v34 = vpack.c.bf16 %v6701_v24, %v6695_v44  ;;  %v17190_v8 = vld [vmem:[#allocation191_spill] sm:$0xff] }
 0x626   : > { %v6308_v25 = vmul.f32 %v14842_v58, %v17187_v59  ;;  %v6368_v24 = vmul.f32 %v14876_v12, %v17195_v10  ;;  %v6338_v44 = vmul.f32 %v14867_v17, %v17197_v49  ;;  %v17198_v12 = vld [vmem:[#allocation163_spill] sm:$0xff] }
 0x627   : > { %v14929_v32 = vpop.permute.xlu1 %6423  ;;  %v7940_v43 = vpack.c.bf16 %v6690_v56, %v6684_v15  ;;  %v6534_v0 = vpop.permute.xlu0 %6533  ;;  %v6410_v59 = vmul.f32 %v6395_v19, %v17198_v12 }
 0x628   : > { %v14935_v42 = vsel %vm1215_vm4, %v6422_v30, %v14929_v32  ;;  %v7978_v30 = vpack.c.bf16 %v6613_v26, %v6599_v35  ;;  %v17188_v26 = vld [vmem:[#allocation24_spill] sm:$0xff]  ;;  %v17193_v35 = vld [vmem:[#allocation135_spill] sm:$0xff] }
 0x629   : > { %v6614_v62 = vmul.f32 %v14935_v42, %v17180_v39  ;;  %7941 = vmatprep.subr.bf16.mxu1 %v7940_v43  ;;  %v6696_v53 = vmul.f32 %v14935_v42, %v17183_v20  ;;  %v17191_v39 = vld [vmem:[#allocation139_spill] sm:$0xff] }
 0x62a   : > { %7943 = vmatpush1.bf16.msra.mxu1 %v7942_v40 }
 0x62b   : > { %v7976_v36 = vpack.c.bf16 %v6614_v62, %v6600_v48  ;;  %v14946_v2 = vpop.permute.xlu1 %6458  ;;  %v6550_v56 = vpop.permute.xlu0 %6549  ;;  %v6307_v62 = vmul.f32 %v14723_v3, %v17191_v39 }
 0x62c   : > { %v6465_v54 = vsel %vm1320_vm6, %v6457_v57, %v14946_v2  ;;  %v17186_v57 = vld [vmem:[#allocation183_spill] sm:$0xff] }
 0x62d   : > { %7977 = vmatprep.subr.bf16.mxu0 %v7976_v36  ;;  %v6702_v6 = vmul.f32 %v6465_v54, %v17184_v33  ;;  %v6641_v15 = vmul.f32 %v14959_v55, %v17186_v57  ;;  %v6628_v43 = vmul.f32 %v6465_v54, %v17188_v26  ;;  %v6278_v36 = vmul.f32 %v14820_v18, %v17193_v35  ;;  %v17196_v33 = vld [vmem:[#allocation130_spill] sm:$0xff] }
 0x62e   : > { %7979 = vmatpush1.bf16.msra.mxu0 %v7978_v30  ;;  %v17194_v30 = vld [vmem:[#allocation192_spill] sm:$0xff]  ;;  %v14994_v57 = vsel %vm721_vm3, %v14833_v60, %v6534_v0  ;;  %v17199_v60 = vld [vmem:[#allocation194_spill] sm:$0xff] }
 0x62f   : > { %v7944_v1 = vpack.c.bf16 %v6702_v6, %v6696_v53  ;;  %v6707_v58 = vmul.f32 %v14959_v55, %v17194_v30  ;;  %v6277_v6 = vmul.f32 %v14828_v31, %v17196_v33  ;;  %v8000_v18 = vpack.c.bf16 %v6308_v25, %v6278_v36 }
 0x630   : > { %v14961_v9 = vpop.permute.xlu1 %6493  ;;  %v6521_v25 = vsel %vm635_vm1, %v14803_v28, %v14922_v22  ;;  %v6660_v26 = vmul.f32 %v14994_v57, %v17199_v60  ;;  %v17203_v28 = vld [vmem:[#allocation196_spill] sm:$0xff]  ;;  %v6553_v33 = vsel %vm830_vm5, %v14858_v5, %v6550_v56  ;;  %v17210_v5 = vld [vmem:[#allocation166_spill] sm:$0xff]  ;;  %v17212_v60 = vld [vmem:[#allocation203_spill] sm:$0xff] }
 0x631   : > { %v14967_v14 = vsel %vm1425_vm8, %v6492_v4, %v14961_v9  ;;  %7945 = vmatprep.subr.bf16.mxu1 %v7944_v1  ;;  %v6627_v4 = vmul.f32 %v14944_v50, %v17192_v51  ;;  %v6566_v1 = vpop.permute.xlu0 %6565 }
 0x632   : > { %v6642_v40 = vmul.f32 %v14967_v14, %v17189_v11  ;;  %7947 = vmatpush1.bf16.msra.mxu1 %v7946_v34  ;;  %v6708_v48 = vmul.f32 %v14967_v14, %v17190_v8  ;;  %v8002_v34 = vpack.c.bf16 %v6307_v62, %v6277_v6  ;;  %v17204_v62 = vld [vmem:[#allocation188_spill] sm:$0xff] }
 0x633   : > { %v7982_v3 = vpack.c.bf16 %v6641_v15, %v6627_v4  ;;  %v8004_v15 = vpack.c.bf16 %v6368_v24, %v6338_v44  ;;  %v6651_v51 = vmul.f32 %v6521_v25, %v17204_v62  ;;  %v17205_v4 = vld [vmem:[#allocation177_spill] sm:$0xff]  ;;  %v6444_v44 = vmul.f32 %v14920_v29, %v17210_v5 }
 0x634   : > { %6857 = vmatprep.subr.mxu1 %v6708_v48  ;;  %v14986_v20 = vpop.permute.xlu1 %6519  ;;  %v7980_v53 = vpack.c.bf16 %v6642_v40, %v6628_v43  ;;  %v17200_v43 = vld [vmem:[#allocation134_spill] sm:$0xff]  ;;  %v17201_v40 = vld [vmem:[#allocation159_spill] sm:$0xff]  ;;  %v6480_v35 = vmul.f32 %v6465_v54, %v17205_v4 }
 0x635   : > { %v6522_v31 = vsel %vm635_vm1, %v14922_v22, %v14986_v20  ;;  %v6374_v11 = vmul.f32 %v14422_v63, %v17200_v43  ;;  %v6409_v8 = vmul.f32 %v14910_v7, %v17201_v40  ;;  %v17202_v48 = vld [vmem:[#allocation190_spill] sm:$0xff]  ;;  %v6590_v36 = vpop.permute.xlu0 %6589  ;;  %v17207_v7 = vpack.c.bf16 %v14775_v23, %v14762_v61  ;;  %v17215_v43 = vld [vmem:[#allocation207_spill] sm:$0xff] }
 0x636   : > { %7981 = vmatprep.subr.bf16.mxu0 %v7980_v53  ;;  %6858 = vmatpush1.msra.mxu1 %v6707_v58  ;;  %v6652_v39 = vmul.f32 %v6522_v31, %v17202_v48  ;;  %v17206_v58 = vld [vmem:[#allocation129_spill] sm:$0xff]  ;;  %v7986_v24 = vpack.c.bf16 %v6660_v26, %v6651_v51  ;;  %v17213_v26 = vld [vmem:[#allocation187_spill] sm:$0xff] }
 0x637   : > { %7983 = vmatpush1.bf16.msra.mxu0 %v7982_v3  ;;  %6870 = vmatmul.mubr.f32.vlgmr.msra.gmra.mrb[12].mxu1 %v14807_v16  ;;  %v8008_v30 = vpack.c.bf16 %v6410_v59, %v6374_v11  ;;  %v6373_v63 = vmul.f32 %v14384_v37, %v17206_v58  ;;  %v17208_v53 = vld [vmem:[#allocation169_spill] sm:$0xff]  ;;  %v17209_v3 = vld [vmem:[#allocation174_spill] sm:$0xff]  ;;  %v6686_v11 = vmul.f32 %v14558_v47, %v17215_v43  ;;  %v17219_v4 = vld [vmem:[#allocation195_spill] sm:$0xff] }
 0x638   : > { %8001 = vmatprep.subr.bf16.mxu1 %v8000_v18  ;;  %7200 = vmatprep.mubr.msk.f32.mxu1 %vm4338_vm14, %v14404_v21  ;;  %v15026_v21 = vsel %vm931_vm7, %v14871_v52, %v6566_v1  ;;  %v6445_v54 = vmul.f32 %v14935_v42, %v17208_v53  ;;  %v6479_v37 = vmul.f32 %v14944_v50, %v17209_v3  ;;  %v15038_v52 = vsel %vm1110_vm2, %v6590_v36, 0.0  ;;  %v17211_v59 = vld [vmem:[#allocation170_spill] sm:$0xff]  ;;  %v17223_v53 = vld [vmem:[#allocation247_spill] sm:$0xff]  ;;  %v17224_v3 = vld [vmem:[#allocation209_spill] sm:$0xff] }
 0x639   : > { %v15001_v17 = vpop.permute.xlu1 %6535  ;;  %8003 = vmatpush1.bf16.msra.mxu1 %v8002_v34  ;;  %v8010_v6 = vpack.c.bf16 %v6409_v8, %v6373_v63  ;;  %v6678_v23 = vmul.f32 %v15026_v21, %v16996_v46  ;;  %v6669_v18 = vmul.f32 %v6553_v33, %v16990_v27  ;;  %v6532_v50 = vmul.f32 %v6522_v31, %v16993_v41  ;;  %v6618_v12 = vpop.permute.xlu0 %6617  ;;  %v17214_v31 = vld [vmem:[#allocation185_spill] sm:$0xff]  ;;  %v17233_v43 = vld [vmem:[#allocation204_spill] sm:$0xff] }
 0x63a   : > { %v6538_v19 = vsel %vm721_vm3, %v6534_v0, %v15001_v17  ;;  %8005 = vmatprep.subr.bf16.mxu1 %v8004_v15  ;;  %v8012_v49 = vpack.c.bf16 %v6480_v35, %v6445_v54  ;;  %v6692_v46 = vmul.f32 %v15038_v52, %v17003_v13  ;;  %v8014_v27 = vpack.c.bf16 %v6479_v37, %v6444_v44  ;;  %v17217_v13 = vld [vmem:[#allocation11_spill] sm:$0xff]  ;;  %v17225_v37 = vld [vmem:[#allocation202_spill] sm:$0xff] }
 0x63b   : > { %v6661_v22 = vmul.f32 %v6538_v19, %v17203_v28  ;;  %v6531_v41 = vmul.f32 %v6521_v25, %v17213_v26  ;;  %v7990_v8 = vpack.c.bf16 %v6678_v23, %v6669_v18  ;;  %v6622_v51 = vsel %vm1320_vm6, %v6618_v12, 0.0 }
 0x63c   : > { %v6548_v35 = vmul.f32 %v6538_v19, %v17219_v4  ;;  %v7992_v58 = vpack.c.bf16 %v6692_v46, %v6686_v11  ;;  %v6704_v19 = vmul.f32 %v6622_v51, %v17224_v3  ;;  %v17228_v46 = vld [vmem:[#allocation48_spill] sm:$0xff]  ;;  %v17244_v3 = vld [vmem:[#allocation217_spill] sm:$0xff] }
 0x63d   : > { %v15020_v0 = vpop.permute.xlu1 %6551  ;;  %8007 = vmatpush1.bf16.msra.mxu1 %v17207_v7  ;;  %v7984_v10 = vpack.c.bf16 %v6661_v22, %v6652_v39  ;;  %v17218_v22 = vld [vmem:[#allocation59_spill] sm:$0xff]  ;;  %v17221_v7 = vld [vmem:[#allocation197_spill] sm:$0xff]  ;;  %v17234_v11 = vld [vmem:[#allocation8_spill] sm:$0xff] }
 0x63e   : > { %8009 = vmatprep.subr.bf16.mxu1 %v8008_v30  ;;  %v6554_v61 = vsel %vm830_vm5, %v6550_v56, %v15020_v0  ;;  %v15054_v56 = vsel %vm1110_vm2, %v14912_v38, %v6590_v36  ;;  %v17216_v38 = vld [vmem:[#allocation182_spill] sm:$0xff] }
 0x63f   : > { %7985 = vmatprep.subr.bf16.mxu0 %v7984_v10  ;;  %v6670_v15 = vmul.f32 %v6554_v61, %v17211_v59  ;;  %v6514_v40 = vmul.f32 %v14959_v55, %v17216_v38  ;;  %v6564_v48 = vmul.f32 %v6554_v61, %v17217_v13  ;;  %v6691_v62 = vmul.f32 %v15054_v56, %v17218_v22  ;;  %v17220_v55 = vld [vmem:[#allocation206_spill] sm:$0xff]  ;;  %v17237_v22 = vld [vmem:[#allocation184_spill] sm:$0xff] }
 0x640   : > { %7987 = vmatpush1.bf16.msra.mxu0 %v7986_v24  ;;  %v6563_v10 = vmul.f32 %v6553_v33, %v17221_v7  ;;  %v17222_v24 = vld [vmem:[#allocation17_spill] sm:$0xff]  ;;  %v6588_v59 = vmul.f32 %v14558_v47, %v17228_v46  ;;  %v6602_v47 = vmul.f32 %v15038_v52, %v17233_v43 }
 0x641   : > { %v15044_v42 = vpop.permute.xlu1 %6567  ;;  %8011 = vmatpush1.bf16.msra.mxu1 %v8010_v6  ;;  %v8018_v63 = vpack.c.bf16 %v6531_v41, %v6514_v40  ;;  %v6685_v54 = vmul.f32 %v17223_v53, %v17222_v24  ;;  %v6619_v6 = vsel %vm1320_vm6, %v14946_v2, %v6618_v12  ;;  %v8020_v23 = vpack.c.bf16 %v6564_v48, %v6548_v35  ;;  %v17227_v33 = vld [vmem:[#allocation205_spill] sm:$0xff]  ;;  %v17229_v12 = vld [vmem:[#allocation162_spill] sm:$0xff]  ;;  %v17232_v41 = vld [vmem:[#allocation32_spill] sm:$0xff] }
 0x642   : > { %v6570_v34 = vsel %vm931_vm7, %v6566_v1, %v15044_v42  ;;  %8013 = vmatprep.subr.bf16.mxu1 %v8012_v49  ;;  %v6515_v1 = vmul.f32 %v14967_v14, %v17214_v31  ;;  %v17226_v49 = vld [vmem:[#allocation193_spill] sm:$0xff]  ;;  %v6587_v31 = vmul.f32 %v17223_v53, %v17232_v41  ;;  %v17236_v48 = vld [vmem:[#allocation210_spill] sm:$0xff]  ;;  %v6673_v24 = vsel %vm931_vm7, %v15044_v42, 0.0 }
 0x643   : > { %v6679_v29 = vmul.f32 %v6570_v34, %v17212_v60  ;;  %v6580_v61 = vmul.f32 %v6570_v34, %v17225_v37  ;;  %v6547_v5 = vmul.f32 %v14994_v57, %v17226_v49  ;;  %v7994_v44 = vpack.c.bf16 %v6691_v62, %v6685_v54  ;;  %v17230_v34 = vld [vmem:[#allocation208_spill] sm:$0xff]  ;;  %v17239_v52 = vld [vmem:[#allocation181_spill] sm:$0xff]  ;;  %v17240_v35 = vld [vmem:[#allocation178_spill] sm:$0xff] }
 0x644   : > { %v8016_v14 = vpack.c.bf16 %v6532_v50, %v6515_v1  ;;  %v6703_v60 = vmul.f32 %v6619_v6, %v17230_v34  ;;  %v6601_v62 = vmul.f32 %v15054_v56, %v17237_v22  ;;  %v6630_v4 = vmul.f32 %v6622_v51, %v17239_v52  ;;  %v17242_v7 = vld [vmem:[#allocation213_spill] sm:$0xff]  ;;  %v17243_v53 = vld [vmem:[#allocation214_spill] sm:$0xff]  ;;  %v17246_v37 = vld [vmem:[#allocation219_spill] sm:$0xff] }
 0x645   : > { %v6604_v39 = vpop.permute.xlu1 %6603  ;;  %v7988_v28 = vpack.c.bf16 %v6679_v29, %v6670_v15  ;;  %8015 = vmatpush1.bf16.msra.mxu1 %v8014_v27  ;;  %v8022_v2 = vpack.c.bf16 %v6563_v10, %v6547_v5  ;;  %v6579_v15 = vmul.f32 %v15026_v21, %v17229_v12  ;;  %v17231_v27 = vld [vmem:[#allocation201_spill] sm:$0xff]  ;;  %v8024_v26 = vpack.c.bf16 %v6588_v59, %v6580_v61  ;;  %v17249_v49 = vld [vmem:[#allocation228_spill] sm:$0xff]  ;;  %v17250_v5 = vld [vmem:[#allocation231_spill] sm:$0xff] }
 0x646   : > { %v6608_v25 = vsel %vm1215_vm4, %v6604_v39, 0.0  ;;  %v6605_v36 = vsel %vm1215_vm4, %v14929_v32, %v6604_v39  ;;  %8017 = vmatprep.subr.bf16.mxu1 %v8016_v14  ;;  %v6646_v56 = vsel %vm635_vm1, %v14986_v20, 0.0  ;;  %v17248_v42 = vld [vmem:[#allocation225_spill] sm:$0xff] }
 0x647   : > { %v6698_v30 = vmul.f32 %v6608_v25, %v17220_v55  ;;  %7989 = vmatprep.subr.bf16.mxu0 %v7988_v28  ;;  %v6697_v18 = vmul.f32 %v6605_v36, %v17227_v33  ;;  %v6616_v57 = vmul.f32 %v6608_v25, %v17231_v27  ;;  %v8026_v40 = vpack.c.bf16 %v6587_v31, %v6579_v15  ;;  %v17238_v25 = vld [vmem:[#allocation212_spill] sm:$0xff]  ;;  %v17253_v33 = vld [vmem:[#allocation234_spill] sm:$0xff] }
 0x648   : > { %7991 = vmatpush1.bf16.msra.mxu0 %v7990_v8  ;;  %v17235_v8 = vld [vmem:[#allocation199_spill] sm:$0xff]  ;;  %v6653_v54 = vmul.f32 %v6646_v56, %v17243_v53 }
 0x649   : > { %7993 = vmatprep.subr.bf16.mxu0 %v7992_v58  ;;  %v6632_v32 = vpop.permute.xlu1 %6631  ;;  %8019 = vmatpush1.bf16.msra.mxu1 %v8018_v63  ;;  %v7996_v50 = vpack.c.bf16 %v6704_v19, %v6698_v30  ;;  %v7998_v1 = vpack.c.bf16 %v6703_v60, %v6697_v18  ;;  %v6615_v13 = vmul.f32 %v6605_v36, %v17235_v8  ;;  %v6655_v36 = vsel %vm721_vm3, %v15001_v17, 0.0  ;;  %v17241_v58 = vld [vmem:[#allocation211_spill] sm:$0xff]  ;;  %v17245_v19 = vld [vmem:[#allocation218_spill] sm:$0xff] }
 0x64a   : > { %8021 = vmatprep.subr.bf16.mxu1 %v8020_v23  ;;  %v6636_v29 = vsel %vm1425_vm8, %v6632_v32, 0.0  ;;  %v6633_v21 = vsel %vm1425_vm8, %v14961_v9, %v6632_v32  ;;  %v8028_v28 = vpack.c.bf16 %v6616_v57, %v6602_v47  ;;  %v6629_v63 = vmul.f32 %v6619_v6, %v17241_v58  ;;  %v17247_v32 = vld [vmem:[#allocation220_spill] sm:$0xff]  ;;  %v17254_v18 = vld [vmem:[#allocation6_spill] sm:$0xff] }
 0x64b   : > { %v6710_v38 = vmul.f32 %v6636_v29, %v17234_v11  ;;  %v6644_v39 = vmul.f32 %v6636_v29, %v17236_v48  ;;  %v6709_v14 = vmul.f32 %v6633_v21, %v17238_v25  ;;  %v8030_v9 = vpack.c.bf16 %v6615_v13, %v6601_v62  ;;  %575 = vst [vmem:[%s494_s18] sm:$0xff] %v17254_v18 }
 0x64c   : > { %7995 = vmatpush1.bf16.msra.mxu0 %v7994_v44  ;;  %v6643_v55 = vmul.f32 %v6633_v21, %v17240_v35  ;;  %v6662_v51 = vmul.f32 %v6655_v36, %v17242_v7  ;;  %v6664_v17 = vsel %vm830_vm5, %v15020_v0, 0.0  ;;  %v6680_v20 = vmul.f32 %v6673_v24, %v17245_v19  ;;  %v17251_v0 = vld [vmem:[#allocation232_spill] sm:$0xff]  ;;  %v17252_v44 = vld [vmem:[#allocation233_spill] sm:$0xff] }
 0x64d   : > { %7997 = vmatprep.subr.bf16.mxu0 %v7996_v50  ;;  %8023 = vmatpush1.bf16.msra.mxu1 %v8022_v2  ;;  %v8032_v30 = vpack.c.bf16 %v6644_v39, %v6630_v4  ;;  %v6671_v61 = vmul.f32 %v6664_v17, %v17246_v37  ;;  %v6716_v50 = vpop.permute.xlu0 %6715 }
 0x64e   : > { %8025 = vmatprep.subr.bf16.mxu1 %v8024_v26  ;;  %v8034_v10 = vpack.c.bf16 %v6643_v55, %v6629_v63  ;;  %v8038_v6 = vpack.c.bf16 %v6662_v51, %v6653_v54  ;;  %v6721_v46 = vrot.slane %v6716_v50, %v17144_v45  ;;  %v17255_v26 = vld [vmem:[#allocation7_spill] sm:$0xff] }
 0x64f   : > { %v8042_v23 = vpack.c.bf16 %v6680_v20, %v6671_v61 }
 0x650   : > { %7999 = vmatpush1.bf16.msra.mxu0 %v7998_v1 }
 0x651   : > { %6928 = vmatprep.subr.mxu0 %v6710_v38  ;;  %8027 = vmatpush1.bf16.msra.mxu1 %v8026_v40 }
 0x652   : > { %8029 = vmatprep.subr.bf16.mxu1 %v8028_v28 }
 0x654   : > { %6929 = vmatpush1.msra.mxu0 %v6709_v14 }
 0x655   : > { %6941 = vmatmul.mubr.f32.vlgmr.msra.gmra.mrb[14].mxu0 %v14807_v16  ;;  %8031 = vmatpush1.bf16.msra.mxu1 %v8030_v9 }
 0x656   : > { %8033 = vmatprep.subr.bf16.mxu1 %v8032_v30 }
 0x659   : > { %8035 = vmatpush1.bf16.msra.mxu1 %v8034_v10 }
 0x65a   : > { %8037 = vmatprep.subr.bf16.mxu1 %v17244_v3 }
 0x65d   : > { %8039 = vmatpush1.bf16.msra.mxu1 %v8038_v6 }
 0x65e   : > { %8041 = vmatprep.subr.bf16.mxu1 %v17247_v32 }
 0x661   : > { %8043 = vmatpush1.bf16.msra.mxu1 %v8042_v23 }
 0x662   : > { %8045 = vmatprep.subr.bf16.mxu1 %v17248_v42 }
 0x665   : > { %8047 = vmatpush1.bf16.msra.mxu1 %v17249_v49 }
 0x666   : > { %8049 = vmatprep.subr.bf16.mxu1 %v17250_v5 }
 0x669   : > { %8051 = vmatpush1.bf16.msra.mxu1 %v17251_v0 }
 0x66a   : > { %6999 = vmatprep.subr.mxu1 %v17252_v44 }
 0x66d   : > { %7000 = vmatpush1.msra.mxu1 %v17253_v33 }
 0x66e   : > { %7012 = vmatmul.mubr.f32.vlgmr.msra.gmra.mrb[14].mxu1 %v14807_v16 }
 0x6da   : > { %v6800_v59 = vpop.f32.mrb[12].mxu0 }
 0x6db   : > { %v6801_v2 = vadd.f32 %v6800_v59, %v6721_v46  ;;  %v6802_v12 = vpop.f32.mrb[13].mxu0 }
 0x6dc   : > { %v6803_v15 = vadd.f32 %v6802_v12, %v6721_v46 }
 0x6de   : > { %v7026_v34 = vcombine.low %v6801_v2, %v6803_v15 }
 0x6e0   : > { %v7036_v41 = vrot.slane %v7026_v34, %v17255_v26 }
 0x70a   : > { %v6871_v60 = vpop.f32.mrb[12].mxu1 }
 0x70b   : > { %v6872_v29 = vadd.f32 %v6871_v60, %v6721_v46  ;;  %v6873_v27 = vpop.f32.mrb[13].mxu1 }
 0x70c   : > { %v6874_v16 = vadd.f32 %v6873_v27, %v6721_v46 }
 0x70e   : > { %v7027_v57 = vcombine.low %v6872_v29, %v6874_v16 }
 0x710   : > { %v7043_v31 = vrot.slane %v7027_v57, %v17255_v26 }
 0x712   : > { %v7058_v1 = vcombine.low %v7036_v41, %v7043_v31 }
 0x714   : > { %v7066_v62 = vrot.slane %v7058_v1, %v17255_v26 }
 0x728   : > { %v6942_v43 = vpop.f32.mrb[14].mxu0 }
 0x729   : > { %v6943_v47 = vadd.f32 %v6942_v43, %v6721_v46  ;;  %v6944_v21 = vpop.f32.mrb[15].mxu0 }
 0x72a   : > { %v6945_v45 = vadd.f32 %v6944_v21, %v6721_v46 }
 0x72c   : > { %v7028_v11 = vcombine.low %v6943_v47, %v6945_v45 }
 0x72e   : > { %v7050_v39 = vrot.slane %v7028_v11, %v17255_v26 }
 0x741   : > { %v7013_v38 = vpop.f32.mrb[14].mxu1 }
 0x742   : > { %v7014_v40 = vadd.f32 %v7013_v38, %v6721_v46  ;;  %v7015_v8 = vpop.f32.mrb[15].mxu1 }
 0x743   : > { %v7016_v13 = vadd.f32 %v7015_v8, %v6721_v46 }
 0x745   : > { %v7029_v48 = vcombine.low %v7014_v40, %v7016_v13 }
 0x747   : > { %v7057_v28 = vrot.slane %v7029_v48, %v17255_v26 }
 0x749   : > { %v7059_v22 = vcombine.low %v7050_v39, %v7057_v28 }
 0x74b   : > { %v7073_v25 = vrot.slane %v7059_v22, %v17255_v26 }
 0x74d   : > { %v7074_v14 = vcombine.low %v7066_v62, %v7073_v25 }
 0x74f   : > { %7076 = vst [vmem:[%s489_s20] sm:$0xff] %v7074_v14 }
 0x750 PF: > { %s27_s15 = sadd.s32 1, %s8198_s15  }
 0x751   : > { %p24_p4 = scmp.ge.s32.totalorder %s27_s15, 4  }
 0x753   :  { %26 = sbr.rel (!%p24_p4) target bundleno = 3 (0x3), region = 117 }

</bundles_post_ra>
